<compile_context>
chip_gen: v7x
topology: tpu7x:2x2x1
jax: 0.10.0
libtpu: 0.0.40
codegen_flags: <defaults>
</compile_context>

<pallas_src>
import math

import jax
import jax.numpy as jnp
from jax import lax
from jax.experimental import pallas as pl
from jax.experimental.pallas import tpu as pltpu

D_MODEL = 128
NUM_HEADS = 8
DK = D_MODEL // NUM_HEADS
LN_EPS = 1e-5
_INV_SQRT_DK = 1.0 / math.sqrt(DK)


def fuser_v6_kernel(x_ref, wqkv_ref, bqkv_ref, wo_ref, bo_ref,
                    lnw_ref, lnb_ref, attw_ref, attb_ref, o_ref):
    TB, S, D = x_ref.shape
    x3 = x_ref[...]                                   # (TB, S, D) f32
    x2 = x3.reshape(TB * S, D)                        # merge leading dims (layout no-op)
    x_bf = x2.astype(jnp.bfloat16)

    # --- fused Q/K/V projection: one (TB*S, D) x (D, 3D) bf16 MXU matmul, f32 accumulate ---
    qkv = jnp.dot(x_bf, wqkv_ref[...], preferred_element_type=jnp.float32)
    qkv = qkv + bqkv_ref[...]                         # (TB*S, 3D) f32
    q_bf = (qkv[:, :D] * _INV_SQRT_DK).astype(jnp.bfloat16).reshape(TB, S, D)
    k_bf = qkv[:, D:2 * D].astype(jnp.bfloat16).reshape(TB, S, D)
    v_bf = qkv[:, 2 * D:].astype(jnp.bfloat16).reshape(TB, S, D)

    # --- per-head scaled-dot attention, batched over the TB axis ---
    head_outs = []
    for h in range(NUM_HEADS):                        # static: NUM_HEADS is compile-time
        sl = slice(h * DK, (h + 1) * DK)              # 16-lane aligned slice
        qh, kh, vh = q_bf[:, :, sl], k_bf[:, :, sl], v_bf[:, :, sl]
        s = jnp.einsum("bqd,bkd->bqk", qh, kh,
                       preferred_element_type=jnp.float32)           # (TB, S, S) f32
        s = s - jnp.max(s, axis=-1, keepdims=True)
        p = jnp.exp(s)
        p = p * pl.reciprocal(jnp.sum(p, axis=-1, keepdims=True), approx=True)
        head_outs.append(jnp.einsum("bqk,bkd->bqd", p.astype(jnp.bfloat16), vh,
                                    preferred_element_type=jnp.float32))  # (TB, S, DK)
    mh = jnp.concatenate(head_outs, axis=-1)          # (TB, S, D) f32
    mh_bf = mh.reshape(TB * S, D).astype(jnp.bfloat16)
    mha = jnp.dot(mh_bf, wo_ref[...], preferred_element_type=jnp.float32) + bo_ref[...]

    # --- residual + LayerNorm (f32 statistics, biased variance == PyTorch) ---
    y = x2 + mha                                      # residual uses the exact f32 input
    mean = jnp.mean(y, axis=-1, keepdims=True)
    cent = y - mean
    var = jnp.mean(cent * cent, axis=-1, keepdims=True)
    y = cent * lax.rsqrt(var + LN_EPS)
    y = y * lnw_ref[...] + lnb_ref[...]               # (TB*S, D) f32

    # --- attention pooling over S (softmax over the sequence per batch element) ---
    # Kept as VPU/XLU reduce ops: at (TB, 8, 128) per step these reductions are tiny,
    # and an MXU formulation would need a non-minor in-kernel transpose/reshape.
    scores = jnp.sum(y * attw_ref[...], axis=-1, keepdims=True) + attb_ref[0, 0]  # (TB*S, 1)
    s3 = scores.reshape(TB, S, 1)
    s3 = s3 - jnp.max(s3, axis=1, keepdims=True)
    w = jnp.exp(s3)
    w = w * pl.reciprocal(jnp.sum(w, axis=1, keepdims=True), approx=True)          # (TB, S, 1)
    y3 = y.reshape(TB, S, D)
    o_ref[...] = jnp.sum(y3 * w, axis=1, keepdims=True)                            # (TB, 1, D)


def _pick_tb(batch, seq, target_rows=256):
    """Per-step batch tile: ~target_rows MXU rows, divides B, keeps grid >= 2 steps."""
    tb = max(1, min(batch, target_rows // max(1, seq)))
    while batch % tb:
        tb -= 1
    if tb == batch and batch > 1 and batch % 2 == 0:
        tb //= 2          # >= 2 grid steps so both v7x TensorCores get work
    return tb


def fuser_v6(x, params, tb=None):
    B, S, D = x.shape
    assert D == D_MODEL
    if tb is None:
        tb = _pick_tb(B, S)            # 128-row tiles on this demo; 256 at larger B (v6e/v7x)
    assert B % tb == 0

    # One-time weight packing: fused QKV weight/bias, bf16 MXU operands.
    wqkv = jnp.concatenate([params["wq"], params["wk"], params["wv"]],
                           axis=1).astype(jnp.bfloat16)                  # (D, 3D) bf16
    bqkv = jnp.concatenate([params["bq"], params["bk"], params["bv"]], axis=1)  # (1, 3D) f32
    wo = params["wo"].astype(jnp.bfloat16)                               # (D, D) bf16

    def const(shape):
        zeros = (0,) * len(shape)
        return pl.BlockSpec(shape, lambda b: zeros)   # constant block index -> DMA'd once

    out = pl.pallas_call(
        fuser_v6_kernel,
        out_shape=jax.ShapeDtypeStruct((B, 1, D), jnp.float32),
        grid_spec=pltpu.PrefetchScalarGridSpec(
            num_scalar_prefetch=0,
            grid=(B // tb,),
            in_specs=[
                pl.BlockSpec((tb, S, D), lambda b: (b, 0, 0)),           # x tile
                const((D, 3 * D)),                                       # fused Wqkv (bf16)
                const((1, 3 * D)),                                       # fused bqkv
                const((D, D)),                                           # Wo (bf16)
                const((1, D)),                                           # bo
                const((1, D)),                                           # ln_w
                const((1, D)),                                           # ln_b
                const((1, D)),                                           # att_w
                pl.BlockSpec(memory_space=pltpu.MemorySpace.SMEM),       # att_b scalar
            ],
            out_specs=pl.BlockSpec((tb, 1, D), lambda b: (b, 0, 0)),
        ),
        compiler_params=pltpu.CompilerParams(
            dimension_semantics=("parallel",)),
    )(x, wqkv, bqkv, wo, params["bo"], params["ln_w"], params["ln_b"],
      params["att_w"], params["att_b"])
    return out[:, 0, :]                                                   # (B, D)


def make_params(key):
    ks = jax.random.split(key, 10)
    scale = 0.05
    return {
        "wq": scale * jax.random.normal(ks[0], (D_MODEL, D_MODEL), jnp.float32),
        "bq": scale * jax.random.normal(ks[1], (1, D_MODEL), jnp.float32),
        "wk": scale * jax.random.normal(ks[2], (D_MODEL, D_MODEL), jnp.float32),
        "bk": scale * jax.random.normal(ks[3], (1, D_MODEL), jnp.float32),
        "wv": scale * jax.random.normal(ks[4], (D_MODEL, D_MODEL), jnp.float32),
        "bv": scale * jax.random.normal(ks[5], (1, D_MODEL), jnp.float32),
        "wo": scale * jax.random.normal(ks[6], (D_MODEL, D_MODEL), jnp.float32),
        "bo": scale * jax.random.normal(ks[7], (1, D_MODEL), jnp.float32),
        "ln_w": jnp.ones((1, D_MODEL), jnp.float32),
        "ln_b": jnp.zeros((1, D_MODEL), jnp.float32),
        "att_w": scale * jax.random.normal(ks[8], (1, D_MODEL), jnp.float32),
        "att_b": scale * jax.random.normal(ks[9], (1, 1), jnp.float32),
    }


def fuser_v6_ref(x, p):
    # pure-JAX f32 reference mirroring the PyTorch semantics
    q = x @ p["wq"] + p["bq"][0]
    k = x @ p["wk"] + p["bk"][0]
    v = x @ p["wv"] + p["bv"][0]
    outs = []
    for h in range(NUM_HEADS):
        sl = slice(h * DK, (h + 1) * DK)
        s = jnp.einsum("bsd,btd->bst", q[..., sl], k[..., sl]) / math.sqrt(DK)
        w = jax.nn.softmax(s, axis=-1)
        outs.append(jnp.einsum("bst,btd->bsd", w, v[..., sl]))
    mh = jnp.concatenate(outs, axis=-1) @ p["wo"] + p["bo"][0]
    y = x + mh
    mean = jnp.mean(y, axis=-1, keepdims=True)
    var = jnp.mean((y - mean) ** 2, axis=-1, keepdims=True)
    y = (y - mean) / jnp.sqrt(var + LN_EPS) * p["ln_w"][0] + p["ln_b"][0]
    scores = jnp.sum(y * p["att_w"][0], axis=-1, keepdims=True) + p["att_b"][0, 0]
    w = jax.nn.softmax(scores, axis=-2)
    return jnp.sum(y * w, axis=-2)


if __name__ == "__main__":
    key = jax.random.PRNGKey(0)
    kx, kp = jax.random.split(key)
    B, S = 32, 8                       # d_model = 128 is fixed by the module
    x = jax.random.normal(kx, (B, S, D_MODEL), jnp.float32)
    params = make_params(kp)

    out = jax.block_until_ready(fuser_v6(x, params))
    ref = jax.block_until_ready(fuser_v6_ref(x, params))

    assert out.shape == (B, D_MODEL)
    max_err = float(jnp.max(jnp.abs(out - ref)))
    # bf16 MXU operands with f32 accumulation -> bf16-level tolerance vs the f32 reference
    assert jnp.allclose(out, ref, atol=5e-2, rtol=5e-2), max_err
    print("KERNEL_OK")
</pallas_src>

<mosaic_0001>
module attributes {stable_mosaic.version = 11 : i64} {
  func.func @fuser_v6_kernel(%arg0: i32, %arg1: memref<16x8x128xf32, #tpu.memory_space<vmem>>, %arg2: memref<128x384xbf16, #tpu.memory_space<vmem>>, %arg3: memref<1x384xf32, #tpu.memory_space<vmem>>, %arg4: memref<128x128xbf16, #tpu.memory_space<vmem>>, %arg5: memref<1x128xf32, #tpu.memory_space<vmem>>, %arg6: memref<1x128xf32, #tpu.memory_space<vmem>>, %arg7: memref<1x128xf32, #tpu.memory_space<vmem>>, %arg8: memref<1x128xf32, #tpu.memory_space<vmem>>, %arg9: memref<1x1xf32, #tpu.memory_space<smem>>, %arg10: memref<16x1x128xf32, #tpu.memory_space<vmem>>) attributes {dimension_semantics = [#tpu.dimension_semantics<parallel>], iteration_bounds = array<i64: 2>, scalar_prefetch = 0 : i64, scratch_operands = 0 : i64, tpu.core_type = #tpu.core_type<tc>, window_params = [{transform_indices = @transform_0, window_bounds = array<i64: 16, 8, 128>}, {pipeline_mode = #tpu.pipeline_mode<synchronous>, transform_indices = @transform_1, window_bounds = array<i64: 128, 384>}, {pipeline_mode = #tpu.pipeline_mode<synchronous>, transform_indices = @transform_2, window_bounds = array<i64: 1, 384>}, {pipeline_mode = #tpu.pipeline_mode<synchronous>, transform_indices = @transform_3, window_bounds = array<i64: 128, 128>}, {pipeline_mode = #tpu.pipeline_mode<synchronous>, transform_indices = @transform_4, window_bounds = array<i64: 1, 128>}, {pipeline_mode = #tpu.pipeline_mode<synchronous>, transform_indices = @transform_5, window_bounds = array<i64: 1, 128>}, {pipeline_mode = #tpu.pipeline_mode<synchronous>, transform_indices = @transform_6, window_bounds = array<i64: 1, 128>}, {pipeline_mode = #tpu.pipeline_mode<synchronous>, transform_indices = @transform_7, window_bounds = array<i64: 1, 128>}, {transform_indices = @transform_8, window_bounds = array<i64: 1, 1>}, {transform_indices = @transform_9, window_bounds = array<i64: 16, 1, 128>}]} {
    %c0 = arith.constant 0 : index
    %c0_0 = arith.constant 0 : index
    %c0_1 = arith.constant 0 : index
    %0 = vector.load %arg1[%c0, %c0_0, %c0_1] : memref<16x8x128xf32, #tpu.memory_space<vmem>>, vector<16x8x128xf32>
    %1 = vector.shape_cast %0 : vector<16x8x128xf32> to vector<128x128xf32>
    %2 = arith.truncf %1 : vector<128x128xf32> to vector<128x128xbf16>
    %c0_2 = arith.constant 0 : index
    %c0_3 = arith.constant 0 : index
    %3 = vector.load %arg2[%c0_2, %c0_3] : memref<128x384xbf16, #tpu.memory_space<vmem>>, vector<128x384xbf16>
    %cst = arith.constant dense<0.000000e+00> : vector<128x384xf32>
    %4 = tpu.matmul %2, %3, %cst {dimension_numbers = #tpu.dot_dimension_numbers<[1], [0], [0], [1], [0, 0, 1, 1], [], []>} : vector<128x128xbf16>, vector<128x384xbf16>, vector<128x384xf32> -> vector<128x384xf32>
    %c0_4 = arith.constant 0 : index
    %c0_5 = arith.constant 0 : index
    %5 = vector.load %arg3[%c0_4, %c0_5] : memref<1x384xf32, #tpu.memory_space<vmem>>, vector<1x384xf32>
    %6 = vector.broadcast %5 : vector<1x384xf32> to vector<128x384xf32>
    %7 = arith.addf %4, %6 : vector<128x384xf32>
    %8 = vector.extract_strided_slice %7 {offsets = [0, 0], sizes = [128, 128], strides = [1, 1]} : vector<128x384xf32> to vector<128x128xf32>
    %cst_6 = arith.constant 2.500000e-01 : f32
    %9 = vector.broadcast %cst_6 : f32 to vector<128x128xf32>
    %10 = arith.mulf %8, %9 : vector<128x128xf32>
    %11 = arith.truncf %10 : vector<128x128xf32> to vector<128x128xbf16>
    %12 = vector.shape_cast %11 : vector<128x128xbf16> to vector<16x8x128xbf16>
    %13 = vector.extract_strided_slice %7 {offsets = [0, 128], sizes = [128, 128], strides = [1, 1]} : vector<128x384xf32> to vector<128x128xf32>
    %14 = arith.truncf %13 : vector<128x128xf32> to vector<128x128xbf16>
    %15 = vector.shape_cast %14 : vector<128x128xbf16> to vector<16x8x128xbf16>
    %16 = vector.extract_strided_slice %7 {offsets = [0, 256], sizes = [128, 128], strides = [1, 1]} : vector<128x384xf32> to vector<128x128xf32>
    %17 = arith.truncf %16 : vector<128x128xf32> to vector<128x128xbf16>
    %18 = vector.shape_cast %17 : vector<128x128xbf16> to vector<16x8x128xbf16>
    %19 = vector.extract_strided_slice %12 {offsets = [0, 0, 0], sizes = [16, 8, 16], strides = [1, 1, 1]} : vector<16x8x128xbf16> to vector<16x8x16xbf16>
    %20 = vector.extract_strided_slice %15 {offsets = [0, 0, 0], sizes = [16, 8, 16], strides = [1, 1, 1]} : vector<16x8x128xbf16> to vector<16x8x16xbf16>
    %21 = vector.extract_strided_slice %18 {offsets = [0, 0, 0], sizes = [16, 8, 16], strides = [1, 1, 1]} : vector<16x8x128xbf16> to vector<16x8x16xbf16>
    "tpu.trace_start"() <{level = 10 : i32, message = "bqd,bkd->bqk"}> : () -> ()
    %cst_7 = arith.constant dense<0.000000e+00> : vector<16x8x8xf32>
    %22 = tpu.matmul %19, %20, %cst_7 {dimension_numbers = #tpu.dot_dimension_numbers<[2], [2], [1], [1], [0, 0, 0, 1, 1, 1], [0], [0]>} : vector<16x8x16xbf16>, vector<16x8x16xbf16>, vector<16x8x8xf32> -> vector<16x8x8xf32>
    "tpu.trace_stop"() : () -> ()
    %cst_8 = arith.constant dense<0xFF800000> : vector<16x8xf32>
    %23 = vector.multi_reduction <maximumf>, %22, %cst_8 [2] : vector<16x8x8xf32> to vector<16x8xf32>
    %24 = vector.shape_cast %23 : vector<16x8xf32> to vector<16x8x1xf32>
    %25 = vector.broadcast %24 : vector<16x8x1xf32> to vector<16x8x8xf32>
    %26 = arith.subf %22, %25 : vector<16x8x8xf32>
    %27 = math.exp %26 : vector<16x8x8xf32>
    %cst_9 = arith.constant dense<0.000000e+00> : vector<16x8xf32>
    %28 = vector.multi_reduction <add>, %27, %cst_9 [2] : vector<16x8x8xf32> to vector<16x8xf32>
    %29 = vector.shape_cast %28 : vector<16x8xf32> to vector<16x8x1xf32>
    %30 = tpu.reciprocal %29 {approx = true} : vector<16x8x1xf32> -> vector<16x8x1xf32>
    %31 = vector.broadcast %30 : vector<16x8x1xf32> to vector<16x8x8xf32>
    %32 = arith.mulf %27, %31 : vector<16x8x8xf32>
    %33 = arith.truncf %32 : vector<16x8x8xf32> to vector<16x8x8xbf16>
    "tpu.trace_start"() <{level = 10 : i32, message = "bqk,bkd->bqd"}> : () -> ()
    %cst_10 = arith.constant dense<0.000000e+00> : vector<16x8x16xf32>
    %34 = tpu.matmul %33, %21, %cst_10 {dimension_numbers = #tpu.dot_dimension_numbers<[2], [1], [1], [2], [0, 0, 0, 1, 1, 2], [0], [0]>} : vector<16x8x8xbf16>, vector<16x8x16xbf16>, vector<16x8x16xf32> -> vector<16x8x16xf32>
    "tpu.trace_stop"() : () -> ()
    %35 = vector.extract_strided_slice %12 {offsets = [0, 0, 16], sizes = [16, 8, 16], strides = [1, 1, 1]} : vector<16x8x128xbf16> to vector<16x8x16xbf16>
    %36 = vector.extract_strided_slice %15 {offsets = [0, 0, 16], sizes = [16, 8, 16], strides = [1, 1, 1]} : vector<16x8x128xbf16> to vector<16x8x16xbf16>
    %37 = vector.extract_strided_slice %18 {offsets = [0, 0, 16], sizes = [16, 8, 16], strides = [1, 1, 1]} : vector<16x8x128xbf16> to vector<16x8x16xbf16>
    "tpu.trace_start"() <{level = 10 : i32, message = "bqd,bkd->bqk"}> : () -> ()
    %cst_11 = arith.constant dense<0.000000e+00> : vector<16x8x8xf32>
    %38 = tpu.matmul %35, %36, %cst_11 {dimension_numbers = #tpu.dot_dimension_numbers<[2], [2], [1], [1], [0, 0, 0, 1, 1, 1], [0], [0]>} : vector<16x8x16xbf16>, vector<16x8x16xbf16>, vector<16x8x8xf32> -> vector<16x8x8xf32>
    "tpu.trace_stop"() : () -> ()
    %cst_12 = arith.constant dense<0xFF800000> : vector<16x8xf32>
    %39 = vector.multi_reduction <maximumf>, %38, %cst_12 [2] : vector<16x8x8xf32> to vector<16x8xf32>
    %40 = vector.shape_cast %39 : vector<16x8xf32> to vector<16x8x1xf32>
    %41 = vector.broadcast %40 : vector<16x8x1xf32> to vector<16x8x8xf32>
    %42 = arith.subf %38, %41 : vector<16x8x8xf32>
    %43 = math.exp %42 : vector<16x8x8xf32>
    %cst_13 = arith.constant dense<0.000000e+00> : vector<16x8xf32>
    %44 = vector.multi_reduction <add>, %43, %cst_13 [2] : vector<16x8x8xf32> to vector<16x8xf32>
    %45 = vector.shape_cast %44 : vector<16x8xf32> to vector<16x8x1xf32>
    %46 = tpu.reciprocal %45 {approx = true} : vector<16x8x1xf32> -> vector<16x8x1xf32>
    %47 = vector.broadcast %46 : vector<16x8x1xf32> to vector<16x8x8xf32>
    %48 = arith.mulf %43, %47 : vector<16x8x8xf32>
    %49 = arith.truncf %48 : vector<16x8x8xf32> to vector<16x8x8xbf16>
    "tpu.trace_start"() <{level = 10 : i32, message = "bqk,bkd->bqd"}> : () -> ()
    %cst_14 = arith.constant dense<0.000000e+00> : vector<16x8x16xf32>
    %50 = tpu.matmul %49, %37, %cst_14 {dimension_numbers = #tpu.dot_dimension_numbers<[2], [1], [1], [2], [0, 0, 0, 1, 1, 2], [0], [0]>} : vector<16x8x8xbf16>, vector<16x8x16xbf16>, vector<16x8x16xf32> -> vector<16x8x16xf32>
    "tpu.trace_stop"() : () -> ()
    %51 = vector.extract_strided_slice %12 {offsets = [0, 0, 32], sizes = [16, 8, 16], strides = [1, 1, 1]} : vector<16x8x128xbf16> to vector<16x8x16xbf16>
    %52 = vector.extract_strided_slice %15 {offsets = [0, 0, 32], sizes = [16, 8, 16], strides = [1, 1, 1]} : vector<16x8x128xbf16> to vector<16x8x16xbf16>
    %53 = vector.extract_strided_slice %18 {offsets = [0, 0, 32], sizes = [16, 8, 16], strides = [1, 1, 1]} : vector<16x8x128xbf16> to vector<16x8x16xbf16>
    "tpu.trace_start"() <{level = 10 : i32, message = "bqd,bkd->bqk"}> : () -> ()
    %cst_15 = arith.constant dense<0.000000e+00> : vector<16x8x8xf32>
    %54 = tpu.matmul %51, %52, %cst_15 {dimension_numbers = #tpu.dot_dimension_numbers<[2], [2], [1], [1], [0, 0, 0, 1, 1, 1], [0], [0]>} : vector<16x8x16xbf16>, vector<16x8x16xbf16>, vector<16x8x8xf32> -> vector<16x8x8xf32>
    "tpu.trace_stop"() : () -> ()
    %cst_16 = arith.constant dense<0xFF800000> : vector<16x8xf32>
    %55 = vector.multi_reduction <maximumf>, %54, %cst_16 [2] : vector<16x8x8xf32> to vector<16x8xf32>
    %56 = vector.shape_cast %55 : vector<16x8xf32> to vector<16x8x1xf32>
    %57 = vector.broadcast %56 : vector<16x8x1xf32> to vector<16x8x8xf32>
    %58 = arith.subf %54, %57 : vector<16x8x8xf32>
    %59 = math.exp %58 : vector<16x8x8xf32>
    %cst_17 = arith.constant dense<0.000000e+00> : vector<16x8xf32>
    %60 = vector.multi_reduction <add>, %59, %cst_17 [2] : vector<16x8x8xf32> to vector<16x8xf32>
    %61 = vector.shape_cast %60 : vector<16x8xf32> to vector<16x8x1xf32>
    %62 = tpu.reciprocal %61 {approx = true} : vector<16x8x1xf32> -> vector<16x8x1xf32>
    %63 = vector.broadcast %62 : vector<16x8x1xf32> to vector<16x8x8xf32>
    %64 = arith.mulf %59, %63 : vector<16x8x8xf32>
    %65 = arith.truncf %64 : vector<16x8x8xf32> to vector<16x8x8xbf16>
    "tpu.trace_start"() <{level = 10 : i32, message = "bqk,bkd->bqd"}> : () -> ()
    %cst_18 = arith.constant dense<0.000000e+00> : vector<16x8x16xf32>
    %66 = tpu.matmul %65, %53, %cst_18 {dimension_numbers = #tpu.dot_dimension_numbers<[2], [1], [1], [2], [0, 0, 0, 1, 1, 2], [0], [0]>} : vector<16x8x8xbf16>, vector<16x8x16xbf16>, vector<16x8x16xf32> -> vector<16x8x16xf32>
    "tpu.trace_stop"() : () -> ()
    %67 = vector.extract_strided_slice %12 {offsets = [0, 0, 48], sizes = [16, 8, 16], strides = [1, 1, 1]} : vector<16x8x128xbf16> to vector<16x8x16xbf16>
    %68 = vector.extract_strided_slice %15 {offsets = [0, 0, 48], sizes = [16, 8, 16], strides = [1, 1, 1]} : vector<16x8x128xbf16> to vector<16x8x16xbf16>
    %69 = vector.extract_strided_slice %18 {offsets = [0, 0, 48], sizes = [16, 8, 16], strides = [1, 1, 1]} : vector<16x8x128xbf16> to vector<16x8x16xbf16>
    "tpu.trace_start"() <{level = 10 : i32, message = "bqd,bkd->bqk"}> : () -> ()
    %cst_19 = arith.constant dense<0.000000e+00> : vector<16x8x8xf32>
    %70 = tpu.matmul %67, %68, %cst_19 {dimension_numbers = #tpu.dot_dimension_numbers<[2], [2], [1], [1], [0, 0, 0, 1, 1, 1], [0], [0]>} : vector<16x8x16xbf16>, vector<16x8x16xbf16>, vector<16x8x8xf32> -> vector<16x8x8xf32>
    "tpu.trace_stop"() : () -> ()
    %cst_20 = arith.constant dense<0xFF800000> : vector<16x8xf32>
    %71 = vector.multi_reduction <maximumf>, %70, %cst_20 [2] : vector<16x8x8xf32> to vector<16x8xf32>
    %72 = vector.shape_cast %71 : vector<16x8xf32> to vector<16x8x1xf32>
    %73 = vector.broadcast %72 : vector<16x8x1xf32> to vector<16x8x8xf32>
    %74 = arith.subf %70, %73 : vector<16x8x8xf32>
    %75 = math.exp %74 : vector<16x8x8xf32>
    %cst_21 = arith.constant dense<0.000000e+00> : vector<16x8xf32>
    %76 = vector.multi_reduction <add>, %75, %cst_21 [2] : vector<16x8x8xf32> to vector<16x8xf32>
    %77 = vector.shape_cast %76 : vector<16x8xf32> to vector<16x8x1xf32>
    %78 = tpu.reciprocal %77 {approx = true} : vector<16x8x1xf32> -> vector<16x8x1xf32>
    %79 = vector.broadcast %78 : vector<16x8x1xf32> to vector<16x8x8xf32>
    %80 = arith.mulf %75, %79 : vector<16x8x8xf32>
    %81 = arith.truncf %80 : vector<16x8x8xf32> to vector<16x8x8xbf16>
    "tpu.trace_start"() <{level = 10 : i32, message = "bqk,bkd->bqd"}> : () -> ()
    %cst_22 = arith.constant dense<0.000000e+00> : vector<16x8x16xf32>
    %82 = tpu.matmul %81, %69, %cst_22 {dimension_numbers = #tpu.dot_dimension_numbers<[2], [1], [1], [2], [0, 0, 0, 1, 1, 2], [0], [0]>} : vector<16x8x8xbf16>, vector<16x8x16xbf16>, vector<16x8x16xf32> -> vector<16x8x16xf32>
    "tpu.trace_stop"() : () -> ()
    %83 = vector.extract_strided_slice %12 {offsets = [0, 0, 64], sizes = [16, 8, 16], strides = [1, 1, 1]} : vector<16x8x128xbf16> to vector<16x8x16xbf16>
    %84 = vector.extract_strided_slice %15 {offsets = [0, 0, 64], sizes = [16, 8, 16], strides = [1, 1, 1]} : vector<16x8x128xbf16> to vector<16x8x16xbf16>
    %85 = vector.extract_strided_slice %18 {offsets = [0, 0, 64], sizes = [16, 8, 16], strides = [1, 1, 1]} : vector<16x8x128xbf16> to vector<16x8x16xbf16>
    "tpu.trace_start"() <{level = 10 : i32, message = "bqd,bkd->bqk"}> : () -> ()
    %cst_23 = arith.constant dense<0.000000e+00> : vector<16x8x8xf32>
    %86 = tpu.matmul %83, %84, %cst_23 {dimension_numbers = #tpu.dot_dimension_numbers<[2], [2], [1], [1], [0, 0, 0, 1, 1, 1], [0], [0]>} : vector<16x8x16xbf16>, vector<16x8x16xbf16>, vector<16x8x8xf32> -> vector<16x8x8xf32>
    "tpu.trace_stop"() : () -> ()
    %cst_24 = arith.constant dense<0xFF800000> : vector<16x8xf32>
    %87 = vector.multi_reduction <maximumf>, %86, %cst_24 [2] : vector<16x8x8xf32> to vector<16x8xf32>
    %88 = vector.shape_cast %87 : vector<16x8xf32> to vector<16x8x1xf32>
    %89 = vector.broadcast %88 : vector<16x8x1xf32> to vector<16x8x8xf32>
    %90 = arith.subf %86, %89 : vector<16x8x8xf32>
    %91 = math.exp %90 : vector<16x8x8xf32>
    %cst_25 = arith.constant dense<0.000000e+00> : vector<16x8xf32>
    %92 = vector.multi_reduction <add>, %91, %cst_25 [2] : vector<16x8x8xf32> to vector<16x8xf32>
    %93 = vector.shape_cast %92 : vector<16x8xf32> to vector<16x8x1xf32>
    %94 = tpu.reciprocal %93 {approx = true} : vector<16x8x1xf32> -> vector<16x8x1xf32>
    %95 = vector.broadcast %94 : vector<16x8x1xf32> to vector<16x8x8xf32>
    %96 = arith.mulf %91, %95 : vector<16x8x8xf32>
    %97 = arith.truncf %96 : vector<16x8x8xf32> to vector<16x8x8xbf16>
    "tpu.trace_start"() <{level = 10 : i32, message = "bqk,bkd->bqd"}> : () -> ()
    %cst_26 = arith.constant dense<0.000000e+00> : vector<16x8x16xf32>
    %98 = tpu.matmul %97, %85, %cst_26 {dimension_numbers = #tpu.dot_dimension_numbers<[2], [1], [1], [2], [0, 0, 0, 1, 1, 2], [0], [0]>} : vector<16x8x8xbf16>, vector<16x8x16xbf16>, vector<16x8x16xf32> -> vector<16x8x16xf32>
    "tpu.trace_stop"() : () -> ()
    %99 = vector.extract_strided_slice %12 {offsets = [0, 0, 80], sizes = [16, 8, 16], strides = [1, 1, 1]} : vector<16x8x128xbf16> to vector<16x8x16xbf16>
    %100 = vector.extract_strided_slice %15 {offsets = [0, 0, 80], sizes = [16, 8, 16], strides = [1, 1, 1]} : vector<16x8x128xbf16> to vector<16x8x16xbf16>
    %101 = vector.extract_strided_slice %18 {offsets = [0, 0, 80], sizes = [16, 8, 16], strides = [1, 1, 1]} : vector<16x8x128xbf16> to vector<16x8x16xbf16>
    "tpu.trace_start"() <{level = 10 : i32, message = "bqd,bkd->bqk"}> : () -> ()
    %cst_27 = arith.constant dense<0.000000e+00> : vector<16x8x8xf32>
    %102 = tpu.matmul %99, %100, %cst_27 {dimension_numbers = #tpu.dot_dimension_numbers<[2], [2], [1], [1], [0, 0, 0, 1, 1, 1], [0], [0]>} : vector<16x8x16xbf16>, vector<16x8x16xbf16>, vector<16x8x8xf32> -> vector<16x8x8xf32>
    "tpu.trace_stop"() : () -> ()
    %cst_28 = arith.constant dense<0xFF800000> : vector<16x8xf32>
    %103 = vector.multi_reduction <maximumf>, %102, %cst_28 [2] : vector<16x8x8xf32> to vector<16x8xf32>
    %104 = vector.shape_cast %103 : vector<16x8xf32> to vector<16x8x1xf32>
    %105 = vector.broadcast %104 : vector<16x8x1xf32> to vector<16x8x8xf32>
    %106 = arith.subf %102, %105 : vector<16x8x8xf32>
    %107 = math.exp %106 : vector<16x8x8xf32>
    %cst_29 = arith.constant dense<0.000000e+00> : vector<16x8xf32>
    %108 = vector.multi_reduction <add>, %107, %cst_29 [2] : vector<16x8x8xf32> to vector<16x8xf32>
    %109 = vector.shape_cast %108 : vector<16x8xf32> to vector<16x8x1xf32>
    %110 = tpu.reciprocal %109 {approx = true} : vector<16x8x1xf32> -> vector<16x8x1xf32>
    %111 = vector.broadcast %110 : vector<16x8x1xf32> to vector<16x8x8xf32>
    %112 = arith.mulf %107, %111 : vector<16x8x8xf32>
    %113 = arith.truncf %112 : vector<16x8x8xf32> to vector<16x8x8xbf16>
    "tpu.trace_start"() <{level = 10 : i32, message = "bqk,bkd->bqd"}> : () -> ()
    %cst_30 = arith.constant dense<0.000000e+00> : vector<16x8x16xf32>
    %114 = tpu.matmul %113, %101, %cst_30 {dimension_numbers = #tpu.dot_dimension_numbers<[2], [1], [1], [2], [0, 0, 0, 1, 1, 2], [0], [0]>} : vector<16x8x8xbf16>, vector<16x8x16xbf16>, vector<16x8x16xf32> -> vector<16x8x16xf32>
    "tpu.trace_stop"() : () -> ()
    %115 = vector.extract_strided_slice %12 {offsets = [0, 0, 96], sizes = [16, 8, 16], strides = [1, 1, 1]} : vector<16x8x128xbf16> to vector<16x8x16xbf16>
    %116 = vector.extract_strided_slice %15 {offsets = [0, 0, 96], sizes = [16, 8, 16], strides = [1, 1, 1]} : vector<16x8x128xbf16> to vector<16x8x16xbf16>
    %117 = vector.extract_strided_slice %18 {offsets = [0, 0, 96], sizes = [16, 8, 16], strides = [1, 1, 1]} : vector<16x8x128xbf16> to vector<16x8x16xbf16>
    "tpu.trace_start"() <{level = 10 : i32, message = "bqd,bkd->bqk"}> : () -> ()
    %cst_31 = arith.constant dense<0.000000e+00> : vector<16x8x8xf32>
    %118 = tpu.matmul %115, %116, %cst_31 {dimension_numbers = #tpu.dot_dimension_numbers<[2], [2], [1], [1], [0, 0, 0, 1, 1, 1], [0], [0]>} : vector<16x8x16xbf16>, vector<16x8x16xbf16>, vector<16x8x8xf32> -> vector<16x8x8xf32>
    "tpu.trace_stop"() : () -> ()
    %cst_32 = arith.constant dense<0xFF800000> : vector<16x8xf32>
    %119 = vector.multi_reduction <maximumf>, %118, %cst_32 [2] : vector<16x8x8xf32> to vector<16x8xf32>
    %120 = vector.shape_cast %119 : vector<16x8xf32> to vector<16x8x1xf32>
    %121 = vector.broadcast %120 : vector<16x8x1xf32> to vector<16x8x8xf32>
    %122 = arith.subf %118, %121 : vector<16x8x8xf32>
    %123 = math.exp %122 : vector<16x8x8xf32>
    %cst_33 = arith.constant dense<0.000000e+00> : vector<16x8xf32>
    %124 = vector.multi_reduction <add>, %123, %cst_33 [2] : vector<16x8x8xf32> to vector<16x8xf32>
    %125 = vector.shape_cast %124 : vector<16x8xf32> to vector<16x8x1xf32>
    %126 = tpu.reciprocal %125 {approx = true} : vector<16x8x1xf32> -> vector<16x8x1xf32>
    %127 = vector.broadcast %126 : vector<16x8x1xf32> to vector<16x8x8xf32>
    %128 = arith.mulf %123, %127 : vector<16x8x8xf32>
    %129 = arith.truncf %128 : vector<16x8x8xf32> to vector<16x8x8xbf16>
    "tpu.trace_start"() <{level = 10 : i32, message = "bqk,bkd->bqd"}> : () -> ()
    %cst_34 = arith.constant dense<0.000000e+00> : vector<16x8x16xf32>
    %130 = tpu.matmul %129, %117, %cst_34 {dimension_numbers = #tpu.dot_dimension_numbers<[2], [1], [1], [2], [0, 0, 0, 1, 1, 2], [0], [0]>} : vector<16x8x8xbf16>, vector<16x8x16xbf16>, vector<16x8x16xf32> -> vector<16x8x16xf32>
    "tpu.trace_stop"() : () -> ()
    %131 = vector.extract_strided_slice %12 {offsets = [0, 0, 112], sizes = [16, 8, 16], strides = [1, 1, 1]} : vector<16x8x128xbf16> to vector<16x8x16xbf16>
    %132 = vector.extract_strided_slice %15 {offsets = [0, 0, 112], sizes = [16, 8, 16], strides = [1, 1, 1]} : vector<16x8x128xbf16> to vector<16x8x16xbf16>
    %133 = vector.extract_strided_slice %18 {offsets = [0, 0, 112], sizes = [16, 8, 16], strides = [1, 1, 1]} : vector<16x8x128xbf16> to vector<16x8x16xbf16>
    "tpu.trace_start"() <{level = 10 : i32, message = "bqd,bkd->bqk"}> : () -> ()
    %cst_35 = arith.constant dense<0.000000e+00> : vector<16x8x8xf32>
    %134 = tpu.matmul %131, %132, %cst_35 {dimension_numbers = #tpu.dot_dimension_numbers<[2], [2], [1], [1], [0, 0, 0, 1, 1, 1], [0], [0]>} : vector<16x8x16xbf16>, vector<16x8x16xbf16>, vector<16x8x8xf32> -> vector<16x8x8xf32>
    "tpu.trace_stop"() : () -> ()
    %cst_36 = arith.constant dense<0xFF800000> : vector<16x8xf32>
    %135 = vector.multi_reduction <maximumf>, %134, %cst_36 [2] : vector<16x8x8xf32> to vector<16x8xf32>
    %136 = vector.shape_cast %135 : vector<16x8xf32> to vector<16x8x1xf32>
    %137 = vector.broadcast %136 : vector<16x8x1xf32> to vector<16x8x8xf32>
    %138 = arith.subf %134, %137 : vector<16x8x8xf32>
    %139 = math.exp %138 : vector<16x8x8xf32>
    %cst_37 = arith.constant dense<0.000000e+00> : vector<16x8xf32>
    %140 = vector.multi_reduction <add>, %139, %cst_37 [2] : vector<16x8x8xf32> to vector<16x8xf32>
    %141 = vector.shape_cast %140 : vector<16x8xf32> to vector<16x8x1xf32>
    %142 = tpu.reciprocal %141 {approx = true} : vector<16x8x1xf32> -> vector<16x8x1xf32>
    %143 = vector.broadcast %142 : vector<16x8x1xf32> to vector<16x8x8xf32>
    %144 = arith.mulf %139, %143 : vector<16x8x8xf32>
    %145 = arith.truncf %144 : vector<16x8x8xf32> to vector<16x8x8xbf16>
    "tpu.trace_start"() <{level = 10 : i32, message = "bqk,bkd->bqd"}> : () -> ()
    %cst_38 = arith.constant dense<0.000000e+00> : vector<16x8x16xf32>
    %146 = tpu.matmul %145, %133, %cst_38 {dimension_numbers = #tpu.dot_dimension_numbers<[2], [1], [1], [2], [0, 0, 0, 1, 1, 2], [0], [0]>} : vector<16x8x8xbf16>, vector<16x8x16xbf16>, vector<16x8x16xf32> -> vector<16x8x16xf32>
    "tpu.trace_stop"() : () -> ()
    %147 = tpu.concatenate %34, %50, %66, %82, %98, %114, %130, %146 in 2 : vector<16x8x16xf32>, vector<16x8x16xf32>, vector<16x8x16xf32>, vector<16x8x16xf32>, vector<16x8x16xf32>, vector<16x8x16xf32>, vector<16x8x16xf32>, vector<16x8x16xf32> -> vector<16x8x128xf32>
    %148 = vector.shape_cast %147 : vector<16x8x128xf32> to vector<128x128xf32>
    %149 = arith.truncf %148 : vector<128x128xf32> to vector<128x128xbf16>
    %c0_39 = arith.constant 0 : index
    %c0_40 = arith.constant 0 : index
    %150 = vector.load %arg4[%c0_39, %c0_40] : memref<128x128xbf16, #tpu.memory_space<vmem>>, vector<128x128xbf16>
    %cst_41 = arith.constant dense<0.000000e+00> : vector<128x128xf32>
    %151 = tpu.matmul %149, %150, %cst_41 {dimension_numbers = #tpu.dot_dimension_numbers<[1], [0], [0], [1], [0, 0, 1, 1], [], []>} : vector<128x128xbf16>, vector<128x128xbf16>, vector<128x128xf32> -> vector<128x128xf32>
    %c0_42 = arith.constant 0 : index
    %c0_43 = arith.constant 0 : index
    %152 = vector.load %arg5[%c0_42, %c0_43] : memref<1x128xf32, #tpu.memory_space<vmem>>, vector<1x128xf32>
    %153 = vector.broadcast %152 : vector<1x128xf32> to vector<128x128xf32>
    %154 = arith.addf %151, %153 : vector<128x128xf32>
    %155 = arith.addf %1, %154 : vector<128x128xf32>
    %cst_44 = arith.constant dense<0.000000e+00> : vector<128xf32>
    %156 = vector.multi_reduction <add>, %155, %cst_44 [1] : vector<128x128xf32> to vector<128xf32>
    %157 = vector.shape_cast %156 : vector<128xf32> to vector<128x1xf32>
    %cst_45 = arith.constant 1.280000e+02 : f32
    %158 = vector.broadcast %cst_45 : f32 to vector<128x1xf32>
    %159 = arith.divf %157, %158 : vector<128x1xf32>
    %160 = vector.broadcast %159 : vector<128x1xf32> to vector<128x128xf32>
    %161 = arith.subf %155, %160 : vector<128x128xf32>
    %162 = arith.mulf %161, %161 : vector<128x128xf32>
    %cst_46 = arith.constant dense<0.000000e+00> : vector<128xf32>
    %163 = vector.multi_reduction <add>, %162, %cst_46 [1] : vector<128x128xf32> to vector<128xf32>
    %164 = vector.shape_cast %163 : vector<128xf32> to vector<128x1xf32>
    %cst_47 = arith.constant 1.280000e+02 : f32
    %165 = vector.broadcast %cst_47 : f32 to vector<128x1xf32>
    %166 = arith.divf %164, %165 : vector<128x1xf32>
    %cst_48 = arith.constant 9.99999974E-6 : f32
    %167 = vector.broadcast %cst_48 : f32 to vector<128x1xf32>
    %168 = arith.addf %166, %167 : vector<128x1xf32>
    %169 = math.rsqrt %168 : vector<128x1xf32>
    %170 = vector.broadcast %169 : vector<128x1xf32> to vector<128x128xf32>
    %171 = arith.mulf %161, %170 : vector<128x128xf32>
    %c0_49 = arith.constant 0 : index
    %c0_50 = arith.constant 0 : index
    %172 = vector.load %arg6[%c0_49, %c0_50] : memref<1x128xf32, #tpu.memory_space<vmem>>, vector<1x128xf32>
    %173 = vector.broadcast %172 : vector<1x128xf32> to vector<128x128xf32>
    %174 = arith.mulf %171, %173 : vector<128x128xf32>
    %c0_51 = arith.constant 0 : index
    %c0_52 = arith.constant 0 : index
    %175 = vector.load %arg7[%c0_51, %c0_52] : memref<1x128xf32, #tpu.memory_space<vmem>>, vector<1x128xf32>
    %176 = vector.broadcast %175 : vector<1x128xf32> to vector<128x128xf32>
    %177 = arith.addf %174, %176 : vector<128x128xf32>
    %c0_53 = arith.constant 0 : index
    %c0_54 = arith.constant 0 : index
    %178 = vector.load %arg8[%c0_53, %c0_54] : memref<1x128xf32, #tpu.memory_space<vmem>>, vector<1x128xf32>
    %179 = vector.broadcast %178 : vector<1x128xf32> to vector<128x128xf32>
    %180 = arith.mulf %177, %179 : vector<128x128xf32>
    %cst_55 = arith.constant dense<0.000000e+00> : vector<128xf32>
    %181 = vector.multi_reduction <add>, %180, %cst_55 [1] : vector<128x128xf32> to vector<128xf32>
    %182 = vector.shape_cast %181 : vector<128xf32> to vector<128x1xf32>
    %c0_56 = arith.constant 0 : index
    %c0_57 = arith.constant 0 : index
    %183 = memref.load %arg9[%c0_56, %c0_57] : memref<1x1xf32, #tpu.memory_space<smem>>
    %184 = vector.broadcast %183 : f32 to vector<128x1xf32>
    %185 = arith.addf %182, %184 : vector<128x1xf32>
    %186 = vector.shape_cast %185 : vector<128x1xf32> to vector<16x8x1xf32>
    %cst_58 = arith.constant dense<0xFF800000> : vector<16x1xf32>
    %187 = vector.multi_reduction <maximumf>, %186, %cst_58 [1] : vector<16x8x1xf32> to vector<16x1xf32>
    %188 = vector.shape_cast %187 : vector<16x1xf32> to vector<16x1x1xf32>
    %189 = vector.broadcast %188 : vector<16x1x1xf32> to vector<16x8x1xf32>
    %190 = arith.subf %186, %189 : vector<16x8x1xf32>
    %191 = math.exp %190 : vector<16x8x1xf32>
    %cst_59 = arith.constant dense<0.000000e+00> : vector<16x1xf32>
    %192 = vector.multi_reduction <add>, %191, %cst_59 [1] : vector<16x8x1xf32> to vector<16x1xf32>
    %193 = vector.shape_cast %192 : vector<16x1xf32> to vector<16x1x1xf32>
    %194 = tpu.reciprocal %193 {approx = true} : vector<16x1x1xf32> -> vector<16x1x1xf32>
    %195 = vector.broadcast %194 : vector<16x1x1xf32> to vector<16x8x1xf32>
    %196 = arith.mulf %191, %195 : vector<16x8x1xf32>
    %197 = vector.shape_cast %177 : vector<128x128xf32> to vector<16x8x128xf32>
    %198 = vector.broadcast %196 : vector<16x8x1xf32> to vector<16x8x128xf32>
    %199 = arith.mulf %197, %198 : vector<16x8x128xf32>
    %cst_60 = arith.constant dense<0.000000e+00> : vector<16x128xf32>
    %200 = vector.multi_reduction <add>, %199, %cst_60 [1] : vector<16x8x128xf32> to vector<16x128xf32>
    %201 = vector.shape_cast %200 : vector<16x128xf32> to vector<16x1x128xf32>
    %c0_61 = arith.constant 0 : index
    %c0_62 = arith.constant 0 : index
    %c0_63 = arith.constant 0 : index
    %202 = vector.load %arg10[%c0_61, %c0_62, %c0_63] : memref<16x1x128xf32, #tpu.memory_space<vmem>>, vector<16x1x128xf32>
    tpu.vector_store %arg10[%c0_61, %c0_62, %c0_63], %201 {strides = array<i32>} : memref<16x1x128xf32, #tpu.memory_space<vmem>>, vector<16x1x128xf32>,
    return
  }
  func.func @transform_0(%arg0: i32) -> (i32, i32, i32) {
    %c0_i32 = arith.constant 0 : i32
    %c0_i32_0 = arith.constant 0 : i32
    %c0_i32_1 = arith.constant 0 : i32
    return %arg0, %c0_i32, %c0_i32_0 : i32, i32, i32
  }
  func.func @transform_1(%arg0: i32) -> (i32, i32) {
    %c0_i32 = arith.constant 0 : i32
    %c0_i32_0 = arith.constant 0 : i32
    %c0_i32_1 = arith.constant 0 : i32
    return %c0_i32, %c0_i32_0 : i32, i32
  }
  func.func @transform_2(%arg0: i32) -> (i32, i32) {
    %c0_i32 = arith.constant 0 : i32
    %c0_i32_0 = arith.constant 0 : i32
    %c0_i32_1 = arith.constant 0 : i32
    return %c0_i32, %c0_i32_0 : i32, i32
  }
  func.func @transform_3(%arg0: i32) -> (i32, i32) {
    %c0_i32 = arith.constant 0 : i32
    %c0_i32_0 = arith.constant 0 : i32
    %c0_i32_1 = arith.constant 0 : i32
    return %c0_i32, %c0_i32_0 : i32, i32
  }
  func.func @transform_4(%arg0: i32) -> (i32, i32) {
    %c0_i32 = arith.constant 0 : i32
    %c0_i32_0 = arith.constant 0 : i32
    %c0_i32_1 = arith.constant 0 : i32
    return %c0_i32, %c0_i32_0 : i32, i32
  }
  func.func @transform_5(%arg0: i32) -> (i32, i32) {
    %c0_i32 = arith.constant 0 : i32
    %c0_i32_0 = arith.constant 0 : i32
    %c0_i32_1 = arith.constant 0 : i32
    return %c0_i32, %c0_i32_0 : i32, i32
  }
  func.func @transform_6(%arg0: i32) -> (i32, i32) {
    %c0_i32 = arith.constant 0 : i32
    %c0_i32_0 = arith.constant 0 : i32
    %c0_i32_1 = arith.constant 0 : i32
    return %c0_i32, %c0_i32_0 : i32, i32
  }
  func.func @transform_7(%arg0: i32) -> (i32, i32) {
    %c0_i32 = arith.constant 0 : i32
    %c0_i32_0 = arith.constant 0 : i32
    %c0_i32_1 = arith.constant 0 : i32
    return %c0_i32, %c0_i32_0 : i32, i32
  }
  func.func @transform_8(%arg0: i32) -> (i32, i32) {
    %c0_i32 = arith.constant 0 : i32
    %c0_i32_0 = arith.constant 0 : i32
    %c0_i32_1 = arith.constant 0 : i32
    return %c0_i32, %c0_i32_0 : i32, i32
  }
  func.func @transform_9(%arg0: i32) -> (i32, i32, i32) {
    %c0_i32 = arith.constant 0 : i32
    %c0_i32_0 = arith.constant 0 : i32
    %c0_i32_1 = arith.constant 0 : i32
    return %arg0, %c0_i32, %c0_i32_0 : i32, i32, i32
  }
}

</mosaic_0001>

<bundles_post_ra>
// kernel: tpu_custom_call.1
= control target key start
LH: loop header
LB: loop body
LE: loop exit
PB: predicated region body
PF: predicated region fallthrough
CT: control target
= control target key end

     0   :  { %s25523_s0 = inlined_call_operand.hbm [shape: f32[32,8,128], index: 0, kind: input, shape index: {}]   ;;  %s25524_s1 = inlined_call_operand.hbm [shape: bf16[128,384], index: 1, kind: input, shape index: {}]   ;;  %s25525_s2 = inlined_call_operand.vmem [shape: f32[1,384], index: 2, kind: input, shape index: {}]   ;;  %s25526_s3 = inlined_call_operand.hbm [shape: bf16[128,128], index: 3, kind: input, shape index: {}]   ;;  %s25527_s4 = inlined_call_operand.vmem [shape: f32[1,128], index: 4, kind: input, shape index: {}]   ;;  %s25528_s5 = inlined_call_operand.vmem [shape: f32[1,128], index: 5, kind: input, shape index: {}]   ;;  %s25529_s6 = inlined_call_operand.vmem [shape: f32[1,128], index: 6, kind: input, shape index: {}]   ;;  %s25530_s7 = inlined_call_operand.vmem [shape: f32[1,128], index: 7, kind: input, shape index: {}]   ;;  %s25531_s8 = inlined_call_operand.<no memory space> [shape: f32[1,1], index: 8, kind: input, shape index: {}]   ;;  %s25532_s9 = inlined_call_operand.hbm [shape: f32[32,1,128], index: 9, kind: output, shape index: {}]  }
   0x1   :  { %14 = sst [smem:[#allocation2]] %s25531_s8 }
   0x2   :  { %15 = vsyncpa [#allocation4], 0 }
   0x3   :  { %17 = vsyncpa [#allocation4 + $0x1], 0 }
   0x4   :  { %18 = vsyncpa [#allocation7], 0 }
   0x5   :  { %19 = vsyncpa [#allocation5], 0 }
   0x6   :  { %21 = vsyncpa [#allocation5 + $0x1], 0  ;;  %s20330_s11 = smov 0   ;;  %s20332_s12 = smov 0  }
   0x7   :  { %s20334_s13 = smov 0   ;;  %s20336_s14 = smov 0  }
   0x8 LB: > { %s20351_s8 = sadd.s32 4294967295, %s20254_s14   ;;  %s16502_s15 = sadd.s32 4294967294, %s20254_s14   ;;  %s20254_s14 = sphi %s20336_s14, %s26125_s14   ;;  %s20250_s13 = sphi %s20334_s13, %s26124_s13   ;;  %s20246_s12 = sphi %s20332_s12, %s26123_s12   ;;  %s20242_s11 = sphi %s20330_s11, %s26122_s11  }
   0x9   : > { %p47_p0 = scmp.ne.s32.totalorder %s20246_s12, %s20242_s11  ;;  %p25533_p1 = scmp.eq.s32.totalorder %s20351_s8, 0 }
   0xa   : > { %p245_p3 = scmp.eq.s32.totalorder %s16502_s15, 1  ;;  %p16503_p5 = scmp.ge.s32.totalorder %s20254_s14, 1 }
   0xb   : > { %p20360_p4 = por %p25533_p1, %p47_p0  ;;  %p252_p7 = scmp.lt.s32.totalorder %s20254_s14, 3 }
   0xc   : > { %p20365_p6 = por %p245_p3, %p47_p0  ;;  %s20256_s19 = smov [#allocation6]  }
   0xd   : > { %s25672_s16 = scalar_select %p20360_p4, 1, 0 }
   0xe   : > { %s25673_s17 = scalar_select %p20365_p6, 1, 0 }
   0xf   : > { %p20370_p8 = pnand %p16503_p5, %p252_p7  ;;  %s264_s20 = sshll.u32 %s20256_s19, 4  ;;  %s20374_s20 = int_to_ptr.vmem [resolvable:$true] %s264_s20 }
  0x10   : > { %s20257_s22 = smov [#allocation8]   ;;  %s20098_s26 = scalar_lea.hbm %s25524_s1, 3072 }
  0x11   : > { %p19082_p9 = pneg %p20370_p8  ;;  %s280_s23 = sshll.u32 %s20257_s22, 4  ;;  %s20385_s23 = int_to_ptr.vmem [resolvable:$true] %s280_s23 }
  0x12   : > { %p20099_p12 = scmp.ne.s32.totalorder %s25524_s1, %s20098_s26  ;;  %p20105_p5 = scmp.lt.u32.totalorder %s20098_s26, %s25524_s1 }
  0x13   : > { %p20381_p11 = pnand %p19082_p9, %p25533_p1 }
  0x15   : > { %p20100_p13 = pneg %p20381_p11 }
  0x17   : > { %p20101_p0 = pnand %p20100_p13, %p20099_p12 }
  0x19   : > { %p20102_p3 = pneg %p20101_p0 }
  0x1b   : > { %p20107_p7 = pnand %p20105_p5, %p20102_p3 }
  0x1d   : > { %20110 = shalt.err (!%p20107_p7)
}
  0x1e   : > { %s20111_s10 = scalar_lea.vmem %s20374_s20, 3072  ;;  %p20119_p2 = scmp.lt.s32.totalorder %s20374_s20, %s20374_s20 }
  0x1f   : > { %p20112_p9 = scmp.ne.s32.totalorder %s20374_s20, %s20111_s10  ;;  %p20120_p12 = scmp.lt.s32.totalorder %s20111_s10, %s20111_s10 }
  0x21   : > { %p20114_p10 = pnand %p20112_p9, %p20100_p13  ;;  %p20121_p0 = por %p20120_p12, %p20119_p2 }
  0x23   : > { %p20115_p1 = pneg %p20114_p10 }
  0x25   : > { %p20122_p6 = pnand %p20121_p0, %p20115_p1 }
  0x27   : > { %20125 = shalt.err (!%p20122_p6)
}
  0x28   : > { %s20258_s15 = smov 192   ;;  %s20259_s19 = smov 12  }
  0x29   : > { %19085 = dma.hbm_to_vmem [thread:$0]  (!%p20381_p11), %s25524_s1, 3072, %s20374_s20, [#allocation7], %s20258_s15, %s20258_s15, %s20259_s19  }
  0x2a   : > { %s20126_s27 = scalar_lea.hbm %s25526_s3, 1024 }
  0x2b   : > { %p20127_p2 = scmp.ne.s32.totalorder %s25526_s3, %s20126_s27  ;;  %p20133_p10 = scmp.lt.u32.totalorder %s20126_s27, %s25526_s3 }
  0x2d   : > { %p20129_p1 = pnand %p20127_p2, %p20100_p13 }
  0x2f   : > { %p20130_p6 = pneg %p20129_p1 }
  0x31   : > { %p20135_p3 = pnand %p20133_p10, %p20130_p6 }
  0x33   : > { %20138 = shalt.err (!%p20135_p3)
}
  0x34   : > { %s20139_s20 = scalar_lea.vmem %s20385_s23, 1024  ;;  %p20147_p12 = scmp.lt.s32.totalorder %s20385_s23, %s20385_s23 }
  0x35   : > { %p20140_p5 = scmp.ne.s32.totalorder %s20385_s23, %s20139_s20  ;;  %p20148_p0 = scmp.lt.s32.totalorder %s20139_s20, %s20139_s20 }
  0x37   : > { %p20142_p7 = pnand %p20140_p5, %p20100_p13  ;;  %p20149_p2 = por %p20148_p0, %p20147_p12 }
  0x39   : > { %p20143_p9 = pneg %p20142_p7 }
  0x3b   : > { %p20150_p1 = pnand %p20149_p2, %p20143_p9 }
  0x3d   : > { %20153 = shalt.err (!%p20150_p1)
}
  0x3e   : > { %s20260_s15 = smov 64   ;;  %s20261_s19 = smov 4  }
  0x3f   : > { %19088 = dma.hbm_to_vmem [thread:$0]  (!%p20381_p11), %s25526_s3, 1024, %s20385_s23, [#allocation7], %s20260_s15, %s20260_s15, %s20261_s19  }
  0x40   : > { %s20440_s25 = sadd.s32 1, %s20254_s14   ;;  %s34_s27 = sadd.s32 1, %s20250_s13 }
  0x41   : > { %s31_s26 = ssub.s32 %s20254_s14, %s20440_s25  ;;  %p41_p6 = scmp.ne.s32.totalorder %s20250_s13, %s20246_s12 }
  0x42   : > { %p32_p13 = scmp.eq.s32.totalorder %s31_s26, 0  ;;  %p42_p10 = scmp.eq.s32.totalorder %s20254_s14, 0 }
  0x43   : > { %p25676_p5 = scmp.eq.s32.totalorder %s20351_s8, 1  ;;  %p19099_p9 = scmp.lt.s32.totalorder %s20254_s14, 2 }
  0x44   : > { %s20449_s28 = scalar_select %p32_p13, %s20250_s13, %s34_s27  }
  0x45   : > { %p43_p3 = por %p42_p10, %p41_p6  ;;  %p20453_p7 = por %p25676_p5, %p41_p6 }
  0x46   : > { %s309_s21 = sand.u32 1, %s20250_s13   ;;  %s16860_s23 = sshll.u32 %s20254_s14, 11 }
  0x47   : > { %s25677_s29 = scalar_select %p20453_p7, 1, 0 }
  0x48   : > { %s16507_s30 = sshll.u32 %s309_s21, 7  ;;  %s20463_s15 = scalar_lea.hbm %s25523_s0, %s16860_s23 }
  0x49   : > { %s313_s19 = scalar_lea.vmem [#allocation3], %s16507_s30  ;;  %p20467_p11 = pnand %p19099_p9, %p43_p3 }
  0x4a   : > { %s320_s22 = sshll.u32 %s313_s19, 4  ;;  %s20471_s26 = scalar_lea.sflag [#allocation4], %s309_s21  ;;  %s20465_s22 = int_to_ptr.vmem [resolvable:$true] %s320_s22 }
  0x4b   : > { %s20154_s27 = scalar_lea.hbm %s20463_s15, 2048  ;;  %p20156_p0 = pneg %p20467_p11 }
  0x4c   : > { %p20155_p12 = scmp.ne.s32.totalorder %s20463_s15, %s20154_s27  ;;  %s20159_s10 = scalar_lea.hbm %s25523_s0, 4096 }
  0x4d   : > { %p20160_p13 = scmp.lt.u32.totalorder %s20463_s15, %s25523_s0  ;;  %p20161_p6 = scmp.lt.u32.totalorder %s20159_s10, %s20154_s27 }
  0x4e   : > { %p20157_p2 = pnand %p20156_p0, %p20155_p12  ;;  %p20163_p3 = scmp.lt.u32.totalorder %s20154_s27, %s20463_s15 }
  0x4f   : > { %p20162_p10 = por %p20161_p6, %p20160_p13 }
  0x50   : > { %p20158_p1 = pneg %p20157_p2 }
  0x51   : > { %p20164_p5 = por %p20163_p3, %p20162_p10 }
  0x53   : > { %p20165_p9 = pnand %p20164_p5, %p20158_p1 }
  0x55   : > { %20168 = shalt.err (!%p20165_p9)
}
  0x56   : > { %s20169_s21 = scalar_lea.vmem %s20465_s22, 2048  ;;  %s20262_s30 = smov [#allocation3]  }
  0x57   : > { %p20170_p12 = scmp.ne.s32.totalorder %s20465_s22, %s20169_s21  ;;  %s20174_s23 = sshll.u32 %s20262_s30, 4  ;;  %s20175_s23 = int_to_ptr.vmem [resolvable:$false] %s20174_s23 }
  0x58   : > { %s20176_s20 = scalar_lea.vmem %s20175_s23, 4096  ;;  %p20177_p4 = scmp.lt.s32.totalorder %s20465_s22, %s20175_s23 }
  0x59   : > { %p20172_p2 = pnand %p20170_p12, %p20156_p0  ;;  %p20178_p13 = scmp.lt.s32.totalorder %s20176_s20, %s20169_s21 }
  0x5b   : > { %p20173_p7 = pneg %p20172_p2  ;;  %p20179_p6 = por %p20178_p13, %p20177_p4 }
  0x5d   : > { %p20180_p10 = pnand %p20179_p6, %p20173_p7 }
  0x5f   : > { %20183 = shalt.err (!%p20180_p10)
}
  0x60   : > { %s20263_s27 = smov 128   ;;  %s20264_s10 = smov 8  }
  0x61   : > { %19092 = dma.hbm_to_vmem [thread:$0]  (!%p20467_p11), %s20463_s15, 2048, %s20465_s22, %s20471_s26, %s20263_s27, %s20263_s27, %s20264_s10  }
  0x62   : > { %332 = sbr.rel (%p20370_p8) target bundleno = 6624 (0x19e0), region = 56 }
  0x69   : > { %s20502_s19 = sand.u32 1, %s20246_s12   ;;  %p25679_p4 = scmp.ne.s32.totalorder %s25672_s16, 0 }
  0x6a   : > { %s16511_s21 = sshll.u32 %s20502_s19, 7  ;;  %s335_s30 = scalar_lea.sflag [#allocation4], %s20502_s19 }
  0x6b   : > { %s20506_s23 = scalar_lea.vmem [#allocation3], %s16511_s21 }
  0x6c   : > { %20229 = dma.done.wait (%p25679_p4), %s335_s30, 2048  }
  0x6d   : > { %20231 = vsyncadd (%p25679_p4), %s335_s30, 4294965248  ;;  %p25680_p7 = scmp.eq.s32.totalorder %s20351_s8, 0 }
  0x6f   : > { %20233 = dma.done.wait (%p25680_p7), [#allocation7], 4096   ;;  %p25681_p8 = pmov %p25680_p7 }
  0x70   : > { %v20265_v0 = vmov 0   ;;  %v19434_v1 = vld [vmem:[#allocation6 + $0x4] ss:$12 sps:$4 sm:$0xff]   ;;  %v19436_v2 = vld [vmem:[#allocation6] ss:$12 sps:$4 sm:$0xff]   ;;  %v387_v27 = vld [vmem:[%s20506_s23 + $0x18] sm:$0xff]  ;;  %v442_v50 = vlaneseq }
  0x71   : > { %20235 = vsyncadd (%p25681_p8), [#allocation7], 4294963200  ;;  %617 = vmatprep.mubr.bf16.mxu0 %v20265_v0  ;;  %585 = vmatprep.subr.bf16.mxu0 %v19434_v1  ;;  %v19437_v3 = vld [vmem:[#allocation6 + $0x1c] ss:$12 sps:$4 sm:$0xff]   ;;  %v19439_v4 = vld [vmem:[#allocation6 + $0x18] ss:$12 sps:$4 sm:$0xff]  }
  0x72   : > { %586 = vmatpush1.bf16.msra.mxu0 %v19436_v2  ;;  %v19440_v5 = vld [vmem:[#allocation6 + $0x34] ss:$12 sps:$4 sm:$0xff]   ;;  %v19442_v6 = vld [vmem:[#allocation6 + $0x30] ss:$12 sps:$4 sm:$0xff]   ;;  %v19443_v7 = vld [vmem:[#allocation6 + $0x4c] ss:$12 sps:$4 sm:$0xff]  }
  0x73   : > { %587 = vmatprep.subr.bf16.mxu0 %v19437_v3  ;;  %v384_v8 = vld [vmem:[%s20506_s23] sm:$0xff]  ;;  %v19445_v9 = vld [vmem:[#allocation6 + $0x48] ss:$12 sps:$4 sm:$0xff]   ;;  %v19454_v20 = vld [vmem:[#allocation6 + $0x90] ss:$12 sps:$4 sm:$0xff]   ;;  %v25536_v49 = vmov 0.0  }
  0x74   : > { %v385_v10 = vld [vmem:[%s20506_s23 + $0x8] sm:$0xff]  ;;  %v19446_v11 = vld [vmem:[#allocation6 + $0x64] ss:$12 sps:$4 sm:$0xff]   ;;  %v19452_v18 = vld [vmem:[#allocation6 + $0x94] ss:$12 sps:$4 sm:$0xff]   ;;  %vm20267_vm0 = vmmov 0  }
  0x75   : > { %v400_v12 = vpack.c.bf16 %v385_v10, %v384_v8  ;;  %v19448_v13 = vld [vmem:[#allocation6 + $0x60] ss:$12 sps:$4 sm:$0xff]   ;;  %v19449_v14 = vld [vmem:[#allocation6 + $0x7c] ss:$12 sps:$4 sm:$0xff]   ;;  %v19451_v17 = vld [vmem:[#allocation6 + $0x78] ss:$12 sps:$4 sm:$0xff]  }
  0x76   : > { %588 = vmatpush1.bf16.msra.mxu0 %v19439_v4  ;;  %v19458_v15 = vld [vmem:[#allocation6 + $0x8] ss:$12 sps:$4 sm:$0xff]   ;;  %v19459_v16 = vld [vmem:[#allocation6 + $0x20] ss:$12 sps:$4 sm:$0xff]   ;;  %v19460_v19 = vld [vmem:[#allocation6 + $0x38] ss:$12 sps:$4 sm:$0xff]  }
  0x77   : > { %589 = vmatprep.subr.bf16.mxu0 %v19440_v5  ;;  %17470 = vmatprep.mubr.bf16.mxu1 %v400_v12  ;;  %v19455_v21 = vld [vmem:[#allocation6 + $0xac] ss:$12 sps:$4 sm:$0xff]   ;;  %v19461_v22 = vld [vmem:[#allocation6 + $0x50] ss:$12 sps:$4 sm:$0xff]   ;;  %v19457_v23 = vld [vmem:[#allocation6 + $0xa8] ss:$12 sps:$4 sm:$0xff]  }
  0x78   : > { %17454 = vmatprep.subr.bf16.mxu1 %v19458_v15  ;;  %v19462_v24 = vld [vmem:[#allocation6 + $0x68] ss:$12 sps:$4 sm:$0xff]   ;;  %v19463_v25 = vld [vmem:[#allocation6 + $0x80] ss:$12 sps:$4 sm:$0xff]   ;;  %v19464_v28 = vld [vmem:[#allocation6 + $0x98] ss:$12 sps:$4 sm:$0xff]  }
  0x79   : > { %17455 = vmatpush3.bf16.msra.mxu1 %v19458_v15  ;;  %v386_v26 = vld [vmem:[%s20506_s23 + $0x10] sm:$0xff]  ;;  %v388_v31 = vld [vmem:[%s20506_s23 + $0x20] sm:$0xff]  ;;  %v389_v32 = vld [vmem:[%s20506_s23 + $0x28] sm:$0xff]  ;;  %v443_v51 = vshrl.u32 %v442_v50, 7  ;;  %vm955_vm1 = vcmask 130048   ;;  %vm1888_vm2 = vcmask 1043456  }
  0x7a   : > { %590 = vmatpush1.bf16.msra.mxu0 %v19442_v6  ;;  %17456 = vmatprep.subr.bf16.mxu1 %v19459_v16  ;;  %v401_v29 = vpack.c.bf16 %v387_v27, %v386_v26  ;;  %v19465_v30 = vld [vmem:[#allocation6 + $0xb0] ss:$12 sps:$4 sm:$0xff]   ;;  %v402_v33 = vpack.c.bf16 %v389_v32, %v388_v31  ;;  %v392_v37 = vld [vmem:[%s20506_s23 + $0x40] sm:$0xff]  ;;  %v393_v38 = vld [vmem:[%s20506_s23 + $0x48] sm:$0xff]  ;;  %vm1692_vm3 = vcmask 64512   ;;  %s20268_s15 = smov 112  }
  0x7b   : > { %591 = vmatprep.subr.bf16.mxu0 %v19443_v7  ;;  %v390_v34 = vld [vmem:[%s20506_s23 + $0x30] sm:$0xff]  ;;  %v391_v35 = vld [vmem:[%s20506_s23 + $0x38] sm:$0xff]  ;;  %v404_v39 = vpack.c.bf16 %v393_v38, %v392_v37  ;;  %v396_v42 = vld [vmem:[%s20506_s23 + $0x60] sm:$0xff]  ;;  %v448_v52 = vsub.s32 1, %v443_v51  ;;  %v444_v54 = vsub.s32 0, %v443_v51  ;;  %v452_v5 = vsub.s32 2, %v443_v51 }
  0x7c   : > { %v403_v36 = vpack.c.bf16 %v391_v35, %v390_v34  ;;  %v394_v40 = vld [vmem:[%s20506_s23 + $0x50] sm:$0xff]  ;;  %v395_v41 = vld [vmem:[%s20506_s23 + $0x58] sm:$0xff]  ;;  %v397_v43 = vld [vmem:[%s20506_s23 + $0x68] sm:$0xff]  ;;  %s20269_s22 = smov 96   ;;  %s20270_s24 = smov 80   ;;  %vm15406_vm4 = vcmask 261120  }
  0x7d   : > { %17457 = vmatpush3.bf16.msra.mxu1 %v19459_v16  ;;  %v405_v44 = vpack.c.bf16 %v395_v41, %v394_v40  ;;  %v406_v45 = vpack.c.bf16 %v397_v43, %v396_v42  ;;  %v398_v46 = vld [vmem:[%s20506_s23 + $0x70] sm:$0xff]  ;;  %v399_v47 = vld [vmem:[%s20506_s23 + $0x78] sm:$0xff]  ;;  %v440_v53 = vld [vmem:[%s25525_s2] sm:$0x7]  ;;  %s20271_s26 = smov 64   ;;  %s20272_s20 = smov 48  }
  0x7e   : > { %592 = vmatpush1.bf16.msra.mxu0 %v19445_v9  ;;  %17458 = vmatprep.subr.bf16.mxu1 %v19460_v19  ;;  %v407_v48 = vpack.c.bf16 %v399_v47, %v398_v46  ;;  %v20549_v55 = vrot.slane %v440_v53, %v448_v52  ;;  %v20551_v56 = vrot.slane %v440_v53, %v444_v54  ;;  %s20273_s27 = smov 32   ;;  %s20274_s10 = smov 16   ;;  %vm15423_vm5 = vcmask 392192  }
  0x7f   : > { %593 = vmatprep.subr.bf16.mxu0 %v19446_v11  ;;  %vm15440_vm6 = vcmask 523264   ;;  %vm15457_vm7 = vcmask 654336   ;;  %vm15474_vm8 = vcmask 785408   ;;  %vm15491_vm9 = vcmask 916480   ;;  %s16909_s21 = sshll.u32 %s20351_s8, 8  ;;  %p26119_p0 = scmp.ne.s32.totalorder %s25677_s29, 0 }
  0x80   : > { %s25474_s18 = scalar_lea.hbm %s25532_s9, %s16909_s21  ;;  %s20275_s8 = smov [#allocation9]  }
  0x81   : > { %17459 = vmatpush3.bf16.msra.mxu1 %v19460_v19 }
  0x82   : > { %594 = vmatpush1.bf16.msra.mxu0 %v19448_v13  ;;  %17460 = vmatprep.subr.bf16.mxu1 %v19461_v22 }
  0x83   : > { %595 = vmatprep.subr.bf16.mxu0 %v19449_v14 }
  0x85   : > { %17461 = vmatpush3.bf16.msra.mxu1 %v19461_v22 }
  0x86   : > { %596 = vmatpush1.bf16.msra.mxu0 %v19451_v17  ;;  %17462 = vmatprep.subr.bf16.mxu1 %v19462_v24 }
  0x87   : > { %597 = vmatprep.subr.bf16.mxu0 %v19452_v18 }
  0x89   : > { %17463 = vmatpush3.bf16.msra.mxu1 %v19462_v24 }
  0x8a   : > { %598 = vmatpush1.bf16.msra.mxu0 %v19454_v20  ;;  %17464 = vmatprep.subr.bf16.mxu1 %v19463_v25 }
  0x8b   : > { %599 = vmatprep.subr.bf16.mxu0 %v19455_v21 }
  0x8d   : > { %17465 = vmatpush3.bf16.msra.mxu1 %v19463_v25 }
  0x8e   : > { %600 = vmatpush1.bf16.msra.mxu0 %v19457_v23  ;;  %17466 = vmatprep.subr.bf16.mxu1 %v19464_v28 }
  0x8f   : > { %17510 = vmatprep.subr.bf16.mxu0 %v25536_v49 }
  0x91   : > { %618 = vmatmul.mubr.bf16.vlgmr.msra.gmra.mrb[0].mxu0 %v400_v12  ;;  %17467 = vmatpush3.bf16.msra.mxu1 %v19464_v28  ;;  %v20567_v12 = vrot.slane %v440_v53, %v452_v5 }
  0x92   : > { %627 = vmatprep.mubr.bf16.mxu0 %v20265_v0  ;;  %17468 = vmatprep.subr.bf16.mxu1 %v19465_v30 }
  0x95   : > { %17469 = vmatpush3.bf16.msra.mxu1 %v19465_v30 }
  0x96   : > { %17486 = vmatprep.subr.bf16.mxu1 %v25536_v49 }
  0x98   : > { %17471 = vmatmul.mubr.bf16.vlgmr.msra.gmra.mrb[0].mxu1 %v401_v29 }
  0x99   : > { %628 = vmatmul.mubr.bf16.gmra.mrb[4].mxu0 %v401_v29  ;;  %17474 = vmatprep.mubr.bf16.mxu1 %v402_v33 }
  0x9a   : > { %637 = vmatprep.mubr.bf16.mxu0 %v20265_v0 }
  0xa0   : > { %17475 = vmatmul.mubr.bf16.gmra.mrb[4].mxu1 %v403_v36 }
  0xa1   : > { %638 = vmatmul.mubr.bf16.gmra.mrb[8].mxu0 %v402_v33  ;;  %17478 = vmatprep.mubr.bf16.mxu1 %v404_v39 }
  0xa2   : > { %647 = vmatprep.mubr.bf16.mxu0 %v20265_v0 }
  0xa8   : > { %17479 = vmatmul.mubr.bf16.gmra.mrb[8].mxu1 %v405_v44 }
  0xa9   : > { %648 = vmatmul.mubr.bf16.gmra.mrb[12].mxu0 %v403_v36  ;;  %17482 = vmatprep.mubr.bf16.mxu1 %v406_v45 }
  0xaa   : > { %657 = vmatprep.mubr.bf16.mxu0 %v20265_v0 }
  0xb0   : > { %17483 = vmatmul.mubr.bf16.gmra.mrb[12].mxu1 %v407_v48 }
  0xb1   : > { %658 = vmatmul.mubr.bf16.gmra.mrb[16].mxu0 %v404_v39  ;;  %17488 = vmatprep.mubr.msk.bf16.mxu1 %vm20267_vm0, %v25536_v49 }
  0xb2   : > { %667 = vmatprep.mubr.bf16.mxu0 %v20265_v0 }
  0xb9   : > { %668 = vmatmul.mubr.bf16.gmra.mrb[20].mxu0 %v405_v44 }
  0xba   : > { %677 = vmatprep.mubr.bf16.mxu0 %v20265_v0 }
  0xc1   : > { %678 = vmatmul.mubr.bf16.gmra.mrb[24].mxu0 %v406_v45 }
  0xc2   : > { %687 = vmatprep.mubr.bf16.mxu0 %v20265_v0 }
  0xc9   : > { %688 = vmatmul.mubr.bf16.gmra.mrb[28].mxu0 %v407_v48 }
  0xca   : > { %17512 = vmatprep.mubr.msk.bf16.mxu0 %vm20267_vm0, %v25536_v49 }
 0x164   : > { %v619_v57 = vpop.f32.mrb[0].mxu0 }
 0x165   : > { %v621_v58 = vpop.f32.mrb[1].mxu0  ;;  %v620_v62 = vadd.f32 %v619_v57, %v20551_v56 }
 0x166   : > { %v622_v59 = vadd.f32 %v621_v58, %v20549_v55  ;;  %v623_v60 = vpop.f32.mrb[2].mxu0 }
 0x167   : > { %v625_v61 = vpop.f32.mrb[3].mxu0  ;;  %v795_v2 = vmul.f32 0.25, %v620_v62  ;;  %v624_v10 = vadd.f32 %v623_v60, %v20551_v56 }
 0x168   : > { %v20555_v63 = vpack.c.bf16 %v622_v59, %v622_v59  ;;  %v626_v0 = vadd.f32 %v625_v61, %v20549_v55 }
 0x169   : > { %v20563_v9 = vpack.c.bf16 %v795_v2, %v795_v2  ;;  %v796_v14 = vmul.f32 0.25, %v624_v10 }
 0x16a   : > { %v960_v1 = vsel %vm955_vm1, %v20555_v63, 0  ;;  %v20561_v6 = vpack.c.bf16 %v626_v0, %v626_v0 }
 0x16b   : > { %17487 = vmatpush3.bf16.xpose.msra.mxu1 %v960_v1  ;;  %v17472_v17 = vpop.f32.mrb[0].mxu1  ;;  %v20592_v28 = vpack.c.bf16 %v796_v14, %v796_v14 }
 0x16c   : > { %v629_v3 = vpop.f32.mrb[4].mxu0  ;;  %17492 = vmatprep.subr.bf16.mxu1 %v25536_v49  ;;  %v1006_v13 = vsel %vm955_vm1, %v20561_v6, 0  ;;  %v20579_v19 = vadd.f32 %v17472_v17, %v20567_v12  ;;  %v20581_v20 = vpop.f32.mrb[1].mxu1 }
 0x16d   : > { %v631_v4 = vpop.f32.mrb[5].mxu0  ;;  %v17473_v24 = vpop.f32.mrb[2].mxu1  ;;  %v630_v29 = vadd.f32 %v629_v3, %v20551_v56 }
 0x16e   : > { %v633_v7 = vpop.f32.mrb[6].mxu0  ;;  %v632_v11 = vadd.f32 %v631_v4, %v20549_v55  ;;  %v20588_v26 = vadd.f32 %v17473_v24, %v20567_v12  ;;  %v20590_v27 = vpop.f32.mrb[3].mxu1 }
 0x16f   : > { %v635_v8 = vpop.f32.mrb[7].mxu0  ;;  %v797_v35 = vmul.f32 0.25, %v630_v29  ;;  %v634_v53 = vadd.f32 %v633_v7, %v20551_v56 }
 0x170   : > { %v20575_v15 = vpack.c.bf16 %v632_v11, %v632_v11  ;;  %v636_v32 = vadd.f32 %v635_v8, %v20549_v55 }
 0x171   : > { %v20625_v52 = vpack.c.bf16 %v797_v35, %v797_v35  ;;  %v798_v62 = vmul.f32 0.25, %v634_v53 }
 0x172   : > { %17489 = vmatmul.mubr.msk.bf16.vlgmr.msra.gmra.mrb[16].mxu1 %vm955_vm1, %v20563_v9  ;;  %v1052_v31 = vsel %vm955_vm1, %v20575_v15, 0  ;;  %v20607_v38 = vpack.c.bf16 %v636_v32, %v636_v32 }
 0x173   : > { %17493 = vmatpush3.bf16.xpose.msra.mxu1 %v1006_v13  ;;  %17494 = vmatprep.mubr.msk.bf16.mxu1 %vm20267_vm0, %v25536_v49  ;;  %v17476_v37 = vpop.f32.mrb[4].mxu1 }
 0x174   : > { %v639_v16 = vpop.f32.mrb[8].mxu0  ;;  %17498 = vmatprep.subr.bf16.mxu1 %v25536_v49  ;;  %v20611_v40 = vadd.f32 %v17476_v37, %v20567_v12  ;;  %v748_v41 = vpop.f32.mrb[5].mxu1  ;;  %v1098_v60 = vsel %vm955_vm1, %v20607_v38, 0 }
 0x175   : > { %v641_v18 = vpop.f32.mrb[9].mxu0  ;;  %v640_v21 = vadd.f32 %v639_v16, %v20551_v56  ;;  %v20620_v46 = vadd.f32 %v748_v41, %v20567_v12  ;;  %v17477_v47 = vpop.f32.mrb[6].mxu1 }
 0x176   : > { %v642_v22 = vadd.f32 %v641_v18, %v20549_v55  ;;  %v20585_v23 = vpop.f32.mrb[10].mxu0  ;;  %v20623_v50 = vadd.f32 %v17477_v47, %v20567_v12  ;;  %v751_v51 = vpop.f32.mrb[7].mxu1 }
 0x177   : > { %v645_v25 = vpop.f32.mrb[11].mxu0  ;;  %v799_v33 = vmul.f32 0.25, %v640_v21  ;;  %v20631_v57 = vadd.f32 %v751_v51, %v20567_v12  ;;  %v20665_v21 = vpack.c.bf16 %v798_v62, %v798_v62 }
 0x178   : > { %v20595_v30 = vpack.c.bf16 %v642_v22, %v642_v22  ;;  %v646_v58 = vadd.f32 %v645_v25, %v20549_v55  ;;  %v644_v22 = vadd.f32 %v20585_v23, %v20551_v56 }
 0x179   : > { %v20613_v42 = vpack.c.bf16 %v799_v33, %v799_v33 }
 0x17a   : > { %17495 = vmatmul.mubr.msk.bf16.vlgmr.msra.gmra.mrb[20].mxu1 %vm955_vm1, %v20592_v28  ;;  %v1144_v34 = vsel %vm955_vm1, %v20595_v30, 0  ;;  %v20646_v2 = vpack.c.bf16 %v646_v58, %v646_v58  ;;  %v800_v33 = vmul.f32 0.25, %v644_v22 }
 0x17b   : > { %17499 = vmatpush3.bf16.xpose.msra.mxu1 %v1052_v31  ;;  %17511 = vmatpush3.bf16.xpose.msra.mxu0 %v1144_v34  ;;  %v17480_v1 = vpop.f32.mrb[8].mxu1 }
 0x17c   : > { %v649_v36 = vpop.f32.mrb[12].mxu0  ;;  %17500 = vmatprep.mubr.msk.bf16.mxu1 %vm20267_vm0, %v25536_v49  ;;  %17504 = vmatprep.subr.bf16.mxu1 %v25536_v49  ;;  %v20651_v4 = vadd.f32 %v17480_v1, %v20567_v12  ;;  %v764_v5 = vpop.f32.mrb[9].mxu1  ;;  %v1190_v32 = vsel %vm955_vm1, %v20646_v2, 0 }
 0x17d   : > { %v651_v39 = vpop.f32.mrb[13].mxu0  ;;  %17522 = vmatprep.subr.bf16.mxu0 %v25536_v49  ;;  %v650_v43 = vadd.f32 %v649_v36, %v20551_v56  ;;  %v20660_v13 = vadd.f32 %v764_v5, %v20567_v12  ;;  %v17481_v14 = vpop.f32.mrb[10].mxu1 }
 0x17e   : > { %v652_v44 = vadd.f32 %v651_v39, %v20549_v55  ;;  %v20617_v45 = vpop.f32.mrb[14].mxu0  ;;  %v20663_v17 = vadd.f32 %v17481_v14, %v20567_v12  ;;  %v767_v18 = vpop.f32.mrb[11].mxu1 }
 0x17f   : > { %v655_v48 = vpop.f32.mrb[15].mxu0  ;;  %v801_v59 = vmul.f32 0.25, %v650_v43  ;;  %v20672_v25 = vadd.f32 %v767_v18, %v20567_v12  ;;  %v654_v62 = vadd.f32 %v20617_v45, %v20551_v56 }
 0x180   : > { %v20628_v54 = vpack.c.bf16 %v652_v44, %v652_v44  ;;  %v656_v29 = vadd.f32 %v655_v48, %v20549_v55 }
 0x181   : > { %v20653_v7 = vpack.c.bf16 %v801_v59, %v801_v59 }
 0x182   : > { %17501 = vmatmul.mubr.msk.bf16.vlgmr.msra.gmra.mrb[24].mxu1 %vm955_vm1, %v20625_v52  ;;  %17513 = vmatmul.mubr.msk.bf16.vlgmr.msra.gmra.mrb[32].mxu0 %vm955_vm1, %v20613_v42  ;;  %v1236_v61 = vsel %vm955_vm1, %v20628_v54, 0  ;;  %v20687_v36 = vpack.c.bf16 %v656_v29, %v656_v29 }
 0x183   : > { %17505 = vmatpush3.bf16.xpose.msra.mxu1 %v1098_v60  ;;  %17523 = vmatpush3.bf16.xpose.msra.mxu0 %v1236_v61  ;;  %v17484_v35 = vpop.f32.mrb[12].mxu1  ;;  %v20704_v61 = vpack.c.bf16 %v800_v33, %v800_v33 }
 0x184   : > { %v659_v0 = vpop.f32.mrb[16].mxu0  ;;  %17506 = vmatprep.mubr.msk.bf16.mxu1 %vm20267_vm0, %v25536_v49  ;;  %17524 = vmatprep.mubr.msk.bf16.mxu0 %vm20267_vm0, %v25536_v49  ;;  %v20692_v39 = vadd.f32 %v17484_v35, %v20567_v12  ;;  %v780_v41 = vpop.f32.mrb[13].mxu1 }
 0x185   : > { %v661_v3 = vpop.f32.mrb[17].mxu0  ;;  %17516 = vmatprep.subr.bf16.mxu1 %v25536_v49  ;;  %17534 = vmatprep.subr.bf16.mxu0 %v25536_v49  ;;  %v660_v8 = vadd.f32 %v659_v0, %v20551_v56  ;;  %v20699_v51 = vadd.f32 %v780_v41, %v20567_v12  ;;  %v17485_v53 = vpop.f32.mrb[14].mxu1 }
 0x186   : > { %v662_v10 = vadd.f32 %v661_v3, %v20549_v55  ;;  %v20657_v11 = vpop.f32.mrb[18].mxu0  ;;  %25682 = vst [vmem:[#allocation13_spill] sm:$0xff] %v20692_v39  ;;  %v20702_v59 = vadd.f32 %v17485_v53, %v20567_v12  ;;  %v783_v60 = vpop.f32.mrb[15].mxu1 }
 0x187   : > { %v665_v16 = vpop.f32.mrb[19].mxu0  ;;  %v803_v31 = vmul.f32 0.25, %v660_v8  ;;  %v20711_v1 = vadd.f32 %v783_v60, %v20567_v12  ;;  %v1282_v8 = vsel %vm955_vm1, %v20687_v36, 0  ;;  %v664_v35 = vadd.f32 %v20657_v11, %v20551_v56 }
 0x188   : > { %v20669_v24 = vpack.c.bf16 %v662_v10, %v662_v10  ;;  %25683 = vst [vmem:[#allocation14_spill] sm:$0xff] %v20702_v59  ;;  %v666_v3 = vadd.f32 %v665_v16, %v20549_v55  ;;  %v802_v10 = vmul.f32 0.25, %v654_v62 }
 0x189   : > { %v20694_v43 = vpack.c.bf16 %v803_v31, %v803_v31  ;;  %25684 = vst [vmem:[#allocation15_spill] sm:$0xff] %v20711_v1  ;;  %v804_v11 = vmul.f32 0.25, %v664_v35  ;;  %v733_v35 = vadd.f32 %v20581_v20, %v20567_v12 }
 0x18a   : > { %17507 = vmatmul.mubr.msk.bf16.vlgmr.msra.gmra.mrb[28].mxu1 %vm955_vm1, %v20665_v21  ;;  %17525 = vmatmul.mubr.msk.bf16.vlgmr.msra.gmra.mrb[36].mxu0 %vm955_vm1, %v20653_v7  ;;  %v1328_v23 = vsel %vm955_vm1, %v20669_v24, 0  ;;  %v20728_v18 = vpack.c.bf16 %v666_v3, %v666_v3 }
 0x18b   : > { %17517 = vmatpush3.bf16.xpose.msra.mxu1 %v1190_v32  ;;  %17535 = vmatpush3.bf16.xpose.msra.mxu0 %v1328_v23  ;;  %v20787_v20 = vpack.c.bf16 %v733_v35, %v733_v35 }
 0x18c   : > { %v669_v34 = vpop.f32.mrb[20].mxu0  ;;  %17518 = vmatprep.mubr.msk.bf16.mxu1 %vm20267_vm0, %v25536_v49  ;;  %17536 = vmatprep.mubr.msk.bf16.mxu0 %vm20267_vm0, %v25536_v49  ;;  %25685 = vst [vmem:[#allocation16_spill] sm:$0xff] %v20728_v18  ;;  %v1374_v53 = vsel %vm955_vm1, %v20728_v18, 0 }
 0x18d   : > { %v671_v37 = vpop.f32.mrb[21].mxu0  ;;  %17528 = vmatprep.subr.bf16.mxu1 %v25536_v49  ;;  %17546 = vmatprep.subr.bf16.mxu0 %v25536_v49  ;;  %v670_v44 = vadd.f32 %v669_v34, %v20551_v56  ;;  %v20735_v34 = vpack.c.bf16 %v802_v10, %v802_v10  ;;  %25693 = vst [vmem:[#allocation24_spill] sm:$0xff] %v20787_v20 }
 0x18e   : > { %v672_v47 = vadd.f32 %v671_v37, %v20549_v55  ;;  %v673_v48 = vpop.f32.mrb[22].mxu0 }
 0x18f   : > { %v675_v58 = vpop.f32.mrb[23].mxu0  ;;  %v805_v5 = vmul.f32 0.25, %v670_v44  ;;  %25686 = vst [vmem:[#allocation17_spill] sm:$0xff] %v20735_v34 }
 0x190   : > { %v20708_v0 = vpack.c.bf16 %v672_v47, %v672_v47  ;;  %v676_v44 = vadd.f32 %v675_v58, %v20549_v55 }
 0x191   : > { %v20730_v22 = vpack.c.bf16 %v805_v5, %v805_v5 }
 0x192   : > { %17519 = vmatmul.mubr.msk.bf16.vlgmr.msra.gmra.mrb[32].mxu1 %vm955_vm1, %v20704_v61  ;;  %17537 = vmatmul.mubr.msk.bf16.vlgmr.msra.gmra.mrb[40].mxu0 %vm955_vm1, %v20694_v43  ;;  %v1420_v45 = vsel %vm955_vm1, %v20708_v0, 0  ;;  %v20757_v3 = vpack.c.bf16 %v676_v44, %v676_v44 }
 0x193   : > { %17529 = vmatpush3.bf16.xpose.msra.mxu1 %v1282_v8  ;;  %17547 = vmatpush3.bf16.xpose.msra.mxu0 %v1420_v45 }
 0x194   : > { %v679_v14 = vpop.f32.mrb[24].mxu0  ;;  %17530 = vmatprep.mubr.msk.bf16.mxu1 %vm20267_vm0, %v25536_v49  ;;  %17548 = vmatprep.mubr.msk.bf16.mxu0 %vm20267_vm0, %v25536_v49  ;;  %25688 = vst [vmem:[#allocation19_spill] sm:$0xff] %v20757_v3 }
 0x195   : > { %v681_v16 = vpop.f32.mrb[25].mxu0  ;;  %17540 = vmatprep.subr.bf16.mxu1 %v25536_v49  ;;  %17558 = vmatprep.subr.bf16.mxu0 %v25536_v49  ;;  %v680_v29 = vadd.f32 %v679_v14, %v20551_v56 }
 0x196   : > { %v682_v31 = vadd.f32 %v681_v16, %v20549_v55  ;;  %v683_v32 = vpop.f32.mrb[26].mxu0 }
 0x197   : > { %v684_v23 = vadd.f32 %v683_v32, %v20551_v56  ;;  %v685_v33 = vpop.f32.mrb[27].mxu0  ;;  %v807_v47 = vmul.f32 0.25, %v680_v29  ;;  %v20764_v29 = vpack.c.bf16 %v804_v11, %v804_v11  ;;  %v1890_v11 = vsel %vm1888_vm2, %v20787_v20, 0 }
 0x198   : > { %v20739_v37 = vpack.c.bf16 %v682_v31, %v682_v31  ;;  %v686_v41 = vadd.f32 %v685_v33, %v20549_v55  ;;  %v674_v31 = vadd.f32 %v673_v48, %v20551_v56 }
 0x199   : > { %v20759_v5 = vpack.c.bf16 %v807_v47, %v807_v47  ;;  %25690 = vst [vmem:[#allocation21_spill] sm:$0xff] %v20764_v29  ;;  %v1466_v47 = vsel %vm955_vm1, %v20757_v3, 0 }
 0x19a   : > { %25687 = vst [vmem:[#allocation18_spill] sm:$0xff] %v20739_v37  ;;  %17531 = vmatmul.mubr.msk.bf16.vlgmr.msra.gmra.mrb[36].mxu1 %vm955_vm1, %v20735_v34  ;;  %17549 = vmatmul.mubr.msk.bf16.vlgmr.msra.gmra.mrb[44].mxu0 %vm955_vm1, %v20730_v22  ;;  %v1512_v60 = vsel %vm955_vm1, %v20739_v37, 0  ;;  %v806_v48 = vmul.f32 0.25, %v674_v31 }
 0x19b   : > { %17541 = vmatpush3.bf16.xpose.msra.mxu1 %v1374_v53  ;;  %17559 = vmatpush3.bf16.xpose.msra.mxu0 %v1512_v60  ;;  %25689 = vst [vmem:[#allocation20_spill] sm:$0xff] %v20759_v5 }
 0x19c   : > { %v689_v62 = vpop.f32.mrb[28].mxu0  ;;  %17542 = vmatprep.mubr.msk.bf16.mxu1 %vm20267_vm0, %v25536_v49  ;;  %17560 = vmatprep.mubr.msk.bf16.mxu0 %vm20267_vm0, %v25536_v49  ;;  %v20792_v60 = vpack.c.bf16 %v806_v48, %v806_v48 }
 0x19d   : > { %v691_v58 = vpop.f32.mrb[29].mxu0  ;;  %17552 = vmatprep.subr.bf16.mxu1 %v25536_v49  ;;  %17570 = vmatprep.subr.bf16.mxu0 %v25536_v49  ;;  %v690_v8 = vadd.f32 %v689_v62, %v20551_v56  ;;  %v808_v62 = vmul.f32 0.25, %v684_v23 }
 0x19e   : > { %v692_v45 = vadd.f32 %v691_v58, %v20549_v55  ;;  %v693_v10 = vpop.f32.mrb[30].mxu0  ;;  %25695 = vst [vmem:[#allocation26_spill] sm:$0xff] %v20792_v60 }
 0x19f   : > { %v694_v14 = vadd.f32 %v693_v10, %v20551_v56  ;;  %v695_v16 = vpop.f32.mrb[31].mxu0  ;;  %v809_v44 = vmul.f32 0.25, %v690_v8  ;;  %v20810_v23 = vpack.c.bf16 %v808_v62, %v808_v62 }
 0x1a0   : > { %v20767_v32 = vpack.c.bf16 %v692_v45, %v692_v45  ;;  %v696_v33 = vadd.f32 %v695_v16, %v20549_v55  ;;  %v20780_v55 = vpack.c.bf16 %v686_v41, %v686_v41  ;;  %v736_v45 = vadd.f32 %v20590_v27, %v20567_v12 }
 0x1a1   : > { %v20790_v53 = vpack.c.bf16 %v809_v44, %v809_v44  ;;  %25697 = vst [vmem:[#allocation28_spill] sm:$0xff] %v20810_v23  ;;  %v810_v10 = vmul.f32 0.25, %v694_v14 }
 0x1a2   : > { %25691 = vst [vmem:[#allocation22_spill] sm:$0xff] %v20767_v32  ;;  %17543 = vmatmul.mubr.msk.bf16.vlgmr.msra.gmra.mrb[40].mxu1 %vm955_vm1, %v20764_v29  ;;  %17561 = vmatmul.mubr.msk.bf16.vlgmr.msra.gmra.mrb[48].mxu0 %vm955_vm1, %v20759_v5  ;;  %v1604_v56 = vsel %vm955_vm1, %v20767_v32, 0  ;;  %25692 = vst [vmem:[#allocation23_spill] sm:$0xff] %v20780_v55  ;;  %v1558_v41 = vsel %vm955_vm1, %v20780_v55, 0  ;;  %v20804_v58 = vpack.c.bf16 %v696_v33, %v696_v33 }
 0x1a3   : > { %17553 = vmatpush3.bf16.xpose.msra.mxu1 %v1466_v47  ;;  %17571 = vmatpush3.bf16.xpose.msra.mxu0 %v1604_v56  ;;  %25694 = vst [vmem:[#allocation25_spill] sm:$0xff] %v20790_v53  ;;  %v20820_v16 = vpack.c.bf16 %v736_v45, %v736_v45  ;;  %v20823_v31 = vpack.c.bf16 %v810_v10, %v810_v10 }
 0x1a4   : > { %17554 = vmatprep.mubr.msk.bf16.mxu1 %vm20267_vm0, %v25536_v49  ;;  %17572 = vmatprep.mubr.msk.bf16.mxu0 %vm20267_vm0, %v25536_v49  ;;  %25696 = vst [vmem:[#allocation27_spill] sm:$0xff] %v20804_v58  ;;  %v1650_v8 = vsel %vm955_vm1, %v20804_v58, 0 }
 0x1a5   : > { %17564 = vmatprep.subr.bf16.mxu1 %v25536_v49  ;;  %17582 = vmatprep.subr.bf16.mxu0 %v25536_v49  ;;  %25698 = vst [vmem:[#allocation29_spill] sm:$0xff] %v20820_v16  ;;  %25699 = vst [vmem:[#allocation30_spill] sm:$0xff] %v20823_v31  ;;  %v1936_v33 = vsel %vm1888_vm2, %v20820_v16, 0 }
 0x1aa   : > { %17555 = vmatmul.mubr.msk.bf16.vlgmr.msra.gmra.mrb[44].mxu1 %vm955_vm1, %v20792_v60  ;;  %17573 = vmatmul.mubr.msk.bf16.vlgmr.msra.gmra.mrb[52].mxu0 %vm955_vm1, %v20790_v53 }
 0x1ab   : > { %17565 = vmatpush3.bf16.xpose.msra.mxu1 %v1558_v41  ;;  %17566 = vmatprep.mubr.msk.bf16.mxu1 %vm20267_vm0, %v25536_v49 }
 0x1ac   : > { %17576 = vmatprep.subr.bf16.mxu1 %v25536_v49  ;;  %17583 = vmatpush3.bf16.msra.mxu0 %v1890_v11 }
 0x1ad   : > { %17584 = vmatprep.mubr.msk.bf16.mxu0 %vm20267_vm0, %v25536_v49  ;;  %17594 = vmatprep.subr.bf16.mxu0 %v25536_v49 }
 0x1b2   : > { %17567 = vmatmul.mubr.msk.bf16.vlgmr.msra.gmra.mrb[48].mxu1 %vm955_vm1, %v20810_v23 }
 0x1b3   : > { %17577 = vmatpush3.bf16.xpose.msra.mxu1 %v1650_v8  ;;  %17578 = vmatprep.mubr.msk.bf16.mxu1 %vm20267_vm0, %v25536_v49 }
 0x1b4   : > { %17588 = vmatprep.subr.bf16.mxu1 %v25536_v49 }
 0x1ba   : > { %17579 = vmatmul.mubr.msk.bf16.vlgmr.msra.gmra.mrb[52].mxu1 %vm955_vm1, %v20823_v31 }
 0x1bb   : > { %17589 = vmatpush3.bf16.msra.mxu1 %v1936_v33  ;;  %17590 = vmatprep.mubr.msk.bf16.mxu1 %vm20267_vm0, %v25536_v49 }
 0x1bc   : > { %17600 = vmatprep.subr.bf16.mxu1 %v25536_v49 }
 0x245   : > { %v20832_v12 = vpop.f32.mrb[16].mxu1 }
 0x246   : > { %v17490_v27 = vpop.f32.mrb[17].mxu1  ;;  %v1693_v14 = vsel %vm1692_vm3, %v20832_v12, -inf }
 0x247   : > { %1694 = vmax.xlane.f32.xlu0 %v1693_v14  ;;  %v999_v35 = vpop.f32.mrb[18].mxu1 }
 0x248   : > { %v17491_v44 = vpop.f32.mrb[19].mxu1 }
 0x24d   : > { %v20836_v47 = vpop.f32.mrb[20].mxu1 }
 0x24e   : > { %v17496_v56 = vpop.f32.mrb[21].mxu1  ;;  %v1696_v48 = vsel %vm1692_vm3, %v20836_v47, -inf }
 0x24f   : > { %1697 = vmax.xlane.f32.xlu0 %v1696_v48  ;;  %v1045_v41 = vpop.f32.mrb[22].mxu1 }
 0x250   : > { %v17497_v11 = vpop.f32.mrb[23].mxu1 }
 0x255   : > { %v20840_v62 = vpop.f32.mrb[24].mxu1  ;;  %v20842_v8 = vpop.f32.mrb[32].mxu0 }
 0x256   : > { %v1705_v45 = vsel %vm1692_vm3, %v20842_v8, -inf  ;;  %v1699_v10 = vsel %vm1692_vm3, %v20840_v62, -inf  ;;  %v17502_v33 = vpop.f32.mrb[25].mxu1  ;;  %v17514_v27 = vpop.f32.mrb[33].mxu0 }
 0x257   : > { %1706 = vmax.xlane.f32.xlu0 %v1705_v45  ;;  %1700 = vmax.xlane.f32.xlu1 %v1699_v10  ;;  %v1091_v14 = vpop.f32.mrb[26].mxu1  ;;  %v1183_v35 = vpop.f32.mrb[34].mxu0 }
 0x258   : > { %v17503_v44 = vpop.f32.mrb[27].mxu1  ;;  %v17515_v56 = vpop.f32.mrb[35].mxu0 }
 0x25d   : > { %v20848_v48 = vpop.f32.mrb[28].mxu1  ;;  %v20850_v41 = vpop.f32.mrb[36].mxu0 }
 0x25e   : > { %v1711_v11 = vsel %vm1692_vm3, %v20850_v41, -inf  ;;  %v1702_v49 = vsel %vm1692_vm3, %v20848_v48, -inf  ;;  %v17508_v59 = vpop.f32.mrb[29].mxu1  ;;  %v17526_v16 = vpop.f32.mrb[37].mxu0 }
 0x25f   : > { %1712 = vmax.xlane.f32.xlu0 %v1711_v11  ;;  %1703 = vmax.xlane.f32.xlu1 %v1702_v49  ;;  %v1137_v45 = vpop.f32.mrb[30].mxu1  ;;  %v1275_v10 = vpop.f32.mrb[38].mxu0 }
 0x260   : > { %v17509_v33 = vpop.f32.mrb[31].mxu1  ;;  %v17527_v27 = vpop.f32.mrb[39].mxu0 }
 0x265   : > { %v20856_v14 = vpop.f32.mrb[32].mxu1  ;;  %v20858_v35 = vpop.f32.mrb[40].mxu0 }
 0x266   : > { %v1717_v44 = vsel %vm1692_vm3, %v20858_v35, -inf  ;;  %v1708_v56 = vsel %vm1692_vm3, %v20856_v14, -inf  ;;  %v17520_v31 = vpop.f32.mrb[33].mxu1  ;;  %v17538_v58 = vpop.f32.mrb[41].mxu0 }
 0x267   : > { %1718 = vmax.xlane.f32.xlu0 %v1717_v44  ;;  %1709 = vmax.xlane.f32.xlu1 %v1708_v56  ;;  %v1229_v59 = vpop.f32.mrb[34].mxu1  ;;  %v1367_v49 = vpop.f32.mrb[42].mxu0 }
 0x268   : > { %v17521_v16 = vpop.f32.mrb[35].mxu1  ;;  %v17539_v11 = vpop.f32.mrb[43].mxu0 }
 0x26d   : > { %v20864_v45 = vpop.f32.mrb[36].mxu1  ;;  %v20866_v10 = vpop.f32.mrb[44].mxu0 }
 0x26e   : > { %v1723_v33 = vsel %vm1692_vm3, %v20866_v10, -inf  ;;  %v1714_v27 = vsel %vm1692_vm3, %v20864_v45, -inf  ;;  %v17532_v23 = vpop.f32.mrb[37].mxu1  ;;  %v17550_v55 = vpop.f32.mrb[45].mxu0 }
 0x26f   : > { %1724 = vmax.xlane.f32.xlu0 %v1723_v33  ;;  %1715 = vmax.xlane.f32.xlu1 %v1714_v27  ;;  %v1321_v58 = vpop.f32.mrb[38].mxu1  ;;  %v1459_v31 = vpop.f32.mrb[46].mxu0 }
 0x270   : > { %v17533_v44 = vpop.f32.mrb[39].mxu1  ;;  %v17551_v56 = vpop.f32.mrb[47].mxu0 }
 0x275   : > { %v20872_v59 = vpop.f32.mrb[40].mxu1  ;;  %v20874_v49 = vpop.f32.mrb[48].mxu0 }
 0x276   : > { %v1729_v16 = vsel %vm1692_vm3, %v20874_v49, -inf  ;;  %v1720_v11 = vsel %vm1692_vm3, %v20872_v59, -inf  ;;  %v17544_v60 = vpop.f32.mrb[41].mxu1  ;;  %v17562_v3 = vpop.f32.mrb[49].mxu0 }
 0x277   : > { %1730 = vmax.xlane.f32.xlu0 %v1729_v16  ;;  %1721 = vmax.xlane.f32.xlu1 %v1720_v11  ;;  %v1413_v55 = vpop.f32.mrb[42].mxu1  ;;  %v1551_v23 = vpop.f32.mrb[50].mxu0 }
 0x278   : > { %v17545_v33 = vpop.f32.mrb[43].mxu1  ;;  %v17563_v27 = vpop.f32.mrb[51].mxu0 }
 0x27d   : > { %v20880_v58 = vpop.f32.mrb[44].mxu1  ;;  %v20882_v31 = vpop.f32.mrb[52].mxu0 }
 0x27e   : > { %v1735_v44 = vsel %vm1692_vm3, %v20882_v31, -inf  ;;  %v1726_v56 = vsel %vm1692_vm3, %v20880_v58, -inf  ;;  %v17556_v29 = vpop.f32.mrb[45].mxu1  ;;  %v17574_v1 = vpop.f32.mrb[53].mxu0 }
 0x27f   : > { %1736 = vmax.xlane.f32.xlu0 %v1735_v44  ;;  %1727 = vmax.xlane.f32.xlu1 %v1726_v56  ;;  %v1505_v3 = vpop.f32.mrb[46].mxu1  ;;  %v1643_v60 = vpop.f32.mrb[54].mxu0 }
 0x280   : > { %v17557_v16 = vpop.f32.mrb[47].mxu1  ;;  %v17575_v11 = vpop.f32.mrb[55].mxu0 }
 0x285   : > { %v20888_v55 = vpop.f32.mrb[48].mxu1 }
 0x286   : > { %v1732_v23 = vsel %vm1692_vm3, %v20888_v55, -inf  ;;  %v17568_v33 = vpop.f32.mrb[49].mxu1 }
 0x287   : > { %1733 = vmax.xlane.f32.xlu1 %v1732_v23  ;;  %v1597_v27 = vpop.f32.mrb[50].mxu1 }
 0x288   : > { %v17569_v39 = vpop.f32.mrb[51].mxu1 }
 0x28d   : > { %v20892_v18 = vpop.f32.mrb[52].mxu1 }
 0x28e   : > { %v1738_v1 = vsel %vm1692_vm3, %v20892_v18, -inf  ;;  %v17580_v29 = vpop.f32.mrb[53].mxu1 }
 0x28f   : > { %1739 = vmax.xlane.f32.xlu1 %v1738_v1  ;;  %v1689_v44 = vpop.f32.mrb[54].mxu1 }
 0x290   : > { %v17581_v56 = vpop.f32.mrb[55].mxu1 }
 0x2d4   : > { %v1695_v3 = vpop.xlane.xlu0 %1694 }
 0x2d5   : > { %v1741_v60 = vsub.f32 %v20832_v12, %v1695_v3 }
 0x2d7   : > { %v1757_v16 = vmul.f32 1.442695, %v1741_v60 }
 0x2d9   : > { %19474 = vpow2.f32 %v1757_v16 }
 0x2dc   : > { %v1698_v11 = vpop.xlane.xlu0 %1697 }
 0x2dd   : > { %v1742_v33 = vsub.f32 %v20836_v47, %v1698_v11 }
 0x2df   : > { %v1759_v23 = vmul.f32 1.442695, %v1742_v33 }
 0x2e1   : > { %19476 = vpow2.f32 %v1759_v23 }
 0x2e3   : > { %v20898_v39 = vpop.eup %19474 }
 0x2e4   : > { %v1707_v27 = vpop.xlane.xlu0 %1706  ;;  %v1701_v34 = vpop.xlane.xlu1 %1700  ;;  %v1789_v29 = vsel %vm1692_vm3, %v20898_v39, 0.0 }
 0x2e5   : > { %v1745_v1 = vsub.f32 %v20842_v8, %v1707_v27  ;;  %v1743_v44 = vsub.f32 %v20840_v62, %v1701_v34  ;;  %1790 = vadd.xlane.f32.xlu0 %v1789_v29 }
 0x2e7   : > { %v1761_v12 = vmul.f32 1.442695, %v1743_v44  ;;  %v1765_v56 = vmul.f32 1.442695, %v1745_v1 }
 0x2e9   : > { %19478 = vpow2.f32 %v1761_v12 }
 0x2ea   : > { %19480 = vpow2.f32 %v1765_v56 }
 0x2eb   : > { %v20904_v3 = vpop.eup %19476 }
 0x2ec   : > { %v1713_v47 = vpop.xlane.xlu0 %1712  ;;  %v1704_v60 = vpop.xlane.xlu1 %1703  ;;  %v1792_v16 = vsel %vm1692_vm3, %v20904_v3, 0.0 }
 0x2ed   : > { %v1747_v11 = vsub.f32 %v20850_v41, %v1713_v47  ;;  %v1744_v33 = vsub.f32 %v20848_v48, %v1704_v60  ;;  %1793 = vadd.xlane.f32.xlu1 %v1792_v16 }
 0x2ef   : > { %v1769_v8 = vmul.f32 1.442695, %v1747_v11  ;;  %v1763_v23 = vmul.f32 1.442695, %v1744_v33 }
 0x2f1   : > { %19482 = vpow2.f32 %v1769_v8 }
 0x2f2   : > { %19484 = vpow2.f32 %v1763_v23 }
 0x2f3   : > { %v20910_v34 = vpop.eup %19478 }
 0x2f4   : > { %v1719_v62 = vpop.xlane.xlu0 %1718  ;;  %v1710_v27 = vpop.xlane.xlu1 %1709  ;;  %v1795_v44 = vsel %vm1692_vm3, %v20910_v34, 0.0 }
 0x2f5   : > { %v1749_v29 = vsub.f32 %v20858_v35, %v1719_v62  ;;  %v1746_v1 = vsub.f32 %v20856_v14, %v1710_v27  ;;  %v20916_v12 = vpop.eup %19480  ;;  %1796 = vadd.xlane.f32.xlu0 %v1795_v44 }
 0x2f6   : > { %v1801_v56 = vsel %vm1692_vm3, %v20916_v12, 0.0 }
 0x2f7   : > { %v1773_v48 = vmul.f32 1.442695, %v1749_v29  ;;  %v1767_v41 = vmul.f32 1.442695, %v1746_v1 }
 0x2f9   : > { %19486 = vpow2.f32 %v1773_v48  ;;  %1802 = vadd.xlane.f32.xlu0 %v1801_v56 }
 0x2fa   : > { %19488 = vpow2.f32 %v1767_v41 }
 0x2fb   : > { %v20920_v47 = vpop.eup %19482 }
 0x2fc   : > { %v20922_v60 = vpop.eup %19484  ;;  %v1725_v35 = vpop.xlane.xlu0 %1724  ;;  %v1807_v16 = vsel %vm1692_vm3, %v20920_v47, 0.0 }
 0x2fd   : > { %v1716_v14 = vpop.xlane.xlu1 %1715  ;;  %v1751_v11 = vsub.f32 %v20866_v10, %v1725_v35  ;;  %v1798_v8 = vsel %vm1692_vm3, %v20922_v60, 0.0  ;;  %1808 = vadd.xlane.f32.xlu0 %v1807_v16 }
 0x2fe   : > { %v1748_v33 = vsub.f32 %v20864_v45, %v1716_v14  ;;  %1799 = vadd.xlane.f32.xlu1 %v1798_v8 }
 0x2ff   : > { %v1777_v23 = vmul.f32 1.442695, %v1751_v11 }
 0x300   : > { %v1771_v62 = vmul.f32 1.442695, %v1748_v33 }
 0x301   : > { %19490 = vpow2.f32 %v1777_v23 }
 0x302   : > { %19492 = vpow2.f32 %v1771_v62 }
 0x303   : > { %v20930_v27 = vpop.eup %19486 }
 0x304   : > { %v20932_v29 = vpop.eup %19488  ;;  %v1731_v1 = vpop.xlane.xlu0 %1730  ;;  %v1813_v10 = vsel %vm1692_vm3, %v20930_v27, 0.0 }
 0x305   : > { %v1722_v44 = vpop.xlane.xlu1 %1721  ;;  %v1753_v45 = vsub.f32 %v20874_v49, %v1731_v1  ;;  %1814 = vadd.xlane.f32.xlu0 %v1813_v10  ;;  %v1804_v41 = vsel %vm1692_vm3, %v20932_v29, 0.0 }
 0x306   : > { %v1750_v48 = vsub.f32 %v20872_v59, %v1722_v44  ;;  %1805 = vadd.xlane.f32.xlu1 %v1804_v41 }
 0x307   : > { %v1781_v56 = vmul.f32 1.442695, %v1753_v45 }
 0x308   : > { %v1775_v35 = vmul.f32 1.442695, %v1750_v48 }
 0x309   : > { %19494 = vpow2.f32 %v1781_v56 }
 0x30a   : > { %19496 = vpow2.f32 %v1775_v35 }
 0x30b   : > { %v20940_v14 = vpop.eup %19490 }
 0x30c   : > { %v20942_v16 = vpop.eup %19492  ;;  %v1737_v11 = vpop.xlane.xlu0 %1736  ;;  %v1819_v49 = vsel %vm1692_vm3, %v20940_v14, 0.0 }
 0x30d   : > { %v1728_v33 = vpop.xlane.xlu1 %1727  ;;  %v1755_v59 = vsub.f32 %v20882_v31, %v1737_v11  ;;  %1820 = vadd.xlane.f32.xlu0 %v1819_v49  ;;  %v1810_v23 = vsel %vm1692_vm3, %v20942_v16, 0.0 }
 0x30e   : > { %v1752_v8 = vsub.f32 %v20880_v58, %v1728_v33  ;;  %1811 = vadd.xlane.f32.xlu1 %v1810_v23 }
 0x30f   : > { %v1785_v62 = vmul.f32 1.442695, %v1755_v59 }
 0x310   : > { %v1779_v1 = vmul.f32 1.442695, %v1752_v8  ;;  %v21009_v8 = vpack.c.bf16 %v20579_v19, %v20579_v19 }
 0x311   : > { %19498 = vpow2.f32 %v1785_v62 }
 0x312   : > { %19500 = vpow2.f32 %v1779_v1  ;;  %25700 = vst [vmem:[#allocation31_spill] sm:$0xff] %v21009_v8  ;;  %v21016_v1 = vpack.c.bf16 %v20620_v46, %v20620_v46 }
 0x313   : > { %v20950_v44 = vpop.eup %19494 }
 0x314   : > { %v20952_v10 = vpop.eup %19496  ;;  %v1825_v45 = vsel %vm1692_vm3, %v20950_v44, 0.0  ;;  %v1734_v35 = vpop.xlane.xlu1 %1733  ;;  %25701 = vst [vmem:[#allocation32_spill] sm:$0xff] %v21016_v1 }
 0x315   : > { %1826 = vadd.xlane.f32.xlu0 %v1825_v45  ;;  %v1816_v58 = vsel %vm1692_vm3, %v20952_v10, 0.0  ;;  %v1754_v11 = vsub.f32 %v20888_v55, %v1734_v35 }
 0x316   : > { %1817 = vadd.xlane.f32.xlu1 %v1816_v58  ;;  %v21022_v58 = vpack.c.bf16 %v20611_v40, %v20611_v40  ;;  %v1982_v40 = vsel %vm1888_vm2, %v21009_v8, 0 }
 0x317   : > { %v1783_v33 = vmul.f32 1.442695, %v1754_v11  ;;  %v25704_v11 = vmov 0.0  }
 0x318   : > { %25702 = vst [vmem:[#allocation33_spill] sm:$0xff] %v21022_v58 }
 0x319   : > { %19502 = vpow2.f32 %v1783_v33 }
 0x31b   : > { %v20958_v31 = vpop.eup %19498 }
 0x31c   : > { %v20960_v48 = vpop.eup %19500  ;;  %v1831_v41 = vsel %vm1692_vm3, %v20958_v31, 0.0  ;;  %v1740_v59 = vpop.xlane.xlu1 %1739 }
 0x31d   : > { %1832 = vadd.xlane.f32.xlu0 %v1831_v41  ;;  %v1822_v56 = vsel %vm1692_vm3, %v20960_v48, 0.0  ;;  %v1756_v23 = vsub.f32 %v20892_v18, %v1740_v59  ;;  %v21028_v41 = vpack.c.bf16 %v20660_v13, %v20660_v13 }
 0x31e   : > { %1823 = vadd.xlane.f32.xlu1 %v1822_v56 }
 0x31f   : > { %v1787_v45 = vmul.f32 1.442695, %v1756_v23  ;;  %25703 = vst [vmem:[#allocation34_spill] sm:$0xff] %v21028_v41 }
 0x323   : > { %v20983_v49 = vpop.eup %19502 }
 0x324   : > { %v1828_v55 = vsel %vm1692_vm3, %v20983_v49, 0.0 }
 0x32f   : > { %2674 = vrot.lane.b32.xlu1 %v20561_v6, %s20268_s15 }
 0x333   : > { %2624 = vrot.lane.b32.xlu0 %v20555_v63, %s20268_s15 }
 0x337   : > { %2724 = vrot.lane.b32.xlu0 %v20575_v15, %s20268_s15 }
 0x33b   : > { %2722 = vrot.lane.b32.xlu0 %v20625_v52, %s20268_s15 }
 0x33f   : > { %2824 = vrot.lane.b32.xlu0 %v20595_v30, %s20268_s15 }
 0x343   : > { %2822 = vrot.lane.b32.xlu0 %v20613_v42, %s20268_s15 }
 0x347   : > { %2924 = vrot.lane.b32.xlu0 %v20628_v54, %s20268_s15 }
 0x34b   : > { %2922 = vrot.lane.b32.xlu0 %v20653_v7, %s20268_s15 }
 0x34f   : > { %3024 = vrot.lane.b32.xlu0 %v20669_v24, %s20268_s15 }
 0x353   : > { %1829 = vadd.xlane.f32.xlu1 %v1828_v55  ;;  %3022 = vrot.lane.b32.xlu0 %v20694_v43, %s20268_s15 }
 0x357   : > { %3124 = vrot.lane.b32.xlu0 %v20708_v0, %s20268_s15 }
 0x35b   : > { %3122 = vrot.lane.b32.xlu0 %v20730_v22, %s20268_s15 }
 0x35f   : > { %3224 = vrot.lane.b32.xlu0 %v20739_v37, %s20268_s15 }
 0x363   : > { %3222 = vrot.lane.b32.xlu0 %v20759_v5, %s20268_s15 }
 0x364   : > { %2622 = vrot.lane.b32.xlu1 %v20563_v9, %s20268_s15 }
 0x367   : > { %3324 = vrot.lane.b32.xlu0 %v20767_v32, %s20268_s15 }
 0x36b   : > { %3322 = vrot.lane.b32.xlu0 %v20790_v53, %s20268_s15 }
 0x36f   : > { %3614 = vrot.lane.b32.xlu0 %v20787_v20, %s20268_s15 }
 0x372   : > { %v1791_v62 = vpop.xlane.xlu0 %1790 }
 0x373   : > { %19504 = vrcp.f32 %v1791_v62  ;;  %3710 = vrot.lane.b32.xlu0 %v21009_v8, %s20268_s15 }
 0x374   : > { %19506 = vpow2.f32 %v1787_v45 }
 0x377   : > { %3806 = vrot.lane.b32.xlu0 %v21016_v1, %s20268_s15 }
 0x37a   : > { %v1794_v19 = vpop.xlane.xlu1 %1793 }
 0x37b   : > { %19508 = vrcp.f32 %v1794_v19  ;;  %3902 = vrot.lane.b32.xlu0 %v21022_v58, %s20268_s15 }
 0x37d   : > { %v19505_v18 = vpop.eup %19504 }
 0x37e   : > { %v1853_v46 = vmul.f32 %v19505_v18, %v20898_v39  ;;  %v21038_v33 = vpop.eup %19506  ;;  %v21043_v39 = vpack.c.bf16 %v20588_v26, %v20588_v26 }
 0x37f   : > { %3998 = vrot.lane.b32.xlu0 %v21028_v41, %s20268_s15  ;;  %v1834_v23 = vsel %vm1692_vm3, %v21038_v33, 0.0 }
 0x380   : > { %v1869_v56 = vpack.c.bf16 %v1853_v46, %v1853_v46  ;;  %25705 = vst [vmem:[#allocation35_spill] sm:$0xff] %v21043_v39  ;;  %v2028_v45 = vsel %vm1888_vm2, %v21043_v39, 0 }
 0x382   : > { %17585 = vmatmul.mubr.msk.bf16.vlgmr.msra.gmra.mrb[56].mxu0 %vm1692_vm3, %v1869_v56  ;;  %v1797_v35 = vpop.xlane.xlu0 %1796 }
 0x383   : > { %17595 = vmatpush3.bf16.msra.mxu0 %v1982_v40  ;;  %17596 = vmatprep.mubr.msk.bf16.mxu0 %vm20267_vm0, %v25704_v11  ;;  %19510 = vrcp.f32 %v1797_v35  ;;  %v2074_v40 = vsel %vm1888_vm2, %v21016_v1, 0 }
 0x384   : > { %17606 = vmatprep.subr.bf16.mxu0 %v25704_v11 }
 0x385   : > { %v19509_v13 = vpop.eup %19508 }
 0x386   : > { %v1854_v55 = vmul.f32 %v19509_v13, %v20904_v3  ;;  %v1803_v59 = vpop.xlane.xlu0 %1802 }
 0x387   : > { %19512 = vrcp.f32 %v1803_v59  ;;  %v21064_v59 = vpack.c.bf16 %v20631_v57, %v20631_v57 }
 0x388   : > { %1835 = vadd.xlane.f32.xlu1 %v1834_v23  ;;  %v1870_v62 = vpack.c.bf16 %v1854_v55, %v1854_v55 }
 0x389   : > { %25706 = vst [vmem:[#allocation36_spill] sm:$0xff] %v21064_v59  ;;  %v2120_v57 = vsel %vm1888_vm2, %v21064_v59, 0 }
 0x38a   : > { %17591 = vmatmul.mubr.msk.bf16.vlgmr.msra.gmra.mrb[56].mxu1 %vm1692_vm3, %v1870_v62  ;;  %v1809_v26 = vpop.xlane.xlu0 %1808 }
 0x38b   : > { %17601 = vmatpush3.bf16.msra.mxu1 %v2028_v45  ;;  %v1800_v19 = vpop.xlane.xlu1 %1799  ;;  %17602 = vmatprep.mubr.msk.bf16.mxu1 %vm20267_vm0, %v25704_v11 }
 0x38c   : > { %17612 = vmatprep.subr.bf16.mxu1 %v25704_v11  ;;  %19514 = vrcp.f32 %v1800_v19 }
 0x38d   : > { %v19511_v3 = vpop.eup %19510  ;;  %19516 = vrcp.f32 %v1809_v26  ;;  %v2166_v26 = vsel %vm1888_vm2, %v21022_v58, 0 }
 0x38e   : > { %v1855_v18 = vmul.f32 %v19511_v3, %v20910_v34 }
 0x390   : > { %v1871_v46 = vpack.c.bf16 %v1855_v18, %v1855_v18 }
 0x391   : > { %v19513_v56 = vpop.eup %19512 }
 0x392   : > { %17597 = vmatmul.mubr.msk.bf16.vlgmr.msra.gmra.mrb[60].mxu0 %vm1692_vm3, %v1871_v46  ;;  %v1815_v13 = vpop.xlane.xlu0 %1814  ;;  %v1857_v55 = vmul.f32 %v19513_v56, %v20916_v12  ;;  %v21087_v56 = vpack.c.bf16 %v20623_v50, %v20623_v50 }
 0x393   : > { %v1806_v35 = vpop.xlane.xlu1 %1805  ;;  %17607 = vmatpush3.bf16.msra.mxu0 %v2074_v40  ;;  %17608 = vmatprep.mubr.msk.bf16.mxu0 %vm20267_vm0, %v25704_v11 }
 0x394   : > { %19518 = vrcp.f32 %v1806_v35  ;;  %17618 = vmatprep.subr.bf16.mxu0 %v25704_v11  ;;  %v1873_v62 = vpack.c.bf16 %v1857_v55, %v1857_v55  ;;  %25707 = vst [vmem:[#allocation37_spill] sm:$0xff] %v21087_v56  ;;  %v2212_v50 = vsel %vm1888_vm2, %v21087_v56, 0 }
 0x395   : > { %19520 = vrcp.f32 %v1815_v13  ;;  %v2258_v13 = vsel %vm1888_vm2, %v21028_v41, 0 }
 0x396   : > { %v19515_v34 = vpop.eup %19514 }
 0x397   : > { %v1856_v23 = vmul.f32 %v19515_v34, %v20922_v60  ;;  %v19517_v45 = vpop.eup %19516 }
 0x398   : > { %v1859_v3 = vmul.f32 %v19517_v45, %v20920_v47 }
 0x399   : > { %2672 = vrot.lane.b32.xlu1 %v20592_v28, %s20268_s15  ;;  %v1872_v19 = vpack.c.bf16 %v1856_v23, %v1856_v23 }
 0x39a   : > { %17609 = vmatmul.mubr.msk.bf16.vlgmr.msra.gmra.mrb[64].mxu0 %vm1692_vm3, %v1873_v62  ;;  %v1821_v60 = vpop.xlane.xlu0 %1820  ;;  %v1875_v47 = vpack.c.bf16 %v1859_v3, %v1859_v3  ;;  %v21106_v62 = vpack.c.bf16 %v20651_v4, %v20651_v4 }
 0x39b   : > { %v1812_v12 = vpop.xlane.xlu1 %1811  ;;  %17619 = vmatpush3.bf16.msra.mxu0 %v2166_v26  ;;  %17603 = vmatmul.mubr.msk.bf16.vlgmr.msra.gmra.mrb[60].mxu1 %vm1692_vm3, %v1872_v19 }
 0x39c   : > { %19522 = vrcp.f32 %v1812_v12  ;;  %17613 = vmatpush3.bf16.msra.mxu1 %v2120_v57  ;;  %17614 = vmatprep.mubr.msk.bf16.mxu1 %vm20267_vm0, %v25704_v11  ;;  %25708 = vst [vmem:[#allocation38_spill] sm:$0xff] %v21106_v62  ;;  %v2350_v4 = vsel %vm1888_vm2, %v21106_v62, 0 }
 0x39d   : > { %2774 = vrot.lane.b32.xlu1 %v20607_v38, %s20268_s15  ;;  %17620 = vmatprep.mubr.msk.bf16.mxu0 %vm20267_vm0, %v25704_v11  ;;  %19524 = vrcp.f32 %v1821_v60 }
 0x39e   : > { %v19519_v18 = vpop.eup %19518  ;;  %17624 = vmatprep.subr.bf16.mxu1 %v25704_v11  ;;  %17630 = vmatprep.subr.bf16.mxu0 %v25704_v11 }
 0x39f   : > { %v1858_v46 = vmul.f32 %v19519_v18, %v20932_v29  ;;  %v19521_v35 = vpop.eup %19520  ;;  %v21132_v18 = vpack.c.bf16 %v20699_v51, %v20699_v51 }
 0x3a0   : > { %v1861_v34 = vmul.f32 %v19521_v35, %v20930_v27  ;;  %v21113_v27 = vpack.c.bf16 %v20672_v25, %v20672_v25 }
 0x3a1   : > { %2772 = vrot.lane.b32.xlu1 %v20665_v21, %s20268_s15  ;;  %v1874_v40 = vpack.c.bf16 %v1858_v46, %v1858_v46  ;;  %25710 = vst [vmem:[#allocation40_spill] sm:$0xff] %v21132_v18  ;;  %v2442_v51 = vsel %vm1888_vm2, %v21132_v18, 0 }
 0x3a2   : > { %17621 = vmatmul.mubr.msk.bf16.vlgmr.msra.gmra.mrb[68].mxu0 %vm1692_vm3, %v1875_v47  ;;  %v1827_v29 = vpop.xlane.xlu0 %1826  ;;  %25709 = vst [vmem:[#allocation39_spill] sm:$0xff] %v21113_v27  ;;  %v1877_v19 = vpack.c.bf16 %v1861_v34, %v1861_v34  ;;  %v2304_v25 = vsel %vm1888_vm2, %v21113_v27, 0  ;;  %v25712_v47 = vld [vmem:[#allocation17_spill] sm:$0xff] }
 0x3a3   : > { %v1818_v55 = vpop.xlane.xlu1 %1817  ;;  %17631 = vmatpush3.bf16.msra.mxu0 %v2258_v13  ;;  %17615 = vmatmul.mubr.msk.bf16.vlgmr.msra.gmra.mrb[64].mxu1 %vm1692_vm3, %v1874_v40 }
 0x3a4   : > { %19526 = vrcp.f32 %v1818_v55  ;;  %17625 = vmatpush3.bf16.msra.mxu1 %v2212_v50  ;;  %17626 = vmatprep.mubr.msk.bf16.mxu1 %vm20267_vm0, %v25704_v11 }
 0x3a5   : > { %2874 = vrot.lane.b32.xlu1 %v20646_v2, %s20268_s15  ;;  %17632 = vmatprep.mubr.msk.bf16.mxu0 %vm20267_vm0, %v25704_v11  ;;  %19528 = vrcp.f32 %v1827_v29  ;;  %v25714_v29 = vld [vmem:[#allocation13_spill] sm:$0xff] }
 0x3a6   : > { %v19523_v23 = vpop.eup %19522  ;;  %17636 = vmatprep.subr.bf16.mxu1 %v25704_v11  ;;  %17642 = vmatprep.subr.bf16.mxu0 %v25704_v11  ;;  %v21158_v34 = vpack.c.bf16 %v25714_v29, %v25714_v29  ;;  %v25724_v29 = vld [vmem:[#allocation29_spill] sm:$0xff] }
 0x3a7   : > { %v1860_v45 = vmul.f32 %v19523_v23, %v20942_v16  ;;  %v19525_v12 = vpop.eup %19524 }
 0x3a8   : > { %v1863_v60 = vmul.f32 %v19525_v12, %v20940_v14  ;;  %v21139_v14 = vpack.c.bf16 %v20663_v17, %v20663_v17  ;;  %v25713_v17 = vld [vmem:[#allocation16_spill] sm:$0xff] }
 0x3a9   : > { %2872 = vrot.lane.b32.xlu1 %v20704_v61, %s20268_s15  ;;  %v1876_v26 = vpack.c.bf16 %v1860_v45, %v1860_v45  ;;  %v25715_v45 = vld [vmem:[#allocation15_spill] sm:$0xff] }
 0x3aa   : > { %17633 = vmatmul.mubr.msk.bf16.vlgmr.msra.gmra.mrb[72].mxu0 %vm1692_vm3, %v1877_v19  ;;  %v1833_v16 = vpop.xlane.xlu0 %1832  ;;  %25711 = vst [vmem:[#allocation41_spill] sm:$0xff] %v21139_v14  ;;  %v1879_v40 = vpack.c.bf16 %v1863_v60, %v1863_v60  ;;  %v25717_v19 = vld [vmem:[#allocation21_spill] sm:$0xff] }
 0x3ab   : > { %v1824_v57 = vpop.xlane.xlu1 %1823  ;;  %17643 = vmatpush3.bf16.msra.mxu0 %v2350_v4  ;;  %17627 = vmatmul.mubr.msk.bf16.vlgmr.msra.gmra.mrb[68].mxu1 %vm1692_vm3, %v1876_v26 }
 0x3ac   : > { %19530 = vrcp.f32 %v1824_v57  ;;  %17637 = vmatpush3.bf16.msra.mxu1 %v2304_v25  ;;  %17638 = vmatprep.mubr.msk.bf16.mxu1 %vm20267_vm0, %v25704_v11  ;;  %v2534_v57 = vsel %vm1888_vm2, %v21158_v34, 0  ;;  %v25718_v25 = vld [vmem:[#allocation19_spill] sm:$0xff] }
 0x3ad   : > { %2974 = vrot.lane.b32.xlu1 %v20687_v36, %s20268_s15  ;;  %17644 = vmatprep.mubr.msk.bf16.mxu0 %vm20267_vm0, %v25704_v11  ;;  %19532 = vrcp.f32 %v1833_v16 }
 0x3ae   : > { %v19527_v3 = vpop.eup %19526  ;;  %17648 = vmatprep.subr.bf16.mxu1 %v25704_v11  ;;  %17654 = vmatprep.subr.bf16.mxu0 %v25704_v11  ;;  %v2625_v60 = vpop.permute.xlu0 %2624 }
 0x3af   : > { %v1862_v46 = vmul.f32 %v19527_v3, %v20952_v10  ;;  %v19529_v13 = vpop.eup %19528  ;;  %v2396_v10 = vsel %vm1888_vm2, %v21139_v14, 0  ;;  %v25719_v3 = vld [vmem:[#allocation26_spill] sm:$0xff] }
 0x3b0   : > { %v1865_v55 = vmul.f32 %v19529_v13, %v20950_v44  ;;  %v21165_v44 = vpack.c.bf16 %v25715_v45, %v25715_v45  ;;  %v25721_v13 = vld [vmem:[#allocation28_spill] sm:$0xff]  ;;  %v21203_v45 = vpop.permute.xlu1 %2674 }
 0x3b1   : > { %2972 = vrot.lane.b32.xlu1 %v25712_v47, %s20268_s15  ;;  %v1878_v35 = vpack.c.bf16 %v1862_v46, %v1862_v46 }
 0x3b2   : > { %17645 = vmatmul.mubr.msk.bf16.vlgmr.msra.gmra.mrb[76].mxu0 %vm1692_vm3, %v1879_v40  ;;  %25716 = vst [vmem:[#allocation17_spill] sm:$0xff] %v21165_v44  ;;  %v1881_v26 = vpack.c.bf16 %v1865_v55, %v1865_v55  ;;  %v2630_v40 = vsel %vm955_vm1, %v2625_v60, 0  ;;  %v25723_v55 = vld [vmem:[#allocation30_spill] sm:$0xff] }
 0x3b3   : > { %17655 = vmatpush3.bf16.msra.mxu0 %v2442_v51  ;;  %17639 = vmatmul.mubr.msk.bf16.vlgmr.msra.gmra.mrb[72].mxu1 %vm1692_vm3, %v1878_v35  ;;  %v2725_v35 = vpop.permute.xlu0 %2724 }
 0x3b4   : > { %17649 = vmatpush3.bf16.msra.mxu1 %v2396_v10  ;;  %17650 = vmatprep.mubr.msk.bf16.mxu1 %vm20267_vm0, %v25704_v11  ;;  %v25722_v10 = vld [vmem:[#allocation27_spill] sm:$0xff] }
 0x3b5   : > { %3074 = vrot.lane.b32.xlu1 %v25713_v17, %s20268_s15  ;;  %17656 = vmatprep.mubr.msk.bf16.mxu0 %vm20267_vm0, %v25704_v11 }
 0x3b6   : > { %v19531_v50 = vpop.eup %19530  ;;  %17660 = vmatprep.subr.bf16.mxu1 %v25704_v11  ;;  %17666 = vmatprep.subr.bf16.mxu0 %v25704_v11 }
 0x3b7   : > { %v1864_v23 = vmul.f32 %v19531_v50, %v20960_v48  ;;  %v19533_v4 = vpop.eup %19532  ;;  %v2488_v48 = vsel %vm1888_vm2, %v21165_v44, 0  ;;  %v2723_v51 = vpop.permute.xlu0 %2722 }
 0x3b8   : > { %v1867_v16 = vmul.f32 %v19533_v4, %v20958_v31  ;;  %v25720_v31 = vld [vmem:[#allocation23_spill] sm:$0xff] }
 0x3b9   : > { %3072 = vrot.lane.b32.xlu1 %v25717_v19, %s20268_s15  ;;  %v1880_v12 = vpack.c.bf16 %v1864_v23, %v1864_v23 }
 0x3ba   : > { %17657 = vmatmul.mubr.msk.bf16.vlgmr.msra.gmra.mrb[80].mxu0 %vm1692_vm3, %v1881_v26  ;;  %v1883_v46 = vpack.c.bf16 %v1867_v16, %v1867_v16 }
 0x3bb   : > { %17667 = vmatpush3.bf16.msra.mxu0 %v2534_v57  ;;  %17651 = vmatmul.mubr.msk.bf16.vlgmr.msra.gmra.mrb[76].mxu1 %vm1692_vm3, %v1880_v12  ;;  %v2825_v50 = vpop.permute.xlu0 %2824 }
 0x3bc   : > { %17661 = vmatpush3.bf16.msra.mxu1 %v2488_v48  ;;  %17668 = vmatprep.mubr.msk.bf16.mxu0 %vm20267_vm0, %v25704_v11  ;;  %v2730_v48 = vsel %vm955_vm1, %v2725_v35, 0 }
 0x3bd   : > { %3174 = vrot.lane.b32.xlu1 %v25718_v25, %s20268_s15  ;;  %17678 = vmatprep.subr.bf16.mxu0 %v25704_v11 }
 0x3be   : > { %17662 = vmatprep.mubr.msk.bf16.mxu1 %vm20267_vm0, %v25704_v11  ;;  %17672 = vmatprep.subr.bf16.mxu1 %v25704_v11 }
 0x3bf   : > { %v2823_v23 = vpop.permute.xlu0 %2822 }
 0x3c1   : > { %3172 = vrot.lane.b32.xlu1 %v25719_v3, %s20268_s15 }
 0x3c2   : > { %17669 = vmatmul.mubr.msk.bf16.vlgmr.msra.gmra.mrb[84].mxu0 %vm1692_vm3, %v1883_v46  ;;  %v25725_v46 = vld [vmem:[#allocation14_spill] sm:$0xff] }
 0x3c3   : > { %17680 = vmatprep.mubr.msk.bf16.mxu0 %vm20267_vm0, %v25704_v11  ;;  %v2925_v26 = vpop.permute.xlu0 %2924 }
 0x3c4   : > { %17679 = vmatpush3.bf16.xpose.msra.mxu0 %v2630_v40  ;;  %v21220_v40 = vpack.c.bf16 %v25725_v46, %v25725_v46 }
 0x3c5   : > { %3274 = vrot.lane.b32.xlu1 %v25720_v31, %s20268_s15  ;;  %17690 = vmatprep.subr.bf16.mxu0 %v25704_v11 }
 0x3c7   : > { %v2923_v4 = vpop.permute.xlu0 %2922 }
 0x3c9   : > { %3272 = vrot.lane.b32.xlu1 %v25721_v13, %s20268_s15 }
 0x3cb   : > { %v3025_v16 = vpop.permute.xlu0 %3024 }
 0x3cc   : > { %v3030_v46 = vsel %vm955_vm1, %v3025_v16, 0 }
 0x3cd   : > { %3374 = vrot.lane.b32.xlu1 %v25722_v10, %s20268_s15 }
 0x3d1   : > { %3372 = vrot.lane.b32.xlu1 %v25723_v55, %s20268_s15 }
 0x3d5   : > { %3662 = vrot.lane.b32.xlu1 %v25724_v29, %s20268_s15 }
 0x3d9   : > { %3758 = vrot.lane.b32.xlu1 %v21043_v39, %s20268_s15 }
 0x3dd   : > { %3854 = vrot.lane.b32.xlu1 %v21064_v59, %s20268_s15 }
 0x3e0   : > { %v1830_v12 = vpop.xlane.xlu1 %1829 }
 0x3e1   : > { %19534 = vrcp.f32 %v1830_v12  ;;  %3950 = vrot.lane.b32.xlu1 %v21087_v56, %s20268_s15  ;;  %v2830_v12 = vsel %vm955_vm1, %v2825_v50, 0 }
 0x3e4   : > { %v2623_v57 = vpop.permute.xlu1 %2622 }
 0x3e5   : > { %4046 = vrot.lane.b32.xlu1 %v21113_v27, %s20268_s15  ;;  %17681 = vmatmul.mubr.msk.bf16.vlgmr.msra.gmra.mrb[88].mxu0 %vm955_vm1, %v2623_v57 }
 0x3e6   : > { %17691 = vmatpush3.bf16.xpose.msra.mxu0 %v2730_v48  ;;  %17692 = vmatprep.mubr.msk.bf16.mxu0 %vm20267_vm0, %v25704_v11  ;;  %v3023_v48 = vpop.permute.xlu0 %3022 }
 0x3e7   : > { %17702 = vmatprep.subr.bf16.mxu0 %v25704_v11 }
 0x3e9   : > { %4094 = vrot.lane.b32.xlu1 %v21106_v62, %s20268_s15 }
 0x3ea   : > { %v3125_v50 = vpop.permute.xlu0 %3124 }
 0x3eb   : > { %v19535_v60 = vpop.eup %19534 }
 0x3ec   : > { %v1866_v35 = vmul.f32 %v19535_v60, %v20983_v49  ;;  %v2580_v49 = vsel %vm1888_vm2, %v21220_v40, 0 }
 0x3ed   : > { %4142 = vrot.lane.b32.xlu1 %v21139_v14, %s20268_s15  ;;  %17693 = vmatmul.mubr.msk.bf16.vlgmr.msra.gmra.mrb[92].mxu0 %vm955_vm1, %v2723_v51  ;;  %v2930_v51 = vsel %vm955_vm1, %v2925_v26, 0 }
 0x3ee   : > { %17703 = vmatpush3.bf16.xpose.msra.mxu0 %v2830_v12  ;;  %v1882_v57 = vpack.c.bf16 %v1866_v35, %v1866_v35  ;;  %17704 = vmatprep.mubr.msk.bf16.mxu0 %vm20267_vm0, %v25704_v11  ;;  %v3123_v60 = vpop.permute.xlu0 %3122 }
 0x3ef   : > { %17714 = vmatprep.subr.bf16.mxu0 %v25704_v11 }
 0x3f0   : > { %17663 = vmatmul.mubr.msk.bf16.vlgmr.msra.gmra.mrb[80].mxu1 %vm1692_vm3, %v1882_v57 }
 0x3f1   : > { %17673 = vmatpush3.bf16.msra.mxu1 %v2580_v49  ;;  %17674 = vmatprep.mubr.msk.bf16.mxu1 %vm20267_vm0, %v25704_v11 }
 0x3f2   : > { %17684 = vmatprep.subr.bf16.mxu1 %v25704_v11  ;;  %v3225_v26 = vpop.permute.xlu0 %3224 }
 0x3f5   : > { %17705 = vmatmul.mubr.msk.bf16.vlgmr.msra.gmra.mrb[96].mxu0 %vm955_vm1, %v2823_v23  ;;  %v3130_v23 = vsel %vm955_vm1, %v3125_v50, 0 }
 0x3f6   : > { %17715 = vmatpush3.bf16.xpose.msra.mxu0 %v2930_v51  ;;  %17716 = vmatprep.mubr.msk.bf16.mxu0 %vm20267_vm0, %v25704_v11  ;;  %v3223_v16 = vpop.permute.xlu0 %3222 }
 0x3f7   : > { %17726 = vmatprep.subr.bf16.mxu0 %v25704_v11 }
 0x3fa   : > { %v3325_v35 = vpop.permute.xlu0 %3324 }
 0x3fb   : > { %v3330_v57 = vsel %vm955_vm1, %v3325_v35, 0 }
 0x3fd   : > { %17717 = vmatmul.mubr.msk.bf16.vlgmr.msra.gmra.mrb[100].mxu0 %vm955_vm1, %v2923_v4  ;;  %v3230_v4 = vsel %vm955_vm1, %v3225_v26, 0 }
 0x3fe   : > { %17727 = vmatpush3.bf16.xpose.msra.mxu0 %v3030_v46  ;;  %17728 = vmatprep.mubr.msk.bf16.mxu0 %vm20267_vm0, %v25704_v11  ;;  %v3323_v12 = vpop.permute.xlu0 %3322 }
 0x3ff   : > { %17738 = vmatprep.subr.bf16.mxu0 %v25704_v11 }
 0x402   : > { %v3615_v51 = vpop.permute.xlu0 %3614 }
 0x403   : > { %v3620_v50 = vsel %vm1888_vm2, %v3615_v51, 0 }
 0x405   : > { %17729 = vmatmul.mubr.msk.bf16.vlgmr.msra.gmra.mrb[104].mxu0 %vm955_vm1, %v3023_v48 }
 0x406   : > { %17739 = vmatpush3.bf16.xpose.msra.mxu0 %v3130_v23  ;;  %17740 = vmatprep.mubr.msk.bf16.mxu0 %vm20267_vm0, %v25704_v11  ;;  %v21403_v53 = vpop.permute.xlu0 %3710 }
 0x407   : > { %17750 = vmatprep.subr.bf16.mxu0 %v25704_v11 }
 0x40d   : > { %17741 = vmatmul.mubr.msk.bf16.vlgmr.msra.gmra.mrb[108].mxu0 %vm955_vm1, %v3123_v60 }
 0x40e   : > { %17751 = vmatpush3.bf16.xpose.msra.mxu0 %v3230_v4  ;;  %17752 = vmatprep.mubr.msk.bf16.mxu0 %vm20267_vm0, %v25704_v11  ;;  %v2680_v4 = vsel %vm955_vm1, %v21203_v45, 0 }
 0x40f   : > { %17762 = vmatprep.subr.bf16.mxu0 %v25704_v11 }
 0x415   : > { %17753 = vmatmul.mubr.msk.bf16.vlgmr.msra.gmra.mrb[112].mxu0 %vm955_vm1, %v3223_v16  ;;  %v1836_v48 = vpop.xlane.xlu1 %1835 }
 0x416   : > { %17763 = vmatpush3.bf16.xpose.msra.mxu0 %v3330_v57  ;;  %19536 = vrcp.f32 %v1836_v48  ;;  %17764 = vmatprep.mubr.msk.bf16.mxu0 %vm20267_vm0, %v25704_v11 }
 0x417   : > { %17774 = vmatprep.subr.bf16.mxu0 %v25704_v11 }
 0x419   : > { %v2673_v49 = vpop.permute.xlu1 %2672 }
 0x41d   : > { %17765 = vmatmul.mubr.msk.bf16.vlgmr.msra.gmra.mrb[116].mxu0 %vm955_vm1, %v3323_v12  ;;  %v2775_v60 = vpop.permute.xlu1 %2774 }
 0x41e   : > { %17775 = vmatpush3.bf16.msra.mxu0 %v3620_v50  ;;  %17776 = vmatprep.mubr.msk.bf16.mxu0 %vm20267_vm0, %v25704_v11  ;;  %v2780_v57 = vsel %vm955_vm1, %v2775_v60, 0 }
 0x41f   : > { %17786 = vmatprep.subr.bf16.mxu0 %v25704_v11 }
 0x420   : > { %v19537_v46 = vpop.eup %19536 }
 0x421   : > { %v2773_v26 = vpop.permute.xlu1 %2772  ;;  %v1868_v23 = vmul.f32 %v19537_v46, %v21038_v33 }
 0x423   : > { %v1884_v16 = vpack.c.bf16 %v1868_v23, %v1868_v23 }
 0x425   : > { %17675 = vmatmul.mubr.msk.bf16.vlgmr.msra.gmra.mrb[84].mxu1 %vm1692_vm3, %v1884_v16  ;;  %v2875_v35 = vpop.permute.xlu1 %2874 }
 0x426   : > { %17685 = vmatpush3.bf16.xpose.msra.mxu1 %v2680_v4  ;;  %17686 = vmatprep.mubr.msk.bf16.mxu1 %vm20267_vm0, %v25704_v11  ;;  %v2880_v45 = vsel %vm955_vm1, %v2875_v35, 0 }
 0x427   : > { %17696 = vmatprep.subr.bf16.mxu1 %v25704_v11 }
 0x429   : > { %v2873_v12 = vpop.permute.xlu1 %2872 }
 0x42d   : > { %17687 = vmatmul.mubr.msk.bf16.vlgmr.msra.gmra.mrb[88].mxu1 %vm955_vm1, %v2673_v49  ;;  %v2975_v48 = vpop.permute.xlu1 %2974 }
 0x42e   : > { %17697 = vmatpush3.bf16.xpose.msra.mxu1 %v2780_v57  ;;  %17698 = vmatprep.mubr.msk.bf16.mxu1 %vm20267_vm0, %v25704_v11  ;;  %v2980_v50 = vsel %vm955_vm1, %v2975_v48, 0 }
 0x42f   : > { %17708 = vmatprep.subr.bf16.mxu1 %v25704_v11 }
 0x431   : > { %v2973_v33 = vpop.permute.xlu1 %2972 }
 0x435   : > { %17699 = vmatmul.mubr.msk.bf16.vlgmr.msra.gmra.mrb[92].mxu1 %vm955_vm1, %v2773_v26  ;;  %v3075_v51 = vpop.permute.xlu1 %3074 }
 0x436   : > { %17709 = vmatpush3.bf16.xpose.msra.mxu1 %v2880_v45  ;;  %17710 = vmatprep.mubr.msk.bf16.mxu1 %vm20267_vm0, %v25704_v11  ;;  %v3080_v26 = vsel %vm955_vm1, %v3075_v51, 0 }
 0x437   : > { %17720 = vmatprep.subr.bf16.mxu1 %v25704_v11 }
 0x439   : > { %v3073_v49 = vpop.permute.xlu1 %3072 }
 0x43d   : > { %17711 = vmatmul.mubr.msk.bf16.vlgmr.msra.gmra.mrb[96].mxu1 %vm955_vm1, %v2873_v12  ;;  %v3175_v60 = vpop.permute.xlu1 %3174 }
 0x43e   : > { %17721 = vmatpush3.bf16.xpose.msra.mxu1 %v2980_v50  ;;  %17722 = vmatprep.mubr.msk.bf16.mxu1 %vm20267_vm0, %v25704_v11  ;;  %v3180_v16 = vsel %vm955_vm1, %v3175_v60, 0 }
 0x43f   : > { %17732 = vmatprep.subr.bf16.mxu1 %v25704_v11 }
 0x441   : > { %v3173_v46 = vpop.permute.xlu1 %3172 }
 0x445   : > { %17723 = vmatmul.mubr.msk.bf16.vlgmr.msra.gmra.mrb[100].mxu1 %vm955_vm1, %v2973_v33  ;;  %v3275_v23 = vpop.permute.xlu1 %3274 }
 0x446   : > { %17733 = vmatpush3.bf16.xpose.msra.mxu1 %v3080_v26  ;;  %17734 = vmatprep.mubr.msk.bf16.mxu1 %vm20267_vm0, %v25704_v11  ;;  %v3280_v35 = vsel %vm955_vm1, %v3275_v23, 0 }
 0x447   : > { %17744 = vmatprep.subr.bf16.mxu1 %v25704_v11 }
 0x449   : > { %v3273_v4 = vpop.permute.xlu1 %3272 }
 0x44d   : > { %17735 = vmatmul.mubr.msk.bf16.vlgmr.msra.gmra.mrb[104].mxu1 %vm955_vm1, %v3073_v49  ;;  %v3375_v57 = vpop.permute.xlu1 %3374 }
 0x44e   : > { %17745 = vmatpush3.bf16.xpose.msra.mxu1 %v3180_v16  ;;  %17746 = vmatprep.mubr.msk.bf16.mxu1 %vm20267_vm0, %v25704_v11  ;;  %v3380_v49 = vsel %vm955_vm1, %v3375_v57, 0 }
 0x44f   : > { %17756 = vmatprep.subr.bf16.mxu1 %v25704_v11 }
 0x451   : > { %v3373_v51 = vpop.permute.xlu1 %3372 }
 0x455   : > { %17747 = vmatmul.mubr.msk.bf16.vlgmr.msra.gmra.mrb[108].mxu1 %vm955_vm1, %v3173_v46  ;;  %v21300_v12 = vpop.f32.mrb[56].mxu0  ;;  %v3663_v23 = vpop.permute.xlu1 %3662 }
 0x456   : > { %25726 = vst [vmem:[#allocation16_spill] sm:$0xff] %v21300_v12  ;;  %17757 = vmatpush3.bf16.xpose.msra.mxu1 %v3280_v35  ;;  %v17586_v48 = vpop.f32.mrb[57].mxu0  ;;  %17758 = vmatprep.mubr.msk.bf16.mxu1 %vm20267_vm0, %v25704_v11  ;;  %v3668_v16 = vsel %vm1888_vm2, %v3663_v23, 0 }
 0x457   : > { %v1929_v33 = vpop.f32.mrb[58].mxu0  ;;  %17768 = vmatprep.subr.bf16.mxu1 %v25704_v11 }
 0x458   : > { %v17587_v45 = vpop.f32.mrb[59].mxu0 }
 0x45d   : > { %17759 = vmatmul.mubr.msk.bf16.vlgmr.msra.gmra.mrb[112].mxu1 %vm955_vm1, %v3273_v4  ;;  %v21307_v50 = vpop.f32.mrb[56].mxu1 }
 0x45e   : > { %25727 = vst [vmem:[#allocation13_spill] sm:$0xff] %v21307_v50  ;;  %17769 = vmatpush3.bf16.xpose.msra.mxu1 %v3380_v49  ;;  %v17592_v60 = vpop.f32.mrb[57].mxu1  ;;  %17770 = vmatprep.mubr.msk.bf16.mxu1 %vm20267_vm0, %v25704_v11 }
 0x45f   : > { %v1975_v46 = vpop.f32.mrb[58].mxu1  ;;  %17780 = vmatprep.subr.bf16.mxu1 %v25704_v11 }
 0x460   : > { %v17593_v26 = vpop.f32.mrb[59].mxu1 }
 0x465   : > { %17771 = vmatmul.mubr.msk.bf16.vlgmr.msra.gmra.mrb[116].mxu1 %vm955_vm1, %v3373_v51  ;;  %v21314_v35 = vpop.f32.mrb[60].mxu0 }
 0x466   : > { %17781 = vmatpush3.bf16.msra.mxu1 %v3668_v16  ;;  %25728 = vst [vmem:[#allocation15_spill] sm:$0xff] %v21314_v35  ;;  %17782 = vmatprep.mubr.msk.bf16.mxu1 %vm20267_vm0, %v25704_v11  ;;  %v17598_v4 = vpop.f32.mrb[61].mxu0 }
 0x467   : > { %17792 = vmatprep.subr.bf16.mxu1 %v25704_v11  ;;  %v2021_v57 = vpop.f32.mrb[62].mxu0 }
 0x468   : > { %v17599_v48 = vpop.f32.mrb[63].mxu0 }
 0x46d   : > { %v21319_v33 = vpop.f32.mrb[64].mxu0 }
 0x46e   : > { %25729 = vst [vmem:[#allocation21_spill] sm:$0xff] %v21319_v33  ;;  %v21321_v45 = vpop.f32.mrb[60].mxu1  ;;  %v17610_v49 = vpop.f32.mrb[65].mxu0 }
 0x46f   : > { %25730 = vst [vmem:[#allocation19_spill] sm:$0xff] %v21321_v45  ;;  %v17604_v60 = vpop.f32.mrb[61].mxu1  ;;  %v2113_v46 = vpop.f32.mrb[66].mxu0 }
 0x470   : > { %v2067_v26 = vpop.f32.mrb[62].mxu1  ;;  %v17611_v51 = vpop.f32.mrb[67].mxu0 }
 0x471   : > { %v17605_v23 = vpop.f32.mrb[63].mxu1 }
 0x475   : > { %v21323_v16 = vpop.f32.mrb[68].mxu0 }
 0x476   : > { %25731 = vst [vmem:[#allocation26_spill] sm:$0xff] %v21323_v16  ;;  %v21325_v35 = vpop.f32.mrb[64].mxu1  ;;  %v17622_v12 = vpop.f32.mrb[69].mxu0 }
 0x477   : > { %25732 = vst [vmem:[#allocation23_spill] sm:$0xff] %v21325_v35  ;;  %v17616_v4 = vpop.f32.mrb[65].mxu1  ;;  %v2205_v50 = vpop.f32.mrb[70].mxu0 }
 0x478   : > { %v2159_v41 = vpop.f32.mrb[66].mxu1  ;;  %v17623_v57 = vpop.f32.mrb[71].mxu0 }
 0x479   : > { %v17617_v48 = vpop.f32.mrb[67].mxu1 }
 0x47d   : > { %v21327_v58 = vpop.f32.mrb[72].mxu0 }
 0x47e   : > { %25733 = vst [vmem:[#allocation28_spill] sm:$0xff] %v21327_v58  ;;  %v21329_v33 = vpop.f32.mrb[68].mxu1  ;;  %v17634_v49 = vpop.f32.mrb[73].mxu0 }
 0x47f   : > { %25734 = vst [vmem:[#allocation27_spill] sm:$0xff] %v21329_v33  ;;  %v17628_v60 = vpop.f32.mrb[69].mxu1  ;;  %v2297_v46 = vpop.f32.mrb[74].mxu0 }
 0x480   : > { %v2251_v26 = vpop.f32.mrb[70].mxu1  ;;  %v17635_v51 = vpop.f32.mrb[75].mxu0 }
 0x481   : > { %v17629_v23 = vpop.f32.mrb[71].mxu1 }
 0x485   : > { %v21331_v45 = vpop.f32.mrb[76].mxu0 }
 0x486   : > { %25735 = vst [vmem:[#allocation30_spill] sm:$0xff] %v21331_v45  ;;  %v21333_v16 = vpop.f32.mrb[72].mxu1  ;;  %v17646_v12 = vpop.f32.mrb[77].mxu0 }
 0x487   : > { %25736 = vst [vmem:[#allocation14_spill] sm:$0xff] %v21333_v16  ;;  %v17640_v4 = vpop.f32.mrb[73].mxu1  ;;  %v2389_v50 = vpop.f32.mrb[78].mxu0 }
 0x488   : > { %v2343_v41 = vpop.f32.mrb[74].mxu1  ;;  %v17647_v57 = vpop.f32.mrb[79].mxu0 }
 0x489   : > { %v17641_v48 = vpop.f32.mrb[75].mxu1 }
 0x48d   : > { %v21335_v35 = vpop.f32.mrb[80].mxu0 }
 0x48e   : > { %25737 = vst [vmem:[#allocation42_spill] sm:$0xff] %v21335_v35  ;;  %v21337_v58 = vpop.f32.mrb[76].mxu1  ;;  %v17658_v49 = vpop.f32.mrb[81].mxu0 }
 0x48f   : > { %25738 = vst [vmem:[#allocation43_spill] sm:$0xff] %v21337_v58  ;;  %v17652_v60 = vpop.f32.mrb[77].mxu1  ;;  %v2481_v46 = vpop.f32.mrb[82].mxu0 }
 0x490   : > { %v2435_v26 = vpop.f32.mrb[78].mxu1  ;;  %v17659_v51 = vpop.f32.mrb[83].mxu0 }
 0x491   : > { %v17653_v23 = vpop.f32.mrb[79].mxu1 }
 0x495   : > { %v21339_v33 = vpop.f32.mrb[84].mxu0 }
 0x496   : > { %25739 = vst [vmem:[#allocation44_spill] sm:$0xff] %v21339_v33  ;;  %v17670_v45 = vpop.f32.mrb[85].mxu0 }
 0x497   : > { %v2573_v16 = vpop.f32.mrb[86].mxu0 }
 0x498   : > { %v17671_v12 = vpop.f32.mrb[87].mxu0 }
 0x4b8   : > { %v21341_v4 = vpop.f32.mrb[88].mxu0 }
 0x4b9   : > { %v17682_v50 = vpop.f32.mrb[89].mxu0  ;;  %v3422_v41 = vsel %vm1692_vm3, %v21341_v4, -inf }
 0x4ba   : > { %3423 = vmax.xlane.f32.xlu0 %v3422_v41  ;;  %v2669_v57 = vpop.f32.mrb[90].mxu0 }
 0x4bb   : > { %v17683_v48 = vpop.f32.mrb[91].mxu0 }
 0x4c0   : > { %v21345_v49 = vpop.f32.mrb[92].mxu0 }
 0x4c1   : > { %v17694_v60 = vpop.f32.mrb[93].mxu0  ;;  %v3428_v46 = vsel %vm1692_vm3, %v21345_v49, -inf }
 0x4c2   : > { %3429 = vmax.xlane.f32.xlu0 %v3428_v46  ;;  %v2769_v26 = vpop.f32.mrb[94].mxu0 }
 0x4c3   : > { %v21349_v45 = vpop.f32.mrb[80].mxu1  ;;  %v17695_v16 = vpop.f32.mrb[95].mxu0 }
 0x4c4   : > { %25740 = vst [vmem:[#allocation45_spill] sm:$0xff] %v21349_v45  ;;  %v17664_v51 = vpop.f32.mrb[81].mxu1 }
 0x4c5   : > { %v2527_v23 = vpop.f32.mrb[82].mxu1 }
 0x4c6   : > { %v17665_v12 = vpop.f32.mrb[83].mxu1 }
 0x4c8   : > { %v21351_v50 = vpop.f32.mrb[96].mxu0 }
 0x4c9   : > { %v17706_v33 = vpop.f32.mrb[97].mxu0 }
 0x4ca   : > { %v2869_v41 = vpop.f32.mrb[98].mxu0 }
 0x4cb   : > { %v17707_v57 = vpop.f32.mrb[99].mxu0 }
 0x4d0   : > { %v21353_v48 = vpop.f32.mrb[100].mxu0 }
 0x4d1   : > { %v17718_v35 = vpop.f32.mrb[101].mxu0 }
 0x4d2   : > { %v2969_v60 = vpop.f32.mrb[102].mxu0 }
 0x4d3   : > { %v17719_v58 = vpop.f32.mrb[103].mxu0 }
 0x4d8   : > { %v21355_v1 = vpop.f32.mrb[104].mxu0 }
 0x4d9   : > { %v17730_v46 = vpop.f32.mrb[105].mxu0 }
 0x4da   : > { %v3069_v26 = vpop.f32.mrb[106].mxu0 }
 0x4db   : > { %v17731_v14 = vpop.f32.mrb[107].mxu0 }
 0x4e0   : > { %v21357_v45 = vpop.f32.mrb[108].mxu0 }
 0x4e1   : > { %v17742_v16 = vpop.f32.mrb[109].mxu0 }
 0x4e2   : > { %v3169_v51 = vpop.f32.mrb[110].mxu0 }
 0x4e3   : > { %v17743_v23 = vpop.f32.mrb[111].mxu0 }
 0x4e8   : > { %v21359_v12 = vpop.f32.mrb[112].mxu0 }
 0x4e9   : > { %v17754_v33 = vpop.f32.mrb[113].mxu0 }
 0x4ea   : > { %v3269_v41 = vpop.f32.mrb[114].mxu0 }
 0x4eb   : > { %v17755_v57 = vpop.f32.mrb[115].mxu0 }
 0x4f0   : > { %v21361_v8 = vpop.f32.mrb[116].mxu0 }
 0x4f1   : > { %v17766_v35 = vpop.f32.mrb[117].mxu0 }
 0x4f2   : > { %v3369_v60 = vpop.f32.mrb[118].mxu0 }
 0x4f3   : > { %v17767_v58 = vpop.f32.mrb[119].mxu0 }
 0x4f8   : > { %v21363_v62 = vpop.f32.mrb[84].mxu1 }
 0x4f9   : > { %25741 = vst [vmem:[#allocation46_spill] sm:$0xff] %v21363_v62  ;;  %v17676_v46 = vpop.f32.mrb[85].mxu1 }
 0x4fa   : > { %v2619_v26 = vpop.f32.mrb[86].mxu1  ;;  %v3434_v46 = vsel %vm1692_vm3, %v21351_v50, -inf }
 0x4fb   : > { %v17677_v14 = vpop.f32.mrb[87].mxu1 }
 0x500   : > { %v21365_v20 = vpop.f32.mrb[88].mxu1 }
 0x501   : > { %v17688_v16 = vpop.f32.mrb[89].mxu1  ;;  %v3425_v51 = vsel %vm1692_vm3, %v21365_v20, -inf }
 0x502   : > { %3426 = vmax.xlane.f32.xlu1 %v3425_v51  ;;  %v2719_v23 = vpop.f32.mrb[90].mxu1  ;;  %v3440_v16 = vsel %vm1692_vm3, %v21353_v48, -inf }
 0x503   : > { %v17689_v33 = vpop.f32.mrb[91].mxu1 }
 0x508   : > { %v21369_v41 = vpop.f32.mrb[92].mxu1 }
 0x509   : > { %v17700_v57 = vpop.f32.mrb[93].mxu1  ;;  %v3431_v35 = vsel %vm1692_vm3, %v21369_v41, -inf }
 0x50a   : > { %3432 = vmax.xlane.f32.xlu0 %v3431_v35  ;;  %v2819_v60 = vpop.f32.mrb[94].mxu1  ;;  %v3446_v57 = vsel %vm1692_vm3, %v21355_v1, -inf }
 0x50b   : > { %v17701_v58 = vpop.f32.mrb[95].mxu1 }
 0x50c   : > { %v3452_v58 = vsel %vm1692_vm3, %v21357_v45, -inf }
 0x50e   : > { %3435 = vmax.xlane.f32.xlu0 %v3434_v46 }
 0x510   : > { %v21375_v26 = vpop.f32.mrb[96].mxu1 }
 0x511   : > { %v17712_v14 = vpop.f32.mrb[97].mxu1  ;;  %v3437_v51 = vsel %vm1692_vm3, %v21375_v26, -inf }
 0x512   : > { %3441 = vmax.xlane.f32.xlu0 %v3440_v16  ;;  %3438 = vmax.xlane.f32.xlu1 %v3437_v51  ;;  %v2919_v23 = vpop.f32.mrb[98].mxu1  ;;  %v3458_v51 = vsel %vm1692_vm3, %v21359_v12, -inf }
 0x513   : > { %v17713_v33 = vpop.f32.mrb[99].mxu1 }
 0x516   : > { %3447 = vmax.xlane.f32.xlu0 %v3446_v57  ;;  %v3464_v57 = vsel %vm1692_vm3, %v21361_v8, -inf }
 0x518   : > { %v21383_v35 = vpop.f32.mrb[100].mxu1 }
 0x519   : > { %v17724_v60 = vpop.f32.mrb[101].mxu1  ;;  %v3443_v46 = vsel %vm1692_vm3, %v21383_v35, -inf }
 0x51a   : > { %3453 = vmax.xlane.f32.xlu0 %v3452_v58  ;;  %3444 = vmax.xlane.f32.xlu1 %v3443_v46  ;;  %v3019_v14 = vpop.f32.mrb[102].mxu1 }
 0x51b   : > { %v17725_v16 = vpop.f32.mrb[103].mxu1 }
 0x51e   : > { %3459 = vmax.xlane.f32.xlu0 %v3458_v51 }
 0x520   : > { %v21391_v23 = vpop.f32.mrb[104].mxu1 }
 0x521   : > { %v17736_v33 = vpop.f32.mrb[105].mxu1  ;;  %v3449_v60 = vsel %vm1692_vm3, %v21391_v23, -inf }
 0x522   : > { %3465 = vmax.xlane.f32.xlu0 %v3464_v57  ;;  %3450 = vmax.xlane.f32.xlu1 %v3449_v60  ;;  %v3119_v62 = vpop.f32.mrb[106].mxu1 }
 0x523   : > { %v17737_v58 = vpop.f32.mrb[107].mxu1 }
 0x524   : > { %v21407_v58 = vpop.permute.xlu0 %3806 }
 0x528   : > { %v21397_v46 = vpop.f32.mrb[108].mxu1  ;;  %v21413_v32 = vpop.permute.xlu0 %3902 }
 0x529   : > { %v17748_v14 = vpop.f32.mrb[109].mxu1  ;;  %v3455_v16 = vsel %vm1692_vm3, %v21397_v46, -inf  ;;  %25742 = vst [vmem:[#allocation47_spill] sm:$0xff] %v21413_v32 }
 0x52a   : > { %3456 = vmax.xlane.f32.xlu1 %v3455_v16  ;;  %v3219_v51 = vpop.f32.mrb[110].mxu1 }
 0x52b   : > { %v17749_v27 = vpop.f32.mrb[111].mxu1 }
 0x52c   : > { %v21415_v59 = vpop.permute.xlu0 %3998 }
 0x52d   : > { %25743 = vst [vmem:[#allocation48_spill] sm:$0xff] %v21415_v59 }
 0x530   : > { %v21401_v33 = vpop.f32.mrb[112].mxu1 }
 0x531   : > { %v17760_v56 = vpop.f32.mrb[113].mxu1  ;;  %v3461_v57 = vsel %vm1692_vm3, %v21401_v33, -inf }
 0x532   : > { %3462 = vmax.xlane.f32.xlu1 %v3461_v57  ;;  %v3319_v62 = vpop.f32.mrb[114].mxu1 }
 0x533   : > { %v17761_v60 = vpop.f32.mrb[115].mxu1 }
 0x538   : > { %4190 = vrot.lane.b32.xlu0 %v21132_v18, %s20268_s15  ;;  %v21411_v14 = vpop.f32.mrb[116].mxu1 }
 0x539   : > { %v17772_v16 = vpop.f32.mrb[117].mxu1 }
 0x53a   : > { %v3419_v27 = vpop.f32.mrb[118].mxu1 }
 0x53b   : > { %v17773_v51 = vpop.f32.mrb[119].mxu1 }
 0x543   : > { %4238 = vrot.lane.b32.xlu1 %v21165_v44, %s20268_s15 }
 0x547   : > { %v3424_v56 = vpop.xlane.xlu0 %3423 }
 0x548   : > { %v3470_v57 = vsub.f32 %v21341_v4, %v3424_v56  ;;  %v3467_v4 = vsel %vm1692_vm3, %v21411_v14, -inf  ;;  %v21431_v56 = vpop.permute.xlu1 %3758 }
 0x54a   : > { %v3486_v62 = vmul.f32 1.442695, %v3470_v57 }
 0x54c   : > { %19538 = vpow2.f32 %v3486_v62 }
 0x54f   : > { %v3430_v60 = vpop.xlane.xlu0 %3429 }
 0x550   : > { %v3472_v18 = vsub.f32 %v21345_v49, %v3430_v60 }
 0x552   : > { %v3490_v5 = vmul.f32 1.442695, %v3472_v18  ;;  %v21433_v18 = vpop.permute.xlu1 %3854 }
 0x554   : > { %19540 = vpow2.f32 %v3490_v5 }
 0x556   : > { %v21421_v16 = vpop.eup %19538  ;;  %v21435_v5 = vpop.permute.xlu1 %3950 }
 0x557   : > { %v3518_v27 = vsel %vm1692_vm3, %v21421_v16, 0.0  ;;  %25744 = vst [vmem:[#allocation49_spill] sm:$0xff] %v21435_v5 }
 0x558   : > { %3519 = vadd.xlane.f32.xlu0 %v3518_v27 }
 0x55a   : > { %v21437_v49 = vpop.permute.xlu1 %4046 }
 0x55b   : > { %25745 = vst [vmem:[#allocation50_spill] sm:$0xff] %v21437_v49 }
 0x55e   : > { %v21425_v51 = vpop.eup %19540  ;;  %v21439_v57 = vpop.permute.xlu1 %4094 }
 0x55f   : > { %v3524_v44 = vsel %vm1692_vm3, %v21425_v51, 0.0  ;;  %25746 = vst [vmem:[#allocation51_spill] sm:$0xff] %v21439_v57 }
 0x560   : > { %3525 = vadd.xlane.f32.xlu0 %v3524_v44 }
 0x562   : > { %v21441_v62 = vpop.permute.xlu1 %4142 }
 0x563   : > { %25747 = vst [vmem:[#allocation52_spill] sm:$0xff] %v21441_v62 }
 0x567   : > { %3468 = vmax.xlane.f32.xlu1 %v3467_v4 }
 0x58f   : > { %v3427_v60 = vpop.xlane.xlu1 %3426 }
 0x590   : > { %v3471_v27 = vsub.f32 %v21365_v20, %v3427_v60 }
 0x592   : > { %v3488_v44 = vmul.f32 1.442695, %v3471_v27 }
 0x594   : > { %19542 = vpow2.f32 %v3488_v44 }
 0x597   : > { %v3433_v59 = vpop.xlane.xlu0 %3432 }
 0x598   : > { %v3473_v4 = vsub.f32 %v21369_v41, %v3433_v59 }
 0x59a   : > { %v3492_v39 = vmul.f32 1.442695, %v3473_v4 }
 0x59b   : > { %v3436_v37 = vpop.xlane.xlu0 %3435 }
 0x59c   : > { %19544 = vpow2.f32 %v3492_v39  ;;  %v3474_v29 = vsub.f32 %v21351_v50, %v3436_v37 }
 0x59e   : > { %v21446_v5 = vpop.eup %19542  ;;  %v3494_v49 = vmul.f32 1.442695, %v3474_v29 }
 0x59f   : > { %v3442_v32 = vpop.xlane.xlu0 %3441  ;;  %v3439_v57 = vpop.xlane.xlu1 %3438  ;;  %v3521_v62 = vsel %vm1692_vm3, %v21446_v5, 0.0 }
 0x5a0   : > { %19546 = vpow2.f32 %v3494_v49  ;;  %v3476_v20 = vsub.f32 %v21353_v48, %v3442_v32  ;;  %v3475_v60 = vsub.f32 %v21375_v26, %v3439_v57  ;;  %3522 = vadd.xlane.f32.xlu1 %v3521_v62 }
 0x5a2   : > { %v3498_v59 = vmul.f32 1.442695, %v3476_v20  ;;  %v3496_v41 = vmul.f32 1.442695, %v3475_v60 }
 0x5a3   : > { %v3448_v27 = vpop.xlane.xlu0 %3447 }
 0x5a4   : > { %19548 = vpow2.f32 %v3498_v59  ;;  %v3478_v39 = vsub.f32 %v21355_v1, %v3448_v27 }
 0x5a5   : > { %19550 = vpow2.f32 %v3496_v41 }
 0x5a6   : > { %v21452_v37 = vpop.eup %19544  ;;  %v3502_v26 = vmul.f32 1.442695, %v3478_v39 }
 0x5a7   : > { %v3454_v29 = vpop.xlane.xlu0 %3453  ;;  %v3445_v50 = vpop.xlane.xlu1 %3444  ;;  %v3527_v44 = vsel %vm1692_vm3, %v21452_v37, 0.0 }
 0x5a8   : > { %v3477_v49 = vsub.f32 %v21383_v35, %v3445_v50  ;;  %3528 = vadd.xlane.f32.xlu1 %v3527_v44  ;;  %v3480_v57 = vsub.f32 %v21357_v45, %v3454_v29 }
 0x5aa   : > { %v21458_v32 = vpop.eup %19546  ;;  %v3500_v48 = vmul.f32 1.442695, %v3477_v49  ;;  %v3506_v60 = vmul.f32 1.442695, %v3480_v57 }
 0x5ab   : > { %v3530_v62 = vsel %vm1692_vm3, %v21458_v32, 0.0  ;;  %v3460_v4 = vpop.xlane.xlu0 %3459 }
 0x5ac   : > { %3531 = vadd.xlane.f32.xlu0 %v3530_v62  ;;  %19552 = vpow2.f32 %v3500_v48  ;;  %v3482_v35 = vsub.f32 %v21359_v12, %v3460_v4 }
 0x5ad   : > { %19554 = vpow2.f32 %v3502_v26 }
 0x5ae   : > { %v21463_v1 = vpop.eup %19548  ;;  %19556 = vpow2.f32 %v3506_v60  ;;  %v3510_v29 = vmul.f32 1.442695, %v3482_v35 }
 0x5af   : > { %v21465_v20 = vpop.eup %19550  ;;  %v3451_v59 = vpop.xlane.xlu1 %3450  ;;  %v3536_v41 = vsel %vm1692_vm3, %v21463_v1, 0.0 }
 0x5b0   : > { %v3479_v45 = vsub.f32 %v21391_v23, %v3451_v59  ;;  %3537 = vadd.xlane.f32.xlu0 %v3536_v41  ;;  %v3533_v27 = vsel %vm1692_vm3, %v21465_v20, 0.0 }
 0x5b1   : > { %3534 = vadd.xlane.f32.xlu1 %v3533_v27 }
 0x5b2   : > { %v3504_v39 = vmul.f32 1.442695, %v3479_v45 }
 0x5b4   : > { %19558 = vpow2.f32 %v3504_v39 }
 0x5b5   : > { %19560 = vpow2.f32 %v3510_v29 }
 0x5b6   : > { %v21473_v50 = vpop.eup %19552 }
 0x5b7   : > { %v3457_v44 = vpop.xlane.xlu1 %3456  ;;  %v3539_v49 = vsel %vm1692_vm3, %v21473_v50, 0.0  ;;  %v21478_v48 = vpop.eup %19554 }
 0x5b8   : > { %v3481_v12 = vsub.f32 %v21397_v46, %v3457_v44  ;;  %3540 = vadd.xlane.f32.xlu1 %v3539_v49  ;;  %v3542_v26 = vsel %vm1692_vm3, %v21478_v48, 0.0  ;;  %v21482_v57 = vpop.eup %19556  ;;  %v3466_v44 = vpop.xlane.xlu0 %3465 }
 0x5b9   : > { %v3548_v35 = vsel %vm1692_vm3, %v21482_v57, 0.0  ;;  %v3484_v49 = vsub.f32 %v21361_v8, %v3466_v44 }
 0x5ba   : > { %v3508_v23 = vmul.f32 1.442695, %v3481_v12 }
 0x5bc   : > { %19562 = vpow2.f32 %v3508_v23  ;;  %3543 = vadd.xlane.f32.xlu1 %v3542_v26  ;;  %v21505_v12 = vpop.permute.xlu0 %4190  ;;  %v3514_v26 = vmul.f32 1.442695, %v3484_v49 }
 0x5be   : > { %v21484_v62 = vpop.eup %19558 }
 0x5bf   : > { %v3463_v4 = vpop.xlane.xlu1 %3462  ;;  %v3545_v46 = vsel %vm1692_vm3, %v21484_v62, 0.0  ;;  %v21491_v59 = vpop.eup %19560 }
 0x5c0   : > { %v3483_v60 = vsub.f32 %v21401_v33, %v3463_v4  ;;  %3546 = vadd.xlane.f32.xlu0 %v3545_v46  ;;  %3549 = vadd.xlane.f32.xlu1 %v3548_v35  ;;  %v3554_v45 = vsel %vm1692_vm3, %v21491_v59, 0.0 }
 0x5c2   : > { %v3512_v41 = vmul.f32 1.442695, %v3483_v60 }
 0x5c3   : > { %v21510_v46 = vpop.permute.xlu1 %4238 }
 0x5c4   : > { %19564 = vpow2.f32 %v3512_v41  ;;  %3555 = vadd.xlane.f32.xlu1 %v3554_v45 }
 0x5c6   : > { %v21495_v27 = vpop.eup %19562 }
 0x5c7   : > { %v3551_v33 = vsel %vm1692_vm3, %v21495_v27, 0.0 }
 0x5c8   : > { %3552 = vadd.xlane.f32.xlu0 %v3551_v33  ;;  %v3716_v33 = vsel %vm1888_vm2, %v21403_v53, 0 }
 0x5ce   : > { %v21499_v39 = vpop.eup %19564 }
 0x5cf   : > { %v3557_v29 = vsel %vm1692_vm3, %v21499_v39, 0.0 }
 0x5d0   : > { %3558 = vadd.xlane.f32.xlu0 %v3557_v29 }
 0x5d5   : > { %4334 = vrot.lane.b32.xlu1 %v21220_v40, %s20268_s15 }
 0x5e5   : > { %v3520_v23 = vpop.xlane.xlu0 %3519 }
 0x5e6   : > { %19566 = vrcp.f32 %v3520_v23  ;;  %4286 = vrot.lane.b32.xlu0 %v21158_v34, %s20268_s15  ;;  %v3812_v23 = vsel %vm1888_vm2, %v21407_v58, 0 }
 0x5e7   : > { %19568 = vpow2.f32 %v3514_v26 }
 0x5ed   : > { %v3526_v4 = vpop.xlane.xlu0 %3525 }
 0x5ee   : > { %19570 = vrcp.f32 %v3526_v4 }
 0x5f0   : > { %v19567_v60 = vpop.eup %19566 }
 0x5f1   : > { %v3582_v35 = vmul.f32 %v19567_v60, %v21421_v16  ;;  %v21517_v29 = vpop.eup %19568 }
 0x5f2   : > { %v3560_v16 = vsel %vm1692_vm3, %v21517_v29, 0.0 }
 0x5f3   : > { %v3598_v41 = vpack.c.bf16 %v3582_v35, %v3582_v35 }
 0x5f4   : > { %v3469_v45 = vpop.xlane.xlu1 %3468 }
 0x5f5   : > { %v3485_v8 = vsub.f32 %v21411_v14, %v3469_v45  ;;  %17777 = vmatmul.mubr.msk.bf16.vlgmr.msra.gmra.mrb[120].mxu0 %vm1692_vm3, %v3598_v41 }
 0x5f6   : > { %17787 = vmatpush3.bf16.msra.mxu0 %v3716_v33  ;;  %17788 = vmatprep.mubr.msk.bf16.mxu0 %vm20267_vm0, %v25704_v11  ;;  %v3764_v33 = vsel %vm1888_vm2, %v21431_v56, 0 }
 0x5f7   : > { %v3516_v44 = vmul.f32 1.442695, %v3485_v8  ;;  %17798 = vmatprep.subr.bf16.mxu0 %v25704_v11 }
 0x5f8   : > { %v19571_v49 = vpop.eup %19570 }
 0x5f9   : > { %19572 = vpow2.f32 %v3516_v44  ;;  %v3584_v53 = vmul.f32 %v19571_v49, %v21425_v51  ;;  %3561 = vadd.xlane.f32.xlu1 %v3560_v16 }
 0x5fb   : > { %v3600_v14 = vpack.c.bf16 %v3584_v53, %v3584_v53  ;;  %v3860_v53 = vsel %vm1888_vm2, %v21433_v18, 0 }
 0x5fd   : > { %17789 = vmatmul.mubr.msk.bf16.vlgmr.msra.gmra.mrb[124].mxu0 %vm1692_vm3, %v3600_v14 }
 0x5fe   : > { %17799 = vmatpush3.bf16.msra.mxu0 %v3812_v23  ;;  %17800 = vmatprep.mubr.msk.bf16.mxu0 %vm20267_vm0, %v25704_v11 }
 0x5ff   : > { %17810 = vmatprep.subr.bf16.mxu0 %v25704_v11 }
 0x603   : > { %v21531_v26 = vpop.eup %19572 }
 0x604   : > { %v3563_v4 = vsel %vm1692_vm3, %v21531_v26, 0.0 }
 0x605   : > { %3564 = vadd.xlane.f32.xlu0 %v3563_v4 }
 0x60a   : > { %4434 = vrot.lane.b32.xlu1 %v20561_v6, %s20269_s22 }
 0x60e   : > { %4432 = vrot.lane.b32.xlu1 %v20592_v28, %s20269_s22 }
 0x612   : > { %4534 = vrot.lane.b32.xlu1 %v20607_v38, %s20269_s22 }
 0x616   : > { %4532 = vrot.lane.b32.xlu1 %v20665_v21, %s20269_s22 }
 0x61a   : > { %4634 = vrot.lane.b32.xlu1 %v20646_v2, %s20269_s22 }
 0x61b   : > { %4384 = vrot.lane.b32.xlu0 %v20555_v63, %s20269_s22 }
 0x61e   : > { %4632 = vrot.lane.b32.xlu1 %v20704_v61, %s20269_s22 }
 0x61f   : > { %4382 = vrot.lane.b32.xlu0 %v20563_v9, %s20269_s22 }
 0x622   : > { %4734 = vrot.lane.b32.xlu1 %v20687_v36, %s20269_s22 }
 0x623   : > { %4484 = vrot.lane.b32.xlu0 %v20575_v15, %s20269_s22 }
 0x626   : > { %4732 = vrot.lane.b32.xlu1 %v25712_v47, %s20269_s22 }
 0x627   : > { %4482 = vrot.lane.b32.xlu0 %v20625_v52, %s20269_s22 }
 0x62a   : > { %4834 = vrot.lane.b32.xlu1 %v25713_v17, %s20269_s22 }
 0x62b   : > { %4584 = vrot.lane.b32.xlu0 %v20595_v30, %s20269_s22 }
 0x62d   : > { %v3523_v58 = vpop.xlane.xlu1 %3522 }
 0x62e   : > { %19574 = vrcp.f32 %v3523_v58  ;;  %4832 = vrot.lane.b32.xlu1 %v25717_v19, %s20269_s22  ;;  %v25748_v58 = vld [vmem:[#allocation47_spill] sm:$0xff] }
 0x62f   : > { %4582 = vrot.lane.b32.xlu0 %v20613_v42, %s20269_s22 }
 0x632   : > { %4934 = vrot.lane.b32.xlu1 %v25718_v25, %s20269_s22 }
 0x633   : > { %4684 = vrot.lane.b32.xlu0 %v20628_v54, %s20269_s22 }
 0x635   : > { %v3529_v51 = vpop.xlane.xlu1 %3528 }
 0x636   : > { %19576 = vrcp.f32 %v3529_v51  ;;  %4932 = vrot.lane.b32.xlu1 %v25719_v3, %s20269_s22 }
 0x637   : > { %4682 = vrot.lane.b32.xlu0 %v20653_v7, %s20269_s22 }
 0x638   : > { %v19575_v60 = vpop.eup %19574 }
 0x639   : > { %v3532_v35 = vpop.xlane.xlu0 %3531  ;;  %v3583_v41 = vmul.f32 %v19575_v60, %v21446_v5 }
 0x63a   : > { %19578 = vrcp.f32 %v3532_v35  ;;  %5034 = vrot.lane.b32.xlu1 %v25720_v31, %s20269_s22  ;;  %v25749_v35 = vld [vmem:[#allocation29_spill] sm:$0xff] }
 0x63b   : > { %4784 = vrot.lane.b32.xlu0 %v20669_v24, %s20269_s22  ;;  %v3599_v45 = vpack.c.bf16 %v3583_v41, %v3583_v41  ;;  %v25750_v41 = vld [vmem:[#allocation18_spill] sm:$0xff] }
 0x63d   : > { %v3538_v8 = vpop.xlane.xlu0 %3537  ;;  %17783 = vmatmul.mubr.msk.bf16.vlgmr.msra.gmra.mrb[120].mxu1 %vm1692_vm3, %v3599_v45 }
 0x63e   : > { %19580 = vrcp.f32 %v3538_v8  ;;  %17793 = vmatpush3.bf16.msra.mxu1 %v3764_v33  ;;  %v3535_v44 = vpop.xlane.xlu1 %3534  ;;  %17794 = vmatprep.mubr.msk.bf16.mxu1 %vm20267_vm0, %v25704_v11  ;;  %v25751_v8 = vld [vmem:[#allocation49_spill] sm:$0xff] }
 0x63f   : > { %19582 = vrcp.f32 %v3535_v44  ;;  %5032 = vrot.lane.b32.xlu1 %v25721_v13, %s20269_s22  ;;  %4782 = vrot.lane.b32.xlu0 %v20694_v43, %s20269_s22  ;;  %v3956_v44 = vsel %vm1888_vm2, %v25751_v8, 0  ;;  %v25759_v8 = vld [vmem:[#allocation25_spill] sm:$0xff] }
 0x640   : > { %v19577_v5 = vpop.eup %19576  ;;  %17804 = vmatprep.subr.bf16.mxu1 %v25704_v11 }
 0x641   : > { %v3585_v56 = vmul.f32 %v19577_v5, %v21452_v37 }
 0x643   : > { %5134 = vrot.lane.b32.xlu1 %v25722_v10, %s20269_s22  ;;  %4884 = vrot.lane.b32.xlu0 %v20708_v0, %s20269_s22  ;;  %v3601_v49 = vpack.c.bf16 %v3585_v56, %v3585_v56  ;;  %v25752_v56 = vld [vmem:[#allocation35_spill] sm:$0xff] }
 0x644   : > { %v19579_v16 = vpop.eup %19578 }
 0x645   : > { %17795 = vmatmul.mubr.msk.bf16.vlgmr.msra.gmra.mrb[124].mxu1 %vm1692_vm3, %v3601_v49  ;;  %v3586_v14 = vmul.f32 %v19579_v16, %v21458_v32  ;;  %v3541_v23 = vpop.xlane.xlu1 %3540  ;;  %v3908_v32 = vsel %vm1888_vm2, %v25748_v58, 0  ;;  %v25753_v16 = vld [vmem:[#allocation20_spill] sm:$0xff] }
 0x646   : > { %17805 = vmatpush3.bf16.msra.mxu1 %v3860_v53  ;;  %17806 = vmatprep.mubr.msk.bf16.mxu1 %vm20267_vm0, %v25704_v11  ;;  %19584 = vrcp.f32 %v3541_v23  ;;  %v25754_v53 = vld [vmem:[#allocation48_spill] sm:$0xff] }
 0x647   : > { %5132 = vrot.lane.b32.xlu1 %v25723_v55, %s20269_s22  ;;  %4882 = vrot.lane.b32.xlu0 %v20730_v22, %s20269_s22  ;;  %v3602_v37 = vpack.c.bf16 %v3586_v14, %v3586_v14  ;;  %v4004_v14 = vsel %vm1888_vm2, %v25754_v53, 0  ;;  %v25761_v53 = vld [vmem:[#allocation39_spill] sm:$0xff] }
 0x648   : > { %v19581_v4 = vpop.eup %19580  ;;  %17816 = vmatprep.subr.bf16.mxu1 %v25704_v11 }
 0x649   : > { %v19583_v18 = vpop.eup %19582  ;;  %17801 = vmatmul.mubr.msk.bf16.vlgmr.msra.gmra.mrb[128].mxu0 %vm1692_vm3, %v3602_v37  ;;  %v3544_v51 = vpop.xlane.xlu1 %3543  ;;  %v3588_v45 = vmul.f32 %v19581_v4, %v21463_v1  ;;  %v25755_v37 = vld [vmem:[#allocation36_spill] sm:$0xff] }
 0x64a   : > { %17811 = vmatpush3.bf16.msra.mxu0 %v3908_v32  ;;  %v3587_v60 = vmul.f32 %v19583_v18, %v21465_v20  ;;  %17812 = vmatprep.mubr.msk.bf16.mxu0 %vm20267_vm0, %v25704_v11  ;;  %19586 = vrcp.f32 %v3544_v51  ;;  %v25756_v18 = vld [vmem:[#allocation22_spill] sm:$0xff] }
 0x64b   : > { %5422 = vrot.lane.b32.xlu1 %v25749_v35, %s20269_s22  ;;  %4984 = vrot.lane.b32.xlu0 %v25750_v41, %s20269_s22  ;;  %v3604_v49 = vpack.c.bf16 %v3588_v45, %v3588_v45 }
 0x64c   : > { %v3603_v33 = vpack.c.bf16 %v3587_v60, %v3587_v60  ;;  %17822 = vmatprep.subr.bf16.mxu0 %v25704_v11  ;;  %v25757_v60 = vld [vmem:[#allocation50_spill] sm:$0xff] }
 0x64d   : > { %v3547_v5 = vpop.xlane.xlu0 %3546  ;;  %v3550_v20 = vpop.xlane.xlu1 %3549  ;;  %v4052_v45 = vsel %vm1888_vm2, %v25757_v60, 0 }
 0x64e   : > { %17807 = vmatmul.mubr.msk.bf16.vlgmr.msra.gmra.mrb[128].mxu1 %vm1692_vm3, %v3603_v33  ;;  %19588 = vrcp.f32 %v3547_v5  ;;  %v25758_v33 = vld [vmem:[#allocation37_spill] sm:$0xff] }
 0x64f   : > { %17817 = vmatpush3.bf16.msra.mxu1 %v3956_v44  ;;  %5518 = vrot.lane.b32.xlu1 %v25752_v56, %s20269_s22  ;;  %19590 = vrcp.f32 %v3550_v20 }
 0x650   : > { %4982 = vrot.lane.b32.xlu0 %v25753_v16, %s20269_s22  ;;  %17818 = vmatprep.mubr.msk.bf16.mxu1 %vm20267_vm0, %v25704_v11  ;;  %v19585_v1 = vpop.eup %19584 }
 0x651   : > { %17813 = vmatmul.mubr.msk.bf16.vlgmr.msra.gmra.mrb[132].mxu0 %vm1692_vm3, %v3604_v49  ;;  %17828 = vmatprep.subr.bf16.mxu1 %v25704_v11  ;;  %v3589_v23 = vmul.f32 %v19585_v1, %v21473_v50  ;;  %v3556_v4 = vpop.xlane.xlu1 %3555  ;;  %v25760_v49 = vld [vmem:[#allocation51_spill] sm:$0xff] }
 0x652   : > { %17823 = vmatpush3.bf16.msra.mxu0 %v4004_v14  ;;  %17824 = vmatprep.mubr.msk.bf16.mxu0 %vm20267_vm0, %v25704_v11  ;;  %v4100_v1 = vsel %vm1888_vm2, %v25760_v49, 0  ;;  %v25762_v14 = vld [vmem:[#allocation24_spill] sm:$0xff] }
 0x653   : > { %5614 = vrot.lane.b32.xlu1 %v25755_v37, %s20269_s22  ;;  %17834 = vmatprep.subr.bf16.mxu0 %v25704_v11  ;;  %v3605_v58 = vpack.c.bf16 %v3589_v23, %v3589_v23 }
 0x654   : > { %5084 = vrot.lane.b32.xlu0 %v25756_v18, %s20269_s22  ;;  %v19587_v32 = vpop.eup %19586 }
 0x655   : > { %v3553_v51 = vpop.xlane.xlu0 %3552  ;;  %v3590_v50 = vmul.f32 %v19587_v32, %v21478_v48  ;;  %v25763_v32 = vld [vmem:[#allocation52_spill] sm:$0xff] }
 0x656   : > { %19592 = vrcp.f32 %v3553_v51  ;;  %17819 = vmatmul.mubr.msk.bf16.vlgmr.msra.gmra.mrb[132].mxu1 %vm1692_vm3, %v3605_v58  ;;  %v4148_v51 = vsel %vm1888_vm2, %v25763_v32, 0 }
 0x657   : > { %19594 = vrcp.f32 %v3556_v4  ;;  %17829 = vmatpush3.bf16.msra.mxu1 %v4052_v45  ;;  %5710 = vrot.lane.b32.xlu1 %v25758_v33, %s20269_s22  ;;  %v3606_v44 = vpack.c.bf16 %v3590_v50, %v3590_v50  ;;  %v25765_v45 = vld [vmem:[#allocation31_spill] sm:$0xff]  ;;  %v25786_v33 = vld [vmem:[#allocation17_spill] sm:$0xff] }
 0x658   : > { %5082 = vrot.lane.b32.xlu0 %v25759_v8, %s20269_s22  ;;  %17830 = vmatprep.mubr.msk.bf16.mxu1 %vm20267_vm0, %v25704_v11  ;;  %v19589_v5 = vpop.eup %19588 }
 0x659   : > { %17840 = vmatprep.subr.bf16.mxu1 %v25704_v11  ;;  %v19591_v20 = vpop.eup %19590  ;;  %17825 = vmatmul.mubr.msk.bf16.vlgmr.msra.gmra.mrb[136].mxu0 %vm1692_vm3, %v3606_v44  ;;  %v3591_v48 = vmul.f32 %v19589_v5, %v21484_v62  ;;  %v25764_v62 = vld [vmem:[#allocation38_spill] sm:$0xff]  ;;  %v4196_v5 = vsel %vm1888_vm2, %v21505_v12, 0 }
 0x65a   : > { %17835 = vmatpush3.bf16.msra.mxu0 %v4100_v1  ;;  %17836 = vmatprep.mubr.msk.bf16.mxu0 %vm20267_vm0, %v25704_v11  ;;  %v3592_v4 = vmul.f32 %v19591_v20, %v21482_v57  ;;  %v25766_v20 = vld [vmem:[#allocation41_spill] sm:$0xff]  ;;  %v25767_v1 = vld [vmem:[#allocation32_spill] sm:$0xff] }
 0x65b   : > { %5806 = vrot.lane.b32.xlu1 %v25761_v53, %s20269_s22  ;;  %v3607_v23 = vpack.c.bf16 %v3591_v48, %v3591_v48  ;;  %17846 = vmatprep.subr.bf16.mxu0 %v25704_v11 }
 0x65c   : > { %5374 = vrot.lane.b32.xlu0 %v25762_v14, %s20269_s22  ;;  %v3608_v50 = vpack.c.bf16 %v3592_v4, %v3592_v4  ;;  %v25768_v4 = vld [vmem:[#allocation33_spill] sm:$0xff] }
 0x65d   : > { %v3559_v58 = vpop.xlane.xlu0 %3558 }
 0x65e   : > { %19596 = vrcp.f32 %v3559_v58  ;;  %17831 = vmatmul.mubr.msk.bf16.vlgmr.msra.gmra.mrb[136].mxu1 %vm1692_vm3, %v3607_v23 }
 0x65f   : > { %17841 = vmatpush3.bf16.msra.mxu1 %v4148_v51  ;;  %5854 = vrot.lane.b32.xlu1 %v25764_v62, %s20269_s22 }
 0x660   : > { %v19593_v60 = vpop.eup %19592  ;;  %5470 = vrot.lane.b32.xlu0 %v25765_v45, %s20269_s22  ;;  %17842 = vmatprep.mubr.msk.bf16.mxu1 %vm20267_vm0, %v25704_v11 }
 0x661   : > { %v19595_v57 = vpop.eup %19594  ;;  %17852 = vmatprep.subr.bf16.mxu1 %v25704_v11  ;;  %v3593_v44 = vmul.f32 %v19593_v60, %v21495_v27  ;;  %17837 = vmatmul.mubr.msk.bf16.vlgmr.msra.gmra.mrb[140].mxu0 %vm1692_vm3, %v3608_v50  ;;  %v4244_v27 = vsel %vm1888_vm2, %v21510_v46, 0  ;;  %v4287_v12 = vpop.permute.xlu0 %4286  ;;  %v25769_v60 = vld [vmem:[#allocation34_spill] sm:$0xff] }
 0x662   : > { %17847 = vmatpush3.bf16.msra.mxu0 %v4196_v5  ;;  %17848 = vmatprep.mubr.msk.bf16.mxu0 %vm20267_vm0, %v25704_v11  ;;  %v3594_v48 = vmul.f32 %v19595_v57, %v21491_v59  ;;  %v4292_v32 = vsel %vm1888_vm2, %v4287_v12, 0  ;;  %v4335_v46 = vpop.permute.xlu1 %4334 }
 0x663   : > { %5902 = vrot.lane.b32.xlu1 %v25766_v20, %s20269_s22  ;;  %v3609_v49 = vpack.c.bf16 %v3593_v44, %v3593_v44  ;;  %17858 = vmatprep.subr.bf16.mxu0 %v25704_v11  ;;  %v4340_v50 = vsel %vm1888_vm2, %v4335_v46, 0 }
 0x664   : > { %5566 = vrot.lane.b32.xlu0 %v25767_v1, %s20269_s22  ;;  %v3610_v58 = vpack.c.bf16 %v3594_v48, %v3594_v48 }
 0x666   : > { %17843 = vmatmul.mubr.msk.bf16.vlgmr.msra.gmra.mrb[140].mxu1 %vm1692_vm3, %v3609_v49 }
 0x667   : > { %17853 = vmatpush3.bf16.msra.mxu1 %v4244_v27  ;;  %17854 = vmatprep.mubr.msk.bf16.mxu1 %vm20267_vm0, %v25704_v11 }
 0x668   : > { %v19597_v23 = vpop.eup %19596  ;;  %5662 = vrot.lane.b32.xlu0 %v25768_v4, %s20269_s22  ;;  %17864 = vmatprep.subr.bf16.mxu1 %v25704_v11 }
 0x669   : > { %v3595_v59 = vmul.f32 %v19597_v23, %v21499_v39  ;;  %17849 = vmatmul.mubr.msk.bf16.vlgmr.msra.gmra.mrb[144].mxu0 %vm1692_vm3, %v3610_v58 }
 0x66a   : > { %17859 = vmatpush3.bf16.msra.mxu0 %v4292_v32  ;;  %17860 = vmatprep.mubr.msk.bf16.mxu0 %vm20267_vm0, %v25704_v11 }
 0x66b   : > { %v3611_v51 = vpack.c.bf16 %v3595_v59, %v3595_v59  ;;  %17870 = vmatprep.subr.bf16.mxu0 %v25704_v11 }
 0x66c   : > { %5758 = vrot.lane.b32.xlu0 %v25769_v60, %s20269_s22 }
 0x66e   : > { %17855 = vmatmul.mubr.msk.bf16.vlgmr.msra.gmra.mrb[144].mxu1 %vm1692_vm3, %v3611_v51 }
 0x66f   : > { %17865 = vmatpush3.bf16.msra.mxu1 %v4340_v50  ;;  %17866 = vmatprep.mubr.msk.bf16.mxu1 %vm20267_vm0, %v25704_v11 }
 0x670   : > { %17876 = vmatprep.subr.bf16.mxu1 %v25704_v11 }
 0x686   : > { %v3562_v39 = vpop.xlane.xlu1 %3561 }
 0x687   : > { %19598 = vrcp.f32 %v3562_v39 }
 0x68a   : > { %v4435_v57 = vpop.permute.xlu1 %4434 }
 0x68e   : > { %v4433_v44 = vpop.permute.xlu1 %4432 }
 0x691   : > { %v19599_v5 = vpop.eup %19598 }
 0x692   : > { %v3565_v49 = vpop.xlane.xlu0 %3564  ;;  %v4535_v48 = vpop.permute.xlu1 %4534  ;;  %v3596_v27 = vmul.f32 %v19599_v5, %v21517_v29 }
 0x693   : > { %19600 = vrcp.f32 %v3565_v49 }
 0x694   : > { %v3612_v12 = vpack.c.bf16 %v3596_v27, %v3596_v27  ;;  %v4440_v27 = vsel %vm955_vm1, %v4435_v57, 0 }
 0x696   : > { %v4385_v23 = vpop.permute.xlu0 %4384  ;;  %17861 = vmatmul.mubr.msk.bf16.vlgmr.msra.gmra.mrb[148].mxu0 %vm1692_vm3, %v3612_v12  ;;  %v4533_v59 = vpop.permute.xlu1 %4532 }
 0x697   : > { %v4390_v58 = vsel %vm955_vm1, %v4385_v23, 0  ;;  %17872 = vmatprep.mubr.msk.bf16.mxu0 %vm20267_vm0, %v25704_v11 }
 0x698   : > { %17871 = vmatpush3.bf16.xpose.msra.mxu0 %v4390_v58 }
 0x699   : > { %17882 = vmatprep.subr.bf16.mxu0 %v25704_v11 }
 0x69a   : > { %v4383_v32 = vpop.permute.xlu0 %4382  ;;  %v4635_v46 = vpop.permute.xlu1 %4634 }
 0x69d   : > { %v19601_v51 = vpop.eup %19600 }
 0x69e   : > { %v4485_v50 = vpop.permute.xlu0 %4484  ;;  %v3597_v39 = vmul.f32 %v19601_v51, %v21531_v26  ;;  %v4633_v5 = vpop.permute.xlu1 %4632 }
 0x69f   : > { %v4490_v29 = vsel %vm955_vm1, %v4485_v50, 0  ;;  %17873 = vmatmul.mubr.msk.bf16.vlgmr.msra.gmra.mrb[152].mxu0 %vm955_vm1, %v4383_v32  ;;  %v4540_v32 = vsel %vm955_vm1, %v4535_v48, 0 }
 0x6a0   : > { %17883 = vmatpush3.bf16.xpose.msra.mxu0 %v4490_v29  ;;  %v3613_v49 = vpack.c.bf16 %v3597_v39, %v3597_v39  ;;  %17884 = vmatprep.mubr.msk.bf16.mxu0 %vm20267_vm0, %v25704_v11 }
 0x6a1   : > { %17894 = vmatprep.subr.bf16.mxu0 %v25704_v11 }
 0x6a2   : > { %v4483_v12 = vpop.permute.xlu0 %4482  ;;  %17867 = vmatmul.mubr.msk.bf16.vlgmr.msra.gmra.mrb[148].mxu1 %vm1692_vm3, %v3613_v49  ;;  %v4735_v23 = vpop.permute.xlu1 %4734 }
 0x6a3   : > { %17877 = vmatpush3.bf16.xpose.msra.mxu1 %v4440_v27  ;;  %17878 = vmatprep.mubr.msk.bf16.mxu1 %vm20267_vm0, %v25704_v11 }
 0x6a4   : > { %17888 = vmatprep.subr.bf16.mxu1 %v25704_v11 }
 0x6a6   : > { %v4585_v26 = vpop.permute.xlu0 %4584  ;;  %v4733_v57 = vpop.permute.xlu1 %4732 }
 0x6a7   : > { %v4590_v58 = vsel %vm955_vm1, %v4585_v26, 0  ;;  %17885 = vmatmul.mubr.msk.bf16.vlgmr.msra.gmra.mrb[156].mxu0 %vm955_vm1, %v4483_v12 }
 0x6a8   : > { %17895 = vmatpush3.bf16.xpose.msra.mxu0 %v4590_v58  ;;  %17896 = vmatprep.mubr.msk.bf16.mxu0 %vm20267_vm0, %v25704_v11 }
 0x6a9   : > { %17906 = vmatprep.subr.bf16.mxu0 %v25704_v11 }
 0x6aa   : > { %v4583_v51 = vpop.permute.xlu0 %4582  ;;  %17879 = vmatmul.mubr.msk.bf16.vlgmr.msra.gmra.mrb[152].mxu1 %vm955_vm1, %v4433_v44  ;;  %v4835_v39 = vpop.permute.xlu1 %4834  ;;  %v4640_v44 = vsel %vm955_vm1, %v4635_v46, 0 }
 0x6ab   : > { %17889 = vmatpush3.bf16.xpose.msra.mxu1 %v4540_v32  ;;  %17890 = vmatprep.mubr.msk.bf16.mxu1 %vm20267_vm0, %v25704_v11 }
 0x6ac   : > { %17900 = vmatprep.subr.bf16.mxu1 %v25704_v11 }
 0x6ae   : > { %v4685_v50 = vpop.permute.xlu0 %4684  ;;  %v4833_v49 = vpop.permute.xlu1 %4832 }
 0x6af   : > { %v4690_v29 = vsel %vm955_vm1, %v4685_v50, 0  ;;  %17897 = vmatmul.mubr.msk.bf16.vlgmr.msra.gmra.mrb[160].mxu0 %vm955_vm1, %v4583_v51 }
 0x6b0   : > { %17907 = vmatpush3.bf16.xpose.msra.mxu0 %v4690_v29  ;;  %17908 = vmatprep.mubr.msk.bf16.mxu0 %vm20267_vm0, %v25704_v11 }
 0x6b1   : > { %17918 = vmatprep.subr.bf16.mxu0 %v25704_v11 }
 0x6b2   : > { %v4683_v48 = vpop.permute.xlu0 %4682  ;;  %17891 = vmatmul.mubr.msk.bf16.vlgmr.msra.gmra.mrb[156].mxu1 %vm955_vm1, %v4533_v59  ;;  %v4740_v59 = vsel %vm955_vm1, %v4735_v23, 0  ;;  %v4935_v26 = vpop.permute.xlu1 %4934 }
 0x6b3   : > { %17901 = vmatpush3.bf16.xpose.msra.mxu1 %v4640_v44  ;;  %17902 = vmatprep.mubr.msk.bf16.mxu1 %vm20267_vm0, %v25704_v11 }
 0x6b4   : > { %17912 = vmatprep.subr.bf16.mxu1 %v25704_v11 }
 0x6b6   : > { %v4785_v27 = vpop.permute.xlu0 %4784  ;;  %v4933_v23 = vpop.permute.xlu1 %4932 }
 0x6b7   : > { %v4790_v12 = vsel %vm955_vm1, %v4785_v27, 0  ;;  %17909 = vmatmul.mubr.msk.bf16.vlgmr.msra.gmra.mrb[164].mxu0 %vm955_vm1, %v4683_v48 }
 0x6b8   : > { %17919 = vmatpush3.bf16.xpose.msra.mxu0 %v4790_v12  ;;  %17920 = vmatprep.mubr.msk.bf16.mxu0 %vm20267_vm0, %v25704_v11 }
 0x6b9   : > { %17930 = vmatprep.subr.bf16.mxu0 %v25704_v11 }
 0x6ba   : > { %v4783_v46 = vpop.permute.xlu0 %4782  ;;  %17903 = vmatmul.mubr.msk.bf16.vlgmr.msra.gmra.mrb[160].mxu1 %vm955_vm1, %v4633_v5  ;;  %v4840_v5 = vsel %vm955_vm1, %v4835_v39, 0  ;;  %v5035_v29 = vpop.permute.xlu1 %5034 }
 0x6bb   : > { %17913 = vmatpush3.bf16.xpose.msra.mxu1 %v4740_v59  ;;  %17914 = vmatprep.mubr.msk.bf16.mxu1 %vm20267_vm0, %v25704_v11 }
 0x6bc   : > { %17924 = vmatprep.subr.bf16.mxu1 %v25704_v11 }
 0x6be   : > { %v4885_v58 = vpop.permute.xlu0 %4884 }
 0x6bf   : > { %v4890_v32 = vsel %vm955_vm1, %v4885_v58, 0  ;;  %17921 = vmatmul.mubr.msk.bf16.vlgmr.msra.gmra.mrb[168].mxu0 %vm955_vm1, %v4783_v46  ;;  %v5033_v46 = vpop.permute.xlu1 %5032 }
 0x6c0   : > { %17931 = vmatpush3.bf16.xpose.msra.mxu0 %v4890_v32  ;;  %17932 = vmatprep.mubr.msk.bf16.mxu0 %vm20267_vm0, %v25704_v11 }
 0x6c1   : > { %17942 = vmatprep.subr.bf16.mxu0 %v25704_v11 }
 0x6c2   : > { %v4883_v51 = vpop.permute.xlu0 %4882  ;;  %17915 = vmatmul.mubr.msk.bf16.vlgmr.msra.gmra.mrb[164].mxu1 %vm955_vm1, %v4733_v57  ;;  %v4940_v57 = vsel %vm955_vm1, %v4935_v26, 0  ;;  %v5040_v26 = vsel %vm955_vm1, %v5035_v29, 0 }
 0x6c3   : > { %17925 = vmatpush3.bf16.xpose.msra.mxu1 %v4840_v5  ;;  %17926 = vmatprep.mubr.msk.bf16.mxu1 %vm20267_vm0, %v25704_v11 }
 0x6c4   : > { %17936 = vmatprep.subr.bf16.mxu1 %v25704_v11 }
 0x6c6   : > { %v4985_v50 = vpop.permute.xlu0 %4984 }
 0x6c7   : > { %v4990_v44 = vsel %vm955_vm1, %v4985_v50, 0  ;;  %17933 = vmatmul.mubr.msk.bf16.vlgmr.msra.gmra.mrb[172].mxu0 %vm955_vm1, %v4883_v51 }
 0x6c8   : > { %v21764_v48 = vpop.f32.mrb[120].mxu0  ;;  %17943 = vmatpush3.bf16.xpose.msra.mxu0 %v4990_v44  ;;  %17944 = vmatprep.mubr.msk.bf16.mxu0 %vm20267_vm0, %v25704_v11  ;;  %v5135_v44 = vpop.permute.xlu1 %5134 }
 0x6c9   : > { %25770 = vst [vmem:[#allocation47_spill] sm:$0xff] %v21764_v48  ;;  %v17778_v39 = vpop.f32.mrb[121].mxu0  ;;  %17954 = vmatprep.subr.bf16.mxu0 %v25704_v11 }
 0x6ca   : > { %v3659_v27 = vpop.f32.mrb[122].mxu0  ;;  %v4983_v12 = vpop.permute.xlu0 %4982  ;;  %17927 = vmatmul.mubr.msk.bf16.vlgmr.msra.gmra.mrb[168].mxu1 %vm955_vm1, %v4833_v49 }
 0x6cb   : > { %17937 = vmatpush3.bf16.xpose.msra.mxu1 %v4940_v57  ;;  %v17779_v59 = vpop.f32.mrb[123].mxu0  ;;  %17938 = vmatprep.mubr.msk.bf16.mxu1 %vm20267_vm0, %v25704_v11 }
 0x6cc   : > { %17948 = vmatprep.subr.bf16.mxu1 %v25704_v11  ;;  %v5133_v29 = vpop.permute.xlu1 %5132 }
 0x6ce   : > { %v5085_v58 = vpop.permute.xlu0 %5084 }
 0x6cf   : > { %v5090_v32 = vsel %vm955_vm1, %v5085_v58, 0  ;;  %17945 = vmatmul.mubr.msk.bf16.vlgmr.msra.gmra.mrb[176].mxu0 %vm955_vm1, %v4983_v12 }
 0x6d0   : > { %v21776_v5 = vpop.f32.mrb[124].mxu0  ;;  %17955 = vmatpush3.bf16.xpose.msra.mxu0 %v5090_v32  ;;  %17956 = vmatprep.mubr.msk.bf16.mxu0 %vm20267_vm0, %v25704_v11  ;;  %v5423_v12 = vpop.permute.xlu1 %5422 }
 0x6d1   : > { %25771 = vst [vmem:[#allocation49_spill] sm:$0xff] %v21776_v5  ;;  %v17790_v49 = vpop.f32.mrb[125].mxu0  ;;  %17966 = vmatprep.subr.bf16.mxu0 %v25704_v11  ;;  %v5428_v59 = vsel %vm1888_vm2, %v5423_v12, 0 }
 0x6d2   : > { %v3755_v51 = vpop.f32.mrb[126].mxu0  ;;  %v5083_v50 = vpop.permute.xlu0 %5082  ;;  %17939 = vmatmul.mubr.msk.bf16.vlgmr.msra.gmra.mrb[172].mxu1 %vm955_vm1, %v4933_v23  ;;  %v5140_v23 = vsel %vm955_vm1, %v5135_v44, 0 }
 0x6d3   : > { %17949 = vmatpush3.bf16.xpose.msra.mxu1 %v5040_v26  ;;  %v17791_v39 = vpop.f32.mrb[127].mxu0  ;;  %17950 = vmatprep.mubr.msk.bf16.mxu1 %vm20267_vm0, %v25704_v11 }
 0x6d4   : > { %17960 = vmatprep.subr.bf16.mxu1 %v25704_v11 }
 0x6d6   : > { %v5375_v57 = vpop.permute.xlu0 %5374 }
 0x6d7   : > { %v5380_v27 = vsel %vm1888_vm2, %v5375_v57, 0  ;;  %17957 = vmatmul.mubr.msk.bf16.vlgmr.msra.gmra.mrb[180].mxu0 %vm955_vm1, %v5083_v50 }
 0x6d8   : > { %17967 = vmatpush3.bf16.msra.mxu0 %v5380_v27  ;;  %17968 = vmatprep.mubr.msk.bf16.mxu0 %vm20267_vm0, %v25704_v11 }
 0x6d9   : > { %17978 = vmatprep.subr.bf16.mxu0 %v25704_v11 }
 0x6da   : > { %17951 = vmatmul.mubr.msk.bf16.vlgmr.msra.gmra.mrb[176].mxu1 %vm955_vm1, %v5033_v46 }
 0x6db   : > { %17961 = vmatpush3.bf16.xpose.msra.mxu1 %v5140_v23  ;;  %17962 = vmatprep.mubr.msk.bf16.mxu1 %vm20267_vm0, %v25704_v11 }
 0x6dc   : > { %17972 = vmatprep.subr.bf16.mxu1 %v25704_v11 }
 0x6e2   : > { %17963 = vmatmul.mubr.msk.bf16.vlgmr.msra.gmra.mrb[180].mxu1 %vm955_vm1, %v5133_v29 }
 0x6e3   : > { %17973 = vmatpush3.bf16.msra.mxu1 %v5428_v59  ;;  %17974 = vmatprep.mubr.msk.bf16.mxu1 %vm20267_vm0, %v25704_v11 }
 0x6e4   : > { %17984 = vmatprep.subr.bf16.mxu1 %v25704_v11 }
 0x710   : > { %v21801_v58 = vpop.f32.mrb[120].mxu1 }
 0x711   : > { %25772 = vst [vmem:[#allocation48_spill] sm:$0xff] %v21801_v58  ;;  %v17784_v32 = vpop.f32.mrb[121].mxu1 }
 0x712   : > { %v3707_v49 = vpop.f32.mrb[122].mxu1 }
 0x713   : > { %v17785_v26 = vpop.f32.mrb[123].mxu1 }
 0x718   : > { %v21805_v51 = vpop.f32.mrb[124].mxu1 }
 0x719   : > { %25773 = vst [vmem:[#allocation50_spill] sm:$0xff] %v21805_v51  ;;  %v17796_v44 = vpop.f32.mrb[125].mxu1 }
 0x71a   : > { %v3803_v39 = vpop.f32.mrb[126].mxu1 }
 0x71b   : > { %v17797_v57 = vpop.f32.mrb[127].mxu1 }
 0x71c   : > { %v21809_v27 = vpop.f32.mrb[128].mxu0 }
 0x71d   : > { %25774 = vst [vmem:[#allocation51_spill] sm:$0xff] %v21809_v27  ;;  %v17802_v29 = vpop.f32.mrb[129].mxu0 }
 0x71e   : > { %v3851_v23 = vpop.f32.mrb[130].mxu0 }
 0x71f   : > { %v17803_v12 = vpop.f32.mrb[131].mxu0 }
 0x721   : > { %v21811_v59 = vpop.f32.mrb[128].mxu1 }
 0x722   : > { %25775 = vst [vmem:[#allocation52_spill] sm:$0xff] %v21811_v59  ;;  %v17808_v49 = vpop.f32.mrb[129].mxu1 }
 0x723   : > { %v3899_v26 = vpop.f32.mrb[130].mxu1 }
 0x724   : > { %v17809_v46 = vpop.f32.mrb[131].mxu1  ;;  %v21815_v48 = vpop.f32.mrb[132].mxu0 }
 0x725   : > { %25776 = vst [vmem:[#allocation53_spill] sm:$0xff] %v21815_v48  ;;  %v17814_v58 = vpop.f32.mrb[133].mxu0 }
 0x726   : > { %v3947_v50 = vpop.f32.mrb[134].mxu0 }
 0x727   : > { %v17815_v44 = vpop.f32.mrb[135].mxu0 }
 0x729   : > { %v21817_v39 = vpop.f32.mrb[132].mxu1 }
 0x72a   : > { %25777 = vst [vmem:[#allocation54_spill] sm:$0xff] %v21817_v39  ;;  %v17820_v29 = vpop.f32.mrb[133].mxu1 }
 0x72b   : > { %v3995_v23 = vpop.f32.mrb[134].mxu1 }
 0x72c   : > { %v17821_v12 = vpop.f32.mrb[135].mxu1  ;;  %v21821_v5 = vpop.f32.mrb[136].mxu0 }
 0x72d   : > { %25778 = vst [vmem:[#allocation55_spill] sm:$0xff] %v21821_v5  ;;  %v17826_v51 = vpop.f32.mrb[137].mxu0 }
 0x72e   : > { %v4043_v32 = vpop.f32.mrb[138].mxu0 }
 0x72f   : > { %v17827_v49 = vpop.f32.mrb[139].mxu0 }
 0x731   : > { %v21823_v26 = vpop.f32.mrb[136].mxu1 }
 0x732   : > { %25779 = vst [vmem:[#allocation56_spill] sm:$0xff] %v21823_v26  ;;  %v17832_v46 = vpop.f32.mrb[137].mxu1 }
 0x733   : > { %v4091_v50 = vpop.f32.mrb[138].mxu1 }
 0x734   : > { %v17833_v44 = vpop.f32.mrb[139].mxu1  ;;  %v21827_v27 = vpop.f32.mrb[140].mxu0 }
 0x735   : > { %25780 = vst [vmem:[#allocation57_spill] sm:$0xff] %v21827_v27  ;;  %v17838_v59 = vpop.f32.mrb[141].mxu0 }
 0x736   : > { %v4139_v57 = vpop.f32.mrb[142].mxu0 }
 0x737   : > { %v17839_v29 = vpop.f32.mrb[143].mxu0 }
 0x739   : > { %v21829_v23 = vpop.f32.mrb[140].mxu1 }
 0x73a   : > { %25781 = vst [vmem:[#allocation58_spill] sm:$0xff] %v21829_v23  ;;  %v17844_v32 = vpop.f32.mrb[141].mxu1 }
 0x73b   : > { %v4187_v12 = vpop.f32.mrb[142].mxu1 }
 0x73c   : > { %v17845_v49 = vpop.f32.mrb[143].mxu1  ;;  %v21833_v48 = vpop.f32.mrb[144].mxu0 }
 0x73d   : > { %25782 = vst [vmem:[#allocation59_spill] sm:$0xff] %v21833_v48  ;;  %v17850_v39 = vpop.f32.mrb[145].mxu0 }
 0x73e   : > { %v4235_v58 = vpop.f32.mrb[146].mxu0 }
 0x73f   : > { %v17851_v46 = vpop.f32.mrb[147].mxu0 }
 0x741   : > { %v21835_v50 = vpop.f32.mrb[144].mxu1 }
 0x742   : > { %25783 = vst [vmem:[#allocation60_spill] sm:$0xff] %v21835_v50  ;;  %v17856_v57 = vpop.f32.mrb[145].mxu1 }
 0x743   : > { %v4283_v44 = vpop.f32.mrb[146].mxu1 }
 0x744   : > { %v17857_v29 = vpop.f32.mrb[147].mxu1 }
 0x769   : > { %v21839_v5 = vpop.f32.mrb[148].mxu0 }
 0x76a   : > { %25784 = vst [vmem:[#allocation61_spill] sm:$0xff] %v21839_v5  ;;  %v17862_v26 = vpop.f32.mrb[149].mxu0 }
 0x76b   : > { %v4331_v51 = vpop.f32.mrb[150].mxu0 }
 0x76c   : > { %v17863_v32 = vpop.f32.mrb[151].mxu0 }
 0x772   : > { %v21841_v12 = vpop.f32.mrb[152].mxu0 }
 0x773   : > { %v17874_v49 = vpop.f32.mrb[153].mxu0  ;;  %v5182_v39 = vsel %vm1692_vm3, %v21841_v12, -inf }
 0x774   : > { %5183 = vmax.xlane.f32.xlu0 %v5182_v39  ;;  %v4429_v58 = vpop.f32.mrb[154].mxu0 }
 0x775   : > { %v21845_v46 = vpop.f32.mrb[148].mxu1  ;;  %v17875_v27 = vpop.f32.mrb[155].mxu0 }
 0x776   : > { %25785 = vst [vmem:[#allocation62_spill] sm:$0xff] %v21845_v46  ;;  %v17868_v44 = vpop.f32.mrb[149].mxu1 }
 0x777   : > { %v4379_v29 = vpop.f32.mrb[150].mxu1 }
 0x778   : > { %v17869_v59 = vpop.f32.mrb[151].mxu1 }
 0x77a   : > { %v21849_v26 = vpop.f32.mrb[156].mxu0 }
 0x77b   : > { %v17886_v51 = vpop.f32.mrb[157].mxu0  ;;  %v5188_v32 = vsel %vm1692_vm3, %v21849_v26, -inf }
 0x77c   : > { %5189 = vmax.xlane.f32.xlu0 %v5188_v32  ;;  %v4529_v49 = vpop.f32.mrb[158].mxu0 }
 0x77d   : > { %v21853_v48 = vpop.f32.mrb[152].mxu1  ;;  %v17887_v39 = vpop.f32.mrb[159].mxu0 }
 0x77e   : > { %v17880_v58 = vpop.f32.mrb[153].mxu1  ;;  %v5185_v27 = vsel %vm1692_vm3, %v21853_v48, -inf }
 0x77f   : > { %5186 = vmax.xlane.f32.xlu1 %v5185_v27  ;;  %v4479_v57 = vpop.f32.mrb[154].mxu1 }
 0x780   : > { %v17881_v44 = vpop.f32.mrb[155].mxu1 }
 0x782   : > { %v21857_v29 = vpop.f32.mrb[160].mxu0 }
 0x783   : > { %v17898_v59 = vpop.f32.mrb[161].mxu0  ;;  %v5194_v57 = vsel %vm1692_vm3, %v21857_v29, -inf }
 0x784   : > { %v4629_v5 = vpop.f32.mrb[162].mxu0 }
 0x785   : > { %v21859_v51 = vpop.f32.mrb[156].mxu1  ;;  %v17899_v46 = vpop.f32.mrb[163].mxu0 }
 0x786   : > { %v17892_v50 = vpop.f32.mrb[157].mxu1  ;;  %v5191_v32 = vsel %vm1692_vm3, %v21859_v51, -inf }
 0x787   : > { %5192 = vmax.xlane.f32.xlu0 %v5191_v32  ;;  %v4579_v49 = vpop.f32.mrb[158].mxu1 }
 0x788   : > { %v17893_v39 = vpop.f32.mrb[159].mxu1 }
 0x78a   : > { %v21863_v58 = vpop.f32.mrb[164].mxu0 }
 0x78b   : > { %v17910_v27 = vpop.f32.mrb[165].mxu0  ;;  %5195 = vmax.xlane.f32.xlu0 %v5194_v57  ;;  %v5200_v50 = vsel %vm1692_vm3, %v21863_v58, -inf }
 0x78c   : > { %v4729_v44 = vpop.f32.mrb[166].mxu0 }
 0x78d   : > { %v21867_v59 = vpop.f32.mrb[160].mxu1  ;;  %v17911_v5 = vpop.f32.mrb[167].mxu0 }
 0x78e   : > { %v17904_v23 = vpop.f32.mrb[161].mxu1  ;;  %v5197_v46 = vsel %vm1692_vm3, %v21867_v59, -inf }
 0x78f   : > { %5201 = vmax.xlane.f32.xlu0 %v5200_v50  ;;  %5198 = vmax.xlane.f32.xlu1 %v5197_v46  ;;  %v4679_v32 = vpop.f32.mrb[162].mxu1 }
 0x790   : > { %v17905_v49 = vpop.f32.mrb[163].mxu1 }
 0x792   : > { %v21873_v39 = vpop.f32.mrb[168].mxu0 }
 0x793   : > { %v17922_v60 = vpop.f32.mrb[169].mxu0  ;;  %v5206_v57 = vsel %vm1692_vm3, %v21873_v39, -inf }
 0x794   : > { %v4829_v27 = vpop.f32.mrb[170].mxu0  ;;  %5207 = vmax.xlane.f32.xlu0 %v5206_v57 }
 0x795   : > { %v21877_v44 = vpop.f32.mrb[164].mxu1  ;;  %v17923_v23 = vpop.f32.mrb[171].mxu0 }
 0x796   : > { %v17916_v5 = vpop.f32.mrb[165].mxu1  ;;  %v5203_v4 = vsel %vm1692_vm3, %v21877_v44, -inf }
 0x797   : > { %5204 = vmax.xlane.f32.xlu1 %v5203_v4  ;;  %v4779_v50 = vpop.f32.mrb[166].mxu1 }
 0x798   : > { %v17917_v46 = vpop.f32.mrb[167].mxu1 }
 0x79a   : > { %v21881_v32 = vpop.f32.mrb[172].mxu0 }
 0x79b   : > { %v17934_v49 = vpop.f32.mrb[173].mxu0  ;;  %v5212_v60 = vsel %vm1692_vm3, %v21881_v32, -inf }
 0x79c   : > { %v4929_v1 = vpop.f32.mrb[174].mxu0  ;;  %5213 = vmax.xlane.f32.xlu0 %v5212_v60 }
 0x79d   : > { %v21885_v27 = vpop.f32.mrb[168].mxu1  ;;  %v17935_v57 = vpop.f32.mrb[175].mxu0 }
 0x79e   : > { %v17928_v20 = vpop.f32.mrb[169].mxu1  ;;  %v5209_v23 = vsel %vm1692_vm3, %v21885_v27, -inf }
 0x79f   : > { %5210 = vmax.xlane.f32.xlu1 %v5209_v23  ;;  %v4879_v5 = vpop.f32.mrb[170].mxu1 }
 0x7a0   : > { %v17929_v4 = vpop.f32.mrb[171].mxu1 }
 0x7a2   : > { %v21889_v50 = vpop.f32.mrb[176].mxu0 }
 0x7a3   : > { %v17946_v46 = vpop.f32.mrb[177].mxu0  ;;  %v5218_v49 = vsel %vm1692_vm3, %v21889_v50, -inf }
 0x7a4   : > { %v5029_v45 = vpop.f32.mrb[178].mxu0  ;;  %5219 = vmax.xlane.f32.xlu0 %v5218_v49 }
 0x7a5   : > { %v21893_v1 = vpop.f32.mrb[172].mxu1  ;;  %v17947_v60 = vpop.f32.mrb[179].mxu0 }
 0x7a6   : > { %v17940_v62 = vpop.f32.mrb[173].mxu1  ;;  %v5215_v20 = vsel %vm1692_vm3, %v21893_v1, -inf }
 0x7a7   : > { %5216 = vmax.xlane.f32.xlu1 %v5215_v20  ;;  %v4979_v57 = vpop.f32.mrb[174].mxu1 }
 0x7a8   : > { %v17941_v23 = vpop.f32.mrb[175].mxu1 }
 0x7aa   : > { %v21897_v5 = vpop.f32.mrb[180].mxu0 }
 0x7ab   : > { %v17958_v4 = vpop.f32.mrb[181].mxu0  ;;  %v5224_v46 = vsel %vm1692_vm3, %v21897_v5, -inf }
 0x7ac   : > { %v5129_v14 = vpop.f32.mrb[182].mxu0  ;;  %5225 = vmax.xlane.f32.xlu0 %v5224_v46  ;;  %v21913_v46 = vpop.permute.xlu1 %5518 }
 0x7ad   : > { %v21901_v45 = vpop.f32.mrb[176].mxu1  ;;  %v17959_v49 = vpop.f32.mrb[183].mxu0  ;;  %v25787_v14 = vld [vmem:[#allocation40_spill] sm:$0xff] }
 0x7ae   : > { %v17952_v53 = vpop.f32.mrb[177].mxu1  ;;  %v5221_v62 = vsel %vm1692_vm3, %v21901_v45, -inf  ;;  %v21915_v49 = vpop.permute.xlu0 %5470 }
 0x7af   : > { %5222 = vmax.xlane.f32.xlu1 %v5221_v62  ;;  %v5079_v60 = vpop.f32.mrb[178].mxu1 }
 0x7b0   : > { %v17953_v20 = vpop.f32.mrb[179].mxu1  ;;  %v21917_v62 = vpop.permute.xlu1 %5614 }
 0x7b2   : > { %v21919_v60 = vpop.permute.xlu0 %5566 }
 0x7b5   : > { %v21905_v57 = vpop.f32.mrb[180].mxu1 }
 0x7b6   : > { %v17964_v23 = vpop.f32.mrb[181].mxu1  ;;  %v5227_v53 = vsel %vm1692_vm3, %v21905_v57, -inf  ;;  %v21923_v20 = vpop.permute.xlu0 %5662 }
 0x7b7   : > { %v5179_v8 = vpop.f32.mrb[182].mxu1  ;;  %25789 = vst [vmem:[#allocation64_spill] sm:$0xff] %v21923_v20 }
 0x7b8   : > { %v17965_v4 = vpop.f32.mrb[183].mxu1  ;;  %v21921_v8 = vpop.permute.xlu1 %5710 }
 0x7b9   : > { %25788 = vst [vmem:[#allocation63_spill] sm:$0xff] %v21921_v8 }
 0x7ba   : > { %v21927_v4 = vpop.permute.xlu0 %5758 }
 0x7bc   : > { %v21925_v23 = vpop.permute.xlu1 %5806 }
 0x7bd   : > { %25790 = vst [vmem:[#allocation65_spill] sm:$0xff] %v21925_v23 }
 0x7c0   : > { %5998 = vrot.lane.b32.xlu1 %v25786_v33, %s20269_s22  ;;  %v21929_v33 = vpop.permute.xlu1 %5854 }
 0x7c1   : > { %25791 = vst [vmem:[#allocation66_spill] sm:$0xff] %v21929_v33 }
 0x7c2   : > { %5950 = vrot.lane.b32.xlu0 %v25787_v14, %s20269_s22 }
 0x7c4   : > { %v21932_v37 = vpop.permute.xlu1 %5902 }
 0x7e4   : > { %5228 = vmax.xlane.f32.xlu1 %v5227_v53 }
 0x801   : > { %v5184_v14 = vpop.xlane.xlu0 %5183 }
 0x802   : > { %v5230_v53 = vsub.f32 %v21841_v12, %v5184_v14 }
 0x804   : > { %v5246_v18 = vmul.f32 1.442695, %v5230_v53 }
 0x806   : > { %19602 = vpow2.f32 %v5246_v18 }
 0x809   : > { %v5190_v16 = vpop.xlane.xlu0 %5189 }
 0x80a   : > { %v5232_v56 = vsub.f32 %v21849_v26, %v5190_v16 }
 0x80c   : > { %v5250_v41 = vmul.f32 1.442695, %v5232_v56  ;;  %v5187_v8 = vpop.xlane.xlu1 %5186 }
 0x80d   : > { %v5231_v35 = vsub.f32 %v21853_v48, %v5187_v8 }
 0x80e   : > { %19604 = vpow2.f32 %v5250_v41 }
 0x80f   : > { %v5248_v23 = vmul.f32 1.442695, %v5231_v35 }
 0x810   : > { %v21936_v20 = vpop.eup %19602 }
 0x811   : > { %19606 = vpow2.f32 %v5248_v23  ;;  %v5278_v33 = vsel %vm1692_vm3, %v21936_v20, 0.0 }
 0x812   : > { %5279 = vadd.xlane.f32.xlu0 %v5278_v33 }
 0x814   : > { %v5193_v12 = vpop.xlane.xlu0 %5192 }
 0x815   : > { %v5233_v18 = vsub.f32 %v21859_v51, %v5193_v12 }
 0x817   : > { %v5252_v14 = vmul.f32 1.442695, %v5233_v18 }
 0x818   : > { %v21941_v53 = vpop.eup %19604  ;;  %v5196_v16 = vpop.xlane.xlu0 %5195 }
 0x819   : > { %19608 = vpow2.f32 %v5252_v14  ;;  %v5234_v56 = vsub.f32 %v21857_v29, %v5196_v16  ;;  %v5284_v35 = vsel %vm1692_vm3, %v21941_v53, 0.0 }
 0x81a   : > { %5285 = vadd.xlane.f32.xlu0 %v5284_v35 }
 0x81b   : > { %v21946_v41 = vpop.eup %19606  ;;  %v5254_v48 = vmul.f32 1.442695, %v5234_v56 }
 0x81c   : > { %v5202_v26 = vpop.xlane.xlu0 %5201  ;;  %v5199_v8 = vpop.xlane.xlu1 %5198  ;;  %v5281_v33 = vsel %vm1692_vm3, %v21946_v41, 0.0 }
 0x81d   : > { %19610 = vpow2.f32 %v5254_v48  ;;  %v5236_v51 = vsub.f32 %v21863_v58, %v5202_v26  ;;  %v5235_v23 = vsub.f32 %v21867_v59, %v5199_v8  ;;  %5282 = vadd.xlane.f32.xlu1 %v5281_v33 }
 0x81f   : > { %v5258_v12 = vmul.f32 1.442695, %v5236_v51  ;;  %v5256_v29 = vmul.f32 1.442695, %v5235_v23 }
 0x821   : > { %19612 = vpow2.f32 %v5258_v12  ;;  %v5208_v18 = vpop.xlane.xlu0 %5207 }
 0x822   : > { %19614 = vpow2.f32 %v5256_v29  ;;  %v5238_v16 = vsub.f32 %v21873_v39, %v5208_v18 }
 0x823   : > { %v21952_v14 = vpop.eup %19608 }
 0x824   : > { %v5205_v56 = vpop.xlane.xlu1 %5204  ;;  %v5287_v35 = vsel %vm1692_vm3, %v21952_v14, 0.0  ;;  %v5262_v59 = vmul.f32 1.442695, %v5238_v16 }
 0x825   : > { %v5237_v48 = vsub.f32 %v21877_v44, %v5205_v56  ;;  %5288 = vadd.xlane.f32.xlu1 %v5287_v35 }
 0x827   : > { %v21958_v58 = vpop.eup %19610  ;;  %v5260_v26 = vmul.f32 1.442695, %v5237_v48 }
 0x828   : > { %v5290_v8 = vsel %vm1692_vm3, %v21958_v58, 0.0 }
 0x829   : > { %19616 = vpow2.f32 %v5260_v26  ;;  %5291 = vadd.xlane.f32.xlu0 %v5290_v8  ;;  %v5214_v33 = vpop.xlane.xlu0 %5213 }
 0x82a   : > { %v5240_v51 = vsub.f32 %v21881_v32, %v5214_v33  ;;  %19618 = vpow2.f32 %v5262_v59 }
 0x82b   : > { %v21963_v39 = vpop.eup %19612 }
 0x82c   : > { %v21965_v23 = vpop.eup %19614  ;;  %v5266_v12 = vmul.f32 1.442695, %v5240_v51  ;;  %v5211_v44 = vpop.xlane.xlu1 %5210  ;;  %v5296_v29 = vsel %vm1692_vm3, %v21963_v39, 0.0 }
 0x82d   : > { %v5239_v18 = vsub.f32 %v21885_v27, %v5211_v44  ;;  %5297 = vadd.xlane.f32.xlu0 %v5296_v29  ;;  %v5293_v16 = vsel %vm1692_vm3, %v21965_v23, 0.0 }
 0x82e   : > { %5294 = vadd.xlane.f32.xlu1 %v5293_v16  ;;  %19620 = vpow2.f32 %v5266_v12 }
 0x82f   : > { %v5264_v56 = vmul.f32 1.442695, %v5239_v18 }
 0x831   : > { %19622 = vpow2.f32 %v5264_v56  ;;  %v5220_v32 = vpop.xlane.xlu0 %5219 }
 0x832   : > { %v5242_v35 = vsub.f32 %v21889_v50, %v5220_v32 }
 0x833   : > { %v21973_v48 = vpop.eup %19616 }
 0x834   : > { %v5270_v59 = vmul.f32 1.442695, %v5242_v35  ;;  %v5217_v26 = vpop.xlane.xlu1 %5216  ;;  %v5299_v8 = vsel %vm1692_vm3, %v21973_v48, 0.0  ;;  %v21977_v33 = vpop.eup %19618 }
 0x835   : > { %v5241_v27 = vsub.f32 %v21893_v1, %v5217_v26  ;;  %5300 = vadd.xlane.f32.xlu1 %v5299_v8  ;;  %v5302_v12 = vsel %vm1692_vm3, %v21977_v33, 0.0 }
 0x836   : > { %19624 = vpow2.f32 %v5270_v59 }
 0x837   : > { %v5268_v51 = vmul.f32 1.442695, %v5241_v27 }
 0x838   : > { %v21982_v44 = vpop.eup %19620 }
 0x839   : > { %19626 = vpow2.f32 %v5268_v51  ;;  %5303 = vadd.xlane.f32.xlu1 %v5302_v12  ;;  %v5308_v16 = vsel %vm1692_vm3, %v21982_v44, 0.0  ;;  %v5226_v27 = vpop.xlane.xlu0 %5225 }
 0x83a   : > { %v5244_v51 = vsub.f32 %v21897_v5, %v5226_v27 }
 0x83b   : > { %v21984_v50 = vpop.eup %19622 }
 0x83c   : > { %v5223_v29 = vpop.xlane.xlu1 %5222  ;;  %v5305_v18 = vsel %vm1692_vm3, %v21984_v50, 0.0  ;;  %v5274_v12 = vmul.f32 1.442695, %v5244_v51 }
 0x83d   : > { %v5243_v1 = vsub.f32 %v21901_v45, %v5223_v29  ;;  %5306 = vadd.xlane.f32.xlu0 %v5305_v18  ;;  %5309 = vadd.xlane.f32.xlu1 %v5308_v16 }
 0x83f   : > { %v5272_v56 = vmul.f32 1.442695, %v5243_v1 }
 0x840   : > { %v21991_v32 = vpop.eup %19624  ;;  %v22008_v29 = vpop.permute.xlu1 %5998 }
 0x841   : > { %19628 = vpow2.f32 %v5272_v56  ;;  %v5314_v35 = vsel %vm1692_vm3, %v21991_v32, 0.0 }
 0x842   : > { %5315 = vadd.xlane.f32.xlu1 %v5314_v35  ;;  %19630 = vpow2.f32 %v5274_v12 }
 0x843   : > { %v21995_v59 = vpop.eup %19626 }
 0x844   : > { %v5311_v26 = vsel %vm1692_vm3, %v21995_v59, 0.0 }
 0x845   : > { %5312 = vadd.xlane.f32.xlu0 %v5311_v26 }
 0x84b   : > { %v21999_v8 = vpop.eup %19628 }
 0x84c   : > { %v5317_v45 = vsel %vm1692_vm3, %v21999_v8, 0.0  ;;  %v22011_v1 = vpop.eup %19630 }
 0x84d   : > { %5318 = vadd.xlane.f32.xlu0 %v5317_v45  ;;  %v5320_v35 = vsel %vm1692_vm3, %v22011_v1, 0.0 }
 0x853   : > { %6094 = vrot.lane.b32.xlu1 %v21220_v40, %s20269_s22 }
 0x863   : > { %6046 = vrot.lane.b32.xlu0 %v21158_v34, %s20269_s22 }
 0x871   : > { %v5229_v18 = vpop.xlane.xlu1 %5228 }
 0x872   : > { %v5245_v16 = vsub.f32 %v21905_v57, %v5229_v18  ;;  %v22031_v57 = vpop.permute.xlu0 %5950 }
 0x874   : > { %v5276_v56 = vmul.f32 1.442695, %v5245_v16 }
 0x876   : > { %19632 = vpow2.f32 %v5276_v56  ;;  %v5476_v56 = vsel %vm1888_vm2, %v21915_v49, 0 }
 0x877   : > { %5321 = vadd.xlane.f32.xlu1 %v5320_v35 }
 0x880   : > { %v22015_v26 = vpop.eup %19632 }
 0x881   : > { %v5323_v5 = vsel %vm1692_vm3, %v22015_v26, 0.0 }
 0x882   : > { %5324 = vadd.xlane.f32.xlu0 %v5323_v5 }
 0x888   : > { %6194 = vrot.lane.b32.xlu1 %v20561_v6, %s20270_s24 }
 0x88c   : > { %6192 = vrot.lane.b32.xlu1 %v20592_v28, %s20270_s24 }
 0x890   : > { %6294 = vrot.lane.b32.xlu1 %v20607_v38, %s20270_s24 }
 0x894   : > { %6292 = vrot.lane.b32.xlu1 %v20665_v21, %s20270_s24 }
 0x898   : > { %6394 = vrot.lane.b32.xlu1 %v20646_v2, %s20270_s24  ;;  %6144 = vrot.lane.b32.xlu0 %v20555_v63, %s20270_s24 }
 0x89c   : > { %6392 = vrot.lane.b32.xlu1 %v20704_v61, %s20270_s24  ;;  %6142 = vrot.lane.b32.xlu0 %v20563_v9, %s20270_s24 }
 0x89f   : > { %v5280_v45 = vpop.xlane.xlu0 %5279 }
 0x8a0   : > { %19634 = vrcp.f32 %v5280_v45  ;;  %6494 = vrot.lane.b32.xlu1 %v20687_v36, %s20270_s24  ;;  %6244 = vrot.lane.b32.xlu0 %v20575_v15, %s20270_s24 }
 0x8a4   : > { %6492 = vrot.lane.b32.xlu1 %v25712_v47, %s20270_s24  ;;  %6242 = vrot.lane.b32.xlu0 %v20625_v52, %s20270_s24 }
 0x8a7   : > { %v5286_v27 = vpop.xlane.xlu0 %5285 }
 0x8a8   : > { %19636 = vrcp.f32 %v5286_v27  ;;  %6594 = vrot.lane.b32.xlu1 %v25713_v17, %s20270_s24  ;;  %6344 = vrot.lane.b32.xlu0 %v20595_v30, %s20270_s24 }
 0x8aa   : > { %v19635_v51 = vpop.eup %19634  ;;  %v5283_v12 = vpop.xlane.xlu1 %5282 }
 0x8ab   : > { %19638 = vrcp.f32 %v5283_v12  ;;  %v5342_v18 = vmul.f32 %v19635_v51, %v21936_v20  ;;  %v5572_v12 = vsel %vm1888_vm2, %v21919_v60, 0 }
 0x8ac   : > { %6592 = vrot.lane.b32.xlu1 %v25717_v19, %s20270_s24  ;;  %6342 = vrot.lane.b32.xlu0 %v20613_v42, %s20270_s24 }
 0x8ad   : > { %v5358_v16 = vpack.c.bf16 %v5342_v18, %v5342_v18 }
 0x8af   : > { %17969 = vmatmul.mubr.msk.bf16.vlgmr.msra.gmra.mrb[184].mxu0 %vm1692_vm3, %v5358_v16 }
 0x8b0   : > { %17979 = vmatpush3.bf16.msra.mxu0 %v5476_v56  ;;  %6694 = vrot.lane.b32.xlu1 %v25718_v25, %s20270_s24 }
 0x8b1   : > { %6444 = vrot.lane.b32.xlu0 %v20628_v54, %s20270_s24  ;;  %17980 = vmatprep.mubr.msk.bf16.mxu0 %vm20267_vm0, %v25704_v11 }
 0x8b2   : > { %v19637_v20 = vpop.eup %19636  ;;  %v5289_v35 = vpop.xlane.xlu1 %5288  ;;  %17990 = vmatprep.subr.bf16.mxu0 %v25704_v11 }
 0x8b3   : > { %19640 = vrcp.f32 %v5289_v35  ;;  %v5344_v5 = vmul.f32 %v19637_v20, %v21941_v53  ;;  %v5620_v35 = vsel %vm1888_vm2, %v21917_v62, 0 }
 0x8b4   : > { %6692 = vrot.lane.b32.xlu1 %v25719_v3, %s20270_s24 }
 0x8b5   : > { %v19639_v49 = vpop.eup %19638  ;;  %6442 = vrot.lane.b32.xlu0 %v20653_v7, %s20270_s24  ;;  %v5360_v45 = vpack.c.bf16 %v5344_v5, %v5344_v5 }
 0x8b6   : > { %v5292_v27 = vpop.xlane.xlu0 %5291  ;;  %v5343_v51 = vmul.f32 %v19639_v49, %v21946_v41  ;;  %v5524_v41 = vsel %vm1888_vm2, %v21913_v46, 0 }
 0x8b7   : > { %19642 = vrcp.f32 %v5292_v27  ;;  %17981 = vmatmul.mubr.msk.bf16.vlgmr.msra.gmra.mrb[188].mxu0 %vm1692_vm3, %v5360_v45  ;;  %v25792_v27 = vld [vmem:[#allocation64_spill] sm:$0xff] }
 0x8b8   : > { %17991 = vmatpush3.bf16.msra.mxu0 %v5572_v12  ;;  %6794 = vrot.lane.b32.xlu1 %v25720_v31, %s20270_s24  ;;  %v5359_v53 = vpack.c.bf16 %v5343_v51, %v5343_v51  ;;  %v5668_v51 = vsel %vm1888_vm2, %v25792_v27, 0 }
 0x8b9   : > { %6544 = vrot.lane.b32.xlu0 %v20669_v24, %s20270_s24  ;;  %17992 = vmatprep.mubr.msk.bf16.mxu0 %vm20267_vm0, %v25704_v11 }
 0x8ba   : > { %v5298_v18 = vpop.xlane.xlu0 %5297  ;;  %17975 = vmatmul.mubr.msk.bf16.vlgmr.msra.gmra.mrb[184].mxu1 %vm1692_vm3, %v5359_v53  ;;  %18002 = vmatprep.subr.bf16.mxu0 %v25704_v11  ;;  %v25793_v53 = vld [vmem:[#allocation29_spill] sm:$0xff] }
 0x8bb   : > { %19644 = vrcp.f32 %v5298_v18  ;;  %17985 = vmatpush3.bf16.msra.mxu1 %v5524_v41  ;;  %v5295_v60 = vpop.xlane.xlu1 %5294  ;;  %17986 = vmatprep.mubr.msk.bf16.mxu1 %vm20267_vm0, %v25704_v11  ;;  %v25794_v18 = vld [vmem:[#allocation18_spill] sm:$0xff] }
 0x8bc   : > { %19646 = vrcp.f32 %v5295_v60  ;;  %6792 = vrot.lane.b32.xlu1 %v25721_v13, %s20270_s24  ;;  %17996 = vmatprep.subr.bf16.mxu1 %v25704_v11 }
 0x8bd   : > { %v19641_v16 = vpop.eup %19640  ;;  %6542 = vrot.lane.b32.xlu0 %v20694_v43, %s20270_s24 }
 0x8be   : > { %v5345_v46 = vmul.f32 %v19641_v16, %v21952_v14 }
 0x8c0   : > { %6894 = vrot.lane.b32.xlu1 %v25722_v10, %s20270_s24  ;;  %v5361_v56 = vpack.c.bf16 %v5345_v46, %v5345_v46 }
 0x8c1   : > { %v19643_v20 = vpop.eup %19642  ;;  %6644 = vrot.lane.b32.xlu0 %v20708_v0, %s20270_s24 }
 0x8c2   : > { %17987 = vmatmul.mubr.msk.bf16.vlgmr.msra.gmra.mrb[188].mxu1 %vm1692_vm3, %v5361_v56  ;;  %v5301_v5 = vpop.xlane.xlu1 %5300  ;;  %v5346_v49 = vmul.f32 %v19643_v20, %v21958_v58  ;;  %v25795_v56 = vld [vmem:[#allocation63_spill] sm:$0xff] }
 0x8c3   : > { %17997 = vmatpush3.bf16.msra.mxu1 %v5620_v35  ;;  %19648 = vrcp.f32 %v5301_v5  ;;  %17998 = vmatprep.mubr.msk.bf16.mxu1 %vm20267_vm0, %v25704_v11  ;;  %v5716_v20 = vsel %vm1888_vm2, %v25795_v56, 0  ;;  %v25802_v56 = vld [vmem:[#allocation25_spill] sm:$0xff] }
 0x8c4   : > { %6892 = vrot.lane.b32.xlu1 %v25723_v55, %s20270_s24  ;;  %v5362_v14 = vpack.c.bf16 %v5346_v49, %v5346_v49  ;;  %18008 = vmatprep.subr.bf16.mxu1 %v25704_v11  ;;  %v5764_v49 = vsel %vm1888_vm2, %v21927_v4, 0  ;;  %v25799_v4 = vld [vmem:[#allocation22_spill] sm:$0xff] }
 0x8c5   : > { %v19645_v45 = vpop.eup %19644  ;;  %6642 = vrot.lane.b32.xlu0 %v20730_v22, %s20270_s24 }
 0x8c6   : > { %v19647_v62 = vpop.eup %19646  ;;  %17993 = vmatmul.mubr.msk.bf16.vlgmr.msra.gmra.mrb[192].mxu0 %vm1692_vm3, %v5362_v14  ;;  %v5304_v58 = vpop.xlane.xlu1 %5303  ;;  %v5348_v41 = vmul.f32 %v19645_v45, %v21963_v39  ;;  %v25797_v39 = vld [vmem:[#allocation20_spill] sm:$0xff] }
 0x8c7   : > { %18003 = vmatpush3.bf16.msra.mxu0 %v5668_v51  ;;  %19650 = vrcp.f32 %v5304_v58  ;;  %v5347_v12 = vmul.f32 %v19647_v62, %v21965_v23  ;;  %18004 = vmatprep.mubr.msk.bf16.mxu0 %vm20267_vm0, %v25704_v11  ;;  %v25796_v23 = vld [vmem:[#allocation35_spill] sm:$0xff]  ;;  %v25798_v62 = vld [vmem:[#allocation36_spill] sm:$0xff] }
 0x8c8   : > { %7182 = vrot.lane.b32.xlu1 %v25793_v53, %s20270_s24  ;;  %18014 = vmatprep.subr.bf16.mxu0 %v25704_v11  ;;  %v5364_v35 = vpack.c.bf16 %v5348_v41, %v5348_v41 }
 0x8c9   : > { %6744 = vrot.lane.b32.xlu0 %v25794_v18, %s20270_s24  ;;  %v5363_v60 = vpack.c.bf16 %v5347_v12, %v5347_v12 }
 0x8ca   : > { %v5307_v16 = vpop.xlane.xlu0 %5306  ;;  %v5310_v46 = vpop.xlane.xlu1 %5309 }
 0x8cb   : > { %19652 = vrcp.f32 %v5307_v16  ;;  %17999 = vmatmul.mubr.msk.bf16.vlgmr.msra.gmra.mrb[192].mxu1 %vm1692_vm3, %v5363_v60  ;;  %v25801_v60 = vld [vmem:[#allocation37_spill] sm:$0xff] }
 0x8cc   : > { %18009 = vmatpush3.bf16.msra.mxu1 %v5716_v20  ;;  %19654 = vrcp.f32 %v5310_v46  ;;  %7278 = vrot.lane.b32.xlu1 %v25796_v23, %s20270_s24 }
 0x8cd   : > { %v19649_v5 = vpop.eup %19648  ;;  %6742 = vrot.lane.b32.xlu0 %v25797_v39, %s20270_s24  ;;  %18010 = vmatprep.mubr.msk.bf16.mxu1 %vm20267_vm0, %v25704_v11 }
 0x8ce   : > { %18005 = vmatmul.mubr.msk.bf16.vlgmr.msra.gmra.mrb[196].mxu0 %vm1692_vm3, %v5364_v35  ;;  %18020 = vmatprep.subr.bf16.mxu1 %v25704_v11  ;;  %v5349_v14 = vmul.f32 %v19649_v5, %v21973_v48  ;;  %v25800_v48 = vld [vmem:[#allocation65_spill] sm:$0xff] }
 0x8cf   : > { %18015 = vmatpush3.bf16.msra.mxu0 %v5764_v49  ;;  %v5316_v45 = vpop.xlane.xlu1 %5315  ;;  %18016 = vmatprep.mubr.msk.bf16.mxu0 %vm20267_vm0, %v25704_v11  ;;  %v5812_v41 = vsel %vm1888_vm2, %v25800_v48, 0  ;;  %v25804_v49 = vld [vmem:[#allocation39_spill] sm:$0xff] }
 0x8d0   : > { %7374 = vrot.lane.b32.xlu1 %v25798_v62, %s20270_s24  ;;  %v5365_v27 = vpack.c.bf16 %v5349_v14, %v5349_v14  ;;  %18026 = vmatprep.subr.bf16.mxu0 %v25704_v11  ;;  %19656 = vrcp.f32 %v5316_v45 }
 0x8d1   : > { %v19651_v51 = vpop.eup %19650  ;;  %6844 = vrot.lane.b32.xlu0 %v25799_v4, %s20270_s24 }
 0x8d2   : > { %v5313_v58 = vpop.xlane.xlu0 %5312  ;;  %v5350_v12 = vmul.f32 %v19651_v51, %v21977_v33  ;;  %v25803_v33 = vld [vmem:[#allocation66_spill] sm:$0xff] }
 0x8d3   : > { %19658 = vrcp.f32 %v5313_v58  ;;  %18011 = vmatmul.mubr.msk.bf16.vlgmr.msra.gmra.mrb[196].mxu1 %vm1692_vm3, %v5365_v27  ;;  %v5860_v35 = vsel %vm1888_vm2, %v25803_v33, 0  ;;  %v25805_v27 = vld [vmem:[#allocation24_spill] sm:$0xff]  ;;  %v5908_v58 = vsel %vm1888_vm2, %v21932_v37, 0 }
 0x8d4   : > { %18021 = vmatpush3.bf16.msra.mxu1 %v5812_v41  ;;  %7470 = vrot.lane.b32.xlu1 %v25801_v60, %s20270_s24  ;;  %v5366_v16 = vpack.c.bf16 %v5350_v12, %v5350_v12  ;;  %v25806_v12 = vld [vmem:[#allocation38_spill] sm:$0xff]  ;;  %v25828_v60 = vld [vmem:[#allocation17_spill] sm:$0xff] }
 0x8d5   : > { %v19653_v46 = vpop.eup %19652  ;;  %6842 = vrot.lane.b32.xlu0 %v25802_v56, %s20270_s24  ;;  %18022 = vmatprep.mubr.msk.bf16.mxu1 %vm20267_vm0, %v25704_v11 }
 0x8d6   : > { %v19655_v20 = vpop.eup %19654  ;;  %18017 = vmatmul.mubr.msk.bf16.vlgmr.msra.gmra.mrb[200].mxu0 %vm1692_vm3, %v5366_v16  ;;  %18032 = vmatprep.subr.bf16.mxu1 %v25704_v11  ;;  %v5351_v5 = vmul.f32 %v19653_v46, %v21984_v50  ;;  %v25807_v16 = vld [vmem:[#allocation31_spill] sm:$0xff]  ;;  %v25808_v46 = vld [vmem:[#allocation41_spill] sm:$0xff] }
 0x8d7   : > { %18027 = vmatpush3.bf16.msra.mxu0 %v5860_v35  ;;  %18028 = vmatprep.mubr.msk.bf16.mxu0 %vm20267_vm0, %v25704_v11  ;;  %v5352_v45 = vmul.f32 %v19655_v20, %v21982_v44  ;;  %v5956_v44 = vsel %vm1888_vm2, %v22031_v57, 0  ;;  %v25809_v57 = vld [vmem:[#allocation32_spill] sm:$0xff]  ;;  %v6004_v35 = vsel %vm1888_vm2, %v22008_v29, 0 }
 0x8d8   : > { %7566 = vrot.lane.b32.xlu1 %v25804_v49, %s20270_s24  ;;  %v5367_v14 = vpack.c.bf16 %v5351_v5, %v5351_v5  ;;  %18038 = vmatprep.subr.bf16.mxu0 %v25704_v11 }
 0x8d9   : > { %7134 = vrot.lane.b32.xlu0 %v25805_v27, %s20270_s24  ;;  %v5368_v48 = vpack.c.bf16 %v5352_v45, %v5352_v45  ;;  %v25810_v45 = vld [vmem:[#allocation33_spill] sm:$0xff] }
 0x8da   : > { %v5319_v51 = vpop.xlane.xlu0 %5318  ;;  %v19657_v50 = vpop.eup %19656 }
 0x8db   : > { %19660 = vrcp.f32 %v5319_v51  ;;  %18023 = vmatmul.mubr.msk.bf16.vlgmr.msra.gmra.mrb[200].mxu1 %vm1692_vm3, %v5367_v14  ;;  %v5354_v33 = vmul.f32 %v19657_v50, %v21991_v32  ;;  %v6095_v51 = vpop.permute.xlu1 %6094  ;;  %v25811_v50 = vld [vmem:[#allocation34_spill] sm:$0xff] }
 0x8dc   : > { %18033 = vmatpush3.bf16.msra.mxu1 %v5908_v58  ;;  %7614 = vrot.lane.b32.xlu1 %v25806_v12, %s20270_s24 }
 0x8dd   : > { %v19659_v41 = vpop.eup %19658  ;;  %7230 = vrot.lane.b32.xlu0 %v25807_v16, %s20270_s24  ;;  %18034 = vmatprep.mubr.msk.bf16.mxu1 %vm20267_vm0, %v25704_v11 }
 0x8de   : > { %18029 = vmatmul.mubr.msk.bf16.vlgmr.msra.gmra.mrb[204].mxu0 %vm1692_vm3, %v5368_v48  ;;  %18044 = vmatprep.subr.bf16.mxu1 %v25704_v11  ;;  %v5353_v37 = vmul.f32 %v19659_v41, %v21995_v59  ;;  %v6047_v5 = vpop.permute.xlu0 %6046  ;;  %v5370_v59 = vpack.c.bf16 %v5354_v33, %v5354_v33  ;;  %v6100_v48 = vsel %vm1888_vm2, %v6095_v51, 0 }
 0x8df   : > { %18039 = vmatpush3.bf16.msra.mxu0 %v5956_v44  ;;  %18040 = vmatprep.mubr.msk.bf16.mxu0 %vm20267_vm0, %v25704_v11  ;;  %v6052_v32 = vsel %vm1888_vm2, %v6047_v5, 0 }
 0x8e0   : > { %7662 = vrot.lane.b32.xlu1 %v25808_v46, %s20270_s24  ;;  %v5369_v20 = vpack.c.bf16 %v5353_v37, %v5353_v37  ;;  %18050 = vmatprep.subr.bf16.mxu0 %v25704_v11 }
 0x8e1   : > { %7326 = vrot.lane.b32.xlu0 %v25809_v57, %s20270_s24 }
 0x8e3   : > { %18035 = vmatmul.mubr.msk.bf16.vlgmr.msra.gmra.mrb[204].mxu1 %vm1692_vm3, %v5369_v20 }
 0x8e4   : > { %18045 = vmatpush3.bf16.msra.mxu1 %v6004_v35  ;;  %18046 = vmatprep.mubr.msk.bf16.mxu1 %vm20267_vm0, %v25704_v11 }
 0x8e5   : > { %v19661_v14 = vpop.eup %19660  ;;  %7422 = vrot.lane.b32.xlu0 %v25810_v45, %s20270_s24  ;;  %18056 = vmatprep.subr.bf16.mxu1 %v25704_v11 }
 0x8e6   : > { %18041 = vmatmul.mubr.msk.bf16.vlgmr.msra.gmra.mrb[208].mxu0 %vm1692_vm3, %v5370_v59  ;;  %v5355_v29 = vmul.f32 %v19661_v14, %v21999_v8 }
 0x8e7   : > { %18051 = vmatpush3.bf16.msra.mxu0 %v6052_v32  ;;  %18052 = vmatprep.mubr.msk.bf16.mxu0 %vm20267_vm0, %v25704_v11 }
 0x8e8   : > { %v5371_v58 = vpack.c.bf16 %v5355_v29, %v5355_v29  ;;  %18062 = vmatprep.subr.bf16.mxu0 %v25704_v11 }
 0x8e9   : > { %7518 = vrot.lane.b32.xlu0 %v25811_v50, %s20270_s24 }
 0x8eb   : > { %18047 = vmatmul.mubr.msk.bf16.vlgmr.msra.gmra.mrb[208].mxu1 %vm1692_vm3, %v5371_v58 }
 0x8ec   : > { %18057 = vmatpush3.bf16.msra.mxu1 %v6100_v48  ;;  %18058 = vmatprep.mubr.msk.bf16.mxu1 %vm20267_vm0, %v25704_v11 }
 0x8ed   : > { %18068 = vmatprep.subr.bf16.mxu1 %v25704_v11 }
 0x904   : > { %v5322_v8 = vpop.xlane.xlu1 %5321 }
 0x905   : > { %19662 = vrcp.f32 %v5322_v8 }
 0x908   : > { %v6195_v41 = vpop.permute.xlu1 %6194 }
 0x90c   : > { %v6193_v44 = vpop.permute.xlu1 %6192 }
 0x90f   : > { %v19663_v37 = vpop.eup %19662  ;;  %v5325_v20 = vpop.xlane.xlu0 %5324 }
 0x910   : > { %19664 = vrcp.f32 %v5325_v20  ;;  %v6295_v33 = vpop.permute.xlu1 %6294  ;;  %v5356_v35 = vmul.f32 %v19663_v37, %v22011_v1 }
 0x912   : > { %v5372_v5 = vpack.c.bf16 %v5356_v35, %v5356_v35  ;;  %v6200_v35 = vsel %vm955_vm1, %v6195_v41, 0 }
 0x913   : > { %v6145_v59 = vpop.permute.xlu0 %6144 }
 0x914   : > { %v6150_v14 = vsel %vm955_vm1, %v6145_v59, 0  ;;  %18053 = vmatmul.mubr.msk.bf16.vlgmr.msra.gmra.mrb[212].mxu0 %vm1692_vm3, %v5372_v5  ;;  %v6293_v32 = vpop.permute.xlu1 %6292 }
 0x915   : > { %18063 = vmatpush3.bf16.xpose.msra.mxu0 %v6150_v14  ;;  %18064 = vmatprep.mubr.msk.bf16.mxu0 %vm20267_vm0, %v25704_v11 }
 0x916   : > { %18074 = vmatprep.subr.bf16.mxu0 %v25704_v11 }
 0x917   : > { %v6143_v29 = vpop.permute.xlu0 %6142 }
 0x918   : > { %v6395_v51 = vpop.permute.xlu1 %6394 }
 0x91a   : > { %v19665_v58 = vpop.eup %19664 }
 0x91b   : > { %v6245_v48 = vpop.permute.xlu0 %6244  ;;  %v5357_v8 = vmul.f32 %v19665_v58, %v22015_v26 }
 0x91c   : > { %v6250_v1 = vsel %vm955_vm1, %v6245_v48, 0  ;;  %18065 = vmatmul.mubr.msk.bf16.vlgmr.msra.gmra.mrb[216].mxu0 %vm955_vm1, %v6143_v29  ;;  %v6393_v37 = vpop.permute.xlu1 %6392  ;;  %v6300_v29 = vsel %vm955_vm1, %v6295_v33, 0 }
 0x91d   : > { %18075 = vmatpush3.bf16.xpose.msra.mxu0 %v6250_v1  ;;  %v5373_v20 = vpack.c.bf16 %v5357_v8, %v5357_v8  ;;  %18076 = vmatprep.mubr.msk.bf16.mxu0 %vm20267_vm0, %v25704_v11 }
 0x91e   : > { %18086 = vmatprep.subr.bf16.mxu0 %v25704_v11 }
 0x91f   : > { %v6243_v5 = vpop.permute.xlu0 %6242  ;;  %18059 = vmatmul.mubr.msk.bf16.vlgmr.msra.gmra.mrb[212].mxu1 %vm1692_vm3, %v5373_v20 }
 0x920   : > { %18069 = vmatpush3.bf16.xpose.msra.mxu1 %v6200_v35  ;;  %v6495_v59 = vpop.permute.xlu1 %6494  ;;  %18070 = vmatprep.mubr.msk.bf16.mxu1 %vm20267_vm0, %v25704_v11 }
 0x921   : > { %18080 = vmatprep.subr.bf16.mxu1 %v25704_v11 }
 0x923   : > { %v6345_v26 = vpop.permute.xlu0 %6344 }
 0x924   : > { %v6350_v14 = vsel %vm955_vm1, %v6345_v26, 0  ;;  %18077 = vmatmul.mubr.msk.bf16.vlgmr.msra.gmra.mrb[220].mxu0 %vm955_vm1, %v6243_v5  ;;  %v6493_v41 = vpop.permute.xlu1 %6492 }
 0x925   : > { %18087 = vmatpush3.bf16.xpose.msra.mxu0 %v6350_v14  ;;  %18088 = vmatprep.mubr.msk.bf16.mxu0 %vm20267_vm0, %v25704_v11 }
 0x926   : > { %18098 = vmatprep.subr.bf16.mxu0 %v25704_v11 }
 0x927   : > { %v6343_v58 = vpop.permute.xlu0 %6342  ;;  %18071 = vmatmul.mubr.msk.bf16.vlgmr.msra.gmra.mrb[216].mxu1 %vm955_vm1, %v6193_v44  ;;  %v6400_v44 = vsel %vm955_vm1, %v6395_v51, 0 }
 0x928   : > { %18081 = vmatpush3.bf16.xpose.msra.mxu1 %v6300_v29  ;;  %18082 = vmatprep.mubr.msk.bf16.mxu1 %vm20267_vm0, %v25704_v11  ;;  %v6595_v8 = vpop.permute.xlu1 %6594 }
 0x929   : > { %18092 = vmatprep.subr.bf16.mxu1 %v25704_v11 }
 0x92b   : > { %v6445_v48 = vpop.permute.xlu0 %6444 }
 0x92c   : > { %v6450_v1 = vsel %vm955_vm1, %v6445_v48, 0  ;;  %18089 = vmatmul.mubr.msk.bf16.vlgmr.msra.gmra.mrb[224].mxu0 %vm955_vm1, %v6343_v58  ;;  %v6593_v20 = vpop.permute.xlu1 %6592 }
 0x92d   : > { %18099 = vmatpush3.bf16.xpose.msra.mxu0 %v6450_v1  ;;  %18100 = vmatprep.mubr.msk.bf16.mxu0 %vm20267_vm0, %v25704_v11 }
 0x92e   : > { %18110 = vmatprep.subr.bf16.mxu0 %v25704_v11 }
 0x92f   : > { %v6443_v33 = vpop.permute.xlu0 %6442  ;;  %18083 = vmatmul.mubr.msk.bf16.vlgmr.msra.gmra.mrb[220].mxu1 %vm955_vm1, %v6293_v32  ;;  %v6500_v32 = vsel %vm955_vm1, %v6495_v59, 0 }
 0x930   : > { %18093 = vmatpush3.bf16.xpose.msra.mxu1 %v6400_v44  ;;  %18094 = vmatprep.mubr.msk.bf16.mxu1 %vm20267_vm0, %v25704_v11  ;;  %v6695_v26 = vpop.permute.xlu1 %6694 }
 0x931   : > { %18104 = vmatprep.subr.bf16.mxu1 %v25704_v11 }
 0x933   : > { %v6545_v35 = vpop.permute.xlu0 %6544 }
 0x934   : > { %v6550_v5 = vsel %vm955_vm1, %v6545_v35, 0  ;;  %18101 = vmatmul.mubr.msk.bf16.vlgmr.msra.gmra.mrb[228].mxu0 %vm955_vm1, %v6443_v33  ;;  %v6693_v59 = vpop.permute.xlu1 %6692 }
 0x935   : > { %18111 = vmatpush3.bf16.xpose.msra.mxu0 %v6550_v5  ;;  %18112 = vmatprep.mubr.msk.bf16.mxu0 %vm20267_vm0, %v25704_v11 }
 0x936   : > { %18122 = vmatprep.subr.bf16.mxu0 %v25704_v11 }
 0x937   : > { %v6543_v51 = vpop.permute.xlu0 %6542  ;;  %18095 = vmatmul.mubr.msk.bf16.vlgmr.msra.gmra.mrb[224].mxu1 %vm955_vm1, %v6393_v37  ;;  %v6600_v37 = vsel %vm955_vm1, %v6595_v8, 0 }
 0x938   : > { %18105 = vmatpush3.bf16.xpose.msra.mxu1 %v6500_v32  ;;  %18106 = vmatprep.mubr.msk.bf16.mxu1 %vm20267_vm0, %v25704_v11  ;;  %v6795_v1 = vpop.permute.xlu1 %6794 }
 0x939   : > { %18116 = vmatprep.subr.bf16.mxu1 %v25704_v11 }
 0x93b   : > { %v6645_v14 = vpop.permute.xlu0 %6644 }
 0x93c   : > { %v6650_v29 = vsel %vm955_vm1, %v6645_v14, 0  ;;  %18113 = vmatmul.mubr.msk.bf16.vlgmr.msra.gmra.mrb[232].mxu0 %vm955_vm1, %v6543_v51  ;;  %v6793_v33 = vpop.permute.xlu1 %6792 }
 0x93d   : > { %18123 = vmatpush3.bf16.xpose.msra.mxu0 %v6650_v29  ;;  %18124 = vmatprep.mubr.msk.bf16.mxu0 %vm20267_vm0, %v25704_v11 }
 0x93e   : > { %18134 = vmatprep.subr.bf16.mxu0 %v25704_v11 }
 0x93f   : > { %v6643_v58 = vpop.permute.xlu0 %6642  ;;  %18107 = vmatmul.mubr.msk.bf16.vlgmr.msra.gmra.mrb[228].mxu1 %vm955_vm1, %v6493_v41  ;;  %v6700_v41 = vsel %vm955_vm1, %v6695_v26, 0 }
 0x940   : > { %18117 = vmatpush3.bf16.xpose.msra.mxu1 %v6600_v37  ;;  %18118 = vmatprep.mubr.msk.bf16.mxu1 %vm20267_vm0, %v25704_v11  ;;  %v6895_v51 = vpop.permute.xlu1 %6894 }
 0x941   : > { %18128 = vmatprep.subr.bf16.mxu1 %v25704_v11 }
 0x943   : > { %v6745_v48 = vpop.permute.xlu0 %6744 }
 0x944   : > { %v6750_v44 = vsel %vm955_vm1, %v6745_v48, 0  ;;  %18125 = vmatmul.mubr.msk.bf16.vlgmr.msra.gmra.mrb[236].mxu0 %vm955_vm1, %v6643_v58  ;;  %v6893_v29 = vpop.permute.xlu1 %6892 }
 0x945   : > { %18135 = vmatpush3.bf16.xpose.msra.mxu0 %v6750_v44  ;;  %18136 = vmatprep.mubr.msk.bf16.mxu0 %vm20267_vm0, %v25704_v11 }
 0x946   : > { %18146 = vmatprep.subr.bf16.mxu0 %v25704_v11 }
 0x947   : > { %v6743_v8 = vpop.permute.xlu0 %6742  ;;  %18119 = vmatmul.mubr.msk.bf16.vlgmr.msra.gmra.mrb[232].mxu1 %vm955_vm1, %v6593_v20  ;;  %v6800_v20 = vsel %vm955_vm1, %v6795_v1, 0 }
 0x948   : > { %18129 = vmatpush3.bf16.xpose.msra.mxu1 %v6700_v41  ;;  %18130 = vmatprep.mubr.msk.bf16.mxu1 %vm20267_vm0, %v25704_v11  ;;  %v7183_v37 = vpop.permute.xlu1 %7182 }
 0x949   : > { %18140 = vmatprep.subr.bf16.mxu1 %v25704_v11  ;;  %v7188_v58 = vsel %vm1888_vm2, %v7183_v37, 0 }
 0x94b   : > { %v6845_v35 = vpop.permute.xlu0 %6844 }
 0x94c   : > { %v6850_v5 = vsel %vm955_vm1, %v6845_v35, 0  ;;  %18137 = vmatmul.mubr.msk.bf16.vlgmr.msra.gmra.mrb[240].mxu0 %vm955_vm1, %v6743_v8 }
 0x94d   : > { %18147 = vmatpush3.bf16.xpose.msra.mxu0 %v6850_v5  ;;  %18148 = vmatprep.mubr.msk.bf16.mxu0 %vm20267_vm0, %v25704_v11 }
 0x94e   : > { %18158 = vmatprep.subr.bf16.mxu0 %v25704_v11 }
 0x94f   : > { %v6843_v32 = vpop.permute.xlu0 %6842  ;;  %18131 = vmatmul.mubr.msk.bf16.vlgmr.msra.gmra.mrb[236].mxu1 %vm955_vm1, %v6693_v59  ;;  %v6900_v59 = vsel %vm955_vm1, %v6895_v51, 0 }
 0x950   : > { %18141 = vmatpush3.bf16.xpose.msra.mxu1 %v6800_v20  ;;  %18142 = vmatprep.mubr.msk.bf16.mxu1 %vm20267_vm0, %v25704_v11 }
 0x951   : > { %18152 = vmatprep.subr.bf16.mxu1 %v25704_v11 }
 0x953   : > { %v7135_v26 = vpop.permute.xlu0 %7134 }
 0x954   : > { %v7140_v14 = vsel %vm1888_vm2, %v7135_v26, 0  ;;  %18149 = vmatmul.mubr.msk.bf16.vlgmr.msra.gmra.mrb[244].mxu0 %vm955_vm1, %v6843_v32 }
 0x955   : > { %18159 = vmatpush3.bf16.msra.mxu0 %v7140_v14  ;;  %18160 = vmatprep.mubr.msk.bf16.mxu0 %vm20267_vm0, %v25704_v11 }
 0x956   : > { %18170 = vmatprep.subr.bf16.mxu0 %v25704_v11 }
 0x957   : > { %18143 = vmatmul.mubr.msk.bf16.vlgmr.msra.gmra.mrb[240].mxu1 %vm955_vm1, %v6793_v33 }
 0x958   : > { %18153 = vmatpush3.bf16.xpose.msra.mxu1 %v6900_v59  ;;  %18154 = vmatprep.mubr.msk.bf16.mxu1 %vm20267_vm0, %v25704_v11 }
 0x959   : > { %18164 = vmatprep.subr.bf16.mxu1 %v25704_v11 }
 0x95f   : > { %18155 = vmatmul.mubr.msk.bf16.vlgmr.msra.gmra.mrb[244].mxu1 %vm955_vm1, %v6893_v29 }
 0x960   : > { %18165 = vmatpush3.bf16.msra.mxu1 %v7188_v58  ;;  %18166 = vmatprep.mubr.msk.bf16.mxu1 %vm20267_vm0, %v25704_v11 }
 0x961   : > { %18176 = vmatprep.subr.bf16.mxu1 %v25704_v11 }
 0x982   : > { %v22297_v48 = vpop.f32.mrb[184].mxu0 }
 0x983   : > { %25812 = vst [vmem:[#allocation64_spill] sm:$0xff] %v22297_v48  ;;  %v17970_v1 = vpop.f32.mrb[185].mxu0 }
 0x984   : > { %v5419_v44 = vpop.f32.mrb[186].mxu0 }
 0x985   : > { %v17971_v41 = vpop.f32.mrb[187].mxu0 }
 0x98a   : > { %v22299_v8 = vpop.f32.mrb[188].mxu0 }
 0x98b   : > { %25813 = vst [vmem:[#allocation63_spill] sm:$0xff] %v22299_v8  ;;  %v17982_v33 = vpop.f32.mrb[189].mxu0 }
 0x98c   : > { %v5515_v35 = vpop.f32.mrb[190].mxu0 }
 0x98d   : > { %v22301_v5 = vpop.f32.mrb[184].mxu1  ;;  %v17983_v20 = vpop.f32.mrb[191].mxu0 }
 0x98e   : > { %25814 = vst [vmem:[#allocation65_spill] sm:$0xff] %v22301_v5  ;;  %v17976_v51 = vpop.f32.mrb[185].mxu1 }
 0x98f   : > { %v5467_v26 = vpop.f32.mrb[186].mxu1 }
 0x990   : > { %v17977_v14 = vpop.f32.mrb[187].mxu1 }
 0x995   : > { %v22305_v29 = vpop.f32.mrb[188].mxu1 }
 0x996   : > { %25815 = vst [vmem:[#allocation66_spill] sm:$0xff] %v22305_v29  ;;  %v17988_v37 = vpop.f32.mrb[189].mxu1 }
 0x997   : > { %v5563_v58 = vpop.f32.mrb[190].mxu1 }
 0x998   : > { %v17989_v1 = vpop.f32.mrb[191].mxu1 }
 0x999   : > { %v22309_v44 = vpop.f32.mrb[192].mxu0 }
 0x99a   : > { %25816 = vst [vmem:[#allocation67_spill] sm:$0xff] %v22309_v44  ;;  %v17994_v41 = vpop.f32.mrb[193].mxu0 }
 0x99b   : > { %v5611_v33 = vpop.f32.mrb[194].mxu0 }
 0x99c   : > { %v17995_v35 = vpop.f32.mrb[195].mxu0 }
 0x99e   : > { %v22311_v20 = vpop.f32.mrb[192].mxu1 }
 0x99f   : > { %25817 = vst [vmem:[#allocation68_spill] sm:$0xff] %v22311_v20  ;;  %v18000_v26 = vpop.f32.mrb[193].mxu1 }
 0x9a0   : > { %v5659_v14 = vpop.f32.mrb[194].mxu1 }
 0x9a1   : > { %v18001_v32 = vpop.f32.mrb[195].mxu1  ;;  %v22315_v48 = vpop.f32.mrb[196].mxu0 }
 0x9a2   : > { %25818 = vst [vmem:[#allocation69_spill] sm:$0xff] %v22315_v48  ;;  %v18006_v5 = vpop.f32.mrb[197].mxu0 }
 0x9a3   : > { %v5707_v59 = vpop.f32.mrb[198].mxu0 }
 0x9a4   : > { %v18007_v37 = vpop.f32.mrb[199].mxu0 }
 0x9a6   : > { %v22317_v58 = vpop.f32.mrb[196].mxu1 }
 0x9a7   : > { %25819 = vst [vmem:[#allocation70_spill] sm:$0xff] %v22317_v58  ;;  %v18012_v41 = vpop.f32.mrb[197].mxu1 }
 0x9a8   : > { %v5755_v33 = vpop.f32.mrb[198].mxu1 }
 0x9a9   : > { %v18013_v35 = vpop.f32.mrb[199].mxu1  ;;  %v22321_v8 = vpop.f32.mrb[200].mxu0 }
 0x9aa   : > { %25820 = vst [vmem:[#allocation71_spill] sm:$0xff] %v22321_v8  ;;  %v18018_v29 = vpop.f32.mrb[201].mxu0 }
 0x9ab   : > { %v5803_v51 = vpop.f32.mrb[202].mxu0 }
 0x9ac   : > { %v18019_v26 = vpop.f32.mrb[203].mxu0 }
 0x9ae   : > { %v22323_v14 = vpop.f32.mrb[200].mxu1 }
 0x9af   : > { %25821 = vst [vmem:[#allocation72_spill] sm:$0xff] %v22323_v14  ;;  %v18024_v32 = vpop.f32.mrb[201].mxu1 }
 0x9b0   : > { %v5851_v59 = vpop.f32.mrb[202].mxu1 }
 0x9b1   : > { %v18025_v37 = vpop.f32.mrb[203].mxu1  ;;  %v22327_v44 = vpop.f32.mrb[204].mxu0 }
 0x9b2   : > { %25822 = vst [vmem:[#allocation73_spill] sm:$0xff] %v22327_v44  ;;  %v18030_v20 = vpop.f32.mrb[205].mxu0 }
 0x9b3   : > { %v5899_v1 = vpop.f32.mrb[206].mxu0 }
 0x9b4   : > { %v18031_v41 = vpop.f32.mrb[207].mxu0 }
 0x9b6   : > { %v22329_v33 = vpop.f32.mrb[204].mxu1 }
 0x9b7   : > { %25823 = vst [vmem:[#allocation74_spill] sm:$0xff] %v22329_v33  ;;  %v18036_v51 = vpop.f32.mrb[205].mxu1 }
 0x9b8   : > { %v5947_v35 = vpop.f32.mrb[206].mxu1 }
 0x9b9   : > { %v18037_v26 = vpop.f32.mrb[207].mxu1  ;;  %v22333_v48 = vpop.f32.mrb[208].mxu0 }
 0x9ba   : > { %25824 = vst [vmem:[#allocation75_spill] sm:$0xff] %v22333_v48  ;;  %v18042_v58 = vpop.f32.mrb[209].mxu0 }
 0x9bb   : > { %v5995_v5 = vpop.f32.mrb[210].mxu0 }
 0x9bc   : > { %v18043_v32 = vpop.f32.mrb[211].mxu0 }
 0x9be   : > { %v22335_v59 = vpop.f32.mrb[208].mxu1 }
 0x9bf   : > { %25825 = vst [vmem:[#allocation76_spill] sm:$0xff] %v22335_v59  ;;  %v18048_v1 = vpop.f32.mrb[209].mxu1 }
 0x9c0   : > { %v6043_v37 = vpop.f32.mrb[210].mxu1 }
 0x9c1   : > { %v18049_v41 = vpop.f32.mrb[211].mxu1 }
 0x9e7   : > { %v22339_v8 = vpop.f32.mrb[212].mxu0 }
 0x9e8   : > { %25826 = vst [vmem:[#allocation77_spill] sm:$0xff] %v22339_v8  ;;  %v18054_v14 = vpop.f32.mrb[213].mxu0 }
 0x9e9   : > { %v6091_v29 = vpop.f32.mrb[214].mxu0 }
 0x9ea   : > { %v18055_v51 = vpop.f32.mrb[215].mxu0 }
 0x9ef   : > { %v22341_v35 = vpop.f32.mrb[216].mxu0 }
 0x9f0   : > { %v18066_v26 = vpop.f32.mrb[217].mxu0  ;;  %v6942_v58 = vsel %vm1692_vm3, %v22341_v35, -inf }
 0x9f1   : > { %6943 = vmax.xlane.f32.xlu0 %v6942_v58  ;;  %v6189_v5 = vpop.f32.mrb[218].mxu0 }
 0x9f2   : > { %v22345_v32 = vpop.f32.mrb[212].mxu1  ;;  %v18067_v44 = vpop.f32.mrb[219].mxu0 }
 0x9f3   : > { %25827 = vst [vmem:[#allocation78_spill] sm:$0xff] %v22345_v32  ;;  %v18060_v37 = vpop.f32.mrb[213].mxu1 }
 0x9f4   : > { %v6139_v41 = vpop.f32.mrb[214].mxu1 }
 0x9f5   : > { %v18061_v20 = vpop.f32.mrb[215].mxu1 }
 0x9f7   : > { %v22349_v14 = vpop.f32.mrb[220].mxu0 }
 0x9f8   : > { %v18078_v29 = vpop.f32.mrb[221].mxu0  ;;  %v6948_v51 = vsel %vm1692_vm3, %v22349_v14, -inf }
 0x9f9   : > { %6949 = vmax.xlane.f32.xlu0 %v6948_v51  ;;  %v6289_v26 = vpop.f32.mrb[222].mxu0 }
 0x9fa   : > { %v22353_v48 = vpop.f32.mrb[216].mxu1  ;;  %v18079_v58 = vpop.f32.mrb[223].mxu0 }
 0x9fb   : > { %v18072_v5 = vpop.f32.mrb[217].mxu1  ;;  %v6945_v44 = vsel %vm1692_vm3, %v22353_v48, -inf }
 0x9fc   : > { %6946 = vmax.xlane.f32.xlu1 %v6945_v44  ;;  %v6239_v1 = vpop.f32.mrb[218].mxu1 }
 0x9fd   : > { %v18073_v37 = vpop.f32.mrb[219].mxu1 }
 0x9ff   : > { %v22357_v41 = vpop.f32.mrb[224].mxu0 }
 0xa00   : > { %v18090_v20 = vpop.f32.mrb[225].mxu0  ;;  %v6954_v1 = vsel %vm1692_vm3, %v22357_v41, -inf }
 0xa01   : > { %v6389_v8 = vpop.f32.mrb[226].mxu0 }
 0xa02   : > { %v22359_v29 = vpop.f32.mrb[220].mxu1  ;;  %v18091_v32 = vpop.f32.mrb[227].mxu0 }
 0xa03   : > { %v18084_v59 = vpop.f32.mrb[221].mxu1  ;;  %v6951_v51 = vsel %vm1692_vm3, %v22359_v29, -inf }
 0xa04   : > { %6952 = vmax.xlane.f32.xlu0 %v6951_v51  ;;  %v6339_v26 = vpop.f32.mrb[222].mxu1 }
 0xa05   : > { %v18085_v58 = vpop.f32.mrb[223].mxu1 }
 0xa07   : > { %v22363_v5 = vpop.f32.mrb[228].mxu0 }
 0xa08   : > { %v18102_v44 = vpop.f32.mrb[229].mxu0  ;;  %6955 = vmax.xlane.f32.xlu0 %v6954_v1  ;;  %v6960_v59 = vsel %vm1692_vm3, %v22363_v5, -inf }
 0xa09   : > { %v6489_v37 = vpop.f32.mrb[230].mxu0 }
 0xa0a   : > { %v22367_v20 = vpop.f32.mrb[224].mxu1  ;;  %v18103_v8 = vpop.f32.mrb[231].mxu0 }
 0xa0b   : > { %v18096_v33 = vpop.f32.mrb[225].mxu1  ;;  %v6957_v32 = vsel %vm1692_vm3, %v22367_v20, -inf }
 0xa0c   : > { %6961 = vmax.xlane.f32.xlu0 %v6960_v59  ;;  %6958 = vmax.xlane.f32.xlu1 %v6957_v32  ;;  %v6439_v51 = vpop.f32.mrb[226].mxu1 }
 0xa0d   : > { %v18097_v26 = vpop.f32.mrb[227].mxu1 }
 0xa0f   : > { %v22373_v58 = vpop.f32.mrb[232].mxu0 }
 0xa10   : > { %v18114_v50 = vpop.f32.mrb[233].mxu0  ;;  %v6966_v1 = vsel %vm1692_vm3, %v22373_v58, -inf }
 0xa11   : > { %v6589_v44 = vpop.f32.mrb[234].mxu0  ;;  %6967 = vmax.xlane.f32.xlu0 %v6966_v1 }
 0xa12   : > { %v22377_v37 = vpop.f32.mrb[228].mxu1  ;;  %v18115_v33 = vpop.f32.mrb[235].mxu0 }
 0xa13   : > { %v18108_v8 = vpop.f32.mrb[229].mxu1  ;;  %v6963_v45 = vsel %vm1692_vm3, %v22377_v37, -inf }
 0xa14   : > { %6964 = vmax.xlane.f32.xlu1 %v6963_v45  ;;  %v6539_v59 = vpop.f32.mrb[230].mxu1 }
 0xa15   : > { %v18109_v32 = vpop.f32.mrb[231].mxu1 }
 0xa17   : > { %v22381_v51 = vpop.f32.mrb[236].mxu0 }
 0xa18   : > { %v18126_v26 = vpop.f32.mrb[237].mxu0  ;;  %v6972_v50 = vsel %vm1692_vm3, %v22381_v51, -inf }
 0xa19   : > { %v6689_v57 = vpop.f32.mrb[238].mxu0  ;;  %6973 = vmax.xlane.f32.xlu0 %v6972_v50 }
 0xa1a   : > { %v22385_v44 = vpop.f32.mrb[232].mxu1  ;;  %v18127_v1 = vpop.f32.mrb[239].mxu0 }
 0xa1b   : > { %v18120_v46 = vpop.f32.mrb[233].mxu1  ;;  %v6969_v33 = vsel %vm1692_vm3, %v22385_v44, -inf }
 0xa1c   : > { %6970 = vmax.xlane.f32.xlu1 %v6969_v33  ;;  %v6639_v8 = vpop.f32.mrb[234].mxu1 }
 0xa1d   : > { %v18121_v45 = vpop.f32.mrb[235].mxu1 }
 0xa1f   : > { %v22389_v59 = vpop.f32.mrb[240].mxu0 }
 0xa20   : > { %v18138_v32 = vpop.f32.mrb[241].mxu0  ;;  %v6978_v26 = vsel %vm1692_vm3, %v22389_v59, -inf }
 0xa21   : > { %v6789_v16 = vpop.f32.mrb[242].mxu0  ;;  %6979 = vmax.xlane.f32.xlu0 %v6978_v26 }
 0xa22   : > { %v22393_v57 = vpop.f32.mrb[236].mxu1  ;;  %v18139_v50 = vpop.f32.mrb[243].mxu0 }
 0xa23   : > { %v18132_v12 = vpop.f32.mrb[237].mxu1  ;;  %v6975_v46 = vsel %vm1692_vm3, %v22393_v57, -inf }
 0xa24   : > { %6976 = vmax.xlane.f32.xlu1 %v6975_v46  ;;  %v6739_v1 = vpop.f32.mrb[238].mxu1 }
 0xa25   : > { %v18133_v33 = vpop.f32.mrb[239].mxu1 }
 0xa27   : > { %v22397_v8 = vpop.f32.mrb[244].mxu0 }
 0xa28   : > { %v18150_v45 = vpop.f32.mrb[245].mxu0  ;;  %v6984_v32 = vsel %vm1692_vm3, %v22397_v8, -inf }
 0xa29   : > { %v6889_v27 = vpop.f32.mrb[246].mxu0  ;;  %6985 = vmax.xlane.f32.xlu0 %v6984_v32  ;;  %v22413_v32 = vpop.permute.xlu1 %7278 }
 0xa2a   : > { %v22401_v16 = vpop.f32.mrb[240].mxu1  ;;  %v18151_v26 = vpop.f32.mrb[247].mxu0  ;;  %v25829_v27 = vld [vmem:[#allocation40_spill] sm:$0xff] }
 0xa2b   : > { %v18144_v49 = vpop.f32.mrb[241].mxu1  ;;  %v6981_v12 = vsel %vm1692_vm3, %v22401_v16, -inf  ;;  %v22415_v26 = vpop.permute.xlu0 %7230 }
 0xa2c   : > { %6982 = vmax.xlane.f32.xlu1 %v6981_v12  ;;  %v6839_v50 = vpop.f32.mrb[242].mxu1 }
 0xa2d   : > { %v18145_v46 = vpop.f32.mrb[243].mxu1  ;;  %v22417_v12 = vpop.permute.xlu1 %7374 }
 0xa2f   : > { %v22419_v50 = vpop.permute.xlu0 %7326 }
 0xa32   : > { %v22405_v1 = vpop.f32.mrb[244].mxu1 }
 0xa33   : > { %v18156_v33 = vpop.f32.mrb[245].mxu1  ;;  %v6987_v49 = vsel %vm1692_vm3, %v22405_v1, -inf  ;;  %v22423_v46 = vpop.permute.xlu0 %7422 }
 0xa34   : > { %v6939_v56 = vpop.f32.mrb[246].mxu1  ;;  %25831 = vst [vmem:[#allocation80_spill] sm:$0xff] %v22423_v46 }
 0xa35   : > { %v18157_v45 = vpop.f32.mrb[247].mxu1  ;;  %v22421_v56 = vpop.permute.xlu1 %7470 }
 0xa36   : > { %25830 = vst [vmem:[#allocation79_spill] sm:$0xff] %v22421_v56 }
 0xa37   : > { %v22427_v45 = vpop.permute.xlu0 %7518 }
 0xa39   : > { %v22425_v33 = vpop.permute.xlu1 %7566 }
 0xa3a   : > { %25832 = vst [vmem:[#allocation81_spill] sm:$0xff] %v22425_v33 }
 0xa3d   : > { %7758 = vrot.lane.b32.xlu1 %v25828_v60, %s20270_s24  ;;  %v22429_v60 = vpop.permute.xlu1 %7614 }
 0xa3e   : > { %25833 = vst [vmem:[#allocation82_spill] sm:$0xff] %v22429_v60 }
 0xa3f   : > { %7710 = vrot.lane.b32.xlu0 %v25829_v27, %s20270_s24 }
 0xa41   : > { %v22432_v62 = vpop.permute.xlu1 %7662 }
 0xa61   : > { %6988 = vmax.xlane.f32.xlu1 %v6987_v49 }
 0xa7e   : > { %v6944_v27 = vpop.xlane.xlu0 %6943 }
 0xa7f   : > { %v6990_v49 = vsub.f32 %v22341_v35, %v6944_v27 }
 0xa81   : > { %v7006_v4 = vmul.f32 1.442695, %v6990_v49 }
 0xa83   : > { %19666 = vpow2.f32 %v7006_v4 }
 0xa86   : > { %v6950_v39 = vpop.xlane.xlu0 %6949 }
 0xa87   : > { %v6992_v23 = vsub.f32 %v22349_v14, %v6950_v39 }
 0xa89   : > { %v7010_v18 = vmul.f32 1.442695, %v6992_v23  ;;  %v6947_v56 = vpop.xlane.xlu1 %6946 }
 0xa8a   : > { %v6991_v53 = vsub.f32 %v22353_v48, %v6947_v56 }
 0xa8b   : > { %19668 = vpow2.f32 %v7010_v18 }
 0xa8c   : > { %v7008_v33 = vmul.f32 1.442695, %v6991_v53 }
 0xa8d   : > { %v22436_v46 = vpop.eup %19666 }
 0xa8e   : > { %19670 = vpow2.f32 %v7008_v33  ;;  %v7038_v60 = vsel %vm1692_vm3, %v22436_v46, 0.0 }
 0xa8f   : > { %7039 = vadd.xlane.f32.xlu0 %v7038_v60 }
 0xa91   : > { %v6953_v35 = vpop.xlane.xlu0 %6952 }
 0xa92   : > { %v6993_v4 = vsub.f32 %v22359_v29, %v6953_v35 }
 0xa94   : > { %v7012_v27 = vmul.f32 1.442695, %v6993_v4 }
 0xa95   : > { %v22441_v49 = vpop.eup %19668  ;;  %v6956_v39 = vpop.xlane.xlu0 %6955 }
 0xa96   : > { %19672 = vpow2.f32 %v7012_v27  ;;  %v6994_v23 = vsub.f32 %v22357_v41, %v6956_v39  ;;  %v7044_v53 = vsel %vm1692_vm3, %v22441_v49, 0.0 }
 0xa97   : > { %7045 = vadd.xlane.f32.xlu0 %v7044_v53 }
 0xa98   : > { %v22446_v18 = vpop.eup %19670  ;;  %v7014_v48 = vmul.f32 1.442695, %v6994_v23 }
 0xa99   : > { %v6962_v14 = vpop.xlane.xlu0 %6961  ;;  %v6959_v56 = vpop.xlane.xlu1 %6958  ;;  %v7041_v60 = vsel %vm1692_vm3, %v22446_v18, 0.0 }
 0xa9a   : > { %19674 = vpow2.f32 %v7014_v48  ;;  %v6996_v29 = vsub.f32 %v22363_v5, %v6962_v14  ;;  %v6995_v33 = vsub.f32 %v22367_v20, %v6959_v56  ;;  %7042 = vadd.xlane.f32.xlu1 %v7041_v60 }
 0xa9c   : > { %v7018_v35 = vmul.f32 1.442695, %v6996_v29  ;;  %v7016_v41 = vmul.f32 1.442695, %v6995_v33 }
 0xa9e   : > { %19676 = vpow2.f32 %v7018_v35  ;;  %v6968_v4 = vpop.xlane.xlu0 %6967 }
 0xa9f   : > { %19678 = vpow2.f32 %v7016_v41  ;;  %v6998_v39 = vsub.f32 %v22373_v58, %v6968_v4 }
 0xaa0   : > { %v22452_v27 = vpop.eup %19672 }
 0xaa1   : > { %v6965_v23 = vpop.xlane.xlu1 %6964  ;;  %v7047_v53 = vsel %vm1692_vm3, %v22452_v27, 0.0  ;;  %v7022_v20 = vmul.f32 1.442695, %v6998_v39 }
 0xaa2   : > { %v6997_v48 = vsub.f32 %v22377_v37, %v6965_v23  ;;  %7048 = vadd.xlane.f32.xlu1 %v7047_v53 }
 0xaa4   : > { %v22458_v5 = vpop.eup %19674  ;;  %v7020_v14 = vmul.f32 1.442695, %v6997_v48 }
 0xaa5   : > { %v7050_v56 = vsel %vm1692_vm3, %v22458_v5, 0.0 }
 0xaa6   : > { %19680 = vpow2.f32 %v7020_v14  ;;  %7051 = vadd.xlane.f32.xlu0 %v7050_v56  ;;  %v6974_v60 = vpop.xlane.xlu0 %6973 }
 0xaa7   : > { %v7000_v29 = vsub.f32 %v22381_v51, %v6974_v60  ;;  %19682 = vpow2.f32 %v7022_v20 }
 0xaa8   : > { %v22463_v58 = vpop.eup %19676 }
 0xaa9   : > { %v22465_v33 = vpop.eup %19678  ;;  %v7026_v35 = vmul.f32 1.442695, %v7000_v29  ;;  %v6971_v37 = vpop.xlane.xlu1 %6970  ;;  %v7056_v41 = vsel %vm1692_vm3, %v22463_v58, 0.0 }
 0xaaa   : > { %v6999_v4 = vsub.f32 %v22385_v44, %v6971_v37  ;;  %7057 = vadd.xlane.f32.xlu0 %v7056_v41  ;;  %v7053_v39 = vsel %vm1692_vm3, %v22465_v33, 0.0 }
 0xaab   : > { %7054 = vadd.xlane.f32.xlu1 %v7053_v39  ;;  %19684 = vpow2.f32 %v7026_v35 }
 0xaac   : > { %v7024_v23 = vmul.f32 1.442695, %v6999_v4 }
 0xaae   : > { %19686 = vpow2.f32 %v7024_v23  ;;  %v6980_v51 = vpop.xlane.xlu0 %6979 }
 0xaaf   : > { %v7002_v53 = vsub.f32 %v22389_v59, %v6980_v51 }
 0xab0   : > { %v22473_v48 = vpop.eup %19680 }
 0xab1   : > { %v7030_v20 = vmul.f32 1.442695, %v7002_v53  ;;  %v6977_v14 = vpop.xlane.xlu1 %6976  ;;  %v7059_v56 = vsel %vm1692_vm3, %v22473_v48, 0.0  ;;  %v22477_v60 = vpop.eup %19682 }
 0xab2   : > { %v7001_v44 = vsub.f32 %v22393_v57, %v6977_v14  ;;  %7060 = vadd.xlane.f32.xlu1 %v7059_v56  ;;  %v7062_v35 = vsel %vm1692_vm3, %v22477_v60, 0.0 }
 0xab3   : > { %19688 = vpow2.f32 %v7030_v20 }
 0xab4   : > { %v7028_v29 = vmul.f32 1.442695, %v7001_v44 }
 0xab5   : > { %v22482_v37 = vpop.eup %19684 }
 0xab6   : > { %19690 = vpow2.f32 %v7028_v29  ;;  %7063 = vadd.xlane.f32.xlu1 %v7062_v35  ;;  %v7068_v39 = vsel %vm1692_vm3, %v22482_v37, 0.0  ;;  %v6986_v44 = vpop.xlane.xlu0 %6985 }
 0xab7   : > { %v7004_v29 = vsub.f32 %v22397_v8, %v6986_v44 }
 0xab8   : > { %v22484_v59 = vpop.eup %19686 }
 0xab9   : > { %v6983_v41 = vpop.xlane.xlu1 %6982  ;;  %v7065_v4 = vsel %vm1692_vm3, %v22484_v59, 0.0  ;;  %v7034_v35 = vmul.f32 1.442695, %v7004_v29 }
 0xaba   : > { %v7003_v57 = vsub.f32 %v22401_v16, %v6983_v41  ;;  %7066 = vadd.xlane.f32.xlu0 %v7065_v4  ;;  %7069 = vadd.xlane.f32.xlu1 %v7068_v39 }
 0xabc   : > { %v7032_v23 = vmul.f32 1.442695, %v7003_v57 }
 0xabd   : > { %v22491_v51 = vpop.eup %19688  ;;  %v22508_v41 = vpop.permute.xlu1 %7758 }
 0xabe   : > { %19692 = vpow2.f32 %v7032_v23  ;;  %v7074_v53 = vsel %vm1692_vm3, %v22491_v51, 0.0 }
 0xabf   : > { %7075 = vadd.xlane.f32.xlu1 %v7074_v53  ;;  %19694 = vpow2.f32 %v7034_v35 }
 0xac0   : > { %v22495_v20 = vpop.eup %19690 }
 0xac1   : > { %v7071_v14 = vsel %vm1692_vm3, %v22495_v20, 0.0 }
 0xac2   : > { %7072 = vadd.xlane.f32.xlu0 %v7071_v14 }
 0xac8   : > { %v22499_v56 = vpop.eup %19692 }
 0xac9   : > { %v7077_v16 = vsel %vm1692_vm3, %v22499_v56, 0.0  ;;  %v22511_v57 = vpop.eup %19694 }
 0xaca   : > { %7078 = vadd.xlane.f32.xlu0 %v7077_v16  ;;  %v7080_v53 = vsel %vm1692_vm3, %v22511_v57, 0.0 }
 0xad0   : > { %7854 = vrot.lane.b32.xlu1 %v21220_v40, %s20270_s24 }
 0xae0   : > { %7806 = vrot.lane.b32.xlu0 %v21158_v34, %s20270_s24 }
 0xaee   : > { %v6989_v4 = vpop.xlane.xlu1 %6988 }
 0xaef   : > { %v7005_v39 = vsub.f32 %v22405_v1, %v6989_v4  ;;  %v22531_v1 = vpop.permute.xlu0 %7710 }
 0xaf1   : > { %v7036_v23 = vmul.f32 1.442695, %v7005_v39 }
 0xaf3   : > { %19696 = vpow2.f32 %v7036_v23  ;;  %v7236_v23 = vsel %vm1888_vm2, %v22415_v26, 0 }
 0xaf4   : > { %7081 = vadd.xlane.f32.xlu1 %v7080_v53 }
 0xafd   : > { %v22515_v14 = vpop.eup %19696 }
 0xafe   : > { %v7083_v8 = vsel %vm1692_vm3, %v22515_v14, 0.0 }
 0xaff   : > { %7084 = vadd.xlane.f32.xlu0 %v7083_v8 }
 0xb05   : > { %7954 = vrot.lane.b32.xlu1 %v20561_v6, %s20271_s26 }
 0xb09   : > { %7952 = vrot.lane.b32.xlu1 %v20592_v28, %s20271_s26 }
 0xb0d   : > { %8054 = vrot.lane.b32.xlu1 %v20607_v38, %s20271_s26 }
 0xb11   : > { %8052 = vrot.lane.b32.xlu1 %v20665_v21, %s20271_s26 }
 0xb15   : > { %8154 = vrot.lane.b32.xlu1 %v20646_v2, %s20271_s26  ;;  %7904 = vrot.lane.b32.xlu0 %v20555_v63, %s20271_s26 }
 0xb19   : > { %8152 = vrot.lane.b32.xlu1 %v20704_v61, %s20271_s26  ;;  %7902 = vrot.lane.b32.xlu0 %v20563_v9, %s20271_s26 }
 0xb1c   : > { %v7040_v16 = vpop.xlane.xlu0 %7039 }
 0xb1d   : > { %19698 = vrcp.f32 %v7040_v16  ;;  %8254 = vrot.lane.b32.xlu1 %v20687_v36, %s20271_s26  ;;  %8004 = vrot.lane.b32.xlu0 %v20575_v15, %s20271_s26 }
 0xb21   : > { %8252 = vrot.lane.b32.xlu1 %v25712_v47, %s20271_s26  ;;  %8002 = vrot.lane.b32.xlu0 %v20625_v52, %s20271_s26 }
 0xb24   : > { %v7046_v44 = vpop.xlane.xlu0 %7045 }
 0xb25   : > { %19700 = vrcp.f32 %v7046_v44  ;;  %8354 = vrot.lane.b32.xlu1 %v25713_v17, %s20271_s26  ;;  %8104 = vrot.lane.b32.xlu0 %v20595_v30, %s20271_s26 }
 0xb27   : > { %v19699_v29 = vpop.eup %19698  ;;  %v7043_v35 = vpop.xlane.xlu1 %7042 }
 0xb28   : > { %19702 = vrcp.f32 %v7043_v35  ;;  %v7102_v4 = vmul.f32 %v19699_v29, %v22436_v46  ;;  %v7332_v35 = vsel %vm1888_vm2, %v22419_v50, 0 }
 0xb29   : > { %8352 = vrot.lane.b32.xlu1 %v25717_v19, %s20271_s26  ;;  %8102 = vrot.lane.b32.xlu0 %v20613_v42, %s20271_s26 }
 0xb2a   : > { %v7118_v39 = vpack.c.bf16 %v7102_v4, %v7102_v4 }
 0xb2c   : > { %18161 = vmatmul.mubr.msk.bf16.vlgmr.msra.gmra.mrb[248].mxu0 %vm1692_vm3, %v7118_v39 }
 0xb2d   : > { %18171 = vmatpush3.bf16.msra.mxu0 %v7236_v23  ;;  %8454 = vrot.lane.b32.xlu1 %v25718_v25, %s20271_s26 }
 0xb2e   : > { %8204 = vrot.lane.b32.xlu0 %v20628_v54, %s20271_s26  ;;  %18172 = vmatprep.mubr.msk.bf16.mxu0 %vm20267_vm0, %v25704_v11 }
 0xb2f   : > { %v19701_v46 = vpop.eup %19700  ;;  %v7049_v53 = vpop.xlane.xlu1 %7048  ;;  %18182 = vmatprep.subr.bf16.mxu0 %v25704_v11 }
 0xb30   : > { %19704 = vrcp.f32 %v7049_v53  ;;  %v7104_v8 = vmul.f32 %v19701_v46, %v22441_v49  ;;  %v7380_v53 = vsel %vm1888_vm2, %v22417_v12, 0 }
 0xb31   : > { %8452 = vrot.lane.b32.xlu1 %v25719_v3, %s20271_s26 }
 0xb32   : > { %v19703_v26 = vpop.eup %19702  ;;  %8202 = vrot.lane.b32.xlu0 %v20653_v7, %s20271_s26  ;;  %v7120_v16 = vpack.c.bf16 %v7104_v8, %v7104_v8 }
 0xb33   : > { %v7052_v44 = vpop.xlane.xlu0 %7051  ;;  %v7103_v29 = vmul.f32 %v19703_v26, %v22446_v18  ;;  %v7284_v18 = vsel %vm1888_vm2, %v22413_v32, 0 }
 0xb34   : > { %19706 = vrcp.f32 %v7052_v44  ;;  %18173 = vmatmul.mubr.msk.bf16.vlgmr.msra.gmra.mrb[252].mxu0 %vm1692_vm3, %v7120_v16 }
 0xb35   : > { %18183 = vmatpush3.bf16.msra.mxu0 %v7332_v35  ;;  %8554 = vrot.lane.b32.xlu1 %v25720_v31, %s20271_s26  ;;  %v7119_v49 = vpack.c.bf16 %v7103_v29, %v7103_v29 }
 0xb36   : > { %8304 = vrot.lane.b32.xlu0 %v20669_v24, %s20271_s26  ;;  %18184 = vmatprep.mubr.msk.bf16.mxu0 %vm20267_vm0, %v25704_v11 }
 0xb37   : > { %v7058_v4 = vpop.xlane.xlu0 %7057  ;;  %18167 = vmatmul.mubr.msk.bf16.vlgmr.msra.gmra.mrb[248].mxu1 %vm1692_vm3, %v7119_v49  ;;  %18194 = vmatprep.subr.bf16.mxu0 %v25704_v11 }
 0xb38   : > { %19708 = vrcp.f32 %v7058_v4  ;;  %18177 = vmatpush3.bf16.msra.mxu1 %v7284_v18  ;;  %v7055_v50 = vpop.xlane.xlu1 %7054  ;;  %18178 = vmatprep.mubr.msk.bf16.mxu1 %vm20267_vm0, %v25704_v11  ;;  %v25835_v18 = vld [vmem:[#allocation29_spill] sm:$0xff] }
 0xb39   : > { %19710 = vrcp.f32 %v7055_v50  ;;  %8552 = vrot.lane.b32.xlu1 %v25721_v13, %s20271_s26  ;;  %18188 = vmatprep.subr.bf16.mxu1 %v25704_v11  ;;  %v25836_v50 = vld [vmem:[#allocation18_spill] sm:$0xff] }
 0xb3a   : > { %v19705_v39 = vpop.eup %19704  ;;  %8302 = vrot.lane.b32.xlu0 %v20694_v43, %s20271_s26 }
 0xb3b   : > { %v7105_v32 = vmul.f32 %v19705_v39, %v22452_v27 }
 0xb3d   : > { %8654 = vrot.lane.b32.xlu1 %v25722_v10, %s20271_s26  ;;  %v7121_v23 = vpack.c.bf16 %v7105_v32, %v7105_v32 }
 0xb3e   : > { %v19707_v46 = vpop.eup %19706  ;;  %8404 = vrot.lane.b32.xlu0 %v20708_v0, %s20271_s26 }
 0xb3f   : > { %v7106_v8 = vmul.f32 %v19707_v46, %v22458_v5  ;;  %18179 = vmatmul.mubr.msk.bf16.vlgmr.msra.gmra.mrb[252].mxu1 %vm1692_vm3, %v7121_v23  ;;  %v7061_v26 = vpop.xlane.xlu1 %7060  ;;  %v25834_v5 = vld [vmem:[#allocation80_spill] sm:$0xff]  ;;  %v25837_v23 = vld [vmem:[#allocation79_spill] sm:$0xff] }
 0xb40   : > { %18189 = vmatpush3.bf16.msra.mxu1 %v7380_v53  ;;  %19712 = vrcp.f32 %v7061_v26  ;;  %18190 = vmatprep.mubr.msk.bf16.mxu1 %vm20267_vm0, %v25704_v11  ;;  %v7428_v44 = vsel %vm1888_vm2, %v25834_v5, 0  ;;  %v7524_v26 = vsel %vm1888_vm2, %v22427_v45, 0  ;;  %v25840_v5 = vld [vmem:[#allocation36_spill] sm:$0xff]  ;;  %v25841_v45 = vld [vmem:[#allocation22_spill] sm:$0xff] }
 0xb41   : > { %v7122_v27 = vpack.c.bf16 %v7106_v8, %v7106_v8  ;;  %8652 = vrot.lane.b32.xlu1 %v25723_v55, %s20271_s26  ;;  %18200 = vmatprep.subr.bf16.mxu1 %v25704_v11  ;;  %v25839_v8 = vld [vmem:[#allocation20_spill] sm:$0xff] }
 0xb42   : > { %v19709_v16 = vpop.eup %19708  ;;  %8402 = vrot.lane.b32.xlu0 %v20730_v22, %s20271_s26 }
 0xb43   : > { %v19711_v12 = vpop.eup %19710  ;;  %18185 = vmatmul.mubr.msk.bf16.vlgmr.msra.gmra.mrb[0].mxu0 %vm1692_vm3, %v7122_v27  ;;  %v7064_v29 = vpop.xlane.xlu1 %7063  ;;  %v7108_v49 = vmul.f32 %v19709_v16, %v22463_v58  ;;  %v25838_v58 = vld [vmem:[#allocation35_spill] sm:$0xff] }
 0xb44   : > { %v7107_v35 = vmul.f32 %v19711_v12, %v22465_v33  ;;  %18195 = vmatpush3.bf16.msra.mxu0 %v7428_v44  ;;  %19714 = vrcp.f32 %v7064_v29  ;;  %18196 = vmatprep.mubr.msk.bf16.mxu0 %vm20267_vm0, %v25704_v11  ;;  %v7476_v33 = vsel %vm1888_vm2, %v25837_v23, 0  ;;  %v25844_v23 = vld [vmem:[#allocation25_spill] sm:$0xff] }
 0xb45   : > { %8942 = vrot.lane.b32.xlu1 %v25835_v18, %s20271_s26  ;;  %18206 = vmatprep.subr.bf16.mxu0 %v25704_v11  ;;  %v7124_v46 = vpack.c.bf16 %v7108_v49, %v7108_v49 }
 0xb46   : > { %v7123_v4 = vpack.c.bf16 %v7107_v35, %v7107_v35  ;;  %8504 = vrot.lane.b32.xlu0 %v25836_v50, %s20271_s26  ;;  %v25842_v35 = vld [vmem:[#allocation81_spill] sm:$0xff] }
 0xb47   : > { %v7067_v39 = vpop.xlane.xlu0 %7066  ;;  %v7070_v32 = vpop.xlane.xlu1 %7069  ;;  %v7572_v49 = vsel %vm1888_vm2, %v25842_v35, 0 }
 0xb48   : > { %19716 = vrcp.f32 %v7067_v39  ;;  %18191 = vmatmul.mubr.msk.bf16.vlgmr.msra.gmra.mrb[0].mxu1 %vm1692_vm3, %v7123_v4  ;;  %v25843_v39 = vld [vmem:[#allocation37_spill] sm:$0xff] }
 0xb49   : > { %18201 = vmatpush3.bf16.msra.mxu1 %v7476_v33  ;;  %19718 = vrcp.f32 %v7070_v32  ;;  %9038 = vrot.lane.b32.xlu1 %v25838_v58, %s20271_s26  ;;  %v25845_v33 = vld [vmem:[#allocation82_spill] sm:$0xff] }
 0xb4a   : > { %v19713_v53 = vpop.eup %19712  ;;  %8502 = vrot.lane.b32.xlu0 %v25839_v8, %s20271_s26  ;;  %18202 = vmatprep.mubr.msk.bf16.mxu1 %vm20267_vm0, %v25704_v11 }
 0xb4b   : > { %v7109_v27 = vmul.f32 %v19713_v53, %v22473_v48  ;;  %18197 = vmatmul.mubr.msk.bf16.vlgmr.msra.gmra.mrb[4].mxu0 %vm1692_vm3, %v7124_v46  ;;  %18212 = vmatprep.subr.bf16.mxu1 %v25704_v11  ;;  %v7620_v46 = vsel %vm1888_vm2, %v25845_v33, 0  ;;  %v25850_v33 = vld [vmem:[#allocation41_spill] sm:$0xff] }
 0xb4c   : > { %18207 = vmatpush3.bf16.msra.mxu0 %v7524_v26  ;;  %v7076_v16 = vpop.xlane.xlu1 %7075  ;;  %18208 = vmatprep.mubr.msk.bf16.mxu0 %vm20267_vm0, %v25704_v11 }
 0xb4d   : > { %v7125_v12 = vpack.c.bf16 %v7109_v27, %v7109_v27  ;;  %9134 = vrot.lane.b32.xlu1 %v25840_v5, %s20271_s26  ;;  %18218 = vmatprep.subr.bf16.mxu0 %v25704_v11  ;;  %19720 = vrcp.f32 %v7076_v16  ;;  %v25846_v16 = vld [vmem:[#allocation39_spill] sm:$0xff] }
 0xb4e   : > { %v19715_v44 = vpop.eup %19714  ;;  %8604 = vrot.lane.b32.xlu0 %v25841_v45, %s20271_s26 }
 0xb4f   : > { %v7110_v48 = vmul.f32 %v19715_v44, %v22477_v60  ;;  %v7073_v29 = vpop.xlane.xlu0 %7072  ;;  %v7668_v44 = vsel %vm1888_vm2, %v22432_v62, 0 }
 0xb50   : > { %19722 = vrcp.f32 %v7073_v29  ;;  %18203 = vmatmul.mubr.msk.bf16.vlgmr.msra.gmra.mrb[4].mxu1 %vm1692_vm3, %v7125_v12  ;;  %v25847_v12 = vld [vmem:[#allocation24_spill] sm:$0xff] }
 0xb51   : > { %v7126_v4 = vpack.c.bf16 %v7110_v48, %v7110_v48  ;;  %18213 = vmatpush3.bf16.msra.mxu1 %v7572_v49  ;;  %9230 = vrot.lane.b32.xlu1 %v25843_v39, %s20271_s26  ;;  %v25849_v49 = vld [vmem:[#allocation31_spill] sm:$0xff]  ;;  %v25870_v39 = vld [vmem:[#allocation17_spill] sm:$0xff] }
 0xb52   : > { %v19717_v32 = vpop.eup %19716  ;;  %8602 = vrot.lane.b32.xlu0 %v25844_v23, %s20271_s26  ;;  %18214 = vmatprep.mubr.msk.bf16.mxu1 %vm20267_vm0, %v25704_v11 }
 0xb53   : > { %v19719_v60 = vpop.eup %19718  ;;  %v7111_v53 = vmul.f32 %v19717_v32, %v22484_v59  ;;  %18209 = vmatmul.mubr.msk.bf16.vlgmr.msra.gmra.mrb[8].mxu0 %vm1692_vm3, %v7126_v4  ;;  %18224 = vmatprep.subr.bf16.mxu1 %v25704_v11  ;;  %v7716_v4 = vsel %vm1888_vm2, %v22531_v1, 0  ;;  %v25851_v1 = vld [vmem:[#allocation32_spill] sm:$0xff] }
 0xb54   : > { %18219 = vmatpush3.bf16.msra.mxu0 %v7620_v46  ;;  %18220 = vmatprep.mubr.msk.bf16.mxu0 %vm20267_vm0, %v25704_v11  ;;  %v7112_v27 = vmul.f32 %v19719_v60, %v22482_v37  ;;  %v25848_v37 = vld [vmem:[#allocation38_spill] sm:$0xff] }
 0xb55   : > { %v7127_v26 = vpack.c.bf16 %v7111_v53, %v7111_v53  ;;  %9326 = vrot.lane.b32.xlu1 %v25846_v16, %s20271_s26  ;;  %18230 = vmatprep.subr.bf16.mxu0 %v25704_v11 }
 0xb56   : > { %8894 = vrot.lane.b32.xlu0 %v25847_v12, %s20271_s26  ;;  %v7128_v29 = vpack.c.bf16 %v7112_v27, %v7112_v27 }
 0xb57   : > { %v7079_v59 = vpop.xlane.xlu0 %7078  ;;  %v19721_v48 = vpop.eup %19720 }
 0xb58   : > { %19724 = vrcp.f32 %v7079_v59  ;;  %18215 = vmatmul.mubr.msk.bf16.vlgmr.msra.gmra.mrb[8].mxu1 %vm1692_vm3, %v7127_v26  ;;  %v7114_v32 = vmul.f32 %v19721_v48, %v22491_v51  ;;  %v25852_v26 = vld [vmem:[#allocation33_spill] sm:$0xff]  ;;  %v25853_v48 = vld [vmem:[#allocation34_spill] sm:$0xff] }
 0xb59   : > { %18225 = vmatpush3.bf16.msra.mxu1 %v7668_v44  ;;  %9374 = vrot.lane.b32.xlu1 %v25848_v37, %s20271_s26 }
 0xb5a   : > { %v19723_v35 = vpop.eup %19722  ;;  %8990 = vrot.lane.b32.xlu0 %v25849_v49, %s20271_s26  ;;  %18226 = vmatprep.mubr.msk.bf16.mxu1 %vm20267_vm0, %v25704_v11  ;;  %v7130_v53 = vpack.c.bf16 %v7114_v32, %v7114_v32 }
 0xb5b   : > { %v7113_v62 = vmul.f32 %v19723_v35, %v22495_v20  ;;  %18221 = vmatmul.mubr.msk.bf16.vlgmr.msra.gmra.mrb[12].mxu0 %vm1692_vm3, %v7128_v29  ;;  %18236 = vmatprep.subr.bf16.mxu1 %v25704_v11  ;;  %v7764_v20 = vsel %vm1888_vm2, %v22508_v41, 0  ;;  %v7807_v46 = vpop.permute.xlu0 %7806  ;;  %v7855_v41 = vpop.permute.xlu1 %7854 }
 0xb5c   : > { %18231 = vmatpush3.bf16.msra.mxu0 %v7716_v4  ;;  %18232 = vmatprep.mubr.msk.bf16.mxu0 %vm20267_vm0, %v25704_v11  ;;  %v7812_v59 = vsel %vm1888_vm2, %v7807_v46, 0  ;;  %v7860_v29 = vsel %vm1888_vm2, %v7855_v41, 0 }
 0xb5d   : > { %v7129_v60 = vpack.c.bf16 %v7113_v62, %v7113_v62  ;;  %9422 = vrot.lane.b32.xlu1 %v25850_v33, %s20271_s26  ;;  %18242 = vmatprep.subr.bf16.mxu0 %v25704_v11 }
 0xb5e   : > { %9086 = vrot.lane.b32.xlu0 %v25851_v1, %s20271_s26 }
 0xb60   : > { %18227 = vmatmul.mubr.msk.bf16.vlgmr.msra.gmra.mrb[12].mxu1 %vm1692_vm3, %v7129_v60 }
 0xb61   : > { %18237 = vmatpush3.bf16.msra.mxu1 %v7764_v20  ;;  %18238 = vmatprep.mubr.msk.bf16.mxu1 %vm20267_vm0, %v25704_v11 }
 0xb62   : > { %v19725_v51 = vpop.eup %19724  ;;  %9182 = vrot.lane.b32.xlu0 %v25852_v26, %s20271_s26  ;;  %18248 = vmatprep.subr.bf16.mxu1 %v25704_v11 }
 0xb63   : > { %v7115_v27 = vmul.f32 %v19725_v51, %v22499_v56  ;;  %18233 = vmatmul.mubr.msk.bf16.vlgmr.msra.gmra.mrb[16].mxu0 %vm1692_vm3, %v7130_v53 }
 0xb64   : > { %18243 = vmatpush3.bf16.msra.mxu0 %v7812_v59  ;;  %18244 = vmatprep.mubr.msk.bf16.mxu0 %vm20267_vm0, %v25704_v11 }
 0xb65   : > { %v7131_v44 = vpack.c.bf16 %v7115_v27, %v7115_v27  ;;  %18254 = vmatprep.subr.bf16.mxu0 %v25704_v11 }
 0xb66   : > { %9278 = vrot.lane.b32.xlu0 %v25853_v48, %s20271_s26 }
 0xb68   : > { %18239 = vmatmul.mubr.msk.bf16.vlgmr.msra.gmra.mrb[16].mxu1 %vm1692_vm3, %v7131_v44 }
 0xb69   : > { %18249 = vmatpush3.bf16.msra.mxu1 %v7860_v29  ;;  %18250 = vmatprep.mubr.msk.bf16.mxu1 %vm20267_vm0, %v25704_v11 }
 0xb6a   : > { %18260 = vmatprep.subr.bf16.mxu1 %v25704_v11 }
 0xb81   : > { %v7082_v56 = vpop.xlane.xlu1 %7081 }
 0xb82   : > { %19726 = vrcp.f32 %v7082_v56 }
 0xb85   : > { %v7955_v35 = vpop.permute.xlu1 %7954 }
 0xb89   : > { %v7953_v4 = vpop.permute.xlu1 %7952 }
 0xb8c   : > { %v19727_v62 = vpop.eup %19726  ;;  %v7085_v32 = vpop.xlane.xlu0 %7084 }
 0xb8d   : > { %v7116_v60 = vmul.f32 %v19727_v62, %v22511_v57  ;;  %19728 = vrcp.f32 %v7085_v32  ;;  %v8055_v20 = vpop.permute.xlu1 %8054 }
 0xb8f   : > { %v7132_v46 = vpack.c.bf16 %v7116_v60, %v7116_v60  ;;  %v7960_v60 = vsel %vm955_vm1, %v7955_v35, 0 }
 0xb90   : > { %v7905_v53 = vpop.permute.xlu0 %7904 }
 0xb91   : > { %v7910_v51 = vsel %vm955_vm1, %v7905_v53, 0  ;;  %18245 = vmatmul.mubr.msk.bf16.vlgmr.msra.gmra.mrb[20].mxu0 %vm1692_vm3, %v7132_v46  ;;  %v8053_v27 = vpop.permute.xlu1 %8052 }
 0xb92   : > { %18255 = vmatpush3.bf16.xpose.msra.mxu0 %v7910_v51  ;;  %18256 = vmatprep.mubr.msk.bf16.mxu0 %vm20267_vm0, %v25704_v11 }
 0xb93   : > { %18266 = vmatprep.subr.bf16.mxu0 %v25704_v11 }
 0xb94   : > { %v7903_v59 = vpop.permute.xlu0 %7902 }
 0xb95   : > { %v8155_v41 = vpop.permute.xlu1 %8154 }
 0xb97   : > { %v19729_v44 = vpop.eup %19728 }
 0xb98   : > { %v7117_v57 = vmul.f32 %v19729_v44, %v22515_v14  ;;  %v8005_v29 = vpop.permute.xlu0 %8004 }
 0xb99   : > { %v8010_v56 = vsel %vm955_vm1, %v8005_v29, 0  ;;  %18257 = vmatmul.mubr.msk.bf16.vlgmr.msra.gmra.mrb[24].mxu0 %vm955_vm1, %v7903_v59  ;;  %v8153_v62 = vpop.permute.xlu1 %8152  ;;  %v8060_v59 = vsel %vm955_vm1, %v8055_v20, 0 }
 0xb9a   : > { %v7133_v32 = vpack.c.bf16 %v7117_v57, %v7117_v57  ;;  %18267 = vmatpush3.bf16.xpose.msra.mxu0 %v8010_v56  ;;  %18268 = vmatprep.mubr.msk.bf16.mxu0 %vm20267_vm0, %v25704_v11 }
 0xb9b   : > { %18278 = vmatprep.subr.bf16.mxu0 %v25704_v11 }
 0xb9c   : > { %v8003_v46 = vpop.permute.xlu0 %8002  ;;  %18251 = vmatmul.mubr.msk.bf16.vlgmr.msra.gmra.mrb[20].mxu1 %vm1692_vm3, %v7133_v32 }
 0xb9d   : > { %18261 = vmatpush3.bf16.xpose.msra.mxu1 %v7960_v60  ;;  %v8255_v14 = vpop.permute.xlu1 %8254  ;;  %18262 = vmatprep.mubr.msk.bf16.mxu1 %vm20267_vm0, %v25704_v11 }
 0xb9e   : > { %18272 = vmatprep.subr.bf16.mxu1 %v25704_v11 }
 0xba0   : > { %v8105_v53 = vpop.permute.xlu0 %8104 }
 0xba1   : > { %v8110_v51 = vsel %vm955_vm1, %v8105_v53, 0  ;;  %18269 = vmatmul.mubr.msk.bf16.vlgmr.msra.gmra.mrb[28].mxu0 %vm955_vm1, %v8003_v46  ;;  %v8253_v35 = vpop.permute.xlu1 %8252 }
 0xba2   : > { %18279 = vmatpush3.bf16.xpose.msra.mxu0 %v8110_v51  ;;  %18280 = vmatprep.mubr.msk.bf16.mxu0 %vm20267_vm0, %v25704_v11 }
 0xba3   : > { %18290 = vmatprep.subr.bf16.mxu0 %v25704_v11 }
 0xba4   : > { %v8103_v44 = vpop.permute.xlu0 %8102  ;;  %18263 = vmatmul.mubr.msk.bf16.vlgmr.msra.gmra.mrb[24].mxu1 %vm955_vm1, %v7953_v4  ;;  %v8160_v4 = vsel %vm955_vm1, %v8155_v41, 0 }
 0xba5   : > { %18273 = vmatpush3.bf16.xpose.msra.mxu1 %v8060_v59  ;;  %18274 = vmatprep.mubr.msk.bf16.mxu1 %vm20267_vm0, %v25704_v11  ;;  %v8355_v29 = vpop.permute.xlu1 %8354 }
 0xba6   : > { %18284 = vmatprep.subr.bf16.mxu1 %v25704_v11 }
 0xba8   : > { %v8205_v57 = vpop.permute.xlu0 %8204 }
 0xba9   : > { %v8210_v56 = vsel %vm955_vm1, %v8205_v57, 0  ;;  %18281 = vmatmul.mubr.msk.bf16.vlgmr.msra.gmra.mrb[32].mxu0 %vm955_vm1, %v8103_v44  ;;  %v8353_v32 = vpop.permute.xlu1 %8352 }
 0xbaa   : > { %18291 = vmatpush3.bf16.xpose.msra.mxu0 %v8210_v56  ;;  %18292 = vmatprep.mubr.msk.bf16.mxu0 %vm20267_vm0, %v25704_v11 }
 0xbab   : > { %18302 = vmatprep.subr.bf16.mxu0 %v25704_v11 }
 0xbac   : > { %v8203_v20 = vpop.permute.xlu0 %8202  ;;  %18275 = vmatmul.mubr.msk.bf16.vlgmr.msra.gmra.mrb[28].mxu1 %vm955_vm1, %v8053_v27  ;;  %v8260_v27 = vsel %vm955_vm1, %v8255_v14, 0 }
 0xbad   : > { %18285 = vmatpush3.bf16.xpose.msra.mxu1 %v8160_v4  ;;  %18286 = vmatprep.mubr.msk.bf16.mxu1 %vm20267_vm0, %v25704_v11  ;;  %v8455_v53 = vpop.permute.xlu1 %8454 }
 0xbae   : > { %18296 = vmatprep.subr.bf16.mxu1 %v25704_v11 }
 0xbb0   : > { %v8305_v60 = vpop.permute.xlu0 %8304 }
 0xbb1   : > { %v8310_v46 = vsel %vm955_vm1, %v8305_v60, 0  ;;  %18293 = vmatmul.mubr.msk.bf16.vlgmr.msra.gmra.mrb[36].mxu0 %vm955_vm1, %v8203_v20  ;;  %v8453_v14 = vpop.permute.xlu1 %8452 }
 0xbb2   : > { %18303 = vmatpush3.bf16.xpose.msra.mxu0 %v8310_v46  ;;  %18304 = vmatprep.mubr.msk.bf16.mxu0 %vm20267_vm0, %v25704_v11 }
 0xbb3   : > { %18314 = vmatprep.subr.bf16.mxu0 %v25704_v11 }
 0xbb4   : > { %v8303_v41 = vpop.permute.xlu0 %8302  ;;  %18287 = vmatmul.mubr.msk.bf16.vlgmr.msra.gmra.mrb[32].mxu1 %vm955_vm1, %v8153_v62  ;;  %v8360_v62 = vsel %vm955_vm1, %v8355_v29, 0 }
 0xbb5   : > { %18297 = vmatpush3.bf16.xpose.msra.mxu1 %v8260_v27  ;;  %18298 = vmatprep.mubr.msk.bf16.mxu1 %vm20267_vm0, %v25704_v11  ;;  %v8555_v56 = vpop.permute.xlu1 %8554 }
 0xbb6   : > { %18308 = vmatprep.subr.bf16.mxu1 %v25704_v11 }
 0xbb8   : > { %v8405_v51 = vpop.permute.xlu0 %8404 }
 0xbb9   : > { %v8410_v59 = vsel %vm955_vm1, %v8405_v51, 0  ;;  %18305 = vmatmul.mubr.msk.bf16.vlgmr.msra.gmra.mrb[40].mxu0 %vm955_vm1, %v8303_v41  ;;  %v8553_v20 = vpop.permute.xlu1 %8552 }
 0xbba   : > { %18315 = vmatpush3.bf16.xpose.msra.mxu0 %v8410_v59  ;;  %18316 = vmatprep.mubr.msk.bf16.mxu0 %vm20267_vm0, %v25704_v11 }
 0xbbb   : > { %18326 = vmatprep.subr.bf16.mxu0 %v25704_v11 }
 0xbbc   : > { %v8403_v44 = vpop.permute.xlu0 %8402  ;;  %18299 = vmatmul.mubr.msk.bf16.vlgmr.msra.gmra.mrb[36].mxu1 %vm955_vm1, %v8253_v35  ;;  %v8460_v35 = vsel %vm955_vm1, %v8455_v53, 0 }
 0xbbd   : > { %18309 = vmatpush3.bf16.xpose.msra.mxu1 %v8360_v62  ;;  %18310 = vmatprep.mubr.msk.bf16.mxu1 %vm20267_vm0, %v25704_v11  ;;  %v8655_v41 = vpop.permute.xlu1 %8654 }
 0xbbe   : > { %18320 = vmatprep.subr.bf16.mxu1 %v25704_v11 }
 0xbc0   : > { %v8505_v57 = vpop.permute.xlu0 %8504 }
 0xbc1   : > { %v8510_v4 = vsel %vm955_vm1, %v8505_v57, 0  ;;  %18317 = vmatmul.mubr.msk.bf16.vlgmr.msra.gmra.mrb[44].mxu0 %vm955_vm1, %v8403_v44  ;;  %v8653_v59 = vpop.permute.xlu1 %8652 }
 0xbc2   : > { %18327 = vmatpush3.bf16.xpose.msra.mxu0 %v8510_v4  ;;  %18328 = vmatprep.mubr.msk.bf16.mxu0 %vm20267_vm0, %v25704_v11 }
 0xbc3   : > { %18338 = vmatprep.subr.bf16.mxu0 %v25704_v11 }
 0xbc4   : > { %v8503_v29 = vpop.permute.xlu0 %8502  ;;  %18311 = vmatmul.mubr.msk.bf16.vlgmr.msra.gmra.mrb[40].mxu1 %vm955_vm1, %v8353_v32  ;;  %v8560_v32 = vsel %vm955_vm1, %v8555_v56, 0 }
 0xbc5   : > { %18321 = vmatpush3.bf16.xpose.msra.mxu1 %v8460_v35  ;;  %18322 = vmatprep.mubr.msk.bf16.mxu1 %vm20267_vm0, %v25704_v11  ;;  %v8943_v62 = vpop.permute.xlu1 %8942 }
 0xbc6   : > { %18332 = vmatprep.subr.bf16.mxu1 %v25704_v11  ;;  %v8948_v44 = vsel %vm1888_vm2, %v8943_v62, 0 }
 0xbc8   : > { %v8605_v60 = vpop.permute.xlu0 %8604 }
 0xbc9   : > { %v8610_v46 = vsel %vm955_vm1, %v8605_v60, 0  ;;  %18329 = vmatmul.mubr.msk.bf16.vlgmr.msra.gmra.mrb[48].mxu0 %vm955_vm1, %v8503_v29 }
 0xbca   : > { %18339 = vmatpush3.bf16.xpose.msra.mxu0 %v8610_v46  ;;  %18340 = vmatprep.mubr.msk.bf16.mxu0 %vm20267_vm0, %v25704_v11 }
 0xbcb   : > { %18350 = vmatprep.subr.bf16.mxu0 %v25704_v11 }
 0xbcc   : > { %v8603_v27 = vpop.permute.xlu0 %8602  ;;  %18323 = vmatmul.mubr.msk.bf16.vlgmr.msra.gmra.mrb[44].mxu1 %vm955_vm1, %v8453_v14  ;;  %v8660_v14 = vsel %vm955_vm1, %v8655_v41, 0 }
 0xbcd   : > { %18333 = vmatpush3.bf16.xpose.msra.mxu1 %v8560_v32  ;;  %18334 = vmatprep.mubr.msk.bf16.mxu1 %vm20267_vm0, %v25704_v11 }
 0xbce   : > { %18344 = vmatprep.subr.bf16.mxu1 %v25704_v11 }
 0xbd0   : > { %v8895_v53 = vpop.permute.xlu0 %8894 }
 0xbd1   : > { %v8900_v51 = vsel %vm1888_vm2, %v8895_v53, 0  ;;  %18341 = vmatmul.mubr.msk.bf16.vlgmr.msra.gmra.mrb[52].mxu0 %vm955_vm1, %v8603_v27 }
 0xbd2   : > { %18351 = vmatpush3.bf16.msra.mxu0 %v8900_v51  ;;  %18352 = vmatprep.mubr.msk.bf16.mxu0 %vm20267_vm0, %v25704_v11 }
 0xbd3   : > { %18362 = vmatprep.subr.bf16.mxu0 %v25704_v11 }
 0xbd4   : > { %18335 = vmatmul.mubr.msk.bf16.vlgmr.msra.gmra.mrb[48].mxu1 %vm955_vm1, %v8553_v20 }
 0xbd5   : > { %18345 = vmatpush3.bf16.xpose.msra.mxu1 %v8660_v14  ;;  %18346 = vmatprep.mubr.msk.bf16.mxu1 %vm20267_vm0, %v25704_v11 }
 0xbd6   : > { %18356 = vmatprep.subr.bf16.mxu1 %v25704_v11 }
 0xbdc   : > { %18347 = vmatmul.mubr.msk.bf16.vlgmr.msra.gmra.mrb[52].mxu1 %vm955_vm1, %v8653_v59 }
 0xbdd   : > { %18357 = vmatpush3.bf16.msra.mxu1 %v8948_v44  ;;  %18358 = vmatprep.mubr.msk.bf16.mxu1 %vm20267_vm0, %v25704_v11 }
 0xbde   : > { %18368 = vmatprep.subr.bf16.mxu1 %v25704_v11 }
 0xbff   : > { %v22797_v57 = vpop.f32.mrb[248].mxu0 }
 0xc00   : > { %25854 = vst [vmem:[#allocation80_spill] sm:$0xff] %v22797_v57  ;;  %v18162_v56 = vpop.f32.mrb[249].mxu0 }
 0xc01   : > { %v7179_v4 = vpop.f32.mrb[250].mxu0 }
 0xc02   : > { %v18163_v35 = vpop.f32.mrb[251].mxu0 }
 0xc07   : > { %v22799_v29 = vpop.f32.mrb[252].mxu0 }
 0xc08   : > { %25855 = vst [vmem:[#allocation79_spill] sm:$0xff] %v22799_v29  ;;  %v18174_v20 = vpop.f32.mrb[253].mxu0 }
 0xc09   : > { %v7275_v60 = vpop.f32.mrb[254].mxu0 }
 0xc0a   : > { %v22801_v46 = vpop.f32.mrb[248].mxu1  ;;  %v18175_v32 = vpop.f32.mrb[255].mxu0 }
 0xc0b   : > { %25856 = vst [vmem:[#allocation81_spill] sm:$0xff] %v22801_v46  ;;  %v18168_v41 = vpop.f32.mrb[249].mxu1 }
 0xc0c   : > { %v7227_v53 = vpop.f32.mrb[250].mxu1 }
 0xc0d   : > { %v18169_v51 = vpop.f32.mrb[251].mxu1 }
 0xc12   : > { %v22805_v59 = vpop.f32.mrb[252].mxu1 }
 0xc13   : > { %25857 = vst [vmem:[#allocation82_spill] sm:$0xff] %v22805_v59  ;;  %v18180_v62 = vpop.f32.mrb[253].mxu1 }
 0xc14   : > { %v7323_v44 = vpop.f32.mrb[254].mxu1 }
 0xc15   : > { %v18181_v56 = vpop.f32.mrb[255].mxu1 }
 0xc16   : > { %v22809_v4 = vpop.f32.mrb[0].mxu0 }
 0xc17   : > { %25858 = vst [vmem:[#allocation83_spill] sm:$0xff] %v22809_v4  ;;  %v18186_v35 = vpop.f32.mrb[1].mxu0 }
 0xc18   : > { %v7371_v20 = vpop.f32.mrb[2].mxu0 }
 0xc19   : > { %v18187_v60 = vpop.f32.mrb[3].mxu0 }
 0xc1b   : > { %v22811_v32 = vpop.f32.mrb[0].mxu1 }
 0xc1c   : > { %25859 = vst [vmem:[#allocation84_spill] sm:$0xff] %v22811_v32  ;;  %v18192_v53 = vpop.f32.mrb[1].mxu1 }
 0xc1d   : > { %v7419_v51 = vpop.f32.mrb[2].mxu1 }
 0xc1e   : > { %v18193_v27 = vpop.f32.mrb[3].mxu1  ;;  %v22815_v57 = vpop.f32.mrb[4].mxu0 }
 0xc1f   : > { %25860 = vst [vmem:[#allocation85_spill] sm:$0xff] %v22815_v57  ;;  %v18198_v46 = vpop.f32.mrb[5].mxu0 }
 0xc20   : > { %v7467_v14 = vpop.f32.mrb[6].mxu0 }
 0xc21   : > { %v18199_v62 = vpop.f32.mrb[7].mxu0 }
 0xc23   : > { %v22817_v44 = vpop.f32.mrb[4].mxu1 }
 0xc24   : > { %25861 = vst [vmem:[#allocation86_spill] sm:$0xff] %v22817_v44  ;;  %v18204_v35 = vpop.f32.mrb[5].mxu1 }
 0xc25   : > { %v7515_v20 = vpop.f32.mrb[6].mxu1 }
 0xc26   : > { %v18205_v60 = vpop.f32.mrb[7].mxu1  ;;  %v22821_v29 = vpop.f32.mrb[8].mxu0 }
 0xc27   : > { %25862 = vst [vmem:[#allocation87_spill] sm:$0xff] %v22821_v29  ;;  %v18210_v59 = vpop.f32.mrb[9].mxu0 }
 0xc28   : > { %v7563_v41 = vpop.f32.mrb[10].mxu0 }
 0xc29   : > { %v18211_v53 = vpop.f32.mrb[11].mxu0 }
 0xc2b   : > { %v22823_v51 = vpop.f32.mrb[8].mxu1 }
 0xc2c   : > { %25863 = vst [vmem:[#allocation88_spill] sm:$0xff] %v22823_v51  ;;  %v18216_v27 = vpop.f32.mrb[9].mxu1 }
 0xc2d   : > { %v7611_v14 = vpop.f32.mrb[10].mxu1 }
 0xc2e   : > { %v18217_v62 = vpop.f32.mrb[11].mxu1  ;;  %v22827_v4 = vpop.f32.mrb[12].mxu0 }
 0xc2f   : > { %25864 = vst [vmem:[#allocation89_spill] sm:$0xff] %v22827_v4  ;;  %v18222_v32 = vpop.f32.mrb[13].mxu0 }
 0xc30   : > { %v7659_v56 = vpop.f32.mrb[14].mxu0 }
 0xc31   : > { %v18223_v35 = vpop.f32.mrb[15].mxu0 }
 0xc33   : > { %v22829_v20 = vpop.f32.mrb[12].mxu1 }
 0xc34   : > { %25865 = vst [vmem:[#allocation90_spill] sm:$0xff] %v22829_v20  ;;  %v18228_v41 = vpop.f32.mrb[13].mxu1 }
 0xc35   : > { %v7707_v60 = vpop.f32.mrb[14].mxu1 }
 0xc36   : > { %v18229_v53 = vpop.f32.mrb[15].mxu1  ;;  %v22833_v57 = vpop.f32.mrb[16].mxu0 }
 0xc37   : > { %25866 = vst [vmem:[#allocation91_spill] sm:$0xff] %v22833_v57  ;;  %v18234_v44 = vpop.f32.mrb[17].mxu0 }
 0xc38   : > { %v7755_v46 = vpop.f32.mrb[18].mxu0 }
 0xc39   : > { %v18235_v27 = vpop.f32.mrb[19].mxu0 }
 0xc3b   : > { %v22835_v14 = vpop.f32.mrb[16].mxu1 }
 0xc3c   : > { %25867 = vst [vmem:[#allocation92_spill] sm:$0xff] %v22835_v14  ;;  %v18240_v56 = vpop.f32.mrb[17].mxu1 }
 0xc3d   : > { %v7803_v62 = vpop.f32.mrb[18].mxu1 }
 0xc3e   : > { %v18241_v35 = vpop.f32.mrb[19].mxu1 }
 0xc64   : > { %v22839_v29 = vpop.f32.mrb[20].mxu0 }
 0xc65   : > { %25868 = vst [vmem:[#allocation93_spill] sm:$0xff] %v22839_v29  ;;  %v18246_v51 = vpop.f32.mrb[21].mxu0 }
 0xc66   : > { %v7851_v59 = vpop.f32.mrb[22].mxu0 }
 0xc67   : > { %v18247_v41 = vpop.f32.mrb[23].mxu0 }
 0xc6c   : > { %v22841_v60 = vpop.f32.mrb[24].mxu0 }
 0xc6d   : > { %v18258_v53 = vpop.f32.mrb[25].mxu0  ;;  %v8702_v44 = vsel %vm1692_vm3, %v22841_v60, -inf }
 0xc6e   : > { %8703 = vmax.xlane.f32.xlu0 %v8702_v44  ;;  %v7949_v46 = vpop.f32.mrb[26].mxu0 }
 0xc6f   : > { %v22845_v27 = vpop.f32.mrb[20].mxu1  ;;  %v18259_v4 = vpop.f32.mrb[27].mxu0 }
 0xc70   : > { %25869 = vst [vmem:[#allocation94_spill] sm:$0xff] %v22845_v27  ;;  %v18252_v62 = vpop.f32.mrb[21].mxu1 }
 0xc71   : > { %v7899_v35 = vpop.f32.mrb[22].mxu1 }
 0xc72   : > { %v18253_v32 = vpop.f32.mrb[23].mxu1 }
 0xc74   : > { %v22849_v51 = vpop.f32.mrb[28].mxu0 }
 0xc75   : > { %v18270_v59 = vpop.f32.mrb[29].mxu0  ;;  %v8708_v41 = vsel %vm1692_vm3, %v22849_v51, -inf }
 0xc76   : > { %8709 = vmax.xlane.f32.xlu0 %v8708_v41  ;;  %v8049_v53 = vpop.f32.mrb[30].mxu0 }
 0xc77   : > { %v22853_v57 = vpop.f32.mrb[24].mxu1  ;;  %v18271_v44 = vpop.f32.mrb[31].mxu0 }
 0xc78   : > { %v18264_v46 = vpop.f32.mrb[25].mxu1  ;;  %v8705_v4 = vsel %vm1692_vm3, %v22853_v57, -inf }
 0xc79   : > { %8706 = vmax.xlane.f32.xlu1 %v8705_v4  ;;  %v7999_v56 = vpop.f32.mrb[26].mxu1 }
 0xc7a   : > { %v18265_v62 = vpop.f32.mrb[27].mxu1 }
 0xc7c   : > { %v22857_v35 = vpop.f32.mrb[32].mxu0 }
 0xc7d   : > { %v18282_v32 = vpop.f32.mrb[33].mxu0  ;;  %v8714_v56 = vsel %vm1692_vm3, %v22857_v35, -inf }
 0xc7e   : > { %v8149_v29 = vpop.f32.mrb[34].mxu0 }
 0xc7f   : > { %v22859_v59 = vpop.f32.mrb[28].mxu1  ;;  %v18283_v27 = vpop.f32.mrb[35].mxu0 }
 0xc80   : > { %v18276_v14 = vpop.f32.mrb[29].mxu1  ;;  %v8711_v41 = vsel %vm1692_vm3, %v22859_v59, -inf }
 0xc81   : > { %8712 = vmax.xlane.f32.xlu0 %v8711_v41  ;;  %v8099_v53 = vpop.f32.mrb[30].mxu1 }
 0xc82   : > { %v18277_v44 = vpop.f32.mrb[31].mxu1 }
 0xc84   : > { %v22863_v46 = vpop.f32.mrb[36].mxu0 }
 0xc85   : > { %v18294_v4 = vpop.f32.mrb[37].mxu0  ;;  %8715 = vmax.xlane.f32.xlu0 %v8714_v56  ;;  %v8720_v14 = vsel %vm1692_vm3, %v22863_v46, -inf }
 0xc86   : > { %v8249_v62 = vpop.f32.mrb[38].mxu0 }
 0xc87   : > { %v22867_v32 = vpop.f32.mrb[32].mxu1  ;;  %v18295_v29 = vpop.f32.mrb[39].mxu0 }
 0xc88   : > { %v18288_v20 = vpop.f32.mrb[33].mxu1  ;;  %v8717_v27 = vsel %vm1692_vm3, %v22867_v32, -inf }
 0xc89   : > { %8721 = vmax.xlane.f32.xlu0 %v8720_v14  ;;  %8718 = vmax.xlane.f32.xlu1 %v8717_v27  ;;  %v8199_v41 = vpop.f32.mrb[34].mxu1 }
 0xc8a   : > { %v18289_v53 = vpop.f32.mrb[35].mxu1 }
 0xc8c   : > { %v22873_v44 = vpop.f32.mrb[40].mxu0 }
 0xc8d   : > { %v18306_v48 = vpop.f32.mrb[41].mxu0  ;;  %v8726_v56 = vsel %vm1692_vm3, %v22873_v44, -inf }
 0xc8e   : > { %v8349_v4 = vpop.f32.mrb[42].mxu0  ;;  %8727 = vmax.xlane.f32.xlu0 %v8726_v56 }
 0xc8f   : > { %v22877_v62 = vpop.f32.mrb[36].mxu1  ;;  %v18307_v20 = vpop.f32.mrb[43].mxu0 }
 0xc90   : > { %v18300_v29 = vpop.f32.mrb[37].mxu1  ;;  %v8723_v26 = vsel %vm1692_vm3, %v22877_v62, -inf }
 0xc91   : > { %8724 = vmax.xlane.f32.xlu1 %v8723_v26  ;;  %v8299_v14 = vpop.f32.mrb[38].mxu1 }
 0xc92   : > { %v18301_v27 = vpop.f32.mrb[39].mxu1 }
 0xc94   : > { %v22881_v41 = vpop.f32.mrb[44].mxu0 }
 0xc95   : > { %v18318_v53 = vpop.f32.mrb[45].mxu0  ;;  %v8732_v48 = vsel %vm1692_vm3, %v22881_v41, -inf }
 0xc96   : > { %v8449_v1 = vpop.f32.mrb[46].mxu0  ;;  %8733 = vmax.xlane.f32.xlu0 %v8732_v48 }
 0xc97   : > { %v22885_v4 = vpop.f32.mrb[40].mxu1  ;;  %v18319_v56 = vpop.f32.mrb[47].mxu0 }
 0xc98   : > { %v18312_v33 = vpop.f32.mrb[41].mxu1  ;;  %v8729_v20 = vsel %vm1692_vm3, %v22885_v4, -inf }
 0xc99   : > { %8730 = vmax.xlane.f32.xlu1 %v8729_v20  ;;  %v8399_v29 = vpop.f32.mrb[42].mxu1 }
 0xc9a   : > { %v18313_v26 = vpop.f32.mrb[43].mxu1 }
 0xc9c   : > { %v22889_v14 = vpop.f32.mrb[48].mxu0 }
 0xc9d   : > { %v18330_v27 = vpop.f32.mrb[49].mxu0  ;;  %v8738_v53 = vsel %vm1692_vm3, %v22889_v14, -inf }
 0xc9e   : > { %v8549_v49 = vpop.f32.mrb[50].mxu0  ;;  %8739 = vmax.xlane.f32.xlu0 %v8738_v53 }
 0xc9f   : > { %v22893_v1 = vpop.f32.mrb[44].mxu1  ;;  %v18331_v48 = vpop.f32.mrb[51].mxu0 }
 0xca0   : > { %v18324_v37 = vpop.f32.mrb[45].mxu1  ;;  %v8735_v33 = vsel %vm1692_vm3, %v22893_v1, -inf }
 0xca1   : > { %8736 = vmax.xlane.f32.xlu1 %v8735_v33  ;;  %v8499_v56 = vpop.f32.mrb[46].mxu1 }
 0xca2   : > { %v18325_v20 = vpop.f32.mrb[47].mxu1 }
 0xca4   : > { %v22897_v29 = vpop.f32.mrb[52].mxu0 }
 0xca5   : > { %v18342_v26 = vpop.f32.mrb[53].mxu0  ;;  %v8744_v27 = vsel %vm1692_vm3, %v22897_v29, -inf }
 0xca6   : > { %v8649_v12 = vpop.f32.mrb[54].mxu0  ;;  %8745 = vmax.xlane.f32.xlu0 %v8744_v27  ;;  %v22913_v27 = vpop.permute.xlu1 %9038 }
 0xca7   : > { %v22901_v49 = vpop.f32.mrb[48].mxu1  ;;  %v18343_v53 = vpop.f32.mrb[55].mxu0  ;;  %v25871_v12 = vld [vmem:[#allocation40_spill] sm:$0xff] }
 0xca8   : > { %v18336_v16 = vpop.f32.mrb[49].mxu1  ;;  %v8741_v37 = vsel %vm1692_vm3, %v22901_v49, -inf  ;;  %v22915_v53 = vpop.permute.xlu0 %8990 }
 0xca9   : > { %8742 = vmax.xlane.f32.xlu1 %v8741_v37  ;;  %v8599_v48 = vpop.f32.mrb[50].mxu1 }
 0xcaa   : > { %v18337_v33 = vpop.f32.mrb[51].mxu1  ;;  %v22917_v37 = vpop.permute.xlu1 %9134 }
 0xcac   : > { %v22919_v48 = vpop.permute.xlu0 %9086 }
 0xcaf   : > { %v22905_v56 = vpop.f32.mrb[52].mxu1 }
 0xcb0   : > { %v18348_v20 = vpop.f32.mrb[53].mxu1  ;;  %v8747_v16 = vsel %vm1692_vm3, %v22905_v56, -inf  ;;  %v22923_v33 = vpop.permute.xlu0 %9182 }
 0xcb1   : > { %v8699_v23 = vpop.f32.mrb[54].mxu1  ;;  %25873 = vst [vmem:[#allocation96_spill] sm:$0xff] %v22923_v33 }
 0xcb2   : > { %v18349_v26 = vpop.f32.mrb[55].mxu1  ;;  %v22921_v23 = vpop.permute.xlu1 %9230 }
 0xcb3   : > { %25872 = vst [vmem:[#allocation95_spill] sm:$0xff] %v22921_v23 }
 0xcb4   : > { %v22927_v26 = vpop.permute.xlu0 %9278 }
 0xcb6   : > { %v22925_v20 = vpop.permute.xlu1 %9326 }
 0xcb7   : > { %25874 = vst [vmem:[#allocation97_spill] sm:$0xff] %v22925_v20 }
 0xcba   : > { %9518 = vrot.lane.b32.xlu1 %v25870_v39, %s20271_s26  ;;  %v22929_v39 = vpop.permute.xlu1 %9374 }
 0xcbb   : > { %25875 = vst [vmem:[#allocation98_spill] sm:$0xff] %v22929_v39 }
 0xcbc   : > { %9470 = vrot.lane.b32.xlu0 %v25871_v12, %s20271_s26 }
 0xcbe   : > { %v22932_v5 = vpop.permute.xlu1 %9422 }
 0xcde   : > { %8748 = vmax.xlane.f32.xlu1 %v8747_v16 }
 0xcfb   : > { %v8704_v12 = vpop.xlane.xlu0 %8703 }
 0xcfc   : > { %v8750_v16 = vsub.f32 %v22841_v60, %v8704_v12 }
 0xcfe   : > { %v8766_v45 = vmul.f32 1.442695, %v8750_v16 }
 0xd00   : > { %19730 = vpow2.f32 %v8766_v45 }
 0xd03   : > { %v8710_v8 = vpop.xlane.xlu0 %8709 }
 0xd04   : > { %v8752_v58 = vsub.f32 %v22849_v51, %v8710_v8 }
 0xd06   : > { %v8770_v50 = vmul.f32 1.442695, %v8752_v58  ;;  %v8707_v23 = vpop.xlane.xlu1 %8706 }
 0xd07   : > { %v8751_v18 = vsub.f32 %v22853_v57, %v8707_v23 }
 0xd08   : > { %19732 = vpow2.f32 %v8770_v50 }
 0xd09   : > { %v8768_v20 = vmul.f32 1.442695, %v8751_v18 }
 0xd0a   : > { %v22936_v33 = vpop.eup %19730 }
 0xd0b   : > { %19734 = vpow2.f32 %v8768_v20  ;;  %v8798_v39 = vsel %vm1692_vm3, %v22936_v33, 0.0 }
 0xd0c   : > { %8799 = vadd.xlane.f32.xlu0 %v8798_v39 }
 0xd0e   : > { %v8713_v60 = vpop.xlane.xlu0 %8712 }
 0xd0f   : > { %v8753_v45 = vsub.f32 %v22859_v59, %v8713_v60 }
 0xd11   : > { %v8772_v12 = vmul.f32 1.442695, %v8753_v45 }
 0xd12   : > { %v22941_v16 = vpop.eup %19732  ;;  %v8716_v8 = vpop.xlane.xlu0 %8715 }
 0xd13   : > { %19736 = vpow2.f32 %v8772_v12  ;;  %v8754_v58 = vsub.f32 %v22857_v35, %v8716_v8  ;;  %v8804_v18 = vsel %vm1692_vm3, %v22941_v16, 0.0 }
 0xd14   : > { %8805 = vadd.xlane.f32.xlu0 %v8804_v18 }
 0xd15   : > { %v22946_v50 = vpop.eup %19734  ;;  %v8774_v57 = vmul.f32 1.442695, %v8754_v58 }
 0xd16   : > { %v8722_v51 = vpop.xlane.xlu0 %8721  ;;  %v8719_v23 = vpop.xlane.xlu1 %8718  ;;  %v8801_v39 = vsel %vm1692_vm3, %v22946_v50, 0.0 }
 0xd17   : > { %19738 = vpow2.f32 %v8774_v57  ;;  %v8756_v59 = vsub.f32 %v22863_v46, %v8722_v51  ;;  %v8755_v20 = vsub.f32 %v22867_v32, %v8719_v23  ;;  %8802 = vadd.xlane.f32.xlu1 %v8801_v39 }
 0xd19   : > { %v8778_v60 = vmul.f32 1.442695, %v8756_v59  ;;  %v8776_v35 = vmul.f32 1.442695, %v8755_v20 }
 0xd1b   : > { %19740 = vpow2.f32 %v8778_v60  ;;  %v8728_v45 = vpop.xlane.xlu0 %8727 }
 0xd1c   : > { %19742 = vpow2.f32 %v8776_v35  ;;  %v8758_v8 = vsub.f32 %v22873_v44, %v8728_v45 }
 0xd1d   : > { %v22952_v12 = vpop.eup %19736 }
 0xd1e   : > { %v8725_v58 = vpop.xlane.xlu1 %8724  ;;  %v8807_v18 = vsel %vm1692_vm3, %v22952_v12, 0.0  ;;  %v8782_v32 = vmul.f32 1.442695, %v8758_v8 }
 0xd1f   : > { %v8757_v57 = vsub.f32 %v22877_v62, %v8725_v58  ;;  %8808 = vadd.xlane.f32.xlu1 %v8807_v18 }
 0xd21   : > { %v22958_v46 = vpop.eup %19738  ;;  %v8780_v51 = vmul.f32 1.442695, %v8757_v57 }
 0xd22   : > { %v8810_v23 = vsel %vm1692_vm3, %v22958_v46, 0.0 }
 0xd23   : > { %19744 = vpow2.f32 %v8780_v51  ;;  %8811 = vadd.xlane.f32.xlu0 %v8810_v23  ;;  %v8734_v39 = vpop.xlane.xlu0 %8733 }
 0xd24   : > { %v8760_v59 = vsub.f32 %v22881_v41, %v8734_v39  ;;  %19746 = vpow2.f32 %v8782_v32 }
 0xd25   : > { %v22963_v44 = vpop.eup %19740 }
 0xd26   : > { %v22965_v20 = vpop.eup %19742  ;;  %v8786_v60 = vmul.f32 1.442695, %v8760_v59  ;;  %v8731_v62 = vpop.xlane.xlu1 %8730  ;;  %v8816_v35 = vsel %vm1692_vm3, %v22963_v44, 0.0 }
 0xd27   : > { %v8759_v45 = vsub.f32 %v22885_v4, %v8731_v62  ;;  %8817 = vadd.xlane.f32.xlu0 %v8816_v35  ;;  %v8813_v8 = vsel %vm1692_vm3, %v22965_v20, 0.0 }
 0xd28   : > { %8814 = vadd.xlane.f32.xlu1 %v8813_v8  ;;  %19748 = vpow2.f32 %v8786_v60 }
 0xd29   : > { %v8784_v58 = vmul.f32 1.442695, %v8759_v45 }
 0xd2b   : > { %19750 = vpow2.f32 %v8784_v58  ;;  %v8740_v41 = vpop.xlane.xlu0 %8739 }
 0xd2c   : > { %v8762_v18 = vsub.f32 %v22889_v14, %v8740_v41 }
 0xd2d   : > { %v22973_v57 = vpop.eup %19744 }
 0xd2e   : > { %v8790_v32 = vmul.f32 1.442695, %v8762_v18  ;;  %v8737_v51 = vpop.xlane.xlu1 %8736  ;;  %v8819_v23 = vsel %vm1692_vm3, %v22973_v57, 0.0  ;;  %v22977_v39 = vpop.eup %19746 }
 0xd2f   : > { %v8761_v4 = vsub.f32 %v22893_v1, %v8737_v51  ;;  %8820 = vadd.xlane.f32.xlu1 %v8819_v23  ;;  %v8822_v60 = vsel %vm1692_vm3, %v22977_v39, 0.0 }
 0xd30   : > { %19752 = vpow2.f32 %v8790_v32 }
 0xd31   : > { %v8788_v59 = vmul.f32 1.442695, %v8761_v4 }
 0xd32   : > { %v22982_v62 = vpop.eup %19748 }
 0xd33   : > { %19754 = vpow2.f32 %v8788_v59  ;;  %8823 = vadd.xlane.f32.xlu1 %v8822_v60  ;;  %v8828_v8 = vsel %vm1692_vm3, %v22982_v62, 0.0  ;;  %v8746_v4 = vpop.xlane.xlu0 %8745 }
 0xd34   : > { %v8764_v59 = vsub.f32 %v22897_v29, %v8746_v4 }
 0xd35   : > { %v22984_v14 = vpop.eup %19750 }
 0xd36   : > { %v8743_v35 = vpop.xlane.xlu1 %8742  ;;  %v8825_v45 = vsel %vm1692_vm3, %v22984_v14, 0.0  ;;  %v8794_v60 = vmul.f32 1.442695, %v8764_v59 }
 0xd37   : > { %v8763_v1 = vsub.f32 %v22901_v49, %v8743_v35  ;;  %8826 = vadd.xlane.f32.xlu0 %v8825_v45  ;;  %8829 = vadd.xlane.f32.xlu1 %v8828_v8 }
 0xd39   : > { %v8792_v58 = vmul.f32 1.442695, %v8763_v1 }
 0xd3a   : > { %v22991_v41 = vpop.eup %19752  ;;  %v23008_v35 = vpop.permute.xlu1 %9518 }
 0xd3b   : > { %19756 = vpow2.f32 %v8792_v58  ;;  %v8834_v18 = vsel %vm1692_vm3, %v22991_v41, 0.0 }
 0xd3c   : > { %8835 = vadd.xlane.f32.xlu1 %v8834_v18  ;;  %19758 = vpow2.f32 %v8794_v60 }
 0xd3d   : > { %v22995_v32 = vpop.eup %19754 }
 0xd3e   : > { %v8831_v51 = vsel %vm1692_vm3, %v22995_v32, 0.0 }
 0xd3f   : > { %8832 = vadd.xlane.f32.xlu0 %v8831_v51 }
 0xd45   : > { %v22999_v23 = vpop.eup %19756 }
 0xd46   : > { %v8837_v49 = vsel %vm1692_vm3, %v22999_v23, 0.0  ;;  %v23011_v1 = vpop.eup %19758 }
 0xd47   : > { %8838 = vadd.xlane.f32.xlu0 %v8837_v49  ;;  %v8840_v18 = vsel %vm1692_vm3, %v23011_v1, 0.0 }
 0xd4d   : > { %9614 = vrot.lane.b32.xlu1 %v21220_v40, %s20271_s26 }
 0xd5d   : > { %9566 = vrot.lane.b32.xlu0 %v21158_v34, %s20271_s26 }
 0xd6b   : > { %v8749_v45 = vpop.xlane.xlu1 %8748 }
 0xd6c   : > { %v8765_v8 = vsub.f32 %v22905_v56, %v8749_v45  ;;  %v23031_v56 = vpop.permute.xlu0 %9470 }
 0xd6e   : > { %v8796_v58 = vmul.f32 1.442695, %v8765_v8 }
 0xd70   : > { %19760 = vpow2.f32 %v8796_v58  ;;  %v8996_v58 = vsel %vm1888_vm2, %v22915_v53, 0 }
 0xd71   : > { %8841 = vadd.xlane.f32.xlu1 %v8840_v18 }
 0xd7a   : > { %v23015_v51 = vpop.eup %19760 }
 0xd7b   : > { %v8843_v29 = vsel %vm1692_vm3, %v23015_v51, 0.0 }
 0xd7c   : > { %8844 = vadd.xlane.f32.xlu0 %v8843_v29 }
 0xd82   : > { %9714 = vrot.lane.b32.xlu1 %v20561_v6, %s20272_s20 }
 0xd86   : > { %9712 = vrot.lane.b32.xlu1 %v20592_v28, %s20272_s20 }
 0xd8a   : > { %9814 = vrot.lane.b32.xlu1 %v20607_v38, %s20272_s20 }
 0xd8e   : > { %9812 = vrot.lane.b32.xlu1 %v20665_v21, %s20272_s20 }
 0xd92   : > { %9914 = vrot.lane.b32.xlu1 %v20646_v2, %s20272_s20  ;;  %9664 = vrot.lane.b32.xlu0 %v20555_v63, %s20272_s20 }
 0xd96   : > { %9912 = vrot.lane.b32.xlu1 %v20704_v61, %s20272_s20  ;;  %9662 = vrot.lane.b32.xlu0 %v20563_v9, %s20272_s20 }
 0xd99   : > { %v8800_v49 = vpop.xlane.xlu0 %8799 }
 0xd9a   : > { %19762 = vrcp.f32 %v8800_v49  ;;  %10014 = vrot.lane.b32.xlu1 %v20687_v36, %s20272_s20  ;;  %9764 = vrot.lane.b32.xlu0 %v20575_v15, %s20272_s20 }
 0xd9e   : > { %10012 = vrot.lane.b32.xlu1 %v25712_v47, %s20272_s20  ;;  %9762 = vrot.lane.b32.xlu0 %v20625_v52, %s20272_s20 }
 0xda1   : > { %v8806_v4 = vpop.xlane.xlu0 %8805 }
 0xda2   : > { %19764 = vrcp.f32 %v8806_v4  ;;  %10114 = vrot.lane.b32.xlu1 %v25713_v17, %s20272_s20  ;;  %9864 = vrot.lane.b32.xlu0 %v20595_v30, %s20272_s20 }
 0xda4   : > { %v19763_v59 = vpop.eup %19762  ;;  %v8803_v60 = vpop.xlane.xlu1 %8802 }
 0xda5   : > { %v8862_v45 = vmul.f32 %v19763_v59, %v22936_v33  ;;  %19766 = vrcp.f32 %v8803_v60  ;;  %v9092_v60 = vsel %vm1888_vm2, %v22919_v48, 0 }
 0xda6   : > { %10112 = vrot.lane.b32.xlu1 %v25717_v19, %s20272_s20  ;;  %9862 = vrot.lane.b32.xlu0 %v20613_v42, %s20272_s20 }
 0xda7   : > { %v8878_v8 = vpack.c.bf16 %v8862_v45, %v8862_v45 }
 0xda9   : > { %18353 = vmatmul.mubr.msk.bf16.vlgmr.msra.gmra.mrb[56].mxu0 %vm1692_vm3, %v8878_v8 }
 0xdaa   : > { %18363 = vmatpush3.bf16.msra.mxu0 %v8996_v58  ;;  %10214 = vrot.lane.b32.xlu1 %v25718_v25, %s20272_s20 }
 0xdab   : > { %9964 = vrot.lane.b32.xlu0 %v20628_v54, %s20272_s20  ;;  %18364 = vmatprep.mubr.msk.bf16.mxu0 %vm20267_vm0, %v25704_v11 }
 0xdac   : > { %v19765_v33 = vpop.eup %19764  ;;  %v8809_v18 = vpop.xlane.xlu1 %8808  ;;  %18374 = vmatprep.subr.bf16.mxu0 %v25704_v11 }
 0xdad   : > { %v8864_v29 = vmul.f32 %v19765_v33, %v22941_v16  ;;  %19768 = vrcp.f32 %v8809_v18  ;;  %v9044_v16 = vsel %vm1888_vm2, %v22913_v27, 0  ;;  %v9140_v18 = vsel %vm1888_vm2, %v22917_v37, 0 }
 0xdae   : > { %10212 = vrot.lane.b32.xlu1 %v25719_v3, %s20272_s20 }
 0xdaf   : > { %v19767_v53 = vpop.eup %19766  ;;  %v8880_v49 = vpack.c.bf16 %v8864_v29, %v8864_v29  ;;  %9962 = vrot.lane.b32.xlu0 %v20653_v7, %s20272_s20 }
 0xdb0   : > { %v8863_v4 = vmul.f32 %v19767_v53, %v22946_v50  ;;  %v8812_v59 = vpop.xlane.xlu0 %8811 }
 0xdb1   : > { %19770 = vrcp.f32 %v8812_v59  ;;  %18365 = vmatmul.mubr.msk.bf16.vlgmr.msra.gmra.mrb[60].mxu0 %vm1692_vm3, %v8880_v49 }
 0xdb2   : > { %v8879_v45 = vpack.c.bf16 %v8863_v4, %v8863_v4  ;;  %18375 = vmatpush3.bf16.msra.mxu0 %v9092_v60  ;;  %10314 = vrot.lane.b32.xlu1 %v25720_v31, %s20272_s20 }
 0xdb3   : > { %10064 = vrot.lane.b32.xlu0 %v20669_v24, %s20272_s20  ;;  %18376 = vmatprep.mubr.msk.bf16.mxu0 %vm20267_vm0, %v25704_v11 }
 0xdb4   : > { %v8818_v50 = vpop.xlane.xlu0 %8817  ;;  %18359 = vmatmul.mubr.msk.bf16.vlgmr.msra.gmra.mrb[56].mxu1 %vm1692_vm3, %v8879_v45  ;;  %18386 = vmatprep.subr.bf16.mxu0 %v25704_v11 }
 0xdb5   : > { %19772 = vrcp.f32 %v8818_v50  ;;  %18369 = vmatpush3.bf16.msra.mxu1 %v9044_v16  ;;  %v8815_v48 = vpop.xlane.xlu1 %8814  ;;  %18370 = vmatprep.mubr.msk.bf16.mxu1 %vm20267_vm0, %v25704_v11  ;;  %v25877_v16 = vld [vmem:[#allocation29_spill] sm:$0xff] }
 0xdb6   : > { %19774 = vrcp.f32 %v8815_v48  ;;  %10312 = vrot.lane.b32.xlu1 %v25721_v13, %s20272_s20  ;;  %18380 = vmatprep.subr.bf16.mxu1 %v25704_v11  ;;  %v25878_v48 = vld [vmem:[#allocation18_spill] sm:$0xff] }
 0xdb7   : > { %v19769_v8 = vpop.eup %19768  ;;  %10062 = vrot.lane.b32.xlu0 %v20694_v43, %s20272_s20 }
 0xdb8   : > { %v8865_v27 = vmul.f32 %v19769_v8, %v22952_v12 }
 0xdba   : > { %v8881_v58 = vpack.c.bf16 %v8865_v27, %v8865_v27  ;;  %10414 = vrot.lane.b32.xlu1 %v25722_v10, %s20272_s20 }
 0xdbb   : > { %v19771_v33 = vpop.eup %19770  ;;  %10164 = vrot.lane.b32.xlu0 %v20708_v0, %s20272_s20 }
 0xdbc   : > { %v8866_v29 = vmul.f32 %v19771_v33, %v22958_v46  ;;  %18371 = vmatmul.mubr.msk.bf16.vlgmr.msra.gmra.mrb[60].mxu1 %vm1692_vm3, %v8881_v58  ;;  %v8821_v53 = vpop.xlane.xlu1 %8820  ;;  %v25876_v46 = vld [vmem:[#allocation96_spill] sm:$0xff]  ;;  %v25879_v58 = vld [vmem:[#allocation95_spill] sm:$0xff] }
 0xdbd   : > { %18381 = vmatpush3.bf16.msra.mxu1 %v9140_v18  ;;  %19776 = vrcp.f32 %v8821_v53  ;;  %18382 = vmatprep.mubr.msk.bf16.mxu1 %vm20267_vm0, %v25704_v11  ;;  %v9188_v4 = vsel %vm1888_vm2, %v25876_v46, 0  ;;  %v9284_v53 = vsel %vm1888_vm2, %v22927_v26, 0  ;;  %v25882_v46 = vld [vmem:[#allocation36_spill] sm:$0xff]  ;;  %v25883_v26 = vld [vmem:[#allocation22_spill] sm:$0xff] }
 0xdbe   : > { %v8882_v12 = vpack.c.bf16 %v8866_v29, %v8866_v29  ;;  %10412 = vrot.lane.b32.xlu1 %v25723_v55, %s20272_s20  ;;  %18392 = vmatprep.subr.bf16.mxu1 %v25704_v11  ;;  %v25881_v29 = vld [vmem:[#allocation20_spill] sm:$0xff] }
 0xdbf   : > { %v19773_v49 = vpop.eup %19772  ;;  %10162 = vrot.lane.b32.xlu0 %v20730_v22, %s20272_s20 }
 0xdc0   : > { %v19775_v37 = vpop.eup %19774  ;;  %18377 = vmatmul.mubr.msk.bf16.vlgmr.msra.gmra.mrb[64].mxu0 %vm1692_vm3, %v8882_v12  ;;  %v8824_v59 = vpop.xlane.xlu1 %8823  ;;  %v8868_v45 = vmul.f32 %v19773_v49, %v22963_v44  ;;  %v25880_v44 = vld [vmem:[#allocation35_spill] sm:$0xff] }
 0xdc1   : > { %v8867_v60 = vmul.f32 %v19775_v37, %v22965_v20  ;;  %18387 = vmatpush3.bf16.msra.mxu0 %v9188_v4  ;;  %19778 = vrcp.f32 %v8824_v59  ;;  %18388 = vmatprep.mubr.msk.bf16.mxu0 %vm20267_vm0, %v25704_v11  ;;  %v9236_v20 = vsel %vm1888_vm2, %v25879_v58, 0  ;;  %v25886_v58 = vld [vmem:[#allocation25_spill] sm:$0xff] }
 0xdc2   : > { %10702 = vrot.lane.b32.xlu1 %v25877_v16, %s20272_s20  ;;  %18398 = vmatprep.subr.bf16.mxu0 %v25704_v11  ;;  %v8884_v33 = vpack.c.bf16 %v8868_v45, %v8868_v45 }
 0xdc3   : > { %v8883_v50 = vpack.c.bf16 %v8867_v60, %v8867_v60  ;;  %10264 = vrot.lane.b32.xlu0 %v25878_v48, %s20272_s20  ;;  %v25884_v60 = vld [vmem:[#allocation97_spill] sm:$0xff] }
 0xdc4   : > { %v8827_v8 = vpop.xlane.xlu0 %8826  ;;  %v8830_v27 = vpop.xlane.xlu1 %8829  ;;  %v9332_v45 = vsel %vm1888_vm2, %v25884_v60, 0 }
 0xdc5   : > { %19780 = vrcp.f32 %v8827_v8  ;;  %18383 = vmatmul.mubr.msk.bf16.vlgmr.msra.gmra.mrb[64].mxu1 %vm1692_vm3, %v8883_v50  ;;  %v25885_v8 = vld [vmem:[#allocation37_spill] sm:$0xff] }
 0xdc6   : > { %18393 = vmatpush3.bf16.msra.mxu1 %v9236_v20  ;;  %19782 = vrcp.f32 %v8830_v27  ;;  %10798 = vrot.lane.b32.xlu1 %v25880_v44, %s20272_s20  ;;  %v25887_v20 = vld [vmem:[#allocation98_spill] sm:$0xff] }
 0xdc7   : > { %v19777_v18 = vpop.eup %19776  ;;  %10262 = vrot.lane.b32.xlu0 %v25881_v29, %s20272_s20  ;;  %18394 = vmatprep.mubr.msk.bf16.mxu1 %vm20267_vm0, %v25704_v11 }
 0xdc8   : > { %v8869_v12 = vmul.f32 %v19777_v18, %v22973_v57  ;;  %18389 = vmatmul.mubr.msk.bf16.vlgmr.msra.gmra.mrb[68].mxu0 %vm1692_vm3, %v8884_v33  ;;  %18404 = vmatprep.subr.bf16.mxu1 %v25704_v11  ;;  %v9380_v33 = vsel %vm1888_vm2, %v25887_v20, 0  ;;  %v25892_v20 = vld [vmem:[#allocation41_spill] sm:$0xff] }
 0xdc9   : > { %18399 = vmatpush3.bf16.msra.mxu0 %v9284_v53  ;;  %v8836_v49 = vpop.xlane.xlu1 %8835  ;;  %18400 = vmatprep.mubr.msk.bf16.mxu0 %vm20267_vm0, %v25704_v11 }
 0xdca   : > { %v8885_v37 = vpack.c.bf16 %v8869_v12, %v8869_v12  ;;  %10894 = vrot.lane.b32.xlu1 %v25882_v46, %s20272_s20  ;;  %18410 = vmatprep.subr.bf16.mxu0 %v25704_v11  ;;  %19784 = vrcp.f32 %v8836_v49  ;;  %v25888_v49 = vld [vmem:[#allocation39_spill] sm:$0xff] }
 0xdcb   : > { %v19779_v4 = vpop.eup %19778  ;;  %10364 = vrot.lane.b32.xlu0 %v25883_v26, %s20272_s20 }
 0xdcc   : > { %v8870_v57 = vmul.f32 %v19779_v4, %v22977_v39  ;;  %v8833_v59 = vpop.xlane.xlu0 %8832  ;;  %v9428_v4 = vsel %vm1888_vm2, %v22932_v5, 0 }
 0xdcd   : > { %19786 = vrcp.f32 %v8833_v59  ;;  %18395 = vmatmul.mubr.msk.bf16.vlgmr.msra.gmra.mrb[68].mxu1 %vm1692_vm3, %v8885_v37  ;;  %v25889_v37 = vld [vmem:[#allocation24_spill] sm:$0xff] }
 0xdce   : > { %v8886_v50 = vpack.c.bf16 %v8870_v57, %v8870_v57  ;;  %18405 = vmatpush3.bf16.msra.mxu1 %v9332_v45  ;;  %10990 = vrot.lane.b32.xlu1 %v25885_v8, %s20272_s20  ;;  %v25891_v45 = vld [vmem:[#allocation31_spill] sm:$0xff]  ;;  %v25912_v8 = vld [vmem:[#allocation17_spill] sm:$0xff] }
 0xdcf   : > { %v19781_v27 = vpop.eup %19780  ;;  %10362 = vrot.lane.b32.xlu0 %v25886_v58, %s20272_s20  ;;  %18406 = vmatprep.mubr.msk.bf16.mxu1 %vm20267_vm0, %v25704_v11 }
 0xdd0   : > { %v19783_v39 = vpop.eup %19782  ;;  %v8871_v18 = vmul.f32 %v19781_v27, %v22984_v14  ;;  %18401 = vmatmul.mubr.msk.bf16.vlgmr.msra.gmra.mrb[72].mxu0 %vm1692_vm3, %v8886_v50  ;;  %18416 = vmatprep.subr.bf16.mxu1 %v25704_v11  ;;  %v9476_v50 = vsel %vm1888_vm2, %v23031_v56, 0  ;;  %v25893_v56 = vld [vmem:[#allocation32_spill] sm:$0xff] }
 0xdd1   : > { %18411 = vmatpush3.bf16.msra.mxu0 %v9380_v33  ;;  %18412 = vmatprep.mubr.msk.bf16.mxu0 %vm20267_vm0, %v25704_v11  ;;  %v8872_v12 = vmul.f32 %v19783_v39, %v22982_v62  ;;  %v25890_v62 = vld [vmem:[#allocation38_spill] sm:$0xff] }
 0xdd2   : > { %v8887_v53 = vpack.c.bf16 %v8871_v18, %v8871_v18  ;;  %11086 = vrot.lane.b32.xlu1 %v25888_v49, %s20272_s20  ;;  %18422 = vmatprep.subr.bf16.mxu0 %v25704_v11 }
 0xdd3   : > { %10654 = vrot.lane.b32.xlu0 %v25889_v37, %s20272_s20  ;;  %v8888_v59 = vpack.c.bf16 %v8872_v12, %v8872_v12 }
 0xdd4   : > { %v8839_v14 = vpop.xlane.xlu0 %8838  ;;  %v19785_v57 = vpop.eup %19784 }
 0xdd5   : > { %19788 = vrcp.f32 %v8839_v14  ;;  %18407 = vmatmul.mubr.msk.bf16.vlgmr.msra.gmra.mrb[72].mxu1 %vm1692_vm3, %v8887_v53  ;;  %v8874_v27 = vmul.f32 %v19785_v57, %v22991_v41  ;;  %v25894_v53 = vld [vmem:[#allocation33_spill] sm:$0xff]  ;;  %v25895_v57 = vld [vmem:[#allocation34_spill] sm:$0xff] }
 0xdd6   : > { %18417 = vmatpush3.bf16.msra.mxu1 %v9428_v4  ;;  %11134 = vrot.lane.b32.xlu1 %v25890_v62, %s20272_s20 }
 0xdd7   : > { %v19787_v60 = vpop.eup %19786  ;;  %10750 = vrot.lane.b32.xlu0 %v25891_v45, %s20272_s20  ;;  %18418 = vmatprep.mubr.msk.bf16.mxu1 %vm20267_vm0, %v25704_v11  ;;  %v8890_v18 = vpack.c.bf16 %v8874_v27, %v8874_v27 }
 0xdd8   : > { %v8873_v5 = vmul.f32 %v19787_v60, %v22995_v32  ;;  %18413 = vmatmul.mubr.msk.bf16.vlgmr.msra.gmra.mrb[76].mxu0 %vm1692_vm3, %v8888_v59  ;;  %18428 = vmatprep.subr.bf16.mxu1 %v25704_v11  ;;  %v9524_v32 = vsel %vm1888_vm2, %v23008_v35, 0  ;;  %v9567_v33 = vpop.permute.xlu0 %9566  ;;  %v9615_v35 = vpop.permute.xlu1 %9614 }
 0xdd9   : > { %18423 = vmatpush3.bf16.msra.mxu0 %v9476_v50  ;;  %18424 = vmatprep.mubr.msk.bf16.mxu0 %vm20267_vm0, %v25704_v11  ;;  %v9572_v14 = vsel %vm1888_vm2, %v9567_v33, 0  ;;  %v9620_v59 = vsel %vm1888_vm2, %v9615_v35, 0 }
 0xdda   : > { %v8889_v39 = vpack.c.bf16 %v8873_v5, %v8873_v5  ;;  %11182 = vrot.lane.b32.xlu1 %v25892_v20, %s20272_s20  ;;  %18434 = vmatprep.subr.bf16.mxu0 %v25704_v11 }
 0xddb   : > { %10846 = vrot.lane.b32.xlu0 %v25893_v56, %s20272_s20 }
 0xddd   : > { %18419 = vmatmul.mubr.msk.bf16.vlgmr.msra.gmra.mrb[76].mxu1 %vm1692_vm3, %v8889_v39 }
 0xdde   : > { %18429 = vmatpush3.bf16.msra.mxu1 %v9524_v32  ;;  %18430 = vmatprep.mubr.msk.bf16.mxu1 %vm20267_vm0, %v25704_v11 }
 0xddf   : > { %v19789_v41 = vpop.eup %19788  ;;  %10942 = vrot.lane.b32.xlu0 %v25894_v53, %s20272_s20  ;;  %18440 = vmatprep.subr.bf16.mxu1 %v25704_v11 }
 0xde0   : > { %v8875_v12 = vmul.f32 %v19789_v41, %v22999_v23  ;;  %18425 = vmatmul.mubr.msk.bf16.vlgmr.msra.gmra.mrb[80].mxu0 %vm1692_vm3, %v8890_v18 }
 0xde1   : > { %18435 = vmatpush3.bf16.msra.mxu0 %v9572_v14  ;;  %18436 = vmatprep.mubr.msk.bf16.mxu0 %vm20267_vm0, %v25704_v11 }
 0xde2   : > { %v8891_v4 = vpack.c.bf16 %v8875_v12, %v8875_v12  ;;  %18446 = vmatprep.subr.bf16.mxu0 %v25704_v11 }
 0xde3   : > { %11038 = vrot.lane.b32.xlu0 %v25895_v57, %s20272_s20 }
 0xde5   : > { %18431 = vmatmul.mubr.msk.bf16.vlgmr.msra.gmra.mrb[80].mxu1 %vm1692_vm3, %v8891_v4 }
 0xde6   : > { %18441 = vmatpush3.bf16.msra.mxu1 %v9620_v59  ;;  %18442 = vmatprep.mubr.msk.bf16.mxu1 %vm20267_vm0, %v25704_v11 }
 0xde7   : > { %18452 = vmatprep.subr.bf16.mxu1 %v25704_v11 }
 0xdfe   : > { %v8842_v23 = vpop.xlane.xlu1 %8841 }
 0xdff   : > { %19790 = vrcp.f32 %v8842_v23 }
 0xe02   : > { %v9715_v60 = vpop.permute.xlu1 %9714 }
 0xe06   : > { %v9713_v50 = vpop.permute.xlu1 %9712 }
 0xe09   : > { %v19791_v5 = vpop.eup %19790  ;;  %v8845_v27 = vpop.xlane.xlu0 %8844 }
 0xe0a   : > { %v8876_v39 = vmul.f32 %v19791_v5, %v23011_v1  ;;  %19792 = vrcp.f32 %v8845_v27  ;;  %v9815_v32 = vpop.permute.xlu1 %9814 }
 0xe0c   : > { %v8892_v33 = vpack.c.bf16 %v8876_v39, %v8876_v39  ;;  %v9720_v39 = vsel %vm955_vm1, %v9715_v60, 0 }
 0xe0d   : > { %v9665_v18 = vpop.permute.xlu0 %9664 }
 0xe0e   : > { %v9670_v41 = vsel %vm955_vm1, %v9665_v18, 0  ;;  %18437 = vmatmul.mubr.msk.bf16.vlgmr.msra.gmra.mrb[84].mxu0 %vm1692_vm3, %v8892_v33  ;;  %v9813_v12 = vpop.permute.xlu1 %9812 }
 0xe0f   : > { %18447 = vmatpush3.bf16.xpose.msra.mxu0 %v9670_v41  ;;  %18448 = vmatprep.mubr.msk.bf16.mxu0 %vm20267_vm0, %v25704_v11 }
 0xe10   : > { %18458 = vmatprep.subr.bf16.mxu0 %v25704_v11 }
 0xe11   : > { %v9663_v14 = vpop.permute.xlu0 %9662 }
 0xe12   : > { %v9915_v35 = vpop.permute.xlu1 %9914 }
 0xe14   : > { %v19793_v4 = vpop.eup %19792 }
 0xe15   : > { %v8877_v1 = vmul.f32 %v19793_v4, %v23015_v51  ;;  %v9765_v59 = vpop.permute.xlu0 %9764 }
 0xe16   : > { %v9770_v23 = vsel %vm955_vm1, %v9765_v59, 0  ;;  %18449 = vmatmul.mubr.msk.bf16.vlgmr.msra.gmra.mrb[88].mxu0 %vm955_vm1, %v9663_v14  ;;  %v9913_v5 = vpop.permute.xlu1 %9912  ;;  %v9820_v14 = vsel %vm955_vm1, %v9815_v32, 0 }
 0xe17   : > { %v8893_v27 = vpack.c.bf16 %v8877_v1, %v8877_v1  ;;  %18459 = vmatpush3.bf16.xpose.msra.mxu0 %v9770_v23  ;;  %18460 = vmatprep.mubr.msk.bf16.mxu0 %vm20267_vm0, %v25704_v11 }
 0xe18   : > { %18470 = vmatprep.subr.bf16.mxu0 %v25704_v11 }
 0xe19   : > { %v9763_v33 = vpop.permute.xlu0 %9762  ;;  %18443 = vmatmul.mubr.msk.bf16.vlgmr.msra.gmra.mrb[84].mxu1 %vm1692_vm3, %v8893_v27 }
 0xe1a   : > { %18453 = vmatpush3.bf16.xpose.msra.mxu1 %v9720_v39  ;;  %v10015_v51 = vpop.permute.xlu1 %10014  ;;  %18454 = vmatprep.mubr.msk.bf16.mxu1 %vm20267_vm0, %v25704_v11 }
 0xe1b   : > { %18464 = vmatprep.subr.bf16.mxu1 %v25704_v11 }
 0xe1d   : > { %v9865_v18 = vpop.permute.xlu0 %9864 }
 0xe1e   : > { %v9870_v41 = vsel %vm955_vm1, %v9865_v18, 0  ;;  %18461 = vmatmul.mubr.msk.bf16.vlgmr.msra.gmra.mrb[92].mxu0 %vm955_vm1, %v9763_v33  ;;  %v10013_v60 = vpop.permute.xlu1 %10012 }
 0xe1f   : > { %18471 = vmatpush3.bf16.xpose.msra.mxu0 %v9870_v41  ;;  %18472 = vmatprep.mubr.msk.bf16.mxu0 %vm20267_vm0, %v25704_v11 }
 0xe20   : > { %18482 = vmatprep.subr.bf16.mxu0 %v25704_v11 }
 0xe21   : > { %v9863_v4 = vpop.permute.xlu0 %9862  ;;  %18455 = vmatmul.mubr.msk.bf16.vlgmr.msra.gmra.mrb[88].mxu1 %vm955_vm1, %v9713_v50  ;;  %v9920_v50 = vsel %vm955_vm1, %v9915_v35, 0 }
 0xe22   : > { %18465 = vmatpush3.bf16.xpose.msra.mxu1 %v9820_v14  ;;  %18466 = vmatprep.mubr.msk.bf16.mxu1 %vm20267_vm0, %v25704_v11  ;;  %v10115_v59 = vpop.permute.xlu1 %10114 }
 0xe23   : > { %18476 = vmatprep.subr.bf16.mxu1 %v25704_v11 }
 0xe25   : > { %v9965_v1 = vpop.permute.xlu0 %9964 }
 0xe26   : > { %v9970_v23 = vsel %vm955_vm1, %v9965_v1, 0  ;;  %18473 = vmatmul.mubr.msk.bf16.vlgmr.msra.gmra.mrb[96].mxu0 %vm955_vm1, %v9863_v4  ;;  %v10113_v27 = vpop.permute.xlu1 %10112 }
 0xe27   : > { %18483 = vmatpush3.bf16.xpose.msra.mxu0 %v9970_v23  ;;  %18484 = vmatprep.mubr.msk.bf16.mxu0 %vm20267_vm0, %v25704_v11 }
 0xe28   : > { %18494 = vmatprep.subr.bf16.mxu0 %v25704_v11 }
 0xe29   : > { %v9963_v32 = vpop.permute.xlu0 %9962  ;;  %18467 = vmatmul.mubr.msk.bf16.vlgmr.msra.gmra.mrb[92].mxu1 %vm955_vm1, %v9813_v12  ;;  %v10020_v12 = vsel %vm955_vm1, %v10015_v51, 0 }
 0xe2a   : > { %18477 = vmatpush3.bf16.xpose.msra.mxu1 %v9920_v50  ;;  %18478 = vmatprep.mubr.msk.bf16.mxu1 %vm20267_vm0, %v25704_v11  ;;  %v10215_v18 = vpop.permute.xlu1 %10214 }
 0xe2b   : > { %18488 = vmatprep.subr.bf16.mxu1 %v25704_v11 }
 0xe2d   : > { %v10065_v39 = vpop.permute.xlu0 %10064 }
 0xe2e   : > { %v10070_v33 = vsel %vm955_vm1, %v10065_v39, 0  ;;  %18485 = vmatmul.mubr.msk.bf16.vlgmr.msra.gmra.mrb[100].mxu0 %vm955_vm1, %v9963_v32  ;;  %v10213_v51 = vpop.permute.xlu1 %10212 }
 0xe2f   : > { %18495 = vmatpush3.bf16.xpose.msra.mxu0 %v10070_v33  ;;  %18496 = vmatprep.mubr.msk.bf16.mxu0 %vm20267_vm0, %v25704_v11 }
 0xe30   : > { %18506 = vmatprep.subr.bf16.mxu0 %v25704_v11 }
 0xe31   : > { %v10063_v35 = vpop.permute.xlu0 %10062  ;;  %18479 = vmatmul.mubr.msk.bf16.vlgmr.msra.gmra.mrb[96].mxu1 %vm955_vm1, %v9913_v5  ;;  %v10120_v5 = vsel %vm955_vm1, %v10115_v59, 0 }
 0xe32   : > { %18489 = vmatpush3.bf16.xpose.msra.mxu1 %v10020_v12  ;;  %18490 = vmatprep.mubr.msk.bf16.mxu1 %vm20267_vm0, %v25704_v11  ;;  %v10315_v23 = vpop.permute.xlu1 %10314 }
 0xe33   : > { %18500 = vmatprep.subr.bf16.mxu1 %v25704_v11 }
 0xe35   : > { %v10165_v41 = vpop.permute.xlu0 %10164 }
 0xe36   : > { %v10170_v14 = vsel %vm955_vm1, %v10165_v41, 0  ;;  %18497 = vmatmul.mubr.msk.bf16.vlgmr.msra.gmra.mrb[104].mxu0 %vm955_vm1, %v10063_v35  ;;  %v10313_v32 = vpop.permute.xlu1 %10312 }
 0xe37   : > { %18507 = vmatpush3.bf16.xpose.msra.mxu0 %v10170_v14  ;;  %18508 = vmatprep.mubr.msk.bf16.mxu0 %vm20267_vm0, %v25704_v11 }
 0xe38   : > { %18518 = vmatprep.subr.bf16.mxu0 %v25704_v11 }
 0xe39   : > { %v10163_v4 = vpop.permute.xlu0 %10162  ;;  %18491 = vmatmul.mubr.msk.bf16.vlgmr.msra.gmra.mrb[100].mxu1 %vm955_vm1, %v10013_v60  ;;  %v10220_v60 = vsel %vm955_vm1, %v10215_v18, 0 }
 0xe3a   : > { %18501 = vmatpush3.bf16.xpose.msra.mxu1 %v10120_v5  ;;  %18502 = vmatprep.mubr.msk.bf16.mxu1 %vm20267_vm0, %v25704_v11  ;;  %v10415_v35 = vpop.permute.xlu1 %10414 }
 0xe3b   : > { %18512 = vmatprep.subr.bf16.mxu1 %v25704_v11 }
 0xe3d   : > { %v10265_v1 = vpop.permute.xlu0 %10264 }
 0xe3e   : > { %v10270_v50 = vsel %vm955_vm1, %v10265_v1, 0  ;;  %18509 = vmatmul.mubr.msk.bf16.vlgmr.msra.gmra.mrb[108].mxu0 %vm955_vm1, %v10163_v4  ;;  %v10413_v14 = vpop.permute.xlu1 %10412 }
 0xe3f   : > { %18519 = vmatpush3.bf16.xpose.msra.mxu0 %v10270_v50  ;;  %18520 = vmatprep.mubr.msk.bf16.mxu0 %vm20267_vm0, %v25704_v11 }
 0xe40   : > { %18530 = vmatprep.subr.bf16.mxu0 %v25704_v11 }
 0xe41   : > { %v10263_v59 = vpop.permute.xlu0 %10262  ;;  %18503 = vmatmul.mubr.msk.bf16.vlgmr.msra.gmra.mrb[104].mxu1 %vm955_vm1, %v10113_v27  ;;  %v10320_v27 = vsel %vm955_vm1, %v10315_v23, 0 }
 0xe42   : > { %18513 = vmatpush3.bf16.xpose.msra.mxu1 %v10220_v60  ;;  %18514 = vmatprep.mubr.msk.bf16.mxu1 %vm20267_vm0, %v25704_v11  ;;  %v10703_v5 = vpop.permute.xlu1 %10702 }
 0xe43   : > { %18524 = vmatprep.subr.bf16.mxu1 %v25704_v11  ;;  %v10708_v4 = vsel %vm1888_vm2, %v10703_v5, 0 }
 0xe45   : > { %v10365_v39 = vpop.permute.xlu0 %10364 }
 0xe46   : > { %v10370_v33 = vsel %vm955_vm1, %v10365_v39, 0  ;;  %18521 = vmatmul.mubr.msk.bf16.vlgmr.msra.gmra.mrb[112].mxu0 %vm955_vm1, %v10263_v59 }
 0xe47   : > { %18531 = vmatpush3.bf16.xpose.msra.mxu0 %v10370_v33  ;;  %18532 = vmatprep.mubr.msk.bf16.mxu0 %vm20267_vm0, %v25704_v11 }
 0xe48   : > { %18542 = vmatprep.subr.bf16.mxu0 %v25704_v11 }
 0xe49   : > { %v10363_v12 = vpop.permute.xlu0 %10362  ;;  %18515 = vmatmul.mubr.msk.bf16.vlgmr.msra.gmra.mrb[108].mxu1 %vm955_vm1, %v10213_v51  ;;  %v10420_v51 = vsel %vm955_vm1, %v10415_v35, 0 }
 0xe4a   : > { %18525 = vmatpush3.bf16.xpose.msra.mxu1 %v10320_v27  ;;  %18526 = vmatprep.mubr.msk.bf16.mxu1 %vm20267_vm0, %v25704_v11 }
 0xe4b   : > { %18536 = vmatprep.subr.bf16.mxu1 %v25704_v11 }
 0xe4d   : > { %v10655_v18 = vpop.permute.xlu0 %10654 }
 0xe4e   : > { %v10660_v41 = vsel %vm1888_vm2, %v10655_v18, 0  ;;  %18533 = vmatmul.mubr.msk.bf16.vlgmr.msra.gmra.mrb[116].mxu0 %vm955_vm1, %v10363_v12 }
 0xe4f   : > { %18543 = vmatpush3.bf16.msra.mxu0 %v10660_v41  ;;  %18544 = vmatprep.mubr.msk.bf16.mxu0 %vm20267_vm0, %v25704_v11 }
 0xe50   : > { %18554 = vmatprep.subr.bf16.mxu0 %v25704_v11 }
 0xe51   : > { %18527 = vmatmul.mubr.msk.bf16.vlgmr.msra.gmra.mrb[112].mxu1 %vm955_vm1, %v10313_v32 }
 0xe52   : > { %18537 = vmatpush3.bf16.xpose.msra.mxu1 %v10420_v51  ;;  %18538 = vmatprep.mubr.msk.bf16.mxu1 %vm20267_vm0, %v25704_v11 }
 0xe53   : > { %18548 = vmatprep.subr.bf16.mxu1 %v25704_v11 }
 0xe59   : > { %18539 = vmatmul.mubr.msk.bf16.vlgmr.msra.gmra.mrb[116].mxu1 %vm955_vm1, %v10413_v14 }
 0xe5a   : > { %18549 = vmatpush3.bf16.msra.mxu1 %v10708_v4  ;;  %18550 = vmatprep.mubr.msk.bf16.mxu1 %vm20267_vm0, %v25704_v11 }
 0xe5b   : > { %18560 = vmatprep.subr.bf16.mxu1 %v25704_v11 }
 0xe7c   : > { %v23297_v1 = vpop.f32.mrb[56].mxu0 }
 0xe7d   : > { %25896 = vst [vmem:[#allocation96_spill] sm:$0xff] %v23297_v1  ;;  %v18354_v23 = vpop.f32.mrb[57].mxu0 }
 0xe7e   : > { %v8939_v50 = vpop.f32.mrb[58].mxu0 }
 0xe7f   : > { %v18355_v60 = vpop.f32.mrb[59].mxu0 }
 0xe84   : > { %v23299_v59 = vpop.f32.mrb[60].mxu0 }
 0xe85   : > { %25897 = vst [vmem:[#allocation95_spill] sm:$0xff] %v23299_v59  ;;  %v18366_v32 = vpop.f32.mrb[61].mxu0 }
 0xe86   : > { %v9035_v39 = vpop.f32.mrb[62].mxu0 }
 0xe87   : > { %v23301_v33 = vpop.f32.mrb[56].mxu1  ;;  %v18367_v27 = vpop.f32.mrb[63].mxu0 }
 0xe88   : > { %25898 = vst [vmem:[#allocation97_spill] sm:$0xff] %v23301_v33  ;;  %v18360_v35 = vpop.f32.mrb[57].mxu1 }
 0xe89   : > { %v8987_v18 = vpop.f32.mrb[58].mxu1 }
 0xe8a   : > { %v18361_v41 = vpop.f32.mrb[59].mxu1 }
 0xe8f   : > { %v23305_v14 = vpop.f32.mrb[60].mxu1 }
 0xe90   : > { %25899 = vst [vmem:[#allocation98_spill] sm:$0xff] %v23305_v14  ;;  %v18372_v5 = vpop.f32.mrb[61].mxu1 }
 0xe91   : > { %v9083_v4 = vpop.f32.mrb[62].mxu1 }
 0xe92   : > { %v18373_v23 = vpop.f32.mrb[63].mxu1 }
 0xe93   : > { %v23309_v50 = vpop.f32.mrb[64].mxu0 }
 0xe94   : > { %25900 = vst [vmem:[#allocation99_spill] sm:$0xff] %v23309_v50  ;;  %v18378_v60 = vpop.f32.mrb[65].mxu0 }
 0xe95   : > { %v9131_v32 = vpop.f32.mrb[66].mxu0 }
 0xe96   : > { %v18379_v39 = vpop.f32.mrb[67].mxu0 }
 0xe98   : > { %v23311_v27 = vpop.f32.mrb[64].mxu1 }
 0xe99   : > { %25901 = vst [vmem:[#allocation100_spill] sm:$0xff] %v23311_v27  ;;  %v18384_v18 = vpop.f32.mrb[65].mxu1 }
 0xe9a   : > { %v9179_v41 = vpop.f32.mrb[66].mxu1 }
 0xe9b   : > { %v18385_v12 = vpop.f32.mrb[67].mxu1  ;;  %v23315_v1 = vpop.f32.mrb[68].mxu0 }
 0xe9c   : > { %25902 = vst [vmem:[#allocation101_spill] sm:$0xff] %v23315_v1  ;;  %v18390_v33 = vpop.f32.mrb[69].mxu0 }
 0xe9d   : > { %v9227_v51 = vpop.f32.mrb[70].mxu0 }
 0xe9e   : > { %v18391_v5 = vpop.f32.mrb[71].mxu0 }
 0xea0   : > { %v23317_v4 = vpop.f32.mrb[68].mxu1 }
 0xea1   : > { %25903 = vst [vmem:[#allocation102_spill] sm:$0xff] %v23317_v4  ;;  %v18396_v60 = vpop.f32.mrb[69].mxu1 }
 0xea2   : > { %v9275_v32 = vpop.f32.mrb[70].mxu1 }
 0xea3   : > { %v18397_v39 = vpop.f32.mrb[71].mxu1  ;;  %v23321_v59 = vpop.f32.mrb[72].mxu0 }
 0xea4   : > { %25904 = vst [vmem:[#allocation103_spill] sm:$0xff] %v23321_v59  ;;  %v18402_v14 = vpop.f32.mrb[73].mxu0 }
 0xea5   : > { %v9323_v35 = vpop.f32.mrb[74].mxu0 }
 0xea6   : > { %v18403_v18 = vpop.f32.mrb[75].mxu0 }
 0xea8   : > { %v23323_v41 = vpop.f32.mrb[72].mxu1 }
 0xea9   : > { %25905 = vst [vmem:[#allocation104_spill] sm:$0xff] %v23323_v41  ;;  %v18408_v12 = vpop.f32.mrb[73].mxu1 }
 0xeaa   : > { %v9371_v51 = vpop.f32.mrb[74].mxu1 }
 0xeab   : > { %v18409_v5 = vpop.f32.mrb[75].mxu1  ;;  %v23327_v50 = vpop.f32.mrb[76].mxu0 }
 0xeac   : > { %25906 = vst [vmem:[#allocation105_spill] sm:$0xff] %v23327_v50  ;;  %v18414_v27 = vpop.f32.mrb[77].mxu0 }
 0xead   : > { %v9419_v23 = vpop.f32.mrb[78].mxu0 }
 0xeae   : > { %v18415_v60 = vpop.f32.mrb[79].mxu0 }
 0xeb0   : > { %v23329_v32 = vpop.f32.mrb[76].mxu1 }
 0xeb1   : > { %25907 = vst [vmem:[#allocation106_spill] sm:$0xff] %v23329_v32  ;;  %v18420_v35 = vpop.f32.mrb[77].mxu1 }
 0xeb2   : > { %v9467_v39 = vpop.f32.mrb[78].mxu1 }
 0xeb3   : > { %v18421_v18 = vpop.f32.mrb[79].mxu1  ;;  %v23333_v1 = vpop.f32.mrb[80].mxu0 }
 0xeb4   : > { %25908 = vst [vmem:[#allocation107_spill] sm:$0xff] %v23333_v1  ;;  %v18426_v4 = vpop.f32.mrb[81].mxu0 }
 0xeb5   : > { %v9515_v33 = vpop.f32.mrb[82].mxu0 }
 0xeb6   : > { %v18427_v12 = vpop.f32.mrb[83].mxu0 }
 0xeb8   : > { %v23335_v51 = vpop.f32.mrb[80].mxu1 }
 0xeb9   : > { %25909 = vst [vmem:[#allocation108_spill] sm:$0xff] %v23335_v51  ;;  %v18432_v23 = vpop.f32.mrb[81].mxu1 }
 0xeba   : > { %v9563_v5 = vpop.f32.mrb[82].mxu1 }
 0xebb   : > { %v18433_v60 = vpop.f32.mrb[83].mxu1 }
 0xee1   : > { %v23339_v59 = vpop.f32.mrb[84].mxu0 }
 0xee2   : > { %25910 = vst [vmem:[#allocation109_spill] sm:$0xff] %v23339_v59  ;;  %v18438_v41 = vpop.f32.mrb[85].mxu0 }
 0xee3   : > { %v9611_v14 = vpop.f32.mrb[86].mxu0 }
 0xee4   : > { %v18439_v35 = vpop.f32.mrb[87].mxu0 }
 0xee9   : > { %v23341_v39 = vpop.f32.mrb[88].mxu0 }
 0xeea   : > { %v18450_v18 = vpop.f32.mrb[89].mxu0  ;;  %v10462_v4 = vsel %vm1692_vm3, %v23341_v39, -inf }
 0xeeb   : > { %10463 = vmax.xlane.f32.xlu0 %v10462_v4  ;;  %v9709_v33 = vpop.f32.mrb[90].mxu0 }
 0xeec   : > { %v23345_v12 = vpop.f32.mrb[84].mxu1  ;;  %v18451_v50 = vpop.f32.mrb[91].mxu0 }
 0xeed   : > { %25911 = vst [vmem:[#allocation110_spill] sm:$0xff] %v23345_v12  ;;  %v18444_v5 = vpop.f32.mrb[85].mxu1 }
 0xeee   : > { %v9659_v60 = vpop.f32.mrb[86].mxu1 }
 0xeef   : > { %v18445_v27 = vpop.f32.mrb[87].mxu1 }
 0xef1   : > { %v23349_v41 = vpop.f32.mrb[92].mxu0 }
 0xef2   : > { %v18462_v14 = vpop.f32.mrb[93].mxu0  ;;  %v10468_v35 = vsel %vm1692_vm3, %v23349_v41, -inf }
 0xef3   : > { %10469 = vmax.xlane.f32.xlu0 %v10468_v35  ;;  %v9809_v18 = vpop.f32.mrb[94].mxu0 }
 0xef4   : > { %v23353_v1 = vpop.f32.mrb[88].mxu1  ;;  %v18463_v4 = vpop.f32.mrb[95].mxu0 }
 0xef5   : > { %v18456_v33 = vpop.f32.mrb[89].mxu1  ;;  %v10465_v50 = vsel %vm1692_vm3, %v23353_v1, -inf }
 0xef6   : > { %10466 = vmax.xlane.f32.xlu1 %v10465_v50  ;;  %v9759_v23 = vpop.f32.mrb[90].mxu1 }
 0xef7   : > { %v18457_v5 = vpop.f32.mrb[91].mxu1 }
 0xef9   : > { %v23357_v60 = vpop.f32.mrb[96].mxu0 }
 0xefa   : > { %v18474_v27 = vpop.f32.mrb[97].mxu0  ;;  %v10474_v23 = vsel %vm1692_vm3, %v23357_v60, -inf }
 0xefb   : > { %v9909_v59 = vpop.f32.mrb[98].mxu0 }
 0xefc   : > { %v23359_v14 = vpop.f32.mrb[92].mxu1  ;;  %v18475_v12 = vpop.f32.mrb[99].mxu0 }
 0xefd   : > { %v18468_v51 = vpop.f32.mrb[93].mxu1  ;;  %v10471_v35 = vsel %vm1692_vm3, %v23359_v14, -inf }
 0xefe   : > { %10472 = vmax.xlane.f32.xlu0 %v10471_v35  ;;  %v9859_v18 = vpop.f32.mrb[94].mxu1 }
 0xeff   : > { %v18469_v4 = vpop.f32.mrb[95].mxu1 }
 0xf01   : > { %v23363_v33 = vpop.f32.mrb[100].mxu0 }
 0xf02   : > { %v18486_v50 = vpop.f32.mrb[101].mxu0  ;;  %10475 = vmax.xlane.f32.xlu0 %v10474_v23  ;;  %v10480_v51 = vsel %vm1692_vm3, %v23363_v33, -inf }
 0xf03   : > { %v10009_v5 = vpop.f32.mrb[102].mxu0 }
 0xf04   : > { %v23367_v27 = vpop.f32.mrb[96].mxu1  ;;  %v18487_v59 = vpop.f32.mrb[103].mxu0 }
 0xf05   : > { %v18480_v32 = vpop.f32.mrb[97].mxu1  ;;  %v10477_v12 = vsel %vm1692_vm3, %v23367_v27, -inf }
 0xf06   : > { %10481 = vmax.xlane.f32.xlu0 %v10480_v51  ;;  %10478 = vmax.xlane.f32.xlu1 %v10477_v12  ;;  %v9959_v35 = vpop.f32.mrb[98].mxu1 }
 0xf07   : > { %v18481_v18 = vpop.f32.mrb[99].mxu1 }
 0xf09   : > { %v23373_v4 = vpop.f32.mrb[104].mxu0 }
 0xf0a   : > { %v18498_v57 = vpop.f32.mrb[105].mxu0  ;;  %v10486_v23 = vsel %vm1692_vm3, %v23373_v4, -inf }
 0xf0b   : > { %v10109_v50 = vpop.f32.mrb[106].mxu0  ;;  %10487 = vmax.xlane.f32.xlu0 %v10486_v23 }
 0xf0c   : > { %v23377_v5 = vpop.f32.mrb[100].mxu1  ;;  %v18499_v32 = vpop.f32.mrb[107].mxu0 }
 0xf0d   : > { %v18492_v59 = vpop.f32.mrb[101].mxu1  ;;  %v10483_v53 = vsel %vm1692_vm3, %v23377_v5, -inf }
 0xf0e   : > { %10484 = vmax.xlane.f32.xlu1 %v10483_v53  ;;  %v10059_v51 = vpop.f32.mrb[102].mxu1 }
 0xf0f   : > { %v18493_v12 = vpop.f32.mrb[103].mxu1 }
 0xf11   : > { %v23381_v35 = vpop.f32.mrb[108].mxu0 }
 0xf12   : > { %v18510_v18 = vpop.f32.mrb[109].mxu0  ;;  %v10492_v57 = vsel %vm1692_vm3, %v23381_v35, -inf }
 0xf13   : > { %v10209_v56 = vpop.f32.mrb[110].mxu0  ;;  %10493 = vmax.xlane.f32.xlu0 %v10492_v57 }
 0xf14   : > { %v23385_v50 = vpop.f32.mrb[104].mxu1  ;;  %v18511_v23 = vpop.f32.mrb[111].mxu0 }
 0xf15   : > { %v18504_v20 = vpop.f32.mrb[105].mxu1  ;;  %v10489_v32 = vsel %vm1692_vm3, %v23385_v50, -inf }
 0xf16   : > { %10490 = vmax.xlane.f32.xlu1 %v10489_v32  ;;  %v10159_v59 = vpop.f32.mrb[106].mxu1 }
 0xf17   : > { %v18505_v53 = vpop.f32.mrb[107].mxu1 }
 0xf19   : > { %v23389_v51 = vpop.f32.mrb[112].mxu0 }
 0xf1a   : > { %v18522_v12 = vpop.f32.mrb[113].mxu0  ;;  %v10498_v18 = vsel %vm1692_vm3, %v23389_v51, -inf }
 0xf1b   : > { %v10309_v45 = vpop.f32.mrb[114].mxu0  ;;  %10499 = vmax.xlane.f32.xlu0 %v10498_v18 }
 0xf1c   : > { %v23393_v56 = vpop.f32.mrb[108].mxu1  ;;  %v18523_v57 = vpop.f32.mrb[115].mxu0 }
 0xf1d   : > { %v18516_v62 = vpop.f32.mrb[109].mxu1  ;;  %v10495_v20 = vsel %vm1692_vm3, %v23393_v56, -inf }
 0xf1e   : > { %10496 = vmax.xlane.f32.xlu1 %v10495_v20  ;;  %v10259_v23 = vpop.f32.mrb[110].mxu1 }
 0xf1f   : > { %v18517_v32 = vpop.f32.mrb[111].mxu1 }
 0xf21   : > { %v23397_v59 = vpop.f32.mrb[116].mxu0 }
 0xf22   : > { %v18534_v53 = vpop.f32.mrb[117].mxu0  ;;  %v10504_v12 = vsel %vm1692_vm3, %v23397_v59, -inf }
 0xf23   : > { %v10409_v37 = vpop.f32.mrb[118].mxu0  ;;  %10505 = vmax.xlane.f32.xlu0 %v10504_v12  ;;  %v23413_v12 = vpop.permute.xlu1 %10798 }
 0xf24   : > { %v23401_v45 = vpop.f32.mrb[112].mxu1  ;;  %v18535_v18 = vpop.f32.mrb[119].mxu0  ;;  %v25913_v37 = vld [vmem:[#allocation40_spill] sm:$0xff] }
 0xf25   : > { %v18528_v49 = vpop.f32.mrb[113].mxu1  ;;  %v10501_v62 = vsel %vm1692_vm3, %v23401_v45, -inf  ;;  %v23415_v18 = vpop.permute.xlu0 %10750 }
 0xf26   : > { %10502 = vmax.xlane.f32.xlu1 %v10501_v62  ;;  %v10359_v57 = vpop.f32.mrb[114].mxu1 }
 0xf27   : > { %v18529_v20 = vpop.f32.mrb[115].mxu1  ;;  %v23417_v62 = vpop.permute.xlu1 %10894 }
 0xf29   : > { %v23419_v57 = vpop.permute.xlu0 %10846 }
 0xf2c   : > { %v23405_v23 = vpop.f32.mrb[116].mxu1 }
 0xf2d   : > { %v18540_v32 = vpop.f32.mrb[117].mxu1  ;;  %v10507_v49 = vsel %vm1692_vm3, %v23405_v23, -inf  ;;  %v23423_v20 = vpop.permute.xlu0 %10942 }
 0xf2e   : > { %v10459_v58 = vpop.f32.mrb[118].mxu1  ;;  %25915 = vst [vmem:[#allocation112_spill] sm:$0xff] %v23423_v20 }
 0xf2f   : > { %v18541_v53 = vpop.f32.mrb[119].mxu1  ;;  %v23421_v58 = vpop.permute.xlu1 %10990 }
 0xf30   : > { %25914 = vst [vmem:[#allocation111_spill] sm:$0xff] %v23421_v58 }
 0xf31   : > { %v23427_v53 = vpop.permute.xlu0 %11038 }
 0xf33   : > { %v23425_v32 = vpop.permute.xlu1 %11086 }
 0xf34   : > { %25916 = vst [vmem:[#allocation113_spill] sm:$0xff] %v23425_v32 }
 0xf37   : > { %11278 = vrot.lane.b32.xlu1 %v25912_v8, %s20272_s20  ;;  %v23429_v8 = vpop.permute.xlu1 %11134 }
 0xf38   : > { %25917 = vst [vmem:[#allocation114_spill] sm:$0xff] %v23429_v8 }
 0xf39   : > { %11230 = vrot.lane.b32.xlu0 %v25913_v37, %s20272_s20 }
 0xf3b   : > { %v23432_v46 = vpop.permute.xlu1 %11182 }
 0xf5b   : > { %10508 = vmax.xlane.f32.xlu1 %v10507_v49 }
 0xf78   : > { %v10464_v37 = vpop.xlane.xlu0 %10463 }
 0xf79   : > { %v10510_v49 = vsub.f32 %v23341_v39, %v10464_v37 }
 0xf7b   : > { %v10526_v26 = vmul.f32 1.442695, %v10510_v49 }
 0xf7d   : > { %19794 = vpow2.f32 %v10526_v26 }
 0xf80   : > { %v10470_v29 = vpop.xlane.xlu0 %10469 }
 0xf81   : > { %v10512_v44 = vsub.f32 %v23349_v41, %v10470_v29 }
 0xf83   : > { %v10530_v48 = vmul.f32 1.442695, %v10512_v44  ;;  %v10467_v58 = vpop.xlane.xlu1 %10466 }
 0xf84   : > { %v10511_v16 = vsub.f32 %v23353_v1, %v10467_v58 }
 0xf85   : > { %19796 = vpow2.f32 %v10530_v48 }
 0xf86   : > { %v10528_v32 = vmul.f32 1.442695, %v10511_v16 }
 0xf87   : > { %v23436_v20 = vpop.eup %19794 }
 0xf88   : > { %19798 = vpow2.f32 %v10528_v32  ;;  %v10558_v8 = vsel %vm1692_vm3, %v23436_v20, 0.0 }
 0xf89   : > { %10559 = vadd.xlane.f32.xlu0 %v10558_v8 }
 0xf8b   : > { %v10473_v39 = vpop.xlane.xlu0 %10472 }
 0xf8c   : > { %v10513_v26 = vsub.f32 %v23359_v14, %v10473_v39 }
 0xf8e   : > { %v10532_v37 = vmul.f32 1.442695, %v10513_v26 }
 0xf8f   : > { %v23441_v49 = vpop.eup %19796  ;;  %v10476_v29 = vpop.xlane.xlu0 %10475 }
 0xf90   : > { %19800 = vpow2.f32 %v10532_v37  ;;  %v10514_v44 = vsub.f32 %v23357_v60, %v10476_v29  ;;  %v10564_v16 = vsel %vm1692_vm3, %v23441_v49, 0.0 }
 0xf91   : > { %10565 = vadd.xlane.f32.xlu0 %v10564_v16 }
 0xf92   : > { %v23446_v48 = vpop.eup %19798  ;;  %v10534_v1 = vmul.f32 1.442695, %v10514_v44 }
 0xf93   : > { %v10482_v41 = vpop.xlane.xlu0 %10481  ;;  %v10479_v58 = vpop.xlane.xlu1 %10478  ;;  %v10561_v8 = vsel %vm1692_vm3, %v23446_v48, 0.0 }
 0xf94   : > { %19802 = vpow2.f32 %v10534_v1  ;;  %v10516_v14 = vsub.f32 %v23363_v33, %v10482_v41  ;;  %v10515_v32 = vsub.f32 %v23367_v27, %v10479_v58  ;;  %10562 = vadd.xlane.f32.xlu1 %v10561_v8 }
 0xf96   : > { %v10538_v39 = vmul.f32 1.442695, %v10516_v14  ;;  %v10536_v60 = vmul.f32 1.442695, %v10515_v32 }
 0xf98   : > { %19804 = vpow2.f32 %v10538_v39  ;;  %v10488_v26 = vpop.xlane.xlu0 %10487 }
 0xf99   : > { %19806 = vpow2.f32 %v10536_v60  ;;  %v10518_v29 = vsub.f32 %v23373_v4, %v10488_v26 }
 0xf9a   : > { %v23452_v37 = vpop.eup %19800 }
 0xf9b   : > { %v10485_v44 = vpop.xlane.xlu1 %10484  ;;  %v10567_v16 = vsel %vm1692_vm3, %v23452_v37, 0.0  ;;  %v10542_v27 = vmul.f32 1.442695, %v10518_v29 }
 0xf9c   : > { %v10517_v1 = vsub.f32 %v23377_v5, %v10485_v44  ;;  %10568 = vadd.xlane.f32.xlu1 %v10567_v16 }
 0xf9e   : > { %v23458_v33 = vpop.eup %19802  ;;  %v10540_v41 = vmul.f32 1.442695, %v10517_v1 }
 0xf9f   : > { %v10570_v58 = vsel %vm1692_vm3, %v23458_v33, 0.0 }
 0xfa0   : > { %19808 = vpow2.f32 %v10540_v41  ;;  %10571 = vadd.xlane.f32.xlu0 %v10570_v58  ;;  %v10494_v8 = vpop.xlane.xlu0 %10493 }
 0xfa1   : > { %v10520_v14 = vsub.f32 %v23381_v35, %v10494_v8  ;;  %19810 = vpow2.f32 %v10542_v27 }
 0xfa2   : > { %v23463_v4 = vpop.eup %19804 }
 0xfa3   : > { %v23465_v32 = vpop.eup %19806  ;;  %v10546_v39 = vmul.f32 1.442695, %v10520_v14  ;;  %v10491_v5 = vpop.xlane.xlu1 %10490  ;;  %v10576_v60 = vsel %vm1692_vm3, %v23463_v4, 0.0 }
 0xfa4   : > { %v10519_v26 = vsub.f32 %v23385_v50, %v10491_v5  ;;  %10577 = vadd.xlane.f32.xlu0 %v10576_v60  ;;  %v10573_v29 = vsel %vm1692_vm3, %v23465_v32, 0.0 }
 0xfa5   : > { %10574 = vadd.xlane.f32.xlu1 %v10573_v29  ;;  %19812 = vpow2.f32 %v10546_v39 }
 0xfa6   : > { %v10544_v44 = vmul.f32 1.442695, %v10519_v26 }
 0xfa8   : > { %19814 = vpow2.f32 %v10544_v44  ;;  %v10500_v35 = vpop.xlane.xlu0 %10499 }
 0xfa9   : > { %v10522_v16 = vsub.f32 %v23389_v51, %v10500_v35 }
 0xfaa   : > { %v23473_v1 = vpop.eup %19808 }
 0xfab   : > { %v10550_v27 = vmul.f32 1.442695, %v10522_v16  ;;  %v10497_v41 = vpop.xlane.xlu1 %10496  ;;  %v10579_v58 = vsel %vm1692_vm3, %v23473_v1, 0.0  ;;  %v23477_v8 = vpop.eup %19810 }
 0xfac   : > { %v10521_v50 = vsub.f32 %v23393_v56, %v10497_v41  ;;  %10580 = vadd.xlane.f32.xlu1 %v10579_v58  ;;  %v10582_v39 = vsel %vm1692_vm3, %v23477_v8, 0.0 }
 0xfad   : > { %19816 = vpow2.f32 %v10550_v27 }
 0xfae   : > { %v10548_v14 = vmul.f32 1.442695, %v10521_v50 }
 0xfaf   : > { %v23482_v5 = vpop.eup %19812 }
 0xfb0   : > { %19818 = vpow2.f32 %v10548_v14  ;;  %10583 = vadd.xlane.f32.xlu1 %v10582_v39  ;;  %v10588_v29 = vsel %vm1692_vm3, %v23482_v5, 0.0  ;;  %v10506_v50 = vpop.xlane.xlu0 %10505 }
 0xfb1   : > { %v10524_v14 = vsub.f32 %v23397_v59, %v10506_v50 }
 0xfb2   : > { %v23484_v51 = vpop.eup %19814 }
 0xfb3   : > { %v10503_v60 = vpop.xlane.xlu1 %10502  ;;  %v10585_v26 = vsel %vm1692_vm3, %v23484_v51, 0.0  ;;  %v10554_v39 = vmul.f32 1.442695, %v10524_v14 }
 0xfb4   : > { %v10523_v56 = vsub.f32 %v23401_v45, %v10503_v60  ;;  %10586 = vadd.xlane.f32.xlu0 %v10585_v26  ;;  %10589 = vadd.xlane.f32.xlu1 %v10588_v29 }
 0xfb6   : > { %v10552_v44 = vmul.f32 1.442695, %v10523_v56 }
 0xfb7   : > { %v23491_v35 = vpop.eup %19816  ;;  %v23508_v60 = vpop.permute.xlu1 %11278 }
 0xfb8   : > { %19820 = vpow2.f32 %v10552_v44  ;;  %v10594_v16 = vsel %vm1692_vm3, %v23491_v35, 0.0 }
 0xfb9   : > { %10595 = vadd.xlane.f32.xlu1 %v10594_v16  ;;  %19822 = vpow2.f32 %v10554_v39 }
 0xfba   : > { %v23495_v27 = vpop.eup %19818 }
 0xfbb   : > { %v10591_v41 = vsel %vm1692_vm3, %v23495_v27, 0.0 }
 0xfbc   : > { %10592 = vadd.xlane.f32.xlu0 %v10591_v41 }
 0xfc2   : > { %v23499_v58 = vpop.eup %19820 }
 0xfc3   : > { %v10597_v45 = vsel %vm1692_vm3, %v23499_v58, 0.0  ;;  %v23511_v56 = vpop.eup %19822 }
 0xfc4   : > { %10598 = vadd.xlane.f32.xlu0 %v10597_v45  ;;  %v10600_v16 = vsel %vm1692_vm3, %v23511_v56, 0.0 }
 0xfca   : > { %11374 = vrot.lane.b32.xlu1 %v21220_v40, %s20272_s20 }
 0xfda   : > { %11326 = vrot.lane.b32.xlu0 %v21158_v34, %s20272_s20 }
 0xfe8   : > { %v10509_v26 = vpop.xlane.xlu1 %10508 }
 0xfe9   : > { %v10525_v29 = vsub.f32 %v23405_v23, %v10509_v26  ;;  %v23531_v23 = vpop.permute.xlu0 %11230 }
 0xfeb   : > { %v10556_v44 = vmul.f32 1.442695, %v10525_v29 }
 0xfed   : > { %19824 = vpow2.f32 %v10556_v44  ;;  %v10756_v44 = vsel %vm1888_vm2, %v23415_v18, 0 }
 0xfee   : > { %10601 = vadd.xlane.f32.xlu1 %v10600_v16 }
 0xff7   : > { %v23515_v41 = vpop.eup %19824 }
 0xff8   : > { %v10603_v59 = vsel %vm1692_vm3, %v23515_v41, 0.0 }
 0xff9   : > { %10604 = vadd.xlane.f32.xlu0 %v10603_v59 }
 0xfff   : > { %11474 = vrot.lane.b32.xlu1 %v20561_v6, %s20273_s27 }
0x1003   : > { %11472 = vrot.lane.b32.xlu1 %v20592_v28, %s20273_s27 }
0x1007   : > { %11574 = vrot.lane.b32.xlu1 %v20607_v38, %s20273_s27 }
0x100b   : > { %11572 = vrot.lane.b32.xlu1 %v20665_v21, %s20273_s27 }
0x100f   : > { %11674 = vrot.lane.b32.xlu1 %v20646_v2, %s20273_s27  ;;  %11424 = vrot.lane.b32.xlu0 %v20555_v63, %s20273_s27 }
0x1013   : > { %11672 = vrot.lane.b32.xlu1 %v20704_v61, %s20273_s27  ;;  %11422 = vrot.lane.b32.xlu0 %v20563_v9, %s20273_s27 }
0x1016   : > { %v10560_v45 = vpop.xlane.xlu0 %10559 }
0x1017   : > { %19826 = vrcp.f32 %v10560_v45  ;;  %11774 = vrot.lane.b32.xlu1 %v20687_v36, %s20273_s27  ;;  %11524 = vrot.lane.b32.xlu0 %v20575_v15, %s20273_s27 }
0x101b   : > { %11772 = vrot.lane.b32.xlu1 %v25712_v47, %s20273_s27  ;;  %11522 = vrot.lane.b32.xlu0 %v20625_v52, %s20273_s27 }
0x101e   : > { %v10566_v50 = vpop.xlane.xlu0 %10565 }
0x101f   : > { %19828 = vrcp.f32 %v10566_v50  ;;  %11874 = vrot.lane.b32.xlu1 %v25713_v17, %s20273_s27  ;;  %11624 = vrot.lane.b32.xlu0 %v20595_v30, %s20273_s27 }
0x1021   : > { %v19827_v14 = vpop.eup %19826  ;;  %v10563_v39 = vpop.xlane.xlu1 %10562 }
0x1022   : > { %v10622_v26 = vmul.f32 %v19827_v14, %v23436_v20  ;;  %19830 = vrcp.f32 %v10563_v39  ;;  %v10852_v39 = vsel %vm1888_vm2, %v23419_v57, 0 }
0x1023   : > { %11872 = vrot.lane.b32.xlu1 %v25717_v19, %s20273_s27  ;;  %11622 = vrot.lane.b32.xlu0 %v20613_v42, %s20273_s27 }
0x1024   : > { %v10638_v29 = vpack.c.bf16 %v10622_v26, %v10622_v26 }
0x1026   : > { %18545 = vmatmul.mubr.msk.bf16.vlgmr.msra.gmra.mrb[120].mxu0 %vm1692_vm3, %v10638_v29 }
0x1027   : > { %18555 = vmatpush3.bf16.msra.mxu0 %v10756_v44  ;;  %11974 = vrot.lane.b32.xlu1 %v25718_v25, %s20273_s27 }
0x1028   : > { %11724 = vrot.lane.b32.xlu0 %v20628_v54, %s20273_s27  ;;  %18556 = vmatprep.mubr.msk.bf16.mxu0 %vm20267_vm0, %v25704_v11 }
0x1029   : > { %v19829_v20 = vpop.eup %19828  ;;  %v10569_v16 = vpop.xlane.xlu1 %10568  ;;  %18566 = vmatprep.subr.bf16.mxu0 %v25704_v11 }
0x102a   : > { %v10624_v59 = vmul.f32 %v19829_v20, %v23441_v49  ;;  %19832 = vrcp.f32 %v10569_v16  ;;  %v10804_v49 = vsel %vm1888_vm2, %v23413_v12, 0  ;;  %v10900_v16 = vsel %vm1888_vm2, %v23417_v62, 0 }
0x102b   : > { %11972 = vrot.lane.b32.xlu1 %v25719_v3, %s20273_s27 }
0x102c   : > { %v19831_v18 = vpop.eup %19830  ;;  %v10640_v45 = vpack.c.bf16 %v10624_v59, %v10624_v59  ;;  %11722 = vrot.lane.b32.xlu0 %v20653_v7, %s20273_s27 }
0x102d   : > { %v10623_v50 = vmul.f32 %v19831_v18, %v23446_v48  ;;  %v10572_v14 = vpop.xlane.xlu0 %10571 }
0x102e   : > { %19834 = vrcp.f32 %v10572_v14  ;;  %18557 = vmatmul.mubr.msk.bf16.vlgmr.msra.gmra.mrb[124].mxu0 %vm1692_vm3, %v10640_v45 }
0x102f   : > { %v10639_v26 = vpack.c.bf16 %v10623_v50, %v10623_v50  ;;  %18567 = vmatpush3.bf16.msra.mxu0 %v10852_v39  ;;  %12074 = vrot.lane.b32.xlu1 %v25720_v31, %s20273_s27 }
0x1030   : > { %11824 = vrot.lane.b32.xlu0 %v20669_v24, %s20273_s27  ;;  %18568 = vmatprep.mubr.msk.bf16.mxu0 %vm20267_vm0, %v25704_v11 }
0x1031   : > { %v10578_v48 = vpop.xlane.xlu0 %10577  ;;  %18551 = vmatmul.mubr.msk.bf16.vlgmr.msra.gmra.mrb[120].mxu1 %vm1692_vm3, %v10639_v26  ;;  %18578 = vmatprep.subr.bf16.mxu0 %v25704_v11 }
0x1032   : > { %19836 = vrcp.f32 %v10578_v48  ;;  %18561 = vmatpush3.bf16.msra.mxu1 %v10804_v49  ;;  %v10575_v57 = vpop.xlane.xlu1 %10574  ;;  %18562 = vmatprep.mubr.msk.bf16.mxu1 %vm20267_vm0, %v25704_v11  ;;  %v25919_v49 = vld [vmem:[#allocation29_spill] sm:$0xff] }
0x1033   : > { %19838 = vrcp.f32 %v10575_v57  ;;  %12072 = vrot.lane.b32.xlu1 %v25721_v13, %s20273_s27  ;;  %18572 = vmatprep.subr.bf16.mxu1 %v25704_v11  ;;  %v25920_v57 = vld [vmem:[#allocation18_spill] sm:$0xff] }
0x1034   : > { %v19833_v29 = vpop.eup %19832  ;;  %11822 = vrot.lane.b32.xlu0 %v20694_v43, %s20273_s27 }
0x1035   : > { %v10625_v12 = vmul.f32 %v19833_v29, %v23452_v37 }
0x1037   : > { %v10641_v44 = vpack.c.bf16 %v10625_v12, %v10625_v12  ;;  %12174 = vrot.lane.b32.xlu1 %v25722_v10, %s20273_s27 }
0x1038   : > { %v19835_v20 = vpop.eup %19834  ;;  %11924 = vrot.lane.b32.xlu0 %v20708_v0, %s20273_s27 }
0x1039   : > { %v10626_v59 = vmul.f32 %v19835_v20, %v23458_v33  ;;  %18563 = vmatmul.mubr.msk.bf16.vlgmr.msra.gmra.mrb[124].mxu1 %vm1692_vm3, %v10641_v44  ;;  %v10581_v18 = vpop.xlane.xlu1 %10580  ;;  %v25918_v33 = vld [vmem:[#allocation112_spill] sm:$0xff]  ;;  %v25921_v44 = vld [vmem:[#allocation111_spill] sm:$0xff] }
0x103a   : > { %18573 = vmatpush3.bf16.msra.mxu1 %v10900_v16  ;;  %19840 = vrcp.f32 %v10581_v18  ;;  %18574 = vmatprep.mubr.msk.bf16.mxu1 %vm20267_vm0, %v25704_v11  ;;  %v10948_v50 = vsel %vm1888_vm2, %v25918_v33, 0  ;;  %v11044_v18 = vsel %vm1888_vm2, %v23427_v53, 0  ;;  %v25924_v33 = vld [vmem:[#allocation36_spill] sm:$0xff]  ;;  %v25925_v53 = vld [vmem:[#allocation22_spill] sm:$0xff] }
0x103b   : > { %v10642_v37 = vpack.c.bf16 %v10626_v59, %v10626_v59  ;;  %12172 = vrot.lane.b32.xlu1 %v25723_v55, %s20273_s27  ;;  %18584 = vmatprep.subr.bf16.mxu1 %v25704_v11  ;;  %v25923_v59 = vld [vmem:[#allocation20_spill] sm:$0xff] }
0x103c   : > { %v19837_v45 = vpop.eup %19836  ;;  %11922 = vrot.lane.b32.xlu0 %v20730_v22, %s20273_s27 }
0x103d   : > { %v19839_v62 = vpop.eup %19838  ;;  %18569 = vmatmul.mubr.msk.bf16.vlgmr.msra.gmra.mrb[128].mxu0 %vm1692_vm3, %v10642_v37  ;;  %v10584_v14 = vpop.xlane.xlu1 %10583  ;;  %v10628_v26 = vmul.f32 %v19837_v45, %v23463_v4  ;;  %v25922_v4 = vld [vmem:[#allocation35_spill] sm:$0xff] }
0x103e   : > { %v10627_v39 = vmul.f32 %v19839_v62, %v23465_v32  ;;  %18579 = vmatpush3.bf16.msra.mxu0 %v10948_v50  ;;  %19842 = vrcp.f32 %v10584_v14  ;;  %18580 = vmatprep.mubr.msk.bf16.mxu0 %vm20267_vm0, %v25704_v11  ;;  %v10996_v32 = vsel %vm1888_vm2, %v25921_v44, 0  ;;  %v25928_v44 = vld [vmem:[#allocation25_spill] sm:$0xff] }
0x103f   : > { %12462 = vrot.lane.b32.xlu1 %v25919_v49, %s20273_s27  ;;  %18590 = vmatprep.subr.bf16.mxu0 %v25704_v11  ;;  %v10644_v20 = vpack.c.bf16 %v10628_v26, %v10628_v26 }
0x1040   : > { %v10643_v48 = vpack.c.bf16 %v10627_v39, %v10627_v39  ;;  %12024 = vrot.lane.b32.xlu0 %v25920_v57, %s20273_s27  ;;  %v25926_v39 = vld [vmem:[#allocation113_spill] sm:$0xff] }
0x1041   : > { %v10587_v29 = vpop.xlane.xlu0 %10586  ;;  %v10590_v12 = vpop.xlane.xlu1 %10589  ;;  %v11092_v26 = vsel %vm1888_vm2, %v25926_v39, 0 }
0x1042   : > { %19844 = vrcp.f32 %v10587_v29  ;;  %18575 = vmatmul.mubr.msk.bf16.vlgmr.msra.gmra.mrb[128].mxu1 %vm1692_vm3, %v10643_v48  ;;  %v25927_v29 = vld [vmem:[#allocation37_spill] sm:$0xff] }
0x1043   : > { %18585 = vmatpush3.bf16.msra.mxu1 %v10996_v32  ;;  %19846 = vrcp.f32 %v10590_v12  ;;  %12558 = vrot.lane.b32.xlu1 %v25922_v4, %s20273_s27  ;;  %v25929_v32 = vld [vmem:[#allocation114_spill] sm:$0xff] }
0x1044   : > { %v19841_v16 = vpop.eup %19840  ;;  %12022 = vrot.lane.b32.xlu0 %v25923_v59, %s20273_s27  ;;  %18586 = vmatprep.mubr.msk.bf16.mxu1 %vm20267_vm0, %v25704_v11 }
0x1045   : > { %v10629_v37 = vmul.f32 %v19841_v16, %v23473_v1  ;;  %18581 = vmatmul.mubr.msk.bf16.vlgmr.msra.gmra.mrb[132].mxu0 %vm1692_vm3, %v10644_v20  ;;  %18596 = vmatprep.subr.bf16.mxu1 %v25704_v11  ;;  %v11140_v20 = vsel %vm1888_vm2, %v25929_v32, 0  ;;  %v25934_v32 = vld [vmem:[#allocation41_spill] sm:$0xff] }
0x1046   : > { %18591 = vmatpush3.bf16.msra.mxu0 %v11044_v18  ;;  %v10596_v45 = vpop.xlane.xlu1 %10595  ;;  %18592 = vmatprep.mubr.msk.bf16.mxu0 %vm20267_vm0, %v25704_v11 }
0x1047   : > { %v10645_v62 = vpack.c.bf16 %v10629_v37, %v10629_v37  ;;  %12654 = vrot.lane.b32.xlu1 %v25924_v33, %s20273_s27  ;;  %18602 = vmatprep.subr.bf16.mxu0 %v25704_v11  ;;  %19848 = vrcp.f32 %v10596_v45  ;;  %v25930_v45 = vld [vmem:[#allocation39_spill] sm:$0xff] }
0x1048   : > { %v19843_v50 = vpop.eup %19842  ;;  %12124 = vrot.lane.b32.xlu0 %v25925_v53, %s20273_s27 }
0x1049   : > { %v10630_v1 = vmul.f32 %v19843_v50, %v23477_v8  ;;  %v10593_v14 = vpop.xlane.xlu0 %10592  ;;  %v11188_v50 = vsel %vm1888_vm2, %v23432_v46, 0 }
0x104a   : > { %19850 = vrcp.f32 %v10593_v14  ;;  %18587 = vmatmul.mubr.msk.bf16.vlgmr.msra.gmra.mrb[132].mxu1 %vm1692_vm3, %v10645_v62  ;;  %v25931_v62 = vld [vmem:[#allocation24_spill] sm:$0xff] }
0x104b   : > { %v10646_v48 = vpack.c.bf16 %v10630_v1, %v10630_v1  ;;  %18597 = vmatpush3.bf16.msra.mxu1 %v11092_v26  ;;  %12750 = vrot.lane.b32.xlu1 %v25927_v29, %s20273_s27  ;;  %v25933_v26 = vld [vmem:[#allocation31_spill] sm:$0xff]  ;;  %v25954_v29 = vld [vmem:[#allocation17_spill] sm:$0xff] }
0x104c   : > { %v19845_v12 = vpop.eup %19844  ;;  %12122 = vrot.lane.b32.xlu0 %v25928_v44, %s20273_s27  ;;  %18598 = vmatprep.mubr.msk.bf16.mxu1 %vm20267_vm0, %v25704_v11 }
0x104d   : > { %v19847_v8 = vpop.eup %19846  ;;  %v10631_v16 = vmul.f32 %v19845_v12, %v23484_v51  ;;  %18593 = vmatmul.mubr.msk.bf16.vlgmr.msra.gmra.mrb[136].mxu0 %vm1692_vm3, %v10646_v48  ;;  %18608 = vmatprep.subr.bf16.mxu1 %v25704_v11  ;;  %v11236_v48 = vsel %vm1888_vm2, %v23531_v23, 0  ;;  %v25935_v23 = vld [vmem:[#allocation32_spill] sm:$0xff] }
0x104e   : > { %18603 = vmatpush3.bf16.msra.mxu0 %v11140_v20  ;;  %18604 = vmatprep.mubr.msk.bf16.mxu0 %vm20267_vm0, %v25704_v11  ;;  %v10632_v37 = vmul.f32 %v19847_v8, %v23482_v5  ;;  %v25932_v5 = vld [vmem:[#allocation38_spill] sm:$0xff] }
0x104f   : > { %v10647_v18 = vpack.c.bf16 %v10631_v16, %v10631_v16  ;;  %12846 = vrot.lane.b32.xlu1 %v25930_v45, %s20273_s27  ;;  %18614 = vmatprep.subr.bf16.mxu0 %v25704_v11 }
0x1050   : > { %12414 = vrot.lane.b32.xlu0 %v25931_v62, %s20273_s27  ;;  %v10648_v14 = vpack.c.bf16 %v10632_v37, %v10632_v37 }
0x1051   : > { %v10599_v51 = vpop.xlane.xlu0 %10598  ;;  %v19849_v1 = vpop.eup %19848 }
0x1052   : > { %19852 = vrcp.f32 %v10599_v51  ;;  %18599 = vmatmul.mubr.msk.bf16.vlgmr.msra.gmra.mrb[136].mxu1 %vm1692_vm3, %v10647_v18  ;;  %v10634_v12 = vmul.f32 %v19849_v1, %v23491_v35  ;;  %v25936_v18 = vld [vmem:[#allocation33_spill] sm:$0xff]  ;;  %v25937_v1 = vld [vmem:[#allocation34_spill] sm:$0xff] }
0x1053   : > { %18609 = vmatpush3.bf16.msra.mxu1 %v11188_v50  ;;  %12894 = vrot.lane.b32.xlu1 %v25932_v5, %s20273_s27 }
0x1054   : > { %v19851_v39 = vpop.eup %19850  ;;  %12510 = vrot.lane.b32.xlu0 %v25933_v26, %s20273_s27  ;;  %18610 = vmatprep.mubr.msk.bf16.mxu1 %vm20267_vm0, %v25704_v11  ;;  %v10650_v16 = vpack.c.bf16 %v10634_v12, %v10634_v12 }
0x1055   : > { %v10633_v46 = vmul.f32 %v19851_v39, %v23495_v27  ;;  %18605 = vmatmul.mubr.msk.bf16.vlgmr.msra.gmra.mrb[140].mxu0 %vm1692_vm3, %v10648_v14  ;;  %18620 = vmatprep.subr.bf16.mxu1 %v25704_v11  ;;  %v11284_v27 = vsel %vm1888_vm2, %v23508_v60, 0  ;;  %v11327_v20 = vpop.permute.xlu0 %11326  ;;  %v11375_v60 = vpop.permute.xlu1 %11374 }
0x1056   : > { %18615 = vmatpush3.bf16.msra.mxu0 %v11236_v48  ;;  %18616 = vmatprep.mubr.msk.bf16.mxu0 %vm20267_vm0, %v25704_v11  ;;  %v11332_v51 = vsel %vm1888_vm2, %v11327_v20, 0  ;;  %v11380_v14 = vsel %vm1888_vm2, %v11375_v60, 0 }
0x1057   : > { %v10649_v8 = vpack.c.bf16 %v10633_v46, %v10633_v46  ;;  %12942 = vrot.lane.b32.xlu1 %v25934_v32, %s20273_s27  ;;  %18626 = vmatprep.subr.bf16.mxu0 %v25704_v11 }
0x1058   : > { %12606 = vrot.lane.b32.xlu0 %v25935_v23, %s20273_s27 }
0x105a   : > { %18611 = vmatmul.mubr.msk.bf16.vlgmr.msra.gmra.mrb[140].mxu1 %vm1692_vm3, %v10649_v8 }
0x105b   : > { %18621 = vmatpush3.bf16.msra.mxu1 %v11284_v27  ;;  %18622 = vmatprep.mubr.msk.bf16.mxu1 %vm20267_vm0, %v25704_v11 }
0x105c   : > { %v19853_v35 = vpop.eup %19852  ;;  %12702 = vrot.lane.b32.xlu0 %v25936_v18, %s20273_s27  ;;  %18632 = vmatprep.subr.bf16.mxu1 %v25704_v11 }
0x105d   : > { %v10635_v37 = vmul.f32 %v19853_v35, %v23499_v58  ;;  %18617 = vmatmul.mubr.msk.bf16.vlgmr.msra.gmra.mrb[144].mxu0 %vm1692_vm3, %v10650_v16 }
0x105e   : > { %18627 = vmatpush3.bf16.msra.mxu0 %v11332_v51  ;;  %18628 = vmatprep.mubr.msk.bf16.mxu0 %vm20267_vm0, %v25704_v11 }
0x105f   : > { %v10651_v50 = vpack.c.bf16 %v10635_v37, %v10635_v37  ;;  %18638 = vmatprep.subr.bf16.mxu0 %v25704_v11 }
0x1060   : > { %12798 = vrot.lane.b32.xlu0 %v25937_v1, %s20273_s27 }
0x1062   : > { %18623 = vmatmul.mubr.msk.bf16.vlgmr.msra.gmra.mrb[144].mxu1 %vm1692_vm3, %v10651_v50 }
0x1063   : > { %18633 = vmatpush3.bf16.msra.mxu1 %v11380_v14  ;;  %18634 = vmatprep.mubr.msk.bf16.mxu1 %vm20267_vm0, %v25704_v11 }
0x1064   : > { %18644 = vmatprep.subr.bf16.mxu1 %v25704_v11 }
0x107b   : > { %v10602_v58 = vpop.xlane.xlu1 %10601 }
0x107c   : > { %19854 = vrcp.f32 %v10602_v58 }
0x107f   : > { %v11475_v39 = vpop.permute.xlu1 %11474 }
0x1083   : > { %v11473_v48 = vpop.permute.xlu1 %11472 }
0x1086   : > { %v19855_v46 = vpop.eup %19854  ;;  %v10605_v12 = vpop.xlane.xlu0 %10604 }
0x1087   : > { %v10636_v8 = vmul.f32 %v19855_v46, %v23511_v56  ;;  %19856 = vrcp.f32 %v10605_v12  ;;  %v11575_v27 = vpop.permute.xlu1 %11574 }
0x1089   : > { %v10652_v20 = vpack.c.bf16 %v10636_v8, %v10636_v8  ;;  %v11480_v8 = vsel %vm955_vm1, %v11475_v39, 0 }
0x108a   : > { %v11425_v16 = vpop.permute.xlu0 %11424 }
0x108b   : > { %v11430_v35 = vsel %vm955_vm1, %v11425_v16, 0  ;;  %18629 = vmatmul.mubr.msk.bf16.vlgmr.msra.gmra.mrb[148].mxu0 %vm1692_vm3, %v10652_v20  ;;  %v11573_v37 = vpop.permute.xlu1 %11572 }
0x108c   : > { %18639 = vmatpush3.bf16.xpose.msra.mxu0 %v11430_v35  ;;  %18640 = vmatprep.mubr.msk.bf16.mxu0 %vm20267_vm0, %v25704_v11 }
0x108d   : > { %18650 = vmatprep.subr.bf16.mxu0 %v25704_v11 }
0x108e   : > { %v11423_v51 = vpop.permute.xlu0 %11422 }
0x108f   : > { %v11675_v60 = vpop.permute.xlu1 %11674 }
0x1091   : > { %v19857_v50 = vpop.eup %19856 }
0x1092   : > { %v10637_v56 = vmul.f32 %v19857_v50, %v23515_v41  ;;  %v11525_v14 = vpop.permute.xlu0 %11524 }
0x1093   : > { %v11530_v58 = vsel %vm955_vm1, %v11525_v14, 0  ;;  %18641 = vmatmul.mubr.msk.bf16.vlgmr.msra.gmra.mrb[152].mxu0 %vm955_vm1, %v11423_v51  ;;  %v11673_v46 = vpop.permute.xlu1 %11672  ;;  %v11580_v51 = vsel %vm955_vm1, %v11575_v27, 0 }
0x1094   : > { %v10653_v12 = vpack.c.bf16 %v10637_v56, %v10637_v56  ;;  %18651 = vmatpush3.bf16.xpose.msra.mxu0 %v11530_v58  ;;  %18652 = vmatprep.mubr.msk.bf16.mxu0 %vm20267_vm0, %v25704_v11 }
0x1095   : > { %18662 = vmatprep.subr.bf16.mxu0 %v25704_v11 }
0x1096   : > { %v11523_v20 = vpop.permute.xlu0 %11522  ;;  %18635 = vmatmul.mubr.msk.bf16.vlgmr.msra.gmra.mrb[148].mxu1 %vm1692_vm3, %v10653_v12 }
0x1097   : > { %18645 = vmatpush3.bf16.xpose.msra.mxu1 %v11480_v8  ;;  %v11775_v41 = vpop.permute.xlu1 %11774  ;;  %18646 = vmatprep.mubr.msk.bf16.mxu1 %vm20267_vm0, %v25704_v11 }
0x1098   : > { %18656 = vmatprep.subr.bf16.mxu1 %v25704_v11 }
0x109a   : > { %v11625_v16 = vpop.permute.xlu0 %11624 }
0x109b   : > { %v11630_v35 = vsel %vm955_vm1, %v11625_v16, 0  ;;  %18653 = vmatmul.mubr.msk.bf16.vlgmr.msra.gmra.mrb[156].mxu0 %vm955_vm1, %v11523_v20  ;;  %v11773_v39 = vpop.permute.xlu1 %11772 }
0x109c   : > { %18663 = vmatpush3.bf16.xpose.msra.mxu0 %v11630_v35  ;;  %18664 = vmatprep.mubr.msk.bf16.mxu0 %vm20267_vm0, %v25704_v11 }
0x109d   : > { %18674 = vmatprep.subr.bf16.mxu0 %v25704_v11 }
0x109e   : > { %v11623_v50 = vpop.permute.xlu0 %11622  ;;  %18647 = vmatmul.mubr.msk.bf16.vlgmr.msra.gmra.mrb[152].mxu1 %vm955_vm1, %v11473_v48  ;;  %v11680_v48 = vsel %vm955_vm1, %v11675_v60, 0 }
0x109f   : > { %18657 = vmatpush3.bf16.xpose.msra.mxu1 %v11580_v51  ;;  %18658 = vmatprep.mubr.msk.bf16.mxu1 %vm20267_vm0, %v25704_v11  ;;  %v11875_v14 = vpop.permute.xlu1 %11874 }
0x10a0   : > { %18668 = vmatprep.subr.bf16.mxu1 %v25704_v11 }
0x10a2   : > { %v11725_v56 = vpop.permute.xlu0 %11724 }
0x10a3   : > { %v11730_v58 = vsel %vm955_vm1, %v11725_v56, 0  ;;  %18665 = vmatmul.mubr.msk.bf16.vlgmr.msra.gmra.mrb[160].mxu0 %vm955_vm1, %v11623_v50  ;;  %v11873_v12 = vpop.permute.xlu1 %11872 }
0x10a4   : > { %18675 = vmatpush3.bf16.xpose.msra.mxu0 %v11730_v58  ;;  %18676 = vmatprep.mubr.msk.bf16.mxu0 %vm20267_vm0, %v25704_v11 }
0x10a5   : > { %18686 = vmatprep.subr.bf16.mxu0 %v25704_v11 }
0x10a6   : > { %v11723_v27 = vpop.permute.xlu0 %11722  ;;  %18659 = vmatmul.mubr.msk.bf16.vlgmr.msra.gmra.mrb[156].mxu1 %vm955_vm1, %v11573_v37  ;;  %v11780_v37 = vsel %vm955_vm1, %v11775_v41, 0 }
0x10a7   : > { %18669 = vmatpush3.bf16.xpose.msra.mxu1 %v11680_v48  ;;  %18670 = vmatprep.mubr.msk.bf16.mxu1 %vm20267_vm0, %v25704_v11  ;;  %v11975_v16 = vpop.permute.xlu1 %11974 }
0x10a8   : > { %18680 = vmatprep.subr.bf16.mxu1 %v25704_v11 }
0x10aa   : > { %v11825_v8 = vpop.permute.xlu0 %11824 }
0x10ab   : > { %v11830_v20 = vsel %vm955_vm1, %v11825_v8, 0  ;;  %18677 = vmatmul.mubr.msk.bf16.vlgmr.msra.gmra.mrb[164].mxu0 %vm955_vm1, %v11723_v27  ;;  %v11973_v41 = vpop.permute.xlu1 %11972 }
0x10ac   : > { %18687 = vmatpush3.bf16.xpose.msra.mxu0 %v11830_v20  ;;  %18688 = vmatprep.mubr.msk.bf16.mxu0 %vm20267_vm0, %v25704_v11 }
0x10ad   : > { %18698 = vmatprep.subr.bf16.mxu0 %v25704_v11 }
0x10ae   : > { %v11823_v60 = vpop.permute.xlu0 %11822  ;;  %18671 = vmatmul.mubr.msk.bf16.vlgmr.msra.gmra.mrb[160].mxu1 %vm955_vm1, %v11673_v46  ;;  %v11880_v46 = vsel %vm955_vm1, %v11875_v14, 0 }
0x10af   : > { %18681 = vmatpush3.bf16.xpose.msra.mxu1 %v11780_v37  ;;  %18682 = vmatprep.mubr.msk.bf16.mxu1 %vm20267_vm0, %v25704_v11  ;;  %v12075_v58 = vpop.permute.xlu1 %12074 }
0x10b0   : > { %18692 = vmatprep.subr.bf16.mxu1 %v25704_v11 }
0x10b2   : > { %v11925_v35 = vpop.permute.xlu0 %11924 }
0x10b3   : > { %v11930_v51 = vsel %vm955_vm1, %v11925_v35, 0  ;;  %18689 = vmatmul.mubr.msk.bf16.vlgmr.msra.gmra.mrb[168].mxu0 %vm955_vm1, %v11823_v60  ;;  %v12073_v27 = vpop.permute.xlu1 %12072 }
0x10b4   : > { %18699 = vmatpush3.bf16.xpose.msra.mxu0 %v11930_v51  ;;  %18700 = vmatprep.mubr.msk.bf16.mxu0 %vm20267_vm0, %v25704_v11 }
0x10b5   : > { %18710 = vmatprep.subr.bf16.mxu0 %v25704_v11 }
0x10b6   : > { %v11923_v50 = vpop.permute.xlu0 %11922  ;;  %18683 = vmatmul.mubr.msk.bf16.vlgmr.msra.gmra.mrb[164].mxu1 %vm955_vm1, %v11773_v39  ;;  %v11980_v39 = vsel %vm955_vm1, %v11975_v16, 0 }
0x10b7   : > { %18693 = vmatpush3.bf16.xpose.msra.mxu1 %v11880_v46  ;;  %18694 = vmatprep.mubr.msk.bf16.mxu1 %vm20267_vm0, %v25704_v11  ;;  %v12175_v60 = vpop.permute.xlu1 %12174 }
0x10b8   : > { %18704 = vmatprep.subr.bf16.mxu1 %v25704_v11 }
0x10ba   : > { %v12025_v56 = vpop.permute.xlu0 %12024 }
0x10bb   : > { %v12030_v48 = vsel %vm955_vm1, %v12025_v56, 0  ;;  %18701 = vmatmul.mubr.msk.bf16.vlgmr.msra.gmra.mrb[172].mxu0 %vm955_vm1, %v11923_v50  ;;  %v12173_v51 = vpop.permute.xlu1 %12172 }
0x10bc   : > { %18711 = vmatpush3.bf16.xpose.msra.mxu0 %v12030_v48  ;;  %18712 = vmatprep.mubr.msk.bf16.mxu0 %vm20267_vm0, %v25704_v11 }
0x10bd   : > { %18722 = vmatprep.subr.bf16.mxu0 %v25704_v11 }
0x10be   : > { %v12023_v14 = vpop.permute.xlu0 %12022  ;;  %18695 = vmatmul.mubr.msk.bf16.vlgmr.msra.gmra.mrb[168].mxu1 %vm955_vm1, %v11873_v12  ;;  %v12080_v12 = vsel %vm955_vm1, %v12075_v58, 0 }
0x10bf   : > { %18705 = vmatpush3.bf16.xpose.msra.mxu1 %v11980_v39  ;;  %18706 = vmatprep.mubr.msk.bf16.mxu1 %vm20267_vm0, %v25704_v11  ;;  %v12463_v46 = vpop.permute.xlu1 %12462 }
0x10c0   : > { %18716 = vmatprep.subr.bf16.mxu1 %v25704_v11  ;;  %v12468_v50 = vsel %vm1888_vm2, %v12463_v46, 0 }
0x10c2   : > { %v12125_v8 = vpop.permute.xlu0 %12124 }
0x10c3   : > { %v12130_v20 = vsel %vm955_vm1, %v12125_v8, 0  ;;  %18713 = vmatmul.mubr.msk.bf16.vlgmr.msra.gmra.mrb[176].mxu0 %vm955_vm1, %v12023_v14 }
0x10c4   : > { %18723 = vmatpush3.bf16.xpose.msra.mxu0 %v12130_v20  ;;  %18724 = vmatprep.mubr.msk.bf16.mxu0 %vm20267_vm0, %v25704_v11 }
0x10c5   : > { %18734 = vmatprep.subr.bf16.mxu0 %v25704_v11 }
0x10c6   : > { %v12123_v37 = vpop.permute.xlu0 %12122  ;;  %18707 = vmatmul.mubr.msk.bf16.vlgmr.msra.gmra.mrb[172].mxu1 %vm955_vm1, %v11973_v41  ;;  %v12180_v41 = vsel %vm955_vm1, %v12175_v60, 0 }
0x10c7   : > { %18717 = vmatpush3.bf16.xpose.msra.mxu1 %v12080_v12  ;;  %18718 = vmatprep.mubr.msk.bf16.mxu1 %vm20267_vm0, %v25704_v11 }
0x10c8   : > { %18728 = vmatprep.subr.bf16.mxu1 %v25704_v11 }
0x10ca   : > { %v12415_v16 = vpop.permute.xlu0 %12414 }
0x10cb   : > { %v12420_v35 = vsel %vm1888_vm2, %v12415_v16, 0  ;;  %18725 = vmatmul.mubr.msk.bf16.vlgmr.msra.gmra.mrb[180].mxu0 %vm955_vm1, %v12123_v37 }
0x10cc   : > { %18735 = vmatpush3.bf16.msra.mxu0 %v12420_v35  ;;  %18736 = vmatprep.mubr.msk.bf16.mxu0 %vm20267_vm0, %v25704_v11 }
0x10cd   : > { %18746 = vmatprep.subr.bf16.mxu0 %v25704_v11 }
0x10ce   : > { %18719 = vmatmul.mubr.msk.bf16.vlgmr.msra.gmra.mrb[176].mxu1 %vm955_vm1, %v12073_v27 }
0x10cf   : > { %18729 = vmatpush3.bf16.xpose.msra.mxu1 %v12180_v41  ;;  %18730 = vmatprep.mubr.msk.bf16.mxu1 %vm20267_vm0, %v25704_v11 }
0x10d0   : > { %18740 = vmatprep.subr.bf16.mxu1 %v25704_v11 }
0x10d6   : > { %18731 = vmatmul.mubr.msk.bf16.vlgmr.msra.gmra.mrb[180].mxu1 %vm955_vm1, %v12173_v51 }
0x10d7   : > { %18741 = vmatpush3.bf16.msra.mxu1 %v12468_v50  ;;  %18742 = vmatprep.mubr.msk.bf16.mxu1 %vm20267_vm0, %v25704_v11 }
0x10d8   : > { %18752 = vmatprep.subr.bf16.mxu1 %v25704_v11 }
0x10f9   : > { %v23797_v56 = vpop.f32.mrb[120].mxu0 }
0x10fa   : > { %25938 = vst [vmem:[#allocation112_spill] sm:$0xff] %v23797_v56  ;;  %v18546_v58 = vpop.f32.mrb[121].mxu0 }
0x10fb   : > { %v10699_v48 = vpop.f32.mrb[122].mxu0 }
0x10fc   : > { %v18547_v39 = vpop.f32.mrb[123].mxu0 }
0x1101   : > { %v23799_v14 = vpop.f32.mrb[124].mxu0 }
0x1102   : > { %25939 = vst [vmem:[#allocation111_spill] sm:$0xff] %v23799_v14  ;;  %v18558_v27 = vpop.f32.mrb[125].mxu0 }
0x1103   : > { %v10795_v8 = vpop.f32.mrb[126].mxu0 }
0x1104   : > { %v23801_v20 = vpop.f32.mrb[120].mxu1  ;;  %v18559_v12 = vpop.f32.mrb[127].mxu0 }
0x1105   : > { %25940 = vst [vmem:[#allocation113_spill] sm:$0xff] %v23801_v20  ;;  %v18552_v60 = vpop.f32.mrb[121].mxu1 }
0x1106   : > { %v10747_v16 = vpop.f32.mrb[122].mxu1 }
0x1107   : > { %v18553_v35 = vpop.f32.mrb[123].mxu1 }
0x110c   : > { %v23805_v51 = vpop.f32.mrb[124].mxu1 }
0x110d   : > { %25941 = vst [vmem:[#allocation114_spill] sm:$0xff] %v23805_v51  ;;  %v18564_v46 = vpop.f32.mrb[125].mxu1 }
0x110e   : > { %v10843_v50 = vpop.f32.mrb[126].mxu1 }
0x110f   : > { %v18565_v58 = vpop.f32.mrb[127].mxu1 }
0x1110   : > { %v23809_v48 = vpop.f32.mrb[128].mxu0 }
0x1111   : > { %25942 = vst [vmem:[#allocation115_spill] sm:$0xff] %v23809_v48  ;;  %v18570_v39 = vpop.f32.mrb[129].mxu0 }
0x1112   : > { %v10891_v27 = vpop.f32.mrb[130].mxu0 }
0x1113   : > { %v18571_v8 = vpop.f32.mrb[131].mxu0 }
0x1115   : > { %v23811_v12 = vpop.f32.mrb[128].mxu1 }
0x1116   : > { %25943 = vst [vmem:[#allocation116_spill] sm:$0xff] %v23811_v12  ;;  %v18576_v16 = vpop.f32.mrb[129].mxu1 }
0x1117   : > { %v10939_v35 = vpop.f32.mrb[130].mxu1 }
0x1118   : > { %v18577_v37 = vpop.f32.mrb[131].mxu1  ;;  %v23815_v56 = vpop.f32.mrb[132].mxu0 }
0x1119   : > { %25944 = vst [vmem:[#allocation117_spill] sm:$0xff] %v23815_v56  ;;  %v18582_v20 = vpop.f32.mrb[133].mxu0 }
0x111a   : > { %v10987_v41 = vpop.f32.mrb[134].mxu0 }
0x111b   : > { %v18583_v46 = vpop.f32.mrb[135].mxu0 }
0x111d   : > { %v23817_v50 = vpop.f32.mrb[132].mxu1 }
0x111e   : > { %25945 = vst [vmem:[#allocation118_spill] sm:$0xff] %v23817_v50  ;;  %v18588_v39 = vpop.f32.mrb[133].mxu1 }
0x111f   : > { %v11035_v27 = vpop.f32.mrb[134].mxu1 }
0x1120   : > { %v18589_v8 = vpop.f32.mrb[135].mxu1  ;;  %v23821_v14 = vpop.f32.mrb[136].mxu0 }
0x1121   : > { %25946 = vst [vmem:[#allocation119_spill] sm:$0xff] %v23821_v14  ;;  %v18594_v51 = vpop.f32.mrb[137].mxu0 }
0x1122   : > { %v11083_v60 = vpop.f32.mrb[138].mxu0 }
0x1123   : > { %v18595_v16 = vpop.f32.mrb[139].mxu0 }
0x1125   : > { %v23823_v35 = vpop.f32.mrb[136].mxu1 }
0x1126   : > { %25947 = vst [vmem:[#allocation120_spill] sm:$0xff] %v23823_v35  ;;  %v18600_v37 = vpop.f32.mrb[137].mxu1 }
0x1127   : > { %v11131_v41 = vpop.f32.mrb[138].mxu1 }
0x1128   : > { %v18601_v46 = vpop.f32.mrb[139].mxu1  ;;  %v23827_v48 = vpop.f32.mrb[140].mxu0 }
0x1129   : > { %25948 = vst [vmem:[#allocation121_spill] sm:$0xff] %v23827_v48  ;;  %v18606_v12 = vpop.f32.mrb[141].mxu0 }
0x112a   : > { %v11179_v58 = vpop.f32.mrb[142].mxu0 }
0x112b   : > { %v18607_v39 = vpop.f32.mrb[143].mxu0 }
0x112d   : > { %v23829_v27 = vpop.f32.mrb[140].mxu1 }
0x112e   : > { %25949 = vst [vmem:[#allocation122_spill] sm:$0xff] %v23829_v27  ;;  %v18612_v60 = vpop.f32.mrb[141].mxu1 }
0x112f   : > { %v11227_v8 = vpop.f32.mrb[142].mxu1 }
0x1130   : > { %v18613_v16 = vpop.f32.mrb[143].mxu1  ;;  %v23833_v56 = vpop.f32.mrb[144].mxu0 }
0x1131   : > { %25950 = vst [vmem:[#allocation123_spill] sm:$0xff] %v23833_v56  ;;  %v18618_v50 = vpop.f32.mrb[145].mxu0 }
0x1132   : > { %v11275_v20 = vpop.f32.mrb[146].mxu0 }
0x1133   : > { %v18619_v37 = vpop.f32.mrb[147].mxu0 }
0x1135   : > { %v23835_v41 = vpop.f32.mrb[144].mxu1 }
0x1136   : > { %25951 = vst [vmem:[#allocation124_spill] sm:$0xff] %v23835_v41  ;;  %v18624_v58 = vpop.f32.mrb[145].mxu1 }
0x1137   : > { %v11323_v46 = vpop.f32.mrb[146].mxu1 }
0x1138   : > { %v18625_v39 = vpop.f32.mrb[147].mxu1 }
0x115e   : > { %v23839_v14 = vpop.f32.mrb[148].mxu0 }
0x115f   : > { %25952 = vst [vmem:[#allocation125_spill] sm:$0xff] %v23839_v14  ;;  %v18630_v35 = vpop.f32.mrb[149].mxu0 }
0x1160   : > { %v11371_v51 = vpop.f32.mrb[150].mxu0 }
0x1161   : > { %v18631_v60 = vpop.f32.mrb[151].mxu0 }
0x1166   : > { %v23841_v8 = vpop.f32.mrb[152].mxu0 }
0x1167   : > { %v18642_v16 = vpop.f32.mrb[153].mxu0  ;;  %v12222_v50 = vsel %vm1692_vm3, %v23841_v8, -inf }
0x1168   : > { %12223 = vmax.xlane.f32.xlu0 %v12222_v50  ;;  %v11469_v20 = vpop.f32.mrb[154].mxu0 }
0x1169   : > { %v23845_v37 = vpop.f32.mrb[148].mxu1  ;;  %v18643_v48 = vpop.f32.mrb[155].mxu0 }
0x116a   : > { %25953 = vst [vmem:[#allocation126_spill] sm:$0xff] %v23845_v37  ;;  %v18636_v46 = vpop.f32.mrb[149].mxu1 }
0x116b   : > { %v11419_v39 = vpop.f32.mrb[150].mxu1 }
0x116c   : > { %v18637_v12 = vpop.f32.mrb[151].mxu1 }
0x116e   : > { %v23849_v35 = vpop.f32.mrb[156].mxu0 }
0x116f   : > { %v18654_v51 = vpop.f32.mrb[157].mxu0  ;;  %v12228_v60 = vsel %vm1692_vm3, %v23849_v35, -inf }
0x1170   : > { %12229 = vmax.xlane.f32.xlu0 %v12228_v60  ;;  %v11569_v16 = vpop.f32.mrb[158].mxu0 }
0x1171   : > { %v23853_v56 = vpop.f32.mrb[152].mxu1  ;;  %v18655_v50 = vpop.f32.mrb[159].mxu0 }
0x1172   : > { %v18648_v20 = vpop.f32.mrb[153].mxu1  ;;  %v12225_v48 = vsel %vm1692_vm3, %v23853_v56, -inf }
0x1173   : > { %12226 = vmax.xlane.f32.xlu1 %v12225_v48  ;;  %v11519_v58 = vpop.f32.mrb[154].mxu1 }
0x1174   : > { %v18649_v46 = vpop.f32.mrb[155].mxu1 }
0x1176   : > { %v23857_v39 = vpop.f32.mrb[160].mxu0 }
0x1177   : > { %v18666_v12 = vpop.f32.mrb[161].mxu0  ;;  %v12234_v58 = vsel %vm1692_vm3, %v23857_v39, -inf }
0x1178   : > { %v11669_v14 = vpop.f32.mrb[162].mxu0 }
0x1179   : > { %v23859_v51 = vpop.f32.mrb[156].mxu1  ;;  %v18667_v37 = vpop.f32.mrb[163].mxu0 }
0x117a   : > { %v18660_v41 = vpop.f32.mrb[157].mxu1  ;;  %v12231_v60 = vsel %vm1692_vm3, %v23859_v51, -inf }
0x117b   : > { %12232 = vmax.xlane.f32.xlu0 %v12231_v60  ;;  %v11619_v16 = vpop.f32.mrb[158].mxu1 }
0x117c   : > { %v18661_v50 = vpop.f32.mrb[159].mxu1 }
0x117e   : > { %v23863_v20 = vpop.f32.mrb[164].mxu0 }
0x117f   : > { %v18678_v48 = vpop.f32.mrb[165].mxu0  ;;  %12235 = vmax.xlane.f32.xlu0 %v12234_v58  ;;  %v12240_v41 = vsel %vm1692_vm3, %v23863_v20, -inf }
0x1180   : > { %v11769_v46 = vpop.f32.mrb[166].mxu0 }
0x1181   : > { %v23867_v12 = vpop.f32.mrb[160].mxu1  ;;  %v18679_v14 = vpop.f32.mrb[167].mxu0 }
0x1182   : > { %v18672_v27 = vpop.f32.mrb[161].mxu1  ;;  %v12237_v37 = vsel %vm1692_vm3, %v23867_v12, -inf }
0x1183   : > { %12241 = vmax.xlane.f32.xlu0 %v12240_v41  ;;  %12238 = vmax.xlane.f32.xlu1 %v12237_v37  ;;  %v11719_v60 = vpop.f32.mrb[162].mxu1 }
0x1184   : > { %v18673_v16 = vpop.f32.mrb[163].mxu1 }
0x1186   : > { %v23873_v50 = vpop.f32.mrb[168].mxu0 }
0x1187   : > { %v18690_v32 = vpop.f32.mrb[169].mxu0  ;;  %v12246_v58 = vsel %vm1692_vm3, %v23873_v50, -inf }
0x1188   : > { %v11869_v48 = vpop.f32.mrb[170].mxu0  ;;  %12247 = vmax.xlane.f32.xlu0 %v12246_v58 }
0x1189   : > { %v23877_v46 = vpop.f32.mrb[164].mxu1  ;;  %v18691_v27 = vpop.f32.mrb[171].mxu0 }
0x118a   : > { %v18684_v14 = vpop.f32.mrb[165].mxu1  ;;  %v12243_v5 = vsel %vm1692_vm3, %v23877_v46, -inf }
0x118b   : > { %12244 = vmax.xlane.f32.xlu1 %v12243_v5  ;;  %v11819_v41 = vpop.f32.mrb[166].mxu1 }
0x118c   : > { %v18685_v37 = vpop.f32.mrb[167].mxu1 }
0x118e   : > { %v23881_v60 = vpop.f32.mrb[172].mxu0 }
0x118f   : > { %v18702_v16 = vpop.f32.mrb[173].mxu0  ;;  %v12252_v32 = vsel %vm1692_vm3, %v23881_v60, -inf }
0x1190   : > { %v11969_v1 = vpop.f32.mrb[174].mxu0  ;;  %12253 = vmax.xlane.f32.xlu0 %v12252_v32 }
0x1191   : > { %v23885_v48 = vpop.f32.mrb[168].mxu1  ;;  %v18703_v58 = vpop.f32.mrb[175].mxu0 }
0x1192   : > { %v18696_v45 = vpop.f32.mrb[169].mxu1  ;;  %v12249_v27 = vsel %vm1692_vm3, %v23885_v48, -inf }
0x1193   : > { %12250 = vmax.xlane.f32.xlu1 %v12249_v27  ;;  %v11919_v14 = vpop.f32.mrb[170].mxu1 }
0x1194   : > { %v18697_v5 = vpop.f32.mrb[171].mxu1 }
0x1196   : > { %v23889_v41 = vpop.f32.mrb[176].mxu0 }
0x1197   : > { %v18714_v37 = vpop.f32.mrb[177].mxu0  ;;  %v12258_v16 = vsel %vm1692_vm3, %v23889_v41, -inf }
0x1198   : > { %v12069_v18 = vpop.f32.mrb[178].mxu0  ;;  %12259 = vmax.xlane.f32.xlu0 %v12258_v16 }
0x1199   : > { %v23893_v1 = vpop.f32.mrb[172].mxu1  ;;  %v18715_v32 = vpop.f32.mrb[179].mxu0 }
0x119a   : > { %v18708_v23 = vpop.f32.mrb[173].mxu1  ;;  %v12255_v45 = vsel %vm1692_vm3, %v23893_v1, -inf }
0x119b   : > { %12256 = vmax.xlane.f32.xlu1 %v12255_v45  ;;  %v12019_v58 = vpop.f32.mrb[174].mxu1 }
0x119c   : > { %v18709_v27 = vpop.f32.mrb[175].mxu1 }
0x119e   : > { %v23897_v14 = vpop.f32.mrb[180].mxu0 }
0x119f   : > { %v18726_v5 = vpop.f32.mrb[181].mxu0  ;;  %v12264_v37 = vsel %vm1692_vm3, %v23897_v14, -inf }
0x11a0   : > { %v12169_v26 = vpop.f32.mrb[182].mxu0  ;;  %12265 = vmax.xlane.f32.xlu0 %v12264_v37  ;;  %v23913_v37 = vpop.permute.xlu1 %12558 }
0x11a1   : > { %v23901_v18 = vpop.f32.mrb[176].mxu1  ;;  %v18727_v16 = vpop.f32.mrb[183].mxu0  ;;  %v25955_v26 = vld [vmem:[#allocation40_spill] sm:$0xff] }
0x11a2   : > { %v18720_v62 = vpop.f32.mrb[177].mxu1  ;;  %v12261_v23 = vsel %vm1692_vm3, %v23901_v18, -inf  ;;  %v23915_v16 = vpop.permute.xlu0 %12510 }
0x11a3   : > { %12262 = vmax.xlane.f32.xlu1 %v12261_v23  ;;  %v12119_v32 = vpop.f32.mrb[178].mxu1 }
0x11a4   : > { %v18721_v45 = vpop.f32.mrb[179].mxu1  ;;  %v23917_v23 = vpop.permute.xlu1 %12654 }
0x11a6   : > { %v23919_v32 = vpop.permute.xlu0 %12606 }
0x11a9   : > { %v23905_v58 = vpop.f32.mrb[180].mxu1 }
0x11aa   : > { %v18732_v27 = vpop.f32.mrb[181].mxu1  ;;  %v12267_v62 = vsel %vm1692_vm3, %v23905_v58, -inf  ;;  %v23923_v45 = vpop.permute.xlu0 %12702 }
0x11ab   : > { %v12219_v44 = vpop.f32.mrb[182].mxu1  ;;  %25957 = vst [vmem:[#allocation128_spill] sm:$0xff] %v23923_v45 }
0x11ac   : > { %v18733_v5 = vpop.f32.mrb[183].mxu1  ;;  %v23921_v44 = vpop.permute.xlu1 %12750 }
0x11ad   : > { %25956 = vst [vmem:[#allocation127_spill] sm:$0xff] %v23921_v44 }
0x11ae   : > { %v23927_v5 = vpop.permute.xlu0 %12798 }
0x11b0   : > { %v23925_v27 = vpop.permute.xlu1 %12846 }
0x11b1   : > { %25958 = vst [vmem:[#allocation129_spill] sm:$0xff] %v23925_v27 }
0x11b4   : > { %13038 = vrot.lane.b32.xlu1 %v25954_v29, %s20273_s27  ;;  %v23929_v29 = vpop.permute.xlu1 %12894 }
0x11b5   : > { %25959 = vst [vmem:[#allocation130_spill] sm:$0xff] %v23929_v29 }
0x11b6   : > { %12990 = vrot.lane.b32.xlu0 %v25955_v26, %s20273_s27 }
0x11b8   : > { %v23932_v33 = vpop.permute.xlu1 %12942 }
0x11d8   : > { %12268 = vmax.xlane.f32.xlu1 %v12267_v62 }
0x11f5   : > { %v12224_v26 = vpop.xlane.xlu0 %12223 }
0x11f6   : > { %v12270_v62 = vsub.f32 %v23841_v8, %v12224_v26 }
0x11f8   : > { %v12286_v53 = vmul.f32 1.442695, %v12270_v62 }
0x11fa   : > { %19858 = vpow2.f32 %v12286_v53 }
0x11fd   : > { %v12230_v59 = vpop.xlane.xlu0 %12229 }
0x11fe   : > { %v12272_v4 = vsub.f32 %v23849_v35, %v12230_v59 }
0x1200   : > { %v12290_v57 = vmul.f32 1.442695, %v12272_v4  ;;  %v12227_v44 = vpop.xlane.xlu1 %12226 }
0x1201   : > { %v12271_v49 = vsub.f32 %v23853_v56, %v12227_v44 }
0x1202   : > { %19860 = vpow2.f32 %v12290_v57 }
0x1203   : > { %v12288_v27 = vmul.f32 1.442695, %v12271_v49 }
0x1204   : > { %v23936_v45 = vpop.eup %19858 }
0x1205   : > { %19862 = vpow2.f32 %v12288_v27  ;;  %v12318_v29 = vsel %vm1692_vm3, %v23936_v45, 0.0 }
0x1206   : > { %12319 = vadd.xlane.f32.xlu0 %v12318_v29 }
0x1208   : > { %v12233_v8 = vpop.xlane.xlu0 %12232 }
0x1209   : > { %v12273_v53 = vsub.f32 %v23859_v51, %v12233_v8 }
0x120b   : > { %v12292_v26 = vmul.f32 1.442695, %v12273_v53 }
0x120c   : > { %v23941_v62 = vpop.eup %19860  ;;  %v12236_v59 = vpop.xlane.xlu0 %12235 }
0x120d   : > { %19864 = vpow2.f32 %v12292_v26  ;;  %v12274_v4 = vsub.f32 %v23857_v39, %v12236_v59  ;;  %v12324_v49 = vsel %vm1692_vm3, %v23941_v62, 0.0 }
0x120e   : > { %12325 = vadd.xlane.f32.xlu0 %v12324_v49 }
0x120f   : > { %v23946_v57 = vpop.eup %19862  ;;  %v12294_v56 = vmul.f32 1.442695, %v12274_v4 }
0x1210   : > { %v12242_v35 = vpop.xlane.xlu0 %12241  ;;  %v12239_v44 = vpop.xlane.xlu1 %12238  ;;  %v12321_v29 = vsel %vm1692_vm3, %v23946_v57, 0.0 }
0x1211   : > { %19866 = vpow2.f32 %v12294_v56  ;;  %v12276_v51 = vsub.f32 %v23863_v20, %v12242_v35  ;;  %v12275_v27 = vsub.f32 %v23867_v12, %v12239_v44  ;;  %12322 = vadd.xlane.f32.xlu1 %v12321_v29 }
0x1213   : > { %v12298_v8 = vmul.f32 1.442695, %v12276_v51  ;;  %v12296_v39 = vmul.f32 1.442695, %v12275_v27 }
0x1215   : > { %19868 = vpow2.f32 %v12298_v8  ;;  %v12248_v53 = vpop.xlane.xlu0 %12247 }
0x1216   : > { %19870 = vpow2.f32 %v12296_v39  ;;  %v12278_v59 = vsub.f32 %v23873_v50, %v12248_v53 }
0x1217   : > { %v23952_v26 = vpop.eup %19864 }
0x1218   : > { %v12245_v4 = vpop.xlane.xlu1 %12244  ;;  %v12327_v49 = vsel %vm1692_vm3, %v23952_v26, 0.0  ;;  %v12302_v12 = vmul.f32 1.442695, %v12278_v59 }
0x1219   : > { %v12277_v56 = vsub.f32 %v23877_v46, %v12245_v4  ;;  %12328 = vadd.xlane.f32.xlu1 %v12327_v49 }
0x121b   : > { %v23958_v20 = vpop.eup %19866  ;;  %v12300_v35 = vmul.f32 1.442695, %v12277_v56 }
0x121c   : > { %v12330_v44 = vsel %vm1692_vm3, %v23958_v20, 0.0 }
0x121d   : > { %19872 = vpow2.f32 %v12300_v35  ;;  %12331 = vadd.xlane.f32.xlu0 %v12330_v44  ;;  %v12254_v29 = vpop.xlane.xlu0 %12253 }
0x121e   : > { %v12280_v51 = vsub.f32 %v23881_v60, %v12254_v29  ;;  %19874 = vpow2.f32 %v12302_v12 }
0x121f   : > { %v23963_v50 = vpop.eup %19868 }
0x1220   : > { %v23965_v27 = vpop.eup %19870  ;;  %v12306_v8 = vmul.f32 1.442695, %v12280_v51  ;;  %v12251_v46 = vpop.xlane.xlu1 %12250  ;;  %v12336_v39 = vsel %vm1692_vm3, %v23963_v50, 0.0 }
0x1221   : > { %v12279_v53 = vsub.f32 %v23885_v48, %v12251_v46  ;;  %12337 = vadd.xlane.f32.xlu0 %v12336_v39  ;;  %v12333_v59 = vsel %vm1692_vm3, %v23965_v27, 0.0 }
0x1222   : > { %12334 = vadd.xlane.f32.xlu1 %v12333_v59  ;;  %19876 = vpow2.f32 %v12306_v8 }
0x1223   : > { %v12304_v4 = vmul.f32 1.442695, %v12279_v53 }
0x1225   : > { %19878 = vpow2.f32 %v12304_v4  ;;  %v12260_v60 = vpop.xlane.xlu0 %12259 }
0x1226   : > { %v12282_v49 = vsub.f32 %v23889_v41, %v12260_v60 }
0x1227   : > { %v23973_v56 = vpop.eup %19872 }
0x1228   : > { %v12310_v12 = vmul.f32 1.442695, %v12282_v49  ;;  %v12257_v35 = vpop.xlane.xlu1 %12256  ;;  %v12339_v44 = vsel %vm1692_vm3, %v23973_v56, 0.0  ;;  %v23977_v29 = vpop.eup %19874 }
0x1229   : > { %v12281_v48 = vsub.f32 %v23893_v1, %v12257_v35  ;;  %12340 = vadd.xlane.f32.xlu1 %v12339_v44  ;;  %v12342_v8 = vsel %vm1692_vm3, %v23977_v29, 0.0 }
0x122a   : > { %19880 = vpow2.f32 %v12310_v12 }
0x122b   : > { %v12308_v51 = vmul.f32 1.442695, %v12281_v48 }
0x122c   : > { %v23982_v46 = vpop.eup %19876 }
0x122d   : > { %19882 = vpow2.f32 %v12308_v51  ;;  %12343 = vadd.xlane.f32.xlu1 %v12342_v8  ;;  %v12348_v59 = vsel %vm1692_vm3, %v23982_v46, 0.0  ;;  %v12266_v48 = vpop.xlane.xlu0 %12265 }
0x122e   : > { %v12284_v51 = vsub.f32 %v23897_v14, %v12266_v48 }
0x122f   : > { %v23984_v41 = vpop.eup %19878 }
0x1230   : > { %v12263_v39 = vpop.xlane.xlu1 %12262  ;;  %v12345_v53 = vsel %vm1692_vm3, %v23984_v41, 0.0  ;;  %v12314_v8 = vmul.f32 1.442695, %v12284_v51  ;;  %v25963_v51 = vld [vmem:[#allocation127_spill] sm:$0xff] }
0x1231   : > { %v12283_v1 = vsub.f32 %v23901_v18, %v12263_v39  ;;  %12346 = vadd.xlane.f32.xlu0 %v12345_v53  ;;  %12349 = vadd.xlane.f32.xlu1 %v12348_v59 }
0x1233   : > { %v12312_v4 = vmul.f32 1.442695, %v12283_v1 }
0x1234   : > { %v23991_v60 = vpop.eup %19880  ;;  %v24008_v39 = vpop.permute.xlu1 %13038 }
0x1235   : > { %19884 = vpow2.f32 %v12312_v4  ;;  %v12354_v49 = vsel %vm1692_vm3, %v23991_v60, 0.0 }
0x1236   : > { %12355 = vadd.xlane.f32.xlu1 %v12354_v49  ;;  %19886 = vpow2.f32 %v12314_v8 }
0x1237   : > { %v23995_v12 = vpop.eup %19882 }
0x1238   : > { %v12351_v35 = vsel %vm1692_vm3, %v23995_v12, 0.0 }
0x1239   : > { %12352 = vadd.xlane.f32.xlu0 %v12351_v35 }
0x123f   : > { %v23999_v44 = vpop.eup %19884 }
0x1240   : > { %v12357_v18 = vsel %vm1692_vm3, %v23999_v44, 0.0  ;;  %v24011_v1 = vpop.eup %19886 }
0x1241   : > { %12358 = vadd.xlane.f32.xlu0 %v12357_v18  ;;  %v12360_v49 = vsel %vm1692_vm3, %v24011_v1, 0.0 }
0x1247   : > { %13134 = vrot.lane.b32.xlu1 %v21220_v40, %s20273_s27 }
0x1257   : > { %13086 = vrot.lane.b32.xlu0 %v21158_v34, %s20273_s27 }
0x1265   : > { %v12269_v53 = vpop.xlane.xlu1 %12268 }
0x1266   : > { %v12285_v59 = vsub.f32 %v23905_v58, %v12269_v53  ;;  %v24031_v58 = vpop.permute.xlu0 %12990 }
0x1268   : > { %v12316_v4 = vmul.f32 1.442695, %v12285_v59  ;;  %v25965_v59 = vld [vmem:[#allocation20_spill] sm:$0xff] }
0x126a   : > { %19888 = vpow2.f32 %v12316_v4  ;;  %v12804_v4 = vsel %vm1888_vm2, %v23927_v5, 0  ;;  %v25967_v5 = vld [vmem:[#allocation22_spill] sm:$0xff] }
0x126b   : > { %12361 = vadd.xlane.f32.xlu1 %v12360_v49 }
0x1274   : > { %v24015_v35 = vpop.eup %19888 }
0x1275   : > { %v12363_v14 = vsel %vm1692_vm3, %v24015_v35, 0.0 }
0x1276   : > { %12364 = vadd.xlane.f32.xlu0 %v12363_v14 }
0x127c   : > { %13234 = vrot.lane.b32.xlu1 %v20561_v6, %s20274_s10 }
0x1280   : > { %13232 = vrot.lane.b32.xlu1 %v20592_v28, %s20274_s10 }
0x1284   : > { %13334 = vrot.lane.b32.xlu1 %v20607_v38, %s20274_s10 }
0x1288   : > { %13332 = vrot.lane.b32.xlu1 %v20665_v21, %s20274_s10 }
0x128c   : > { %13434 = vrot.lane.b32.xlu1 %v20646_v2, %s20274_s10  ;;  %13184 = vrot.lane.b32.xlu0 %v20555_v63, %s20274_s10 }
0x1290   : > { %13432 = vrot.lane.b32.xlu1 %v20704_v61, %s20274_s10  ;;  %13182 = vrot.lane.b32.xlu0 %v20563_v9, %s20274_s10 }
0x1293   : > { %v12320_v6 = vpop.xlane.xlu0 %12319 }
0x1294   : > { %19890 = vrcp.f32 %v12320_v6  ;;  %13534 = vrot.lane.b32.xlu1 %v20687_v36, %s20274_s10  ;;  %13284 = vrot.lane.b32.xlu0 %v20575_v15, %s20274_s10 }
0x1298   : > { %13532 = vrot.lane.b32.xlu1 %v25712_v47, %s20274_s10  ;;  %13282 = vrot.lane.b32.xlu0 %v20625_v52, %s20274_s10  ;;  %v12516_v52 = vsel %vm1888_vm2, %v23915_v16, 0  ;;  %v12612_v47 = vsel %vm1888_vm2, %v23919_v32, 0  ;;  %v12660_v16 = vsel %vm1888_vm2, %v23917_v23, 0  ;;  %v25960_v23 = vld [vmem:[#allocation128_spill] sm:$0xff] }
0x129b   : > { %v12326_v63 = vpop.xlane.xlu0 %12325 }
0x129c   : > { %19892 = vrcp.f32 %v12326_v63  ;;  %13634 = vrot.lane.b32.xlu1 %v25713_v17, %s20274_s10  ;;  %13384 = vrot.lane.b32.xlu0 %v20595_v30, %s20274_s10  ;;  %v25966_v63 = vld [vmem:[#allocation36_spill] sm:$0xff] }
0x129e   : > { %v19891_v9 = vpop.eup %19890  ;;  %v12323_v28 = vpop.xlane.xlu1 %12322 }
0x129f   : > { %v12382_v38 = vmul.f32 %v19891_v9, %v23936_v45  ;;  %19894 = vrcp.f32 %v12323_v28  ;;  %v12708_v45 = vsel %vm1888_vm2, %v25960_v23, 0 }
0x12a0   : > { %13632 = vrot.lane.b32.xlu1 %v25717_v19, %s20274_s10  ;;  %13382 = vrot.lane.b32.xlu0 %v20613_v42, %s20274_s10 }
0x12a1   : > { %v12398_v15 = vpack.c.bf16 %v12382_v38, %v12382_v38  ;;  %v25968_v38 = vld [vmem:[#allocation129_spill] sm:$0xff] }
0x12a3   : > { %18737 = vmatmul.mubr.msk.bf16.vlgmr.msra.gmra.mrb[184].mxu0 %vm1692_vm3, %v12398_v15  ;;  %v12852_v15 = vsel %vm1888_vm2, %v25968_v38, 0 }
0x12a4   : > { %18747 = vmatpush3.bf16.msra.mxu0 %v12516_v52  ;;  %13734 = vrot.lane.b32.xlu1 %v25718_v25, %s20274_s10 }
0x12a5   : > { %13484 = vrot.lane.b32.xlu0 %v20628_v54, %s20274_s10  ;;  %18748 = vmatprep.mubr.msk.bf16.mxu0 %vm20267_vm0, %v25704_v11 }
0x12a6   : > { %v19893_v30 = vpop.eup %19892  ;;  %v12329_v2 = vpop.xlane.xlu1 %12328  ;;  %18758 = vmatprep.subr.bf16.mxu0 %v25704_v11 }
0x12a7   : > { %v12384_v42 = vmul.f32 %v19893_v30, %v23941_v62  ;;  %19896 = vrcp.f32 %v12329_v2  ;;  %v25969_v30 = vld [vmem:[#allocation37_spill] sm:$0xff] }
0x12a8   : > { %13732 = vrot.lane.b32.xlu1 %v25719_v3, %s20274_s10 }
0x12a9   : > { %v19895_v21 = vpop.eup %19894  ;;  %v12400_v36 = vpack.c.bf16 %v12384_v42, %v12384_v42  ;;  %13482 = vrot.lane.b32.xlu0 %v20653_v7, %s20274_s10  ;;  %v12564_v7 = vsel %vm1888_vm2, %v23913_v37, 0  ;;  %v25970_v42 = vld [vmem:[#allocation25_spill] sm:$0xff] }
0x12aa   : > { %v12383_v54 = vmul.f32 %v19895_v21, %v23946_v57  ;;  %v12332_v61 = vpop.xlane.xlu0 %12331  ;;  %v25971_v21 = vld [vmem:[#allocation130_spill] sm:$0xff] }
0x12ab   : > { %19898 = vrcp.f32 %v12332_v61  ;;  %18749 = vmatmul.mubr.msk.bf16.vlgmr.msra.gmra.mrb[188].mxu0 %vm1692_vm3, %v12400_v36  ;;  %v12900_v36 = vsel %vm1888_vm2, %v25971_v21, 0 }
0x12ac   : > { %v12399_v17 = vpack.c.bf16 %v12383_v54, %v12383_v54  ;;  %18759 = vmatpush3.bf16.msra.mxu0 %v12612_v47  ;;  %13834 = vrot.lane.b32.xlu1 %v25720_v31, %s20274_s10 }
0x12ad   : > { %13584 = vrot.lane.b32.xlu0 %v20669_v24, %s20274_s10  ;;  %18760 = vmatprep.mubr.msk.bf16.mxu0 %vm20267_vm0, %v25704_v11 }
0x12ae   : > { %v12338_v19 = vpop.xlane.xlu0 %12337  ;;  %18743 = vmatmul.mubr.msk.bf16.vlgmr.msra.gmra.mrb[184].mxu1 %vm1692_vm3, %v12399_v17  ;;  %18770 = vmatprep.subr.bf16.mxu0 %v25704_v11  ;;  %v25972_v17 = vld [vmem:[#allocation24_spill] sm:$0xff] }
0x12af   : > { %19900 = vrcp.f32 %v12338_v19  ;;  %18753 = vmatpush3.bf16.msra.mxu1 %v12564_v7  ;;  %v12335_v25 = vpop.xlane.xlu1 %12334  ;;  %18754 = vmatprep.mubr.msk.bf16.mxu1 %vm20267_vm0, %v25704_v11 }
0x12b0   : > { %19902 = vrcp.f32 %v12335_v25  ;;  %13832 = vrot.lane.b32.xlu1 %v25721_v13, %s20274_s10  ;;  %18764 = vmatprep.subr.bf16.mxu1 %v25704_v11 }
0x12b1   : > { %v19897_v24 = vpop.eup %19896  ;;  %13582 = vrot.lane.b32.xlu0 %v20694_v43, %s20274_s10 }
0x12b2   : > { %v12385_v3 = vmul.f32 %v19897_v24, %v23952_v26  ;;  %v25961_v26 = vld [vmem:[#allocation29_spill] sm:$0xff] }
0x12b4   : > { %v12401_v31 = vpack.c.bf16 %v12385_v3, %v12385_v3  ;;  %13934 = vrot.lane.b32.xlu1 %v25722_v10, %s20274_s10  ;;  %v12996_v3 = vsel %vm1888_vm2, %v24031_v58, 0 }
0x12b5   : > { %v19899_v37 = vpop.eup %19898  ;;  %13684 = vrot.lane.b32.xlu0 %v20708_v0, %s20274_s10 }
0x12b6   : > { %v12386_v13 = vmul.f32 %v19899_v37, %v23958_v20  ;;  %18755 = vmatmul.mubr.msk.bf16.vlgmr.msra.gmra.mrb[188].mxu1 %vm1692_vm3, %v12401_v31  ;;  %v12341_v32 = vpop.xlane.xlu1 %12340  ;;  %v25962_v20 = vld [vmem:[#allocation18_spill] sm:$0xff] }
0x12b7   : > { %18765 = vmatpush3.bf16.msra.mxu1 %v12660_v16  ;;  %19904 = vrcp.f32 %v12341_v32  ;;  %18766 = vmatprep.mubr.msk.bf16.mxu1 %vm20267_vm0, %v25704_v11  ;;  %v25974_v16 = vld [vmem:[#allocation32_spill] sm:$0xff] }
0x12b8   : > { %v12402_v43 = vpack.c.bf16 %v12386_v13, %v12386_v13  ;;  %13932 = vrot.lane.b32.xlu1 %v25723_v55, %s20274_s10  ;;  %18776 = vmatprep.subr.bf16.mxu1 %v25704_v11  ;;  %v13044_v13 = vsel %vm1888_vm2, %v24008_v39, 0 }
0x12b9   : > { %v19901_v0 = vpop.eup %19900  ;;  %13682 = vrot.lane.b32.xlu0 %v20730_v22, %s20274_s10 }
0x12ba   : > { %v19903_v10 = vpop.eup %19902  ;;  %18761 = vmatmul.mubr.msk.bf16.vlgmr.msra.gmra.mrb[192].mxu0 %vm1692_vm3, %v12402_v43  ;;  %v12344_v62 = vpop.xlane.xlu1 %12343  ;;  %v12388_v55 = vmul.f32 %v19901_v0, %v23963_v50  ;;  %v25964_v50 = vld [vmem:[#allocation35_spill] sm:$0xff] }
0x12bb   : > { %v12387_v57 = vmul.f32 %v19903_v10, %v23965_v27  ;;  %18771 = vmatpush3.bf16.msra.mxu0 %v12708_v45  ;;  %19906 = vrcp.f32 %v12344_v62  ;;  %18772 = vmatprep.mubr.msk.bf16.mxu0 %vm20267_vm0, %v25704_v11  ;;  %v12756_v27 = vsel %vm1888_vm2, %v25963_v51, 0 }
0x12bc   : > { %14222 = vrot.lane.b32.xlu1 %v25961_v26, %s20274_s10  ;;  %18782 = vmatprep.subr.bf16.mxu0 %v25704_v11  ;;  %v12404_v8 = vpack.c.bf16 %v12388_v55, %v12388_v55 }
0x12bd   : > { %v12403_v22 = vpack.c.bf16 %v12387_v57, %v12387_v57  ;;  %13784 = vrot.lane.b32.xlu0 %v25962_v20, %s20274_s10 }
0x12be   : > { %v12347_v18 = vpop.xlane.xlu0 %12346  ;;  %v12350_v48 = vpop.xlane.xlu1 %12349 }
0x12bf   : > { %19908 = vrcp.f32 %v12347_v18  ;;  %18767 = vmatmul.mubr.msk.bf16.vlgmr.msra.gmra.mrb[192].mxu1 %vm1692_vm3, %v12403_v22 }
0x12c0   : > { %18777 = vmatpush3.bf16.msra.mxu1 %v12756_v27  ;;  %19910 = vrcp.f32 %v12350_v48  ;;  %14318 = vrot.lane.b32.xlu1 %v25964_v50, %s20274_s10 }
0x12c1   : > { %v19905_v53 = vpop.eup %19904  ;;  %13782 = vrot.lane.b32.xlu0 %v25965_v59, %s20274_s10  ;;  %18778 = vmatprep.mubr.msk.bf16.mxu1 %vm20267_vm0, %v25704_v11 }
0x12c2   : > { %v12389_v49 = vmul.f32 %v19905_v53, %v23973_v56  ;;  %18773 = vmatmul.mubr.msk.bf16.vlgmr.msra.gmra.mrb[196].mxu0 %vm1692_vm3, %v12404_v8  ;;  %18788 = vmatprep.subr.bf16.mxu1 %v25704_v11 }
0x12c3   : > { %18783 = vmatpush3.bf16.msra.mxu0 %v12804_v4  ;;  %v12356_v14 = vpop.xlane.xlu1 %12355  ;;  %18784 = vmatprep.mubr.msk.bf16.mxu0 %vm20267_vm0, %v25704_v11 }
0x12c4   : > { %v12405_v6 = vpack.c.bf16 %v12389_v49, %v12389_v49  ;;  %14414 = vrot.lane.b32.xlu1 %v25966_v63, %s20274_s10  ;;  %18794 = vmatprep.subr.bf16.mxu0 %v25704_v11  ;;  %19912 = vrcp.f32 %v12356_v14 }
0x12c5   : > { %v19907_v9 = vpop.eup %19906  ;;  %13884 = vrot.lane.b32.xlu0 %v25967_v5, %s20274_s10 }
0x12c6   : > { %v12390_v56 = vmul.f32 %v19907_v9, %v23977_v29  ;;  %v12353_v28 = vpop.xlane.xlu0 %12352 }
0x12c7   : > { %19914 = vrcp.f32 %v12353_v28  ;;  %18779 = vmatmul.mubr.msk.bf16.vlgmr.msra.gmra.mrb[196].mxu1 %vm1692_vm3, %v12405_v6  ;;  %v13135_v39 = vpop.permute.xlu1 %13134 }
0x12c8   : > { %v12406_v52 = vpack.c.bf16 %v12390_v56, %v12390_v56  ;;  %18789 = vmatpush3.bf16.msra.mxu1 %v12852_v15  ;;  %14510 = vrot.lane.b32.xlu1 %v25969_v30, %s20274_s10  ;;  %v13140_v23 = vsel %vm1888_vm2, %v13135_v39, 0 }
0x12c9   : > { %v19909_v2 = vpop.eup %19908  ;;  %13882 = vrot.lane.b32.xlu0 %v25970_v42, %s20274_s10  ;;  %18790 = vmatprep.mubr.msk.bf16.mxu1 %vm20267_vm0, %v25704_v11 }
0x12ca   : > { %v19911_v29 = vpop.eup %19910  ;;  %v12391_v54 = vmul.f32 %v19909_v2, %v23984_v41  ;;  %18785 = vmatmul.mubr.msk.bf16.vlgmr.msra.gmra.mrb[200].mxu0 %vm1692_vm3, %v12406_v52  ;;  %18800 = vmatprep.subr.bf16.mxu1 %v25704_v11  ;;  %v12948_v41 = vsel %vm1888_vm2, %v23932_v33, 0 }
0x12cb   : > { %18795 = vmatpush3.bf16.msra.mxu0 %v12900_v36  ;;  %18796 = vmatprep.mubr.msk.bf16.mxu0 %vm20267_vm0, %v25704_v11  ;;  %v12392_v47 = vmul.f32 %v19911_v29, %v23982_v46  ;;  %v25973_v46 = vld [vmem:[#allocation31_spill] sm:$0xff] }
0x12cc   : > { %v12407_v61 = vpack.c.bf16 %v12391_v54, %v12391_v54  ;;  %18806 = vmatprep.subr.bf16.mxu0 %v25704_v11 }
0x12cd   : > { %14174 = vrot.lane.b32.xlu0 %v25972_v17, %s20274_s10  ;;  %v12408_v25 = vpack.c.bf16 %v12392_v47, %v12392_v47 }
0x12ce   : > { %v12359_v7 = vpop.xlane.xlu0 %12358  ;;  %v19913_v19 = vpop.eup %19912 }
0x12cf   : > { %19916 = vrcp.f32 %v12359_v7  ;;  %18791 = vmatmul.mubr.msk.bf16.vlgmr.msra.gmra.mrb[200].mxu1 %vm1692_vm3, %v12407_v61  ;;  %v12394_v31 = vmul.f32 %v19913_v19, %v23991_v60  ;;  %v25975_v60 = vld [vmem:[#allocation33_spill] sm:$0xff] }
0x12d0   : > { %18801 = vmatpush3.bf16.msra.mxu1 %v12948_v41  ;;  %18802 = vmatprep.mubr.msk.bf16.mxu1 %vm20267_vm0, %v25704_v11 }
0x12d1   : > { %v19915_v24 = vpop.eup %19914  ;;  %14270 = vrot.lane.b32.xlu0 %v25973_v46, %s20274_s10  ;;  %18812 = vmatprep.subr.bf16.mxu1 %v25704_v11 }
0x12d2   : > { %v12393_v33 = vmul.f32 %v19915_v24, %v23995_v12  ;;  %18797 = vmatmul.mubr.msk.bf16.vlgmr.msra.gmra.mrb[204].mxu0 %vm1692_vm3, %v12408_v25  ;;  %v13087_v58 = vpop.permute.xlu0 %13086  ;;  %v12410_v12 = vpack.c.bf16 %v12394_v31, %v12394_v31 }
0x12d3   : > { %18807 = vmatpush3.bf16.msra.mxu0 %v12996_v3  ;;  %18808 = vmatprep.mubr.msk.bf16.mxu0 %vm20267_vm0, %v25704_v11  ;;  %v13092_v0 = vsel %vm1888_vm2, %v13087_v58, 0 }
0x12d4   : > { %v12409_v37 = vpack.c.bf16 %v12393_v33, %v12393_v33  ;;  %18818 = vmatprep.subr.bf16.mxu0 %v25704_v11 }
0x12d5   : > { %14366 = vrot.lane.b32.xlu0 %v25974_v16, %s20274_s10 }
0x12d7   : > { %18803 = vmatmul.mubr.msk.bf16.vlgmr.msra.gmra.mrb[204].mxu1 %vm1692_vm3, %v12409_v37 }
0x12d8   : > { %18813 = vmatpush3.bf16.msra.mxu1 %v13044_v13  ;;  %18814 = vmatprep.mubr.msk.bf16.mxu1 %vm20267_vm0, %v25704_v11 }
0x12d9   : > { %v19917_v32 = vpop.eup %19916  ;;  %14462 = vrot.lane.b32.xlu0 %v25975_v60, %s20274_s10  ;;  %18824 = vmatprep.subr.bf16.mxu1 %v25704_v11 }
0x12da   : > { %v12395_v43 = vmul.f32 %v19917_v32, %v23999_v44  ;;  %18809 = vmatmul.mubr.msk.bf16.vlgmr.msra.gmra.mrb[208].mxu0 %vm1692_vm3, %v12410_v12 }
0x12db   : > { %18819 = vmatpush3.bf16.msra.mxu0 %v13092_v0  ;;  %18820 = vmatprep.mubr.msk.bf16.mxu0 %vm20267_vm0, %v25704_v11 }
0x12dc   : > { %v12411_v10 = vpack.c.bf16 %v12395_v43, %v12395_v43  ;;  %18830 = vmatprep.subr.bf16.mxu0 %v25704_v11 }
0x12df   : > { %18815 = vmatmul.mubr.msk.bf16.vlgmr.msra.gmra.mrb[208].mxu1 %vm1692_vm3, %v12411_v10 }
0x12e0   : > { %18825 = vmatpush3.bf16.msra.mxu1 %v13140_v23  ;;  %18826 = vmatprep.mubr.msk.bf16.mxu1 %vm20267_vm0, %v25704_v11 }
0x12e1   : > { %18836 = vmatprep.subr.bf16.mxu1 %v25704_v11 }
0x12f8   : > { %v12362_v44 = vpop.xlane.xlu1 %12361 }
0x12f9   : > { %19918 = vrcp.f32 %v12362_v44 }
0x12fc   : > { %v13235_v45 = vpop.permute.xlu1 %13234 }
0x12fd   : > { %v13240_v14 = vsel %vm955_vm1, %v13235_v45, 0 }
0x1300   : > { %v13233_v62 = vpop.permute.xlu1 %13232 }
0x1303   : > { %v19919_v57 = vpop.eup %19918  ;;  %v12365_v55 = vpop.xlane.xlu0 %12364 }
0x1304   : > { %v12396_v26 = vmul.f32 %v19919_v57, %v24011_v1  ;;  %19920 = vrcp.f32 %v12365_v55  ;;  %v13335_v22 = vpop.permute.xlu1 %13334 }
0x1305   : > { %v13340_v56 = vsel %vm955_vm1, %v13335_v22, 0 }
0x1306   : > { %v12412_v20 = vpack.c.bf16 %v12396_v26, %v12396_v26 }
0x1307   : > { %v13185_v18 = vpop.permute.xlu0 %13184 }
0x1308   : > { %v13190_v48 = vsel %vm955_vm1, %v13185_v18, 0  ;;  %18821 = vmatmul.mubr.msk.bf16.vlgmr.msra.gmra.mrb[212].mxu0 %vm1692_vm3, %v12412_v20  ;;  %v13333_v51 = vpop.permute.xlu1 %13332 }
0x1309   : > { %18831 = vmatpush3.bf16.xpose.msra.mxu0 %v13190_v48  ;;  %18832 = vmatprep.mubr.msk.bf16.mxu0 %vm20267_vm0, %v25704_v11 }
0x130a   : > { %18842 = vmatprep.subr.bf16.mxu0 %v25704_v11 }
0x130b   : > { %v13183_v27 = vpop.permute.xlu0 %13182 }
0x130c   : > { %v13435_v8 = vpop.permute.xlu1 %13434 }
0x130d   : > { %v13440_v30 = vsel %vm955_vm1, %v13435_v8, 0 }
0x130e   : > { %v19921_v50 = vpop.eup %19920 }
0x130f   : > { %v12397_v1 = vmul.f32 %v19921_v50, %v24015_v35  ;;  %v13285_v53 = vpop.permute.xlu0 %13284 }
0x1310   : > { %v13290_v59 = vsel %vm955_vm1, %v13285_v53, 0  ;;  %18833 = vmatmul.mubr.msk.bf16.vlgmr.msra.gmra.mrb[216].mxu0 %vm955_vm1, %v13183_v27  ;;  %v13433_v4 = vpop.permute.xlu1 %13432 }
0x1311   : > { %v12413_v49 = vpack.c.bf16 %v12397_v1, %v12397_v1  ;;  %18843 = vmatpush3.bf16.xpose.msra.mxu0 %v13290_v59  ;;  %18844 = vmatprep.mubr.msk.bf16.mxu0 %vm20267_vm0, %v25704_v11 }
0x1312   : > { %18854 = vmatprep.subr.bf16.mxu0 %v25704_v11 }
0x1313   : > { %v13283_v6 = vpop.permute.xlu0 %13282  ;;  %18827 = vmatmul.mubr.msk.bf16.vlgmr.msra.gmra.mrb[212].mxu1 %vm1692_vm3, %v12413_v49 }
0x1314   : > { %18837 = vmatpush3.bf16.xpose.msra.mxu1 %v13240_v14  ;;  %v13535_v35 = vpop.permute.xlu1 %13534  ;;  %18838 = vmatprep.mubr.msk.bf16.mxu1 %vm20267_vm0, %v25704_v11 }
0x1315   : > { %18848 = vmatprep.subr.bf16.mxu1 %v25704_v11  ;;  %v13540_v36 = vsel %vm955_vm1, %v13535_v35, 0 }
0x1317   : > { %v13385_v63 = vpop.permute.xlu0 %13384 }
0x1318   : > { %v13390_v9 = vsel %vm955_vm1, %v13385_v63, 0  ;;  %18845 = vmatmul.mubr.msk.bf16.vlgmr.msra.gmra.mrb[220].mxu0 %vm955_vm1, %v13283_v6  ;;  %v13533_v5 = vpop.permute.xlu1 %13532 }
0x1319   : > { %18855 = vmatpush3.bf16.xpose.msra.mxu0 %v13390_v9  ;;  %18856 = vmatprep.mubr.msk.bf16.mxu0 %vm20267_vm0, %v25704_v11 }
0x131a   : > { %18866 = vmatprep.subr.bf16.mxu0 %v25704_v11 }
0x131b   : > { %v13383_v28 = vpop.permute.xlu0 %13382  ;;  %18839 = vmatmul.mubr.msk.bf16.vlgmr.msra.gmra.mrb[216].mxu1 %vm955_vm1, %v13233_v62 }
0x131c   : > { %18849 = vmatpush3.bf16.xpose.msra.mxu1 %v13340_v56  ;;  %18850 = vmatprep.mubr.msk.bf16.mxu1 %vm20267_vm0, %v25704_v11  ;;  %v13635_v15 = vpop.permute.xlu1 %13634 }
0x131d   : > { %18860 = vmatprep.subr.bf16.mxu1 %v25704_v11  ;;  %v13640_v41 = vsel %vm955_vm1, %v13635_v15, 0 }
0x131f   : > { %v13485_v38 = vpop.permute.xlu0 %13484 }
0x1320   : > { %v13490_v52 = vsel %vm955_vm1, %v13485_v38, 0  ;;  %18857 = vmatmul.mubr.msk.bf16.vlgmr.msra.gmra.mrb[224].mxu0 %vm955_vm1, %v13383_v28  ;;  %v13633_v42 = vpop.permute.xlu1 %13632 }
0x1321   : > { %18867 = vmatpush3.bf16.xpose.msra.mxu0 %v13490_v52  ;;  %18868 = vmatprep.mubr.msk.bf16.mxu0 %vm20267_vm0, %v25704_v11 }
0x1322   : > { %18878 = vmatprep.subr.bf16.mxu0 %v25704_v11 }
0x1323   : > { %v13483_v2 = vpop.permute.xlu0 %13482  ;;  %18851 = vmatmul.mubr.msk.bf16.vlgmr.msra.gmra.mrb[220].mxu1 %vm955_vm1, %v13333_v51 }
0x1324   : > { %18861 = vmatpush3.bf16.xpose.msra.mxu1 %v13440_v30  ;;  %18862 = vmatprep.mubr.msk.bf16.mxu1 %vm20267_vm0, %v25704_v11  ;;  %v13735_v61 = vpop.permute.xlu1 %13734 }
0x1325   : > { %18872 = vmatprep.subr.bf16.mxu1 %v25704_v11  ;;  %v13740_v3 = vsel %vm955_vm1, %v13735_v61, 0 }
0x1327   : > { %v13585_v29 = vpop.permute.xlu0 %13584 }
0x1328   : > { %v13590_v21 = vsel %vm955_vm1, %v13585_v29, 0  ;;  %18869 = vmatmul.mubr.msk.bf16.vlgmr.msra.gmra.mrb[228].mxu0 %vm955_vm1, %v13483_v2  ;;  %v13733_v7 = vpop.permute.xlu1 %13732 }
0x1329   : > { %18879 = vmatpush3.bf16.xpose.msra.mxu0 %v13590_v21  ;;  %18880 = vmatprep.mubr.msk.bf16.mxu0 %vm20267_vm0, %v25704_v11 }
0x132a   : > { %18890 = vmatprep.subr.bf16.mxu0 %v25704_v11 }
0x132b   : > { %v13583_v54 = vpop.permute.xlu0 %13582  ;;  %18863 = vmatmul.mubr.msk.bf16.vlgmr.msra.gmra.mrb[224].mxu1 %vm955_vm1, %v13433_v4 }
0x132c   : > { %18873 = vmatpush3.bf16.xpose.msra.mxu1 %v13540_v36  ;;  %18874 = vmatprep.mubr.msk.bf16.mxu1 %vm20267_vm0, %v25704_v11  ;;  %v13835_v24 = vpop.permute.xlu1 %13834 }
0x132d   : > { %18884 = vmatprep.subr.bf16.mxu1 %v25704_v11  ;;  %v13840_v13 = vsel %vm955_vm1, %v13835_v24, 0 }
0x132f   : > { %v13685_v47 = vpop.permute.xlu0 %13684 }
0x1330   : > { %v13690_v17 = vsel %vm955_vm1, %v13685_v47, 0  ;;  %18881 = vmatmul.mubr.msk.bf16.vlgmr.msra.gmra.mrb[232].mxu0 %vm955_vm1, %v13583_v54  ;;  %v13833_v31 = vpop.permute.xlu1 %13832 }
0x1331   : > { %18891 = vmatpush3.bf16.xpose.msra.mxu0 %v13690_v17  ;;  %18892 = vmatprep.mubr.msk.bf16.mxu0 %vm20267_vm0, %v25704_v11 }
0x1332   : > { %18902 = vmatprep.subr.bf16.mxu0 %v25704_v11 }
0x1333   : > { %v13683_v19 = vpop.permute.xlu0 %13682  ;;  %18875 = vmatmul.mubr.msk.bf16.vlgmr.msra.gmra.mrb[228].mxu1 %vm955_vm1, %v13533_v5 }
0x1334   : > { %18885 = vmatpush3.bf16.xpose.msra.mxu1 %v13640_v41  ;;  %18886 = vmatprep.mubr.msk.bf16.mxu1 %vm20267_vm0, %v25704_v11  ;;  %v13935_v12 = vpop.permute.xlu1 %13934 }
0x1335   : > { %18896 = vmatprep.subr.bf16.mxu1 %v25704_v11  ;;  %v13940_v0 = vsel %vm955_vm1, %v13935_v12, 0 }
0x1337   : > { %v13785_v25 = vpop.permute.xlu0 %13784 }
0x1338   : > { %v13790_v46 = vsel %vm955_vm1, %v13785_v25, 0  ;;  %18893 = vmatmul.mubr.msk.bf16.vlgmr.msra.gmra.mrb[236].mxu0 %vm955_vm1, %v13683_v19  ;;  %v13933_v43 = vpop.permute.xlu1 %13932 }
0x1339   : > { %18903 = vmatpush3.bf16.xpose.msra.mxu0 %v13790_v46  ;;  %18904 = vmatprep.mubr.msk.bf16.mxu0 %vm20267_vm0, %v25704_v11 }
0x133a   : > { %18914 = vmatprep.subr.bf16.mxu0 %v25704_v11 }
0x133b   : > { %v13783_v33 = vpop.permute.xlu0 %13782  ;;  %18887 = vmatmul.mubr.msk.bf16.vlgmr.msra.gmra.mrb[232].mxu1 %vm955_vm1, %v13633_v42 }
0x133c   : > { %18897 = vmatpush3.bf16.xpose.msra.mxu1 %v13740_v3  ;;  %18898 = vmatprep.mubr.msk.bf16.mxu1 %vm20267_vm0, %v25704_v11  ;;  %v14223_v39 = vpop.permute.xlu1 %14222 }
0x133d   : > { %18908 = vmatprep.subr.bf16.mxu1 %v25704_v11  ;;  %v14228_v10 = vsel %vm1888_vm2, %v14223_v39, 0 }
0x133f   : > { %v13885_v37 = vpop.permute.xlu0 %13884 }
0x1340   : > { %v13890_v16 = vsel %vm955_vm1, %v13885_v37, 0  ;;  %18905 = vmatmul.mubr.msk.bf16.vlgmr.msra.gmra.mrb[240].mxu0 %vm955_vm1, %v13783_v33 }
0x1341   : > { %18915 = vmatpush3.bf16.xpose.msra.mxu0 %v13890_v16  ;;  %18916 = vmatprep.mubr.msk.bf16.mxu0 %vm20267_vm0, %v25704_v11 }
0x1342   : > { %18926 = vmatprep.subr.bf16.mxu0 %v25704_v11 }
0x1343   : > { %v13883_v58 = vpop.permute.xlu0 %13882  ;;  %18899 = vmatmul.mubr.msk.bf16.vlgmr.msra.gmra.mrb[236].mxu1 %vm955_vm1, %v13733_v7 }
0x1344   : > { %18909 = vmatpush3.bf16.xpose.msra.mxu1 %v13840_v13  ;;  %18910 = vmatprep.mubr.msk.bf16.mxu1 %vm20267_vm0, %v25704_v11 }
0x1345   : > { %18920 = vmatprep.subr.bf16.mxu1 %v25704_v11 }
0x1347   : > { %v14175_v32 = vpop.permute.xlu0 %14174 }
0x1348   : > { %v14180_v60 = vsel %vm1888_vm2, %v14175_v32, 0  ;;  %18917 = vmatmul.mubr.msk.bf16.vlgmr.msra.gmra.mrb[244].mxu0 %vm955_vm1, %v13883_v58 }
0x1349   : > { %18927 = vmatpush3.bf16.msra.mxu0 %v14180_v60  ;;  %18928 = vmatprep.mubr.msk.bf16.mxu0 %vm20267_vm0, %v25704_v11 }
0x134a   : > { %18938 = vmatprep.subr.bf16.mxu0 %v25704_v11 }
0x134b   : > { %18911 = vmatmul.mubr.msk.bf16.vlgmr.msra.gmra.mrb[240].mxu1 %vm955_vm1, %v13833_v31 }
0x134c   : > { %18921 = vmatpush3.bf16.xpose.msra.mxu1 %v13940_v0  ;;  %18922 = vmatprep.mubr.msk.bf16.mxu1 %vm20267_vm0, %v25704_v11 }
0x134d   : > { %18932 = vmatprep.subr.bf16.mxu1 %v25704_v11 }
0x1353   : > { %18923 = vmatmul.mubr.msk.bf16.vlgmr.msra.gmra.mrb[244].mxu1 %vm955_vm1, %v13933_v43 }
0x1354   : > { %18933 = vmatpush3.bf16.msra.mxu1 %v14228_v10  ;;  %18934 = vmatprep.mubr.msk.bf16.mxu1 %vm20267_vm0, %v25704_v11 }
0x1355   : > { %18944 = vmatprep.subr.bf16.mxu1 %v25704_v11 }
0x1376   : > { %v24289_v23 = vpop.f32.mrb[184].mxu0 }
0x1377   : > { %v18738_v44 = vpop.f32.mrb[185].mxu0 }
0x1378   : > { %v12459_v45 = vpop.f32.mrb[186].mxu0 }
0x1379   : > { %v18739_v62 = vpop.f32.mrb[187].mxu0 }
0x137e   : > { %v24291_v57 = vpop.f32.mrb[188].mxu0 }
0x137f   : > { %v18750_v55 = vpop.f32.mrb[189].mxu0 }
0x1380   : > { %v12555_v26 = vpop.f32.mrb[190].mxu0 }
0x1381   : > { %v24293_v22 = vpop.f32.mrb[184].mxu1  ;;  %v18751_v20 = vpop.f32.mrb[191].mxu0 }
0x1382   : > { %v19254_v18 = vpack.i.bf16 %v24293_v22, %v24289_v23  ;;  %v18744_v48 = vpop.f32.mrb[185].mxu1 }
0x1383   : > { %v12507_v51 = vpop.f32.mrb[186].mxu1 }
0x1384   : > { %v18745_v27 = vpop.f32.mrb[187].mxu1 }
0x1389   : > { %v24297_v8 = vpop.f32.mrb[188].mxu1 }
0x138a   : > { %v19264_v50 = vpack.i.bf16 %v24297_v8, %v24291_v57  ;;  %v18756_v1 = vpop.f32.mrb[189].mxu1 }
0x138b   : > { %v12603_v53 = vpop.f32.mrb[190].mxu1 }
0x138c   : > { %v18757_v59 = vpop.f32.mrb[191].mxu1 }
0x138d   : > { %v24301_v4 = vpop.f32.mrb[192].mxu0 }
0x138e   : > { %v18762_v49 = vpop.f32.mrb[193].mxu0 }
0x138f   : > { %v12651_v14 = vpop.f32.mrb[194].mxu0 }
0x1390   : > { %v18763_v6 = vpop.f32.mrb[195].mxu0 }
0x1392   : > { %v24303_v35 = vpop.f32.mrb[192].mxu1 }
0x1393   : > { %v19374_v63 = vpack.i.bf16 %v24303_v35, %v24301_v4  ;;  %v18768_v9 = vpop.f32.mrb[193].mxu1 }
0x1394   : > { %v12699_v5 = vpop.f32.mrb[194].mxu1 }
0x1395   : > { %v18769_v56 = vpop.f32.mrb[195].mxu1  ;;  %v24307_v28 = vpop.f32.mrb[196].mxu0 }
0x1396   : > { %v18774_v38 = vpop.f32.mrb[197].mxu0 }
0x1397   : > { %v12747_v15 = vpop.f32.mrb[198].mxu0 }
0x1398   : > { %v18775_v52 = vpop.f32.mrb[199].mxu0 }
0x139a   : > { %v24309_v30 = vpop.f32.mrb[196].mxu1 }
0x139b   : > { %v18780_v42 = vpop.f32.mrb[197].mxu1 }
0x139c   : > { %v12795_v29 = vpop.f32.mrb[198].mxu1 }
0x139d   : > { %v18781_v21 = vpop.f32.mrb[199].mxu1  ;;  %v24313_v36 = vpop.f32.mrb[200].mxu0 }
0x139e   : > { %v18786_v54 = vpop.f32.mrb[201].mxu0 }
0x139f   : > { %v12843_v61 = vpop.f32.mrb[202].mxu0 }
0x13a0   : > { %v18787_v47 = vpop.f32.mrb[203].mxu0 }
0x13a2   : > { %v24315_v17 = vpop.f32.mrb[200].mxu1 }
0x13a3   : > { %v19259_v7 = vpack.i.bf16 %v24315_v17, %v24313_v36  ;;  %v18792_v41 = vpop.f32.mrb[201].mxu1  ;;  %v26027_v17 = vld [vmem:[#allocation82_spill] sm:$0xff] }
0x13a4   : > { %v12891_v19 = vpop.f32.mrb[202].mxu1 }
0x13a5   : > { %v18793_v25 = vpop.f32.mrb[203].mxu1  ;;  %v24319_v24 = vpop.f32.mrb[204].mxu0 }
0x13a6   : > { %v18798_v46 = vpop.f32.mrb[205].mxu0 }
0x13a7   : > { %v12939_v3 = vpop.f32.mrb[206].mxu0 }
0x13a8   : > { %v18799_v33 = vpop.f32.mrb[207].mxu0 }
0x13aa   : > { %v24321_v31 = vpop.f32.mrb[204].mxu1 }
0x13ab   : > { %v19269_v37 = vpack.i.bf16 %v24321_v31, %v24319_v24  ;;  %v18804_v16 = vpop.f32.mrb[205].mxu1  ;;  %v26030_v31 = vld [vmem:[#allocation60_spill] sm:$0xff] }
0x13ac   : > { %v12987_v13 = vpop.f32.mrb[206].mxu1 }
0x13ad   : > { %v18805_v58 = vpop.f32.mrb[207].mxu1  ;;  %v24325_v12 = vpop.f32.mrb[208].mxu0 }
0x13ae   : > { %v18810_v32 = vpop.f32.mrb[209].mxu0 }
0x13af   : > { %v13035_v60 = vpop.f32.mrb[210].mxu0 }
0x13b0   : > { %v18811_v43 = vpop.f32.mrb[211].mxu0 }
0x13b2   : > { %v24327_v0 = vpop.f32.mrb[208].mxu1 }
0x13b3   : > { %v19379_v39 = vpack.i.bf16 %v24327_v0, %v24325_v12  ;;  %v18816_v10 = vpop.f32.mrb[209].mxu1  ;;  %v26088_v12 = vld [vmem:[#allocation85_spill] sm:$0xff] }
0x13b4   : > { %v13083_v44 = vpop.f32.mrb[210].mxu1 }
0x13b5   : > { %v18817_v45 = vpop.f32.mrb[211].mxu1 }
0x13db   : > { %v24331_v62 = vpop.f32.mrb[212].mxu0 }
0x13dc   : > { %v18822_v55 = vpop.f32.mrb[213].mxu0 }
0x13dd   : > { %v13131_v26 = vpop.f32.mrb[214].mxu0 }
0x13de   : > { %v18823_v20 = vpop.f32.mrb[215].mxu0 }
0x13e3   : > { %v24333_v48 = vpop.f32.mrb[216].mxu0 }
0x13e4   : > { %v18834_v51 = vpop.f32.mrb[217].mxu0  ;;  %v13982_v27 = vsel %vm1692_vm3, %v24333_v48, -inf }
0x13e5   : > { %13983 = vmax.xlane.f32.xlu0 %v13982_v27  ;;  %v13229_v1 = vpop.f32.mrb[218].mxu0 }
0x13e6   : > { %v24337_v53 = vpop.f32.mrb[212].mxu1  ;;  %v18835_v59 = vpop.f32.mrb[219].mxu0 }
0x13e7   : > { %v19389_v49 = vpack.i.bf16 %v24337_v53, %v24331_v62  ;;  %v18828_v14 = vpop.f32.mrb[213].mxu1  ;;  %v26099_v53 = vld [vmem:[#allocation118_spill] sm:$0xff] }
0x13e8   : > { %v13179_v6 = vpop.f32.mrb[214].mxu1 }
0x13e9   : > { %v18829_v9 = vpop.f32.mrb[215].mxu1 }
0x13eb   : > { %v24341_v5 = vpop.f32.mrb[220].mxu0 }
0x13ec   : > { %v18846_v56 = vpop.f32.mrb[221].mxu0  ;;  %v13988_v38 = vsel %vm1692_vm3, %v24341_v5, -inf }
0x13ed   : > { %13989 = vmax.xlane.f32.xlu0 %v13988_v38  ;;  %v13329_v15 = vpop.f32.mrb[222].mxu0 }
0x13ee   : > { %v24345_v52 = vpop.f32.mrb[216].mxu1  ;;  %v18847_v42 = vpop.f32.mrb[223].mxu0 }
0x13ef   : > { %v18840_v29 = vpop.f32.mrb[217].mxu1  ;;  %v13985_v21 = vsel %vm1692_vm3, %v24345_v52, -inf }
0x13f0   : > { %13986 = vmax.xlane.f32.xlu1 %v13985_v21  ;;  %v13279_v54 = vpop.f32.mrb[218].mxu1 }
0x13f1   : > { %v18841_v61 = vpop.f32.mrb[219].mxu1 }
0x13f3   : > { %v24349_v47 = vpop.f32.mrb[224].mxu0 }
0x13f4   : > { %v18858_v41 = vpop.f32.mrb[225].mxu0  ;;  %v13994_v32 = vsel %vm1692_vm3, %v24349_v47, -inf }
0x13f5   : > { %v13429_v19 = vpop.f32.mrb[226].mxu0 }
0x13f6   : > { %v24351_v25 = vpop.f32.mrb[220].mxu1  ;;  %v18859_v46 = vpop.f32.mrb[227].mxu0 }
0x13f7   : > { %v18852_v3 = vpop.f32.mrb[221].mxu1  ;;  %v13991_v33 = vsel %vm1692_vm3, %v24351_v25, -inf }
0x13f8   : > { %13992 = vmax.xlane.f32.xlu0 %v13991_v33  ;;  %v13379_v16 = vpop.f32.mrb[222].mxu1 }
0x13f9   : > { %v18853_v13 = vpop.f32.mrb[223].mxu1 }
0x13fb   : > { %v24355_v58 = vpop.f32.mrb[228].mxu0 }
0x13fc   : > { %v18870_v60 = vpop.f32.mrb[229].mxu0  ;;  %13995 = vmax.xlane.f32.xlu0 %v13994_v32  ;;  %v14000_v55 = vsel %vm1692_vm3, %v24355_v58, -inf }
0x13fd   : > { %v13529_v43 = vpop.f32.mrb[230].mxu0 }
0x13fe   : > { %v24359_v10 = vpop.f32.mrb[224].mxu1  ;;  %v18871_v44 = vpop.f32.mrb[231].mxu0 }
0x13ff   : > { %v18864_v45 = vpop.f32.mrb[225].mxu1  ;;  %v13997_v26 = vsel %vm1692_vm3, %v24359_v10, -inf }
0x1400   : > { %14001 = vmax.xlane.f32.xlu0 %v14000_v55  ;;  %13998 = vmax.xlane.f32.xlu1 %v13997_v26  ;;  %v13479_v20 = vpop.f32.mrb[226].mxu1 }
0x1401   : > { %v18865_v51 = vpop.f32.mrb[227].mxu1 }
0x1403   : > { %v24365_v27 = vpop.f32.mrb[232].mxu0 }
0x1404   : > { %v18882_v1 = vpop.f32.mrb[233].mxu0  ;;  %v14006_v59 = vsel %vm1692_vm3, %v24365_v27, -inf }
0x1405   : > { %v13629_v14 = vpop.f32.mrb[234].mxu0  ;;  %14007 = vmax.xlane.f32.xlu0 %v14006_v59 }
0x1406   : > { %v24369_v6 = vpop.f32.mrb[228].mxu1  ;;  %v18883_v9 = vpop.f32.mrb[235].mxu0 }
0x1407   : > { %v18876_v56 = vpop.f32.mrb[229].mxu1  ;;  %v14003_v38 = vsel %vm1692_vm3, %v24369_v6, -inf }
0x1408   : > { %14004 = vmax.xlane.f32.xlu1 %v14003_v38  ;;  %v13579_v15 = vpop.f32.mrb[230].mxu1 }
0x1409   : > { %v18877_v42 = vpop.f32.mrb[231].mxu1 }
0x140b   : > { %v24373_v29 = vpop.f32.mrb[236].mxu0 }
0x140c   : > { %v18894_v21 = vpop.f32.mrb[237].mxu0  ;;  %v14012_v54 = vsel %vm1692_vm3, %v24373_v29, -inf }
0x140d   : > { %v13729_v61 = vpop.f32.mrb[238].mxu0  ;;  %14013 = vmax.xlane.f32.xlu0 %v14012_v54 }
0x140e   : > { %v24377_v41 = vpop.f32.mrb[232].mxu1  ;;  %v18895_v19 = vpop.f32.mrb[239].mxu0 }
0x140f   : > { %v18888_v46 = vpop.f32.mrb[233].mxu1  ;;  %v14009_v3 = vsel %vm1692_vm3, %v24377_v41, -inf }
0x1410   : > { %14010 = vmax.xlane.f32.xlu1 %v14009_v3  ;;  %v13679_v33 = vpop.f32.mrb[234].mxu1 }
0x1411   : > { %v18889_v16 = vpop.f32.mrb[235].mxu1  ;;  %v25976_v33 = vld [vmem:[#allocation39_spill] sm:$0xff] }
0x1412   : > { %v25977_v16 = vld [vmem:[#allocation34_spill] sm:$0xff] }
0x1413   : > { %v24381_v13 = vpop.f32.mrb[240].mxu0 }
0x1414   : > { %v18906_v32 = vpop.f32.mrb[241].mxu0  ;;  %v14018_v60 = vsel %vm1692_vm3, %v24381_v13, -inf }
0x1415   : > { %v13829_v43 = vpop.f32.mrb[242].mxu0  ;;  %14019 = vmax.xlane.f32.xlu0 %v14018_v60  ;;  %v25978_v32 = vld [vmem:[#allocation38_spill] sm:$0xff]  ;;  %v25979_v60 = vld [vmem:[#allocation41_spill] sm:$0xff] }
0x1416   : > { %v24385_v44 = vpop.f32.mrb[236].mxu1  ;;  %v18907_v45 = vpop.f32.mrb[243].mxu0 }
0x1417   : > { %v18900_v55 = vpop.f32.mrb[237].mxu1  ;;  %v14015_v26 = vsel %vm1692_vm3, %v24385_v44, -inf  ;;  %v24409_v45 = vpop.permute.xlu0 %14270 }
0x1418   : > { %14016 = vmax.xlane.f32.xlu1 %v14015_v26  ;;  %v13779_v20 = vpop.f32.mrb[238].mxu1  ;;  %v24413_v26 = vpop.permute.xlu1 %14318 }
0x1419   : > { %v18901_v51 = vpop.f32.mrb[239].mxu1 }
0x141b   : > { %v24389_v1 = vpop.f32.mrb[244].mxu0  ;;  %v24411_v55 = vpop.permute.xlu0 %14366 }
0x141c   : > { %v18918_v59 = vpop.f32.mrb[245].mxu0  ;;  %v14024_v14 = vsel %vm1692_vm3, %v24389_v1, -inf }
0x141d   : > { %v13929_v9 = vpop.f32.mrb[246].mxu0  ;;  %14025 = vmax.xlane.f32.xlu0 %v14024_v14  ;;  %v24417_v59 = vpop.permute.xlu1 %14414 }
0x141e   : > { %v24393_v56 = vpop.f32.mrb[240].mxu1  ;;  %v18919_v38 = vpop.f32.mrb[247].mxu0 }
0x141f   : > { %v18912_v15 = vpop.f32.mrb[241].mxu1  ;;  %v14021_v42 = vsel %vm1692_vm3, %v24393_v56, -inf  ;;  %v24415_v20 = vpop.permute.xlu0 %14462 }
0x1420   : > { %14022 = vmax.xlane.f32.xlu1 %v14021_v42  ;;  %v13879_v21 = vpop.f32.mrb[242].mxu1 }
0x1421   : > { %v18913_v54 = vpop.f32.mrb[243].mxu1  ;;  %v24420_v38 = vpop.permute.xlu1 %14510 }
0x1426   : > { %v24397_v61 = vpop.f32.mrb[244].mxu1 }
0x1427   : > { %v18924_v19 = vpop.f32.mrb[245].mxu1  ;;  %v14027_v43 = vsel %vm1692_vm3, %v24397_v61, -inf }
0x1428   : > { %v13979_v46 = vpop.f32.mrb[246].mxu1 }
0x1429   : > { %v18925_v3 = vpop.f32.mrb[247].mxu1 }
0x1431   : > { %14606 = vrot.lane.b32.xlu1 %v25976_v33, %s20274_s10 }
0x1433   : > { %14558 = vrot.lane.b32.xlu0 %v25977_v16, %s20274_s10 }
0x1435   : > { %14654 = vrot.lane.b32.xlu1 %v25978_v32, %s20274_s10 }
0x1439   : > { %14702 = vrot.lane.b32.xlu1 %v25979_v60, %s20274_s10 }
0x145d   : > { %14028 = vmax.xlane.f32.xlu1 %v14027_v43 }
0x1472   : > { %v13984_v51 = vpop.xlane.xlu0 %13983 }
0x1473   : > { %v14030_v14 = vsub.f32 %v24333_v48, %v13984_v51 }
0x1475   : > { %v14046_v9 = vmul.f32 1.442695, %v14030_v14 }
0x1477   : > { %19922 = vpow2.f32 %v14046_v9 }
0x147a   : > { %v13990_v15 = vpop.xlane.xlu0 %13989 }
0x147b   : > { %v14032_v42 = vsub.f32 %v24341_v5, %v13990_v15 }
0x147d   : > { %v14050_v21 = vmul.f32 1.442695, %v14032_v42  ;;  %v13987_v54 = vpop.xlane.xlu1 %13986 }
0x147e   : > { %v14031_v19 = vsub.f32 %v24345_v52, %v13987_v54 }
0x147f   : > { %19924 = vpow2.f32 %v14050_v21 }
0x1480   : > { %v14048_v46 = vmul.f32 1.442695, %v14031_v19 }
0x1481   : > { %v24424_v3 = vpop.eup %19922 }
0x1482   : > { %19926 = vpow2.f32 %v14048_v46  ;;  %v14078_v33 = vsel %vm1692_vm3, %v24424_v3, 0.0 }
0x1483   : > { %14079 = vadd.xlane.f32.xlu0 %v14078_v33 }
0x1485   : > { %v13993_v48 = vpop.xlane.xlu0 %13992 }
0x1486   : > { %v14033_v16 = vsub.f32 %v24351_v25, %v13993_v48 }
0x1488   : > { %v14052_v32 = vmul.f32 1.442695, %v14033_v16 }
0x1489   : > { %v24429_v60 = vpop.eup %19924  ;;  %v13996_v5 = vpop.xlane.xlu0 %13995 }
0x148a   : > { %19928 = vpow2.f32 %v14052_v32  ;;  %v14034_v43 = vsub.f32 %v24349_v47, %v13996_v5  ;;  %v14084_v52 = vsel %vm1692_vm3, %v24429_v60, 0.0 }
0x148b   : > { %14085 = vadd.xlane.f32.xlu0 %v14084_v52 }
0x148c   : > { %v24434_v51 = vpop.eup %19926  ;;  %v14054_v14 = vmul.f32 1.442695, %v14034_v43 }
0x148d   : > { %v14002_v9 = vpop.xlane.xlu0 %14001  ;;  %v13999_v15 = vpop.xlane.xlu1 %13998  ;;  %v14081_v42 = vsel %vm1692_vm3, %v24434_v51, 0.0 }
0x148e   : > { %19930 = vpow2.f32 %v14054_v14  ;;  %v14036_v25 = vsub.f32 %v24355_v58, %v14002_v9  ;;  %v14035_v21 = vsub.f32 %v24359_v10, %v13999_v15  ;;  %14082 = vadd.xlane.f32.xlu1 %v14081_v42 }
0x1490   : > { %v14058_v54 = vmul.f32 1.442695, %v14036_v25  ;;  %v14056_v47 = vmul.f32 1.442695, %v14035_v21 }
0x1492   : > { %19932 = vpow2.f32 %v14058_v54  ;;  %v14008_v19 = vpop.xlane.xlu0 %14007 }
0x1493   : > { %19934 = vpow2.f32 %v14056_v47  ;;  %v14038_v33 = vsub.f32 %v24365_v27, %v14008_v19 }
0x1494   : > { %v24440_v46 = vpop.eup %19928 }
0x1495   : > { %v14005_v48 = vpop.xlane.xlu1 %14004  ;;  %v14087_v16 = vsel %vm1692_vm3, %v24440_v46, 0.0  ;;  %v14062_v10 = vmul.f32 1.442695, %v14038_v33 }
0x1496   : > { %v14037_v32 = vsub.f32 %v24369_v6, %v14005_v48  ;;  %14088 = vadd.xlane.f32.xlu1 %v14087_v16 }
0x1498   : > { %v24446_v58 = vpop.eup %19930  ;;  %v14060_v5 = vmul.f32 1.442695, %v14037_v32 }
0x1499   : > { %v14090_v43 = vsel %vm1692_vm3, %v24446_v58, 0.0 }
0x149a   : > { %19936 = vpow2.f32 %v14060_v5  ;;  %14091 = vadd.xlane.f32.xlu0 %v14090_v43  ;;  %v14014_v52 = vpop.xlane.xlu0 %14013 }
0x149b   : > { %v14040_v14 = vsub.f32 %v24373_v29, %v14014_v52  ;;  %19938 = vpow2.f32 %v14062_v10 }
0x149c   : > { %v24451_v27 = vpop.eup %19932 }
0x149d   : > { %v24453_v9 = vpop.eup %19934  ;;  %v14066_v15 = vmul.f32 1.442695, %v14040_v14  ;;  %v14011_v6 = vpop.xlane.xlu1 %14010  ;;  %v14096_v42 = vsel %vm1692_vm3, %v24451_v27, 0.0  ;;  %v25980_v14 = vld [vmem:[#allocation17_spill] sm:$0xff] }
0x149e   : > { %v14039_v25 = vsub.f32 %v24377_v41, %v14011_v6  ;;  %14097 = vadd.xlane.f32.xlu0 %v14096_v42  ;;  %v14093_v21 = vsel %vm1692_vm3, %v24453_v9, 0.0  ;;  %v25981_v6 = vld [vmem:[#allocation40_spill] sm:$0xff] }
0x149f   : > { %14094 = vadd.xlane.f32.xlu1 %v14093_v21  ;;  %19940 = vpow2.f32 %v14066_v15 }
0x14a0   : > { %v14064_v54 = vmul.f32 1.442695, %v14039_v25 }
0x14a2   : > { %19942 = vpow2.f32 %v14064_v54  ;;  %v14020_v15 = vpop.xlane.xlu0 %14019 }
0x14a3   : > { %v14042_v42 = vsub.f32 %v24381_v13, %v14020_v15 }
0x14a4   : > { %v24460_v29 = vpop.eup %19936 }
0x14a5   : > { %v14017_v47 = vpop.xlane.xlu1 %14016  ;;  %v14099_v19 = vsel %vm1692_vm3, %v24460_v29, 0.0  ;;  %v24464_v33 = vpop.eup %19938  ;;  %v14070_v21 = vmul.f32 1.442695, %v14042_v42 }
0x14a6   : > { %v14041_v48 = vsub.f32 %v24385_v44, %v14017_v47  ;;  %14100 = vadd.xlane.f32.xlu1 %v14099_v19  ;;  %v14102_v16 = vsel %vm1692_vm3, %v24464_v33, 0.0 }
0x14a8   : > { %v14068_v41 = vmul.f32 1.442695, %v14041_v48 }
0x14a9   : > { %v24469_v32 = vpop.eup %19940 }
0x14aa   : > { %19944 = vpow2.f32 %v14068_v41  ;;  %14103 = vadd.xlane.f32.xlu1 %v14102_v16  ;;  %v14108_v43 = vsel %vm1692_vm3, %v24469_v32, 0.0  ;;  %v14026_v25 = vpop.xlane.xlu0 %14025 }
0x14ab   : > { %v14044_v54 = vsub.f32 %v24389_v1, %v14026_v25  ;;  %19946 = vpow2.f32 %v14070_v21 }
0x14ac   : > { %v24471_v10 = vpop.eup %19942 }
0x14ad   : > { %v14105_v5 = vsel %vm1692_vm3, %v24471_v10, 0.0  ;;  %v14023_v47 = vpop.xlane.xlu1 %14022  ;;  %v14074_v19 = vmul.f32 1.442695, %v14044_v54 }
0x14ae   : > { %14106 = vadd.xlane.f32.xlu0 %v14105_v5  ;;  %14109 = vadd.xlane.f32.xlu1 %v14108_v43  ;;  %v14043_v48 = vsub.f32 %v24393_v56, %v14023_v47  ;;  %v25982_v47 = vld [vmem:[#allocation56_spill] sm:$0xff] }
0x14af   : > { %19948 = vpow2.f32 %v14074_v19  ;;  %v25983_v19 = vld [vmem:[#allocation55_spill] sm:$0xff] }
0x14b0   : > { %v14072_v41 = vmul.f32 1.442695, %v14043_v48  ;;  %v25984_v48 = vpack.i.bf16 %v25982_v47, %v25983_v19  ;;  %v25994_v47 = vld [vmem:[#allocation88_spill] sm:$0xff]  ;;  %v25995_v19 = vld [vmem:[#allocation87_spill] sm:$0xff] }
0x14b1   : > { %v24488_v16 = vpop.permute.xlu1 %14606 }
0x14b2   : > { %19950 = vpow2.f32 %v14072_v41  ;;  %v25985_v41 = vld [vmem:[#allocation58_spill] sm:$0xff] }
0x14b4   : > { %v24477_v44 = vpop.eup %19944 }
0x14b5   : > { %v14111_v52 = vsel %vm1692_vm3, %v24477_v44, 0.0  ;;  %v24490_v5 = vpop.eup %19946  ;;  %v24492_v43 = vpop.permute.xlu1 %14654 }
0x14b6   : > { %14112 = vadd.xlane.f32.xlu0 %v14111_v52  ;;  %v14114_v13 = vsel %vm1692_vm3, %v24490_v5, 0.0 }
0x14b9   : > { %v24496_v52 = vpop.eup %19948  ;;  %v24498_v1 = vpop.permute.xlu1 %14702 }
0x14ba   : > { %v14120_v56 = vsel %vm1692_vm3, %v24496_v52, 0.0 }
0x14bf   : > { %14798 = vrot.lane.b32.xlu1 %v25980_v14, %s20274_s10  ;;  %v24502_v14 = vpop.eup %19950 }
0x14cc   : > { %14750 = vrot.lane.b32.xlu0 %v25981_v6, %s20274_s10  ;;  %v14117_v6 = vsel %vm1692_vm3, %v24502_v14, 0.0 }
0x14e3   : > { %14115 = vadd.xlane.f32.xlu1 %v14114_v13 }
0x14e7   : > { %14121 = vadd.xlane.f32.xlu1 %v14120_v56  ;;  %v25988_v56 = vld [vmem:[#allocation72_spill] sm:$0xff] }
0x14ea   : > { %v14029_v15 = vpop.xlane.xlu1 %14028 }
0x14eb   : > { %v14045_v42 = vsub.f32 %v24397_v61, %v14029_v15  ;;  %14118 = vadd.xlane.f32.xlu0 %v14117_v6  ;;  %v25986_v61 = vld [vmem:[#allocation57_spill] sm:$0xff]  ;;  %v25989_v15 = vld [vmem:[#allocation71_spill] sm:$0xff]  ;;  %v25991_v6 = vld [vmem:[#allocation74_spill] sm:$0xff] }
0x14ec   : > { %v25987_v13 = vpack.i.bf16 %v25985_v41, %v25986_v61  ;;  %v25997_v41 = vld [vmem:[#allocation90_spill] sm:$0xff]  ;;  %v25998_v61 = vld [vmem:[#allocation89_spill] sm:$0xff] }
0x14ed   : > { %v14076_v25 = vmul.f32 1.442695, %v14045_v42  ;;  %v25992_v42 = vld [vmem:[#allocation73_spill] sm:$0xff] }
0x14ef   : > { %19952 = vpow2.f32 %v14076_v25  ;;  %v25993_v25 = vpack.i.bf16 %v25991_v6, %v25992_v42  ;;  %v26003_v6 = vld [vmem:[#allocation48_spill] sm:$0xff]  ;;  %v26004_v42 = vld [vmem:[#allocation47_spill] sm:$0xff] }
0x14f8   : > { %14894 = vrot.lane.b32.xlu1 %v21220_v40, %s20274_s10  ;;  %v25990_v40 = vpack.i.bf16 %v25988_v56, %v25989_v15  ;;  %v26000_v56 = vld [vmem:[#allocation104_spill] sm:$0xff]  ;;  %v26001_v15 = vld [vmem:[#allocation103_spill] sm:$0xff] }
0x14f9   : > { %v24509_v21 = vpop.eup %19952 }
0x14fa   : > { %v14123_v54 = vsel %vm1692_vm3, %v24509_v21, 0.0 }
0x14fb   : > { %14124 = vadd.xlane.f32.xlu0 %v14123_v54  ;;  %v24529_v54 = vpop.permute.xlu0 %14558 }
0x14fc   : > { %19160 = vrot.lane.b32.xlu1 %v25984_v48, %s20274_s10  ;;  %v25996_v48 = vpack.i.bf16 %v25994_v47, %v25995_v19  ;;  %v26006_v19 = vld [vmem:[#allocation106_spill] sm:$0xff] }
0x1500   : > { %19170 = vrot.lane.b32.xlu1 %v25987_v13, %s20274_s10  ;;  %v25999_v13 = vpack.i.bf16 %v25997_v41, %v25998_v61 }
0x1504   : > { %19180 = vrot.lane.b32.xlu1 %v25990_v40, %s20273_s27  ;;  %v26002_v40 = vpack.i.bf16 %v26000_v56, %v26001_v15 }
0x1508   : > { %19190 = vrot.lane.b32.xlu1 %v25993_v25, %s20273_s27  ;;  %v26005_v25 = vpack.i.bf16 %v26003_v6, %v26004_v42  ;;  %v26013_v6 = vld [vmem:[#allocation119_spill] sm:$0xff] }
0x150c   : > { %19200 = vrot.lane.b32.xlu1 %v25996_v48, %s20272_s20  ;;  %v26007_v48 = vld [vmem:[#allocation105_spill] sm:$0xff] }
0x150d   : > { %v26008_v41 = vpack.i.bf16 %v26006_v19, %v26007_v48  ;;  %v26016_v19 = vld [vmem:[#allocation64_spill] sm:$0xff] }
0x1510   : > { %v14080_v2 = vpop.xlane.xlu0 %14079  ;;  %19210 = vrot.lane.b32.xlu1 %v25999_v13, %s20272_s20 }
0x1511   : > { %19954 = vrcp.f32 %v14080_v2  ;;  %14846 = vrot.lane.b32.xlu0 %v21158_v34, %s20274_s10  ;;  %v26009_v2 = vld [vmem:[#allocation50_spill] sm:$0xff]  ;;  %v26010_v34 = vld [vmem:[#allocation49_spill] sm:$0xff] }
0x1512   : > { %v26011_v61 = vpack.i.bf16 %v26009_v2, %v26010_v34  ;;  %v26018_v2 = vld [vmem:[#allocation122_spill] sm:$0xff] }
0x1514   : > { %19220 = vrot.lane.b32.xlu1 %v26002_v40, %s20271_s26  ;;  %v26012_v40 = vld [vmem:[#allocation120_spill] sm:$0xff] }
0x1515   : > { %19155 = vrot.lane.b32.xlu0 %v26005_v25, %s20274_s10  ;;  %v26014_v42 = vpack.i.bf16 %v26012_v40, %v26013_v6  ;;  %v26015_v25 = vld [vmem:[#allocation65_spill] sm:$0xff] }
0x1516   : > { %v26017_v48 = vpack.i.bf16 %v26015_v25, %v26016_v19  ;;  %v26024_v6 = vld [vmem:[#allocation81_spill] sm:$0xff] }
0x1518   : > { %v14086_v47 = vpop.xlane.xlu0 %14085  ;;  %19230 = vrot.lane.b32.xlu1 %v26008_v41, %s20271_s26  ;;  %v14276_v41 = vsel %vm1888_vm2, %v24409_v45, 0 }
0x1519   : > { %19956 = vrcp.f32 %v14086_v47  ;;  %19165 = vrot.lane.b32.xlu0 %v26011_v61, %s20274_s10  ;;  %v26021_v61 = vld [vmem:[#allocation66_spill] sm:$0xff] }
0x151b   : > { %v19955_v13 = vpop.eup %19954  ;;  %v14083_v56 = vpop.xlane.xlu1 %14082 }
0x151c   : > { %v14142_v15 = vmul.f32 %v19955_v13, %v24424_v3  ;;  %19958 = vrcp.f32 %v14083_v56  ;;  %19240 = vrot.lane.b32.xlu1 %v26014_v42, %s20270_s24  ;;  %v26019_v3 = vld [vmem:[#allocation121_spill] sm:$0xff]  ;;  %v26022_v13 = vld [vmem:[#allocation63_spill] sm:$0xff]  ;;  %v26025_v42 = vld [vmem:[#allocation80_spill] sm:$0xff] }
0x151d   : > { %19175 = vrot.lane.b32.xlu0 %v26017_v48, %s20273_s27  ;;  %v26020_v34 = vpack.i.bf16 %v26018_v2, %v26019_v3  ;;  %v26023_v56 = vpack.i.bf16 %v26021_v61, %v26022_v13  ;;  %v26026_v25 = vpack.i.bf16 %v26024_v6, %v26025_v42  ;;  %v14372_v2 = vsel %vm1888_vm2, %v24411_v55, 0  ;;  %v26034_v61 = vld [vmem:[#allocation96_spill] sm:$0xff]  ;;  %v26039_v42 = vld [vmem:[#allocation98_spill] sm:$0xff] }
0x151e   : > { %v14158_v47 = vpack.c.bf16 %v14142_v15, %v14142_v15  ;;  %v14324_v55 = vsel %vm1888_vm2, %v24413_v26, 0 }
0x1520   : > { %18929 = vmatmul.mubr.msk.bf16.vlgmr.msra.gmra.mrb[248].mxu0 %vm1692_vm3, %v14158_v47  ;;  %19250 = vrot.lane.b32.xlu1 %v26020_v34, %s20270_s24  ;;  %v26033_v34 = vld [vmem:[#allocation97_spill] sm:$0xff] }
0x1521   : > { %18939 = vmatpush3.bf16.msra.mxu0 %v14276_v41  ;;  %19185 = vrot.lane.b32.xlu0 %v26023_v56, %s20273_s27  ;;  %v26035_v13 = vpack.i.bf16 %v26033_v34, %v26034_v61  ;;  %v26049_v34 = vld [vmem:[#allocation77_spill] sm:$0xff] }
0x1522   : > { %18940 = vmatprep.mubr.msk.bf16.mxu0 %vm20267_vm0, %v25704_v11  ;;  %18950 = vmatprep.subr.bf16.mxu0 %v25704_v11 }
0x1523   : > { %v19957_v15 = vpop.eup %19956  ;;  %v14089_v45 = vpop.xlane.xlu1 %14088 }
0x1524   : > { %v14144_v40 = vmul.f32 %v19957_v15, %v24429_v60  ;;  %19960 = vrcp.f32 %v14089_v45  ;;  %19260 = vrot.lane.b32.xlu1 %v19259_v7, %s20269_s22  ;;  %v26028_v7 = vld [vmem:[#allocation79_spill] sm:$0xff]  ;;  %v26036_v15 = vld [vmem:[#allocation62_spill] sm:$0xff]  ;;  %v26037_v45 = vld [vmem:[#allocation61_spill] sm:$0xff] }
0x1525   : > { %19195 = vrot.lane.b32.xlu0 %v26026_v25, %s20272_s20  ;;  %v26029_v60 = vpack.i.bf16 %v26027_v17, %v26028_v7  ;;  %v26040_v25 = vld [vmem:[#allocation95_spill] sm:$0xff] }
0x1526   : > { %v19959_v19 = vpop.eup %19958  ;;  %v14160_v48 = vpack.c.bf16 %v14144_v40, %v14144_v40  ;;  %v26038_v40 = vpack.i.bf16 %v26036_v15, %v26037_v45 }
0x1527   : > { %v14143_v47 = vmul.f32 %v19959_v19, %v24434_v51  ;;  %v14092_v41 = vpop.xlane.xlu0 %14091  ;;  %v26041_v19 = vpack.i.bf16 %v26039_v42, %v26040_v25 }
0x1528   : > { %19962 = vrcp.f32 %v14092_v41  ;;  %18941 = vmatmul.mubr.msk.bf16.vlgmr.msra.gmra.mrb[252].mxu0 %vm1692_vm3, %v14160_v48  ;;  %19270 = vrot.lane.b32.xlu1 %v19269_v37, %s20269_s22  ;;  %v26031_v37 = vld [vmem:[#allocation59_spill] sm:$0xff] }
0x1529   : > { %v14159_v36 = vpack.c.bf16 %v14143_v47, %v14143_v47  ;;  %18951 = vmatpush3.bf16.msra.mxu0 %v14372_v2  ;;  %19205 = vrot.lane.b32.xlu0 %v26029_v60, %s20272_s20  ;;  %v26032_v3 = vpack.i.bf16 %v26030_v31, %v26031_v37  ;;  %v14420_v47 = vsel %vm1888_vm2, %v24417_v59, 0  ;;  %v26042_v2 = vld [vmem:[#allocation76_spill] sm:$0xff]  ;;  %v26045_v60 = vld [vmem:[#allocation113_spill] sm:$0xff] }
0x152a   : > { %18952 = vmatprep.mubr.msk.bf16.mxu0 %vm20267_vm0, %v25704_v11  ;;  %18962 = vmatprep.subr.bf16.mxu0 %v25704_v11 }
0x152b   : > { %v14098_v51 = vpop.xlane.xlu0 %14097  ;;  %18935 = vmatmul.mubr.msk.bf16.vlgmr.msra.gmra.mrb[248].mxu1 %vm1692_vm3, %v14159_v36  ;;  %v26043_v36 = vld [vmem:[#allocation75_spill] sm:$0xff] }
0x152c   : > { %19964 = vrcp.f32 %v14098_v51  ;;  %18945 = vmatpush3.bf16.msra.mxu1 %v14324_v55  ;;  %v14095_v24 = vpop.xlane.xlu1 %14094  ;;  %19280 = vrot.lane.b32.xlu1 %v26032_v3, %s20274_s10  ;;  %v26044_v17 = vpack.i.bf16 %v26042_v2, %v26043_v36  ;;  %v26046_v55 = vld [vmem:[#allocation112_spill] sm:$0xff]  ;;  %v26048_v3 = vld [vmem:[#allocation78_spill] sm:$0xff]  ;;  %v26061_v36 = vld [vmem:[#allocation107_spill] sm:$0xff] }
0x152d   : > { %19966 = vrcp.f32 %v14095_v24  ;;  %19215 = vrot.lane.b32.xlu0 %v26035_v13, %s20271_s26  ;;  %18946 = vmatprep.mubr.msk.bf16.mxu1 %vm20267_vm0, %v25704_v11  ;;  %v26047_v51 = vpack.i.bf16 %v26045_v60, %v26046_v55  ;;  %v14468_v24 = vsel %vm1888_vm2, %v24415_v20, 0  ;;  %v26050_v61 = vpack.i.bf16 %v26048_v3, %v26049_v34  ;;  %v26060_v2 = vld [vmem:[#allocation108_spill] sm:$0xff]  ;;  %v26070_v3 = vld [vmem:[#allocation53_spill] sm:$0xff] }
0x152e   : > { %v19961_v26 = vpop.eup %19960  ;;  %18956 = vmatprep.subr.bf16.mxu1 %v25704_v11  ;;  %v26062_v57 = vpack.i.bf16 %v26060_v2, %v26061_v36  ;;  %v14660_v60 = vsel %vm1888_vm2, %v24492_v43, 0  ;;  %v26096_v36 = vld [vmem:[#allocation116_spill] sm:$0xff] }
0x152f   : > { %v14145_v56 = vmul.f32 %v19961_v26, %v24440_v46  ;;  %v26051_v26 = vld [vmem:[#allocation114_spill] sm:$0xff] }
0x1530   : > { %19290 = vrot.lane.b32.xlu1 %v26038_v40, %s20274_s10  ;;  %v14516_v40 = vsel %vm1888_vm2, %v24420_v38, 0  ;;  %v14564_v38 = vsel %vm1888_vm2, %v24529_v54, 0  ;;  %v14612_v54 = vsel %vm1888_vm2, %v24488_v16, 0 }
0x1531   : > { %v14161_v6 = vpack.c.bf16 %v14145_v56, %v14145_v56  ;;  %19225 = vrot.lane.b32.xlu0 %v26041_v19, %s20271_s26  ;;  %v26052_v56 = vld [vmem:[#allocation111_spill] sm:$0xff] }
0x1532   : > { %v19963_v48 = vpop.eup %19962  ;;  %v26053_v15 = vpack.i.bf16 %v26051_v26, %v26052_v56  ;;  %v26075_v56 = vld [vmem:[#allocation68_spill] sm:$0xff] }
0x1533   : > { %v14146_v41 = vmul.f32 %v19963_v48, %v24446_v58  ;;  %18947 = vmatmul.mubr.msk.bf16.vlgmr.msra.gmra.mrb[252].mxu1 %vm1692_vm3, %v14161_v6  ;;  %v14101_v46 = vpop.xlane.xlu1 %14100  ;;  %v26055_v6 = vld [vmem:[#allocation91_spill] sm:$0xff] }
0x1534   : > { %18957 = vmatpush3.bf16.msra.mxu1 %v14420_v47  ;;  %19968 = vrcp.f32 %v14101_v46  ;;  %19300 = vrot.lane.b32.xlu1 %v26044_v17, %s20273_s27  ;;  %v26057_v47 = vld [vmem:[#allocation94_spill] sm:$0xff]  ;;  %v26064_v17 = vld [vmem:[#allocation51_spill] sm:$0xff] }
0x1535   : > { %v14162_v7 = vpack.c.bf16 %v14146_v41, %v14146_v41  ;;  %19235 = vrot.lane.b32.xlu0 %v26047_v51, %s20270_s24  ;;  %18958 = vmatprep.mubr.msk.bf16.mxu1 %vm20267_vm0, %v25704_v11  ;;  %v26058_v41 = vld [vmem:[#allocation93_spill] sm:$0xff]  ;;  %v26066_v51 = vld [vmem:[#allocation110_spill] sm:$0xff] }
0x1536   : > { %v19965_v59 = vpop.eup %19964  ;;  %18968 = vmatprep.subr.bf16.mxu1 %v25704_v11  ;;  %v26059_v46 = vpack.i.bf16 %v26057_v47, %v26058_v41  ;;  %v26084_v47 = vld [vmem:[#allocation84_spill] sm:$0xff]  ;;  %v26085_v41 = vld [vmem:[#allocation83_spill] sm:$0xff] }
0x1537   : > { %v19967_v58 = vpop.eup %19966  ;;  %18953 = vmatmul.mubr.msk.bf16.vlgmr.msra.gmra.mrb[0].mxu0 %vm1692_vm3, %v14162_v7  ;;  %v14104_v31 = vpop.xlane.xlu1 %14103  ;;  %v14148_v13 = vmul.f32 %v19965_v59, %v24451_v27  ;;  %v26054_v27 = vld [vmem:[#allocation92_spill] sm:$0xff]  ;;  %v26067_v59 = vld [vmem:[#allocation109_spill] sm:$0xff] }
0x1538   : > { %v14147_v37 = vmul.f32 %v19967_v58, %v24453_v9  ;;  %18963 = vmatpush3.bf16.msra.mxu0 %v14468_v24  ;;  %19970 = vrcp.f32 %v14104_v31  ;;  %19310 = vrot.lane.b32.xlu1 %v26050_v61, %s20273_s27  ;;  %v26056_v42 = vpack.i.bf16 %v26054_v27, %v26055_v6  ;;  %v26068_v58 = vpack.i.bf16 %v26066_v51, %v26067_v59  ;;  %v26072_v61 = vld [vmem:[#allocation124_spill] sm:$0xff]  ;;  %v26079_v27 = vld [vmem:[#allocation125_spill] sm:$0xff] }
0x1539   : > { %19245 = vrot.lane.b32.xlu0 %v26053_v15, %s20270_s24  ;;  %18964 = vmatprep.mubr.msk.bf16.mxu0 %vm20267_vm0, %v25704_v11  ;;  %v14164_v25 = vpack.c.bf16 %v14148_v13, %v14148_v13  ;;  %v26073_v13 = vld [vmem:[#allocation123_spill] sm:$0xff] }
0x153a   : > { %v14163_v20 = vpack.c.bf16 %v14147_v37, %v14147_v37  ;;  %18974 = vmatprep.subr.bf16.mxu0 %v25704_v11  ;;  %v26069_v37 = vld [vmem:[#allocation54_spill] sm:$0xff]  ;;  %v26076_v15 = vld [vmem:[#allocation67_spill] sm:$0xff] }
0x153b   : > { %v14107_v9 = vpop.xlane.xlu0 %14106  ;;  %v14110_v45 = vpop.xlane.xlu1 %14109  ;;  %v26071_v34 = vpack.i.bf16 %v26069_v37, %v26070_v3 }
0x153c   : > { %19972 = vrcp.f32 %v14107_v9  ;;  %18959 = vmatmul.mubr.msk.bf16.vlgmr.msra.gmra.mrb[0].mxu1 %vm1692_vm3, %v14163_v20  ;;  %19320 = vrot.lane.b32.xlu1 %v26056_v42, %s20272_s20  ;;  %v26077_v20 = vpack.i.bf16 %v26075_v56, %v26076_v15 }
0x153d   : > { %18969 = vmatpush3.bf16.msra.mxu1 %v14516_v40  ;;  %19974 = vrcp.f32 %v14110_v45  ;;  %19255 = vrot.lane.b32.xlu0 %v19254_v18, %s20269_s22  ;;  %v26078_v40 = vld [vmem:[#allocation126_spill] sm:$0xff] }
0x153e   : > { %v19969_v19 = vpop.eup %19968  ;;  %18970 = vmatprep.mubr.msk.bf16.mxu1 %vm20267_vm0, %v25704_v11  ;;  %18980 = vmatprep.subr.bf16.mxu1 %v25704_v11  ;;  %v26080_v6 = vpack.i.bf16 %v26078_v40, %v26079_v27  ;;  %v26106_v40 = vld [vmem:[#allocation30_spill] sm:$0xff] }
0x153f   : > { %v14149_v48 = vmul.f32 %v19969_v19, %v24460_v29  ;;  %18965 = vmatmul.mubr.msk.bf16.vlgmr.msra.gmra.mrb[4].mxu0 %vm1692_vm3, %v14164_v25  ;;  %v14799_v42 = vpop.permute.xlu1 %14798  ;;  %v26081_v19 = vld [vmem:[#allocation70_spill] sm:$0xff] }
0x1540   : > { %18975 = vmatpush3.bf16.msra.mxu0 %v14564_v38  ;;  %19330 = vrot.lane.b32.xlu1 %v26059_v46, %s20272_s20  ;;  %v26082_v38 = vld [vmem:[#allocation69_spill] sm:$0xff]  ;;  %v26086_v46 = vpack.i.bf16 %v26084_v47, %v26085_v41 }
0x1541   : > { %v14165_v23 = vpack.c.bf16 %v14149_v48, %v14149_v48  ;;  %19265 = vrot.lane.b32.xlu0 %v19264_v50, %s20269_s22  ;;  %18976 = vmatprep.mubr.msk.bf16.mxu0 %vm20267_vm0, %v25704_v11  ;;  %v26063_v50 = vld [vmem:[#allocation52_spill] sm:$0xff]  ;;  %v26083_v48 = vpack.i.bf16 %v26081_v19, %v26082_v38 }
0x1542   : > { %v19971_v22 = vpop.eup %19970  ;;  %18986 = vmatprep.subr.bf16.mxu0 %v25704_v11  ;;  %v26065_v7 = vpack.i.bf16 %v26063_v50, %v26064_v17  ;;  %v26102_v17 = vpack.i.bf16 %v24309_v30, %v24307_v28 }
0x1543   : > { %v14150_v18 = vmul.f32 %v19971_v22, %v24464_v33  ;;  %v14113_v29 = vpop.xlane.xlu0 %14112  ;;  %v26091_v22 = vld [vmem:[#allocation99_spill] sm:$0xff] }
0x1544   : > { %19976 = vrcp.f32 %v14113_v29  ;;  %18971 = vmatmul.mubr.msk.bf16.vlgmr.msra.gmra.mrb[4].mxu1 %vm1692_vm3, %v14165_v23  ;;  %19340 = vrot.lane.b32.xlu1 %v26062_v57, %s20271_s26  ;;  %v26087_v23 = vld [vmem:[#allocation86_spill] sm:$0xff]  ;;  %v26097_v57 = vld [vmem:[#allocation115_spill] sm:$0xff] }
0x1545   : > { %v14166_v8 = vpack.c.bf16 %v14150_v18, %v14150_v18  ;;  %18981 = vmatpush3.bf16.msra.mxu1 %v14612_v54  ;;  %19275 = vrot.lane.b32.xlu0 %v26065_v7, %s20274_s10  ;;  %v26089_v0 = vpack.i.bf16 %v26087_v23, %v26088_v12  ;;  %v26093_v29 = vld [vmem:[#allocation102_spill] sm:$0xff]  ;;  %v26094_v54 = vld [vmem:[#allocation101_spill] sm:$0xff]  ;;  %v26098_v62 = vpack.i.bf16 %v26096_v36, %v26097_v57 }
0x1546   : > { %v19973_v33 = vpop.eup %19972  ;;  %18982 = vmatprep.mubr.msk.bf16.mxu1 %vm20267_vm0, %v25704_v11  ;;  %18992 = vmatprep.subr.bf16.mxu1 %v25704_v11  ;;  %v26095_v2 = vpack.i.bf16 %v26093_v29, %v26094_v54 }
0x1547   : > { %v19975_v16 = vpop.eup %19974  ;;  %v14151_v55 = vmul.f32 %v19973_v33, %v24471_v10  ;;  %18977 = vmatmul.mubr.msk.bf16.vlgmr.msra.gmra.mrb[8].mxu0 %vm1692_vm3, %v14166_v8  ;;  %v14708_v10 = vsel %vm1888_vm2, %v24498_v1, 0  ;;  %v14751_v43 = vpop.permute.xlu0 %14750 }
0x1548   : > { %18987 = vmatpush3.bf16.msra.mxu0 %v14660_v60  ;;  %19350 = vrot.lane.b32.xlu1 %v26068_v58, %s20271_s26  ;;  %v14152_v31 = vmul.f32 %v19975_v16, %v24469_v32  ;;  %v26074_v32 = vpack.i.bf16 %v26072_v61, %v26073_v13  ;;  %v14756_v45 = vsel %vm1888_vm2, %v14751_v43, 0 }
0x1549   : > { %v14167_v24 = vpack.c.bf16 %v14151_v55, %v14151_v55  ;;  %19285 = vrot.lane.b32.xlu0 %v26071_v34, %s20274_s10  ;;  %18988 = vmatprep.mubr.msk.bf16.mxu0 %vm20267_vm0, %v25704_v11  ;;  %v26104_v34 = vld [vmem:[#allocation28_spill] sm:$0xff] }
0x154a   : > { %18998 = vmatprep.subr.bf16.mxu0 %v25704_v11  ;;  %v14168_v26 = vpack.c.bf16 %v14152_v31, %v14152_v31 }
0x154c   : > { %18983 = vmatmul.mubr.msk.bf16.vlgmr.msra.gmra.mrb[8].mxu1 %vm1692_vm3, %v14167_v24  ;;  %19360 = vrot.lane.b32.xlu1 %v26074_v32, %s20270_s24  ;;  %v26103_v24 = vld [vmem:[#allocation14_spill] sm:$0xff] }
0x154d   : > { %18993 = vmatpush3.bf16.msra.mxu1 %v14708_v10  ;;  %19295 = vrot.lane.b32.xlu0 %v26077_v20, %s20273_s27 }
0x154e   : > { %v19977_v9 = vpop.eup %19976  ;;  %18994 = vmatprep.mubr.msk.bf16.mxu1 %vm20267_vm0, %v25704_v11  ;;  %19004 = vmatprep.subr.bf16.mxu1 %v25704_v11 }
0x154f   : > { %v14153_v1 = vmul.f32 %v19977_v9, %v24477_v44  ;;  %18989 = vmatmul.mubr.msk.bf16.vlgmr.msra.gmra.mrb[12].mxu0 %vm1692_vm3, %v14168_v26  ;;  %v14804_v44 = vsel %vm1888_vm2, %v14799_v42, 0 }
0x1550   : > { %18999 = vmatpush3.bf16.msra.mxu0 %v14756_v45  ;;  %19370 = vrot.lane.b32.xlu1 %v26080_v6, %s20270_s24 }
0x1551   : > { %v14169_v25 = vpack.c.bf16 %v14153_v1, %v14153_v1  ;;  %19305 = vrot.lane.b32.xlu0 %v26083_v48, %s20273_s27  ;;  %19000 = vmatprep.mubr.msk.bf16.mxu0 %vm20267_vm0, %v25704_v11  ;;  %v26105_v1 = vld [vmem:[#allocation43_spill] sm:$0xff] }
0x1552   : > { %19010 = vmatprep.subr.bf16.mxu0 %v25704_v11 }
0x1554   : > { %18995 = vmatmul.mubr.msk.bf16.vlgmr.msra.gmra.mrb[12].mxu1 %vm1692_vm3, %v14169_v25  ;;  %19380 = vrot.lane.b32.xlu1 %v19379_v39, %s20269_s22  ;;  %v26090_v39 = vld [vmem:[#allocation100_spill] sm:$0xff] }
0x1555   : > { %19005 = vmatpush3.bf16.msra.mxu1 %v14804_v44  ;;  %19315 = vrot.lane.b32.xlu0 %v26086_v46, %s20272_s20  ;;  %v26092_v18 = vpack.i.bf16 %v26090_v39, %v26091_v22 }
0x1556   : > { %19006 = vmatprep.mubr.msk.bf16.mxu1 %vm20267_vm0, %v25704_v11  ;;  %19016 = vmatprep.subr.bf16.mxu1 %v25704_v11 }
0x1558   : > { %19390 = vrot.lane.b32.xlu1 %v19389_v49, %s20269_s22  ;;  %v26100_v49 = vld [vmem:[#allocation117_spill] sm:$0xff] }
0x1559   : > { %19325 = vrot.lane.b32.xlu0 %v26089_v0, %s20272_s20  ;;  %v26101_v8 = vpack.i.bf16 %v26099_v53, %v26100_v49  ;;  %s16514_s20 = sshll.u32 %s20502_s19, 4 }
0x155a   : > { %s25417_s27 = scalar_lea.vmem [#allocation9], %s16514_s20 }
0x155b   : > { %s16410_s30 = sshll.u32 %s25417_s27, 4  ;;  %s25476_s30 = int_to_ptr.vmem [resolvable:$true] %s16410_s30 }
0x155d   : > { %19335 = vrot.lane.b32.xlu0 %v26092_v18, %s20271_s26 }
0x1561   : > { %19345 = vrot.lane.b32.xlu0 %v26095_v2, %s20271_s26  ;;  %s15978_s26 = sld [smem:[#allocation2]] }
0x1565   : > { %19355 = vrot.lane.b32.xlu0 %v26098_v62, %s20270_s24 }
0x1569   : > { %19365 = vrot.lane.b32.xlu0 %v26101_v8, %s20270_s24  ;;  %s20188_s24 = sshll.u32 %s20275_s8, 4  ;;  %s20189_s24 = int_to_ptr.vmem [resolvable:$false] %s20188_s24 }
0x156a   : > { %p20191_p5 = scmp.lt.s32.totalorder %s25476_s30, %s20189_s24 }
0x156d   : > { %19375 = vrot.lane.b32.xlu0 %v19374_v63, %s20269_s22 }
0x1570   : > { %v14116_v50 = vpop.xlane.xlu1 %14115 }
0x1571   : > { %19978 = vrcp.f32 %v14116_v50  ;;  %19385 = vrot.lane.b32.xlu0 %v26102_v17, %s20269_s22  ;;  %s20184_s22 = scalar_lea.vmem %s25476_s30, 256 }
0x1572   : > { %p20185_p11 = scmp.ne.s32.totalorder %s25476_s30, %s20184_s22 }
0x1574   : > { %v14122_v7 = vpop.xlane.xlu1 %14121  ;;  %p20186_p1 = pnand %p20185_p11, %p26119_p0 }
0x1576   : > { %p20187_p3 = pneg %p20186_p1 }
0x1578   : > { %v14119_v33 = vpop.xlane.xlu0 %14118  ;;  %v14895_v16 = vpop.permute.xlu1 %14894 }
0x1579   : > { %19980 = vrcp.f32 %v14119_v33 }
0x157a   : > { %19982 = vrcp.f32 %v14122_v7 }
0x157b   : > { %v19979_v60 = vpop.eup %19978 }
0x157c   : > { %v14154_v55 = vmul.f32 %v19979_v60, %v24490_v5  ;;  %v19161_v51 = vpop.permute.xlu1 %19160 }
0x157d   : > { %v19163_v35 = vunpack.i.h.bf16 %v19161_v51  ;;  %v19162_v63 = vunpack.i.l.bf16 %v19161_v51 }
0x157e   : > { %v14170_v59 = vpack.c.bf16 %v14154_v55, %v14154_v55 }
0x157f   : > { %v15399_v31 = vsel %vm955_vm1, %v26103_v24, %v19163_v35  ;;  %v15398_v10 = vsel %vm955_vm1, %v26104_v34, %v19162_v63  ;;  %v26107_v35 = vld [vmem:[#allocation13_spill] sm:$0xff] }
0x1580   : > { %19001 = vmatmul.mubr.msk.bf16.vlgmr.msra.gmra.mrb[16].mxu0 %vm1692_vm3, %v14170_v59  ;;  %v19171_v4 = vpop.permute.xlu1 %19170 }
0x1581   : > { %19012 = vmatprep.mubr.msk.bf16.mxu0 %vm20267_vm0, %v25704_v11  ;;  %v19173_v43 = vunpack.i.h.bf16 %v19171_v4  ;;  %v19172_v61 = vunpack.i.l.bf16 %v19171_v4 }
0x1583   : > { %v19981_v28 = vpop.eup %19980  ;;  %v15401_v45 = vsel %vm955_vm1, %v26105_v1, %v19173_v43  ;;  %v15400_v27 = vsel %vm955_vm1, %v26106_v40, %v19172_v61  ;;  %v26109_v1 = vld [vmem:[#allocation19_spill] sm:$0xff] }
0x1584   : > { %v14155_v30 = vmul.f32 %v19981_v28, %v24502_v14  ;;  %v19181_v58 = vpop.permute.xlu1 %19180  ;;  %v19983_v26 = vpop.eup %19982  ;;  %v14900_v14 = vsel %vm1888_vm2, %v14895_v16, 0  ;;  %v26108_v28 = vld [vmem:[#allocation16_spill] sm:$0xff]  ;;  %v26110_v40 = vld [vmem:[#allocation15_spill] sm:$0xff] }
0x1585   : > { %v19183_v5 = vunpack.i.h.bf16 %v19181_v58  ;;  %v19182_v37 = vunpack.i.l.bf16 %v19181_v58  ;;  %v14156_v6 = vmul.f32 %v19983_v26, %v24496_v52 }
0x1586   : > { %v14171_v3 = vpack.c.bf16 %v14155_v30, %v14155_v30 }
0x1587   : > { %v15415_v13 = vsel %vm15406_vm4, %v15398_v10, %v19182_v37  ;;  %v15416_v32 = vsel %vm15406_vm4, %v15399_v31, %v19183_v5 }
0x1588   : > { %v14125_v56 = vpop.xlane.xlu0 %14124  ;;  %19007 = vmatmul.mubr.msk.bf16.vlgmr.msra.gmra.mrb[16].mxu1 %vm1692_vm3, %v14171_v3  ;;  %v19191_v15 = vpop.permute.xlu1 %19190 }
0x1589   : > { %19984 = vrcp.f32 %v14125_v56  ;;  %19017 = vmatpush3.bf16.msra.mxu1 %v14900_v14  ;;  %v19193_v20 = vunpack.i.h.bf16 %v19191_v15  ;;  %v19192_v9 = vunpack.i.l.bf16 %v19191_v15  ;;  %19018 = vmatprep.mubr.msk.bf16.mxu1 %vm20267_vm0, %v25704_v11  ;;  %v14172_v11 = vpack.c.bf16 %v14156_v6, %v14156_v6 }
0x158b   : > { %v15417_v42 = vsel %vm15406_vm4, %v15400_v27, %v19192_v9  ;;  %v15418_v25 = vsel %vm15406_vm4, %v15401_v45, %v19193_v20 }
0x158c   : > { %v14847_v19 = vpop.permute.xlu0 %14846  ;;  %v19201_v38 = vpop.permute.xlu1 %19200 }
0x158d   : > { %v14852_v48 = vsel %vm1888_vm2, %v14847_v19, 0  ;;  %v19203_v44 = vunpack.i.h.bf16 %v19201_v38  ;;  %v19202_v47 = vunpack.i.l.bf16 %v19201_v38 }
0x158e   : > { %19011 = vmatpush3.bf16.msra.mxu0 %v14852_v48 }
0x158f   : > { %v15432_v41 = vsel %vm15423_vm5, %v15415_v13, %v19202_v47  ;;  %v15433_v46 = vsel %vm15423_vm5, %v15416_v32, %v19203_v44 }
0x1590   : > { %v19156_v23 = vpop.permute.xlu0 %19155  ;;  %v19211_v12 = vpop.permute.xlu1 %19210 }
0x1591   : > { %v19213_v52 = vunpack.i.h.bf16 %v19211_v12  ;;  %v19212_v0 = vunpack.i.l.bf16 %v19211_v12  ;;  %19013 = vmatmul.mubr.msk.bf16.vlgmr.msra.gmra.mrb[20].mxu0 %vm1692_vm3, %v14172_v11  ;;  %v19158_v16 = vunpack.i.h.bf16 %v19156_v23  ;;  %v19157_v60 = vunpack.i.l.bf16 %v19156_v23 }
0x1593   : > { %v19985_v39 = vpop.eup %19984  ;;  %v15434_v22 = vsel %vm15423_vm5, %v15417_v42, %v19212_v0  ;;  %v15435_v18 = vsel %vm15423_vm5, %v15418_v25, %v19213_v52  ;;  %v15391_v63 = vsel %vm955_vm1, %v26107_v35, %v19158_v16  ;;  %v15390_v30 = vsel %vm955_vm1, %v26108_v28, %v19157_v60  ;;  %v26114_v16 = vld [vmem:[#allocation44_spill] sm:$0xff] }
0x1594   : > { %v14157_v29 = vmul.f32 %v19985_v39, %v24509_v21  ;;  %v19166_v54 = vpop.permute.xlu0 %19165  ;;  %v19221_v2 = vpop.permute.xlu1 %19220 }
0x1595   : > { %v19223_v36 = vunpack.i.h.bf16 %v19221_v2  ;;  %v19222_v57 = vunpack.i.l.bf16 %v19221_v2  ;;  %v19168_v58 = vunpack.i.h.bf16 %v19166_v54  ;;  %v19167_v24 = vunpack.i.l.bf16 %v19166_v54  ;;  %v26111_v2 = vld [vmem:[#allocation45_spill] sm:$0xff] }
0x1596   : > { %v14173_v62 = vpack.c.bf16 %v14157_v29, %v14157_v29 }
0x1597   : > { %v24821_v53 = vsel %vm15440_vm6, %v15432_v41, %v19222_v57  ;;  %v24824_v49 = vsel %vm15440_vm6, %v15433_v46, %v19223_v36  ;;  %v15393_v45 = vsel %vm955_vm1, %v26109_v1, %v19168_v58  ;;  %v15392_v27 = vsel %vm955_vm1, %v26110_v40, %v19167_v24  ;;  %v26112_v57 = vld [vmem:[#allocation42_spill] sm:$0xff] }
0x1598   : > { %v19176_v8 = vpop.permute.xlu0 %19175  ;;  %19019 = vmatmul.mubr.msk.bf16.vlgmr.msra.gmra.mrb[20].mxu1 %vm1692_vm3, %v14173_v62  ;;  %v19231_v50 = vpop.permute.xlu1 %19230 }
0x1599   : > { %v19233_v17 = vunpack.i.h.bf16 %v19231_v50  ;;  %v19232_v7 = vunpack.i.l.bf16 %v19231_v50  ;;  %v19178_v59 = vunpack.i.h.bf16 %v19176_v8  ;;  %v19177_v4 = vunpack.i.l.bf16 %v19176_v8 }
0x159b   : > { %v15451_v21 = vsel %vm15440_vm6, %v15434_v22, %v19232_v7  ;;  %v15452_v33 = vsel %vm15440_vm6, %v15435_v18, %v19233_v17  ;;  %v15407_v43 = vsel %vm15406_vm4, %v15390_v30, %v19177_v4  ;;  %v15408_v61 = vsel %vm15406_vm4, %v15391_v63, %v19178_v59 }
0x159c   : > { %v19186_v55 = vpop.permute.xlu0 %19185  ;;  %v24829_v51 = vpop.permute.xlu1 %19240 }
0x159d   : > { %v19188_v13 = vunpack.i.h.bf16 %v19186_v55  ;;  %v19187_v32 = vunpack.i.l.bf16 %v19186_v55 }
0x159f   : > { %v15409_v25 = vsel %vm15406_vm4, %v15392_v27, %v19187_v32  ;;  %v15410_v19 = vsel %vm15406_vm4, %v15393_v45, %v19188_v13 }
0x15a0   : > { %v19196_v31 = vpop.permute.xlu0 %19195  ;;  %v19251_v5 = vpop.permute.xlu1 %19250 }
0x15a1   : > { %v19198_v37 = vunpack.i.h.bf16 %v19196_v31  ;;  %v19197_v3 = vunpack.i.l.bf16 %v19196_v31  ;;  %v19253_v34 = vunpack.i.h.bf16 %v19251_v5  ;;  %v19252_v10 = vunpack.i.l.bf16 %v19251_v5 }
0x15a3   : > { %v15424_v26 = vsel %vm15423_vm5, %v15407_v43, %v19197_v3  ;;  %v15425_v14 = vsel %vm15423_vm5, %v15408_v61, %v19198_v37  ;;  %v24840_v56 = vsel %vm15457_vm7, %v15451_v21, %v19252_v10  ;;  %v24843_v15 = vsel %vm15457_vm7, %v15452_v33, %v19253_v34  ;;  %v26113_v21 = vld [vmem:[#allocation46_spill] sm:$0xff] }
0x15a4   : > { %v19206_v20 = vpop.permute.xlu0 %19205  ;;  %v24845_v9 = vpop.permute.xlu1 %19260 }
0x15a5   : > { %v19208_v6 = vunpack.i.h.bf16 %v19206_v20  ;;  %v19207_v42 = vunpack.i.l.bf16 %v19206_v20 }
0x15a7   : > { %v15426_v38 = vsel %vm15423_vm5, %v15409_v25, %v19207_v42  ;;  %v15427_v48 = vsel %vm15423_vm5, %v15410_v19, %v19208_v6 }
0x15a8   : > { %v19216_v44 = vpop.permute.xlu0 %19215  ;;  %v24855_v47 = vpop.permute.xlu1 %19270 }
0x15a9   : > { %v19218_v11 = vunpack.i.h.bf16 %v19216_v44  ;;  %v19217_v41 = vunpack.i.l.bf16 %v19216_v44 }
0x15ab   : > { %v24858_v46 = vsel %vm15440_vm6, %v15424_v26, %v19217_v41  ;;  %v24861_v23 = vsel %vm15440_vm6, %v15425_v14, %v19218_v11 }
0x15ac   : > { %v19226_v12 = vpop.permute.xlu0 %19225  ;;  %v19281_v52 = vpop.permute.xlu1 %19280 }
0x15ad   : > { %v19228_v0 = vunpack.i.h.bf16 %v19226_v12  ;;  %v19227_v39 = vunpack.i.l.bf16 %v19226_v12  ;;  %v19283_v22 = vunpack.i.h.bf16 %v19281_v52  ;;  %v19282_v18 = vunpack.i.l.bf16 %v19281_v52 }
0x15af   : > { %v15443_v29 = vsel %vm15440_vm6, %v15426_v38, %v19227_v39  ;;  %v15444_v54 = vsel %vm15440_vm6, %v15427_v48, %v19228_v0  ;;  %v15403_v36 = vsel %vm955_vm1, %v26111_v2, %v19283_v22  ;;  %v15402_v62 = vsel %vm955_vm1, %v26112_v57, %v19282_v18 }
0x15b0   : > { %v24869_v8 = vpop.permute.xlu0 %19235  ;;  %v19291_v50 = vpop.permute.xlu1 %19290 }
0x15b1   : > { %v19293_v17 = vunpack.i.h.bf16 %v19291_v50  ;;  %v19292_v7 = vunpack.i.l.bf16 %v19291_v50 }
0x15b3   : > { %v15405_v33 = vsel %vm955_vm1, %v26113_v21, %v19293_v17  ;;  %v15404_v60 = vsel %vm955_vm1, %v26114_v16, %v19292_v7  ;;  %v19466_v21 = vld [vmem:[#allocation8] sm:$0xff]   ;;  %v19468_v16 = vld [vmem:[#allocation8 + $0x10] sm:$0xff]  }
0x15b4   : > { %v19246_v55 = vpop.permute.xlu0 %19245  ;;  %v19301_v59 = vpop.permute.xlu1 %19300  ;;  %19022 = vmatprep.subr.bf16.mxu0 %v19466_v21  ;;  %19054 = vmatprep.subr.bf16.mxu1 %v19466_v21 }
0x15b5   : > { %v19248_v4 = vunpack.i.h.bf16 %v19246_v55  ;;  %v19247_v35 = vunpack.i.l.bf16 %v19246_v55  ;;  %v19303_v63 = vunpack.i.h.bf16 %v19301_v59  ;;  %v19302_v28 = vunpack.i.l.bf16 %v19301_v59  ;;  %19023 = vmatpush3.bf16.msra.mxu0 %v19466_v21  ;;  %19062 = vmatpush3.bf16.msra.mxu1 %v19466_v21  ;;  %v19470_v55 = vld [vmem:[#allocation8 + $0x20] sm:$0xff]  }
0x15b7   : > { %v24876_v30 = vsel %vm15457_vm7, %v15443_v29, %v19247_v35  ;;  %v24879_v58 = vsel %vm15457_vm7, %v15444_v54, %v19248_v4  ;;  %v15419_v24 = vsel %vm15406_vm4, %v15402_v62, %v19302_v28  ;;  %v15420_v31 = vsel %vm15406_vm4, %v15403_v36, %v19303_v63  ;;  %v19471_v35 = vld [vmem:[#allocation8 + $0x28] sm:$0xff]   ;;  %v19472_v28 = vld [vmem:[#allocation8 + $0x30] sm:$0xff]  }
0x15b8   : > { %v19311_v5 = vpop.permute.xlu1 %19310 }
0x15b9   : > { %v19313_v37 = vunpack.i.h.bf16 %v19311_v5  ;;  %v19312_v3 = vunpack.i.l.bf16 %v19311_v5 }
0x15bb   : > { %v15421_v34 = vsel %vm15406_vm4, %v15404_v60, %v19312_v3  ;;  %v15422_v10 = vsel %vm15406_vm4, %v15405_v33, %v19313_v37  ;;  %v19467_v33 = vld [vmem:[#allocation8 + $0x8] sm:$0xff]   ;;  %v19469_v60 = vld [vmem:[#allocation8 + $0x18] sm:$0xff]  }
0x15bc   : > { %v19321_v43 = vpop.permute.xlu1 %19320  ;;  %19024 = vmatprep.subr.bf16.mxu0 %v19467_v33  ;;  %19055 = vmatprep.subr.bf16.mxu1 %v19467_v33  ;;  %v19473_v3 = vld [vmem:[#allocation8 + $0x38] sm:$0xff]  }
0x15bd   : > { %v19323_v61 = vunpack.i.h.bf16 %v19321_v43  ;;  %v19322_v13 = vunpack.i.l.bf16 %v19321_v43  ;;  %19025 = vmatpush3.bf16.msra.mxu0 %v19467_v33  ;;  %19063 = vmatpush3.bf16.msra.mxu1 %v19467_v33 }
0x15be   : > { %19026 = vmatprep.subr.bf16.mxu0 %v19468_v16  ;;  %19056 = vmatprep.subr.bf16.mxu1 %v19468_v16 }
0x15bf   : > { %v15436_v32 = vsel %vm15423_vm5, %v15419_v24, %v19322_v13  ;;  %v15437_v26 = vsel %vm15423_vm5, %v15420_v31, %v19323_v61 }
0x15c0   : > { %v19331_v14 = vpop.permute.xlu1 %19330 }
0x15c1   : > { %v19333_v20 = vunpack.i.h.bf16 %v19331_v14  ;;  %v19332_v1 = vunpack.i.l.bf16 %v19331_v14  ;;  %19027 = vmatpush3.bf16.msra.mxu0 %v19468_v16  ;;  %19064 = vmatpush3.bf16.msra.mxu1 %v19468_v16 }
0x15c2   : > { %19028 = vmatprep.subr.bf16.mxu0 %v19469_v60  ;;  %19057 = vmatprep.subr.bf16.mxu1 %v19469_v60 }
0x15c3   : > { %v15438_v45 = vsel %vm15423_vm5, %v15421_v34, %v19332_v1  ;;  %v15439_v40 = vsel %vm15423_vm5, %v15422_v10, %v19333_v20 }
0x15c4   : > { %v19341_v27 = vpop.permute.xlu1 %19340 }
0x15c5   : > { %v19343_v6 = vunpack.i.h.bf16 %v19341_v27  ;;  %v19342_v42 = vunpack.i.l.bf16 %v19341_v27  ;;  %19029 = vmatpush3.bf16.msra.mxu0 %v19469_v60  ;;  %19065 = vmatpush3.bf16.msra.mxu1 %v19469_v60  ;;  %v19256_v60 = vpop.permute.xlu0 %19255 }
0x15c6   : > { %19030 = vmatprep.subr.bf16.mxu0 %v19470_v55  ;;  %19058 = vmatprep.subr.bf16.mxu1 %v19470_v55 }
0x15c7   : > { %v15453_v25 = vsel %vm15440_vm6, %v15436_v32, %v19342_v42  ;;  %v15454_v19 = vsel %vm15440_vm6, %v15437_v26, %v19343_v6 }
0x15c8   : > { %v19351_v38 = vpop.permute.xlu1 %19350 }
0x15c9   : > { %v19353_v48 = vunpack.i.h.bf16 %v19351_v38  ;;  %v19352_v44 = vunpack.i.l.bf16 %v19351_v38  ;;  %19031 = vmatpush3.bf16.msra.mxu0 %v19470_v55  ;;  %19066 = vmatpush3.bf16.msra.mxu1 %v19470_v55 }
0x15ca   : > { %19032 = vmatprep.subr.bf16.mxu0 %v19471_v35  ;;  %19059 = vmatprep.subr.bf16.mxu1 %v19471_v35 }
0x15cb   : > { %v15455_v11 = vsel %vm15440_vm6, %v15438_v45, %v19352_v44  ;;  %v15456_v41 = vsel %vm15440_vm6, %v15439_v40, %v19353_v48 }
0x15cc   : > { %v19361_v12 = vpop.permute.xlu1 %19360 }
0x15cd   : > { %v19363_v52 = vunpack.i.h.bf16 %v19361_v12  ;;  %v19362_v0 = vunpack.i.l.bf16 %v19361_v12  ;;  %19033 = vmatpush3.bf16.msra.mxu0 %v19471_v35  ;;  %19067 = vmatpush3.bf16.msra.mxu1 %v19471_v35 }
0x15ce   : > { %19034 = vmatprep.subr.bf16.mxu0 %v19472_v28  ;;  %19060 = vmatprep.subr.bf16.mxu1 %v19472_v28 }
0x15cf   : > { %v15470_v39 = vsel %vm15457_vm7, %v15453_v25, %v19362_v0  ;;  %v15471_v22 = vsel %vm15457_vm7, %v15454_v19, %v19363_v52 }
0x15d0   : > { %v19371_v18 = vpop.permute.xlu1 %19370 }
0x15d1   : > { %v19373_v29 = vunpack.i.h.bf16 %v19371_v18  ;;  %v19372_v54 = vunpack.i.l.bf16 %v19371_v18  ;;  %19035 = vmatpush3.bf16.msra.mxu0 %v19472_v28  ;;  %19068 = vmatpush3.bf16.msra.mxu1 %v19472_v28 }
0x15d2   : > { %19036 = vmatprep.subr.bf16.mxu0 %v19473_v3  ;;  %19061 = vmatprep.subr.bf16.mxu1 %v19473_v3 }
0x15d3   : > { %v24896_v2 = vsel %vm15457_vm7, %v15455_v11, %v19372_v54  ;;  %v24899_v36 = vsel %vm15457_vm7, %v15456_v41, %v19373_v29 }
0x15d4   : > { %v19381_v57 = vpop.permute.xlu1 %19380 }
0x15d5   : > { %v19383_v62 = vunpack.i.h.bf16 %v19381_v57  ;;  %v19382_v50 = vunpack.i.l.bf16 %v19381_v57  ;;  %19037 = vmatpush3.bf16.msra.mxu0 %v19473_v3  ;;  %19069 = vmatpush3.bf16.msra.mxu1 %v19473_v3 }
0x15d7   : > { %v24902_v17 = vsel %vm15474_vm8, %v15470_v39, %v19382_v50  ;;  %v24905_v7 = vsel %vm15474_vm8, %v15471_v22, %v19383_v62 }
0x15f3   : > { %v14216_v59 = vpop.f32.mrb[248].mxu0 }
0x15f4   : > { %v18930_v4 = vpop.f32.mrb[249].mxu0 }
0x15f5   : > { %v14219_v63 = vpop.f32.mrb[250].mxu0 }
0x15f6   : > { %v18931_v24 = vpop.f32.mrb[251].mxu0 }
0x15f7   : > { %v24912_v24 = vpop.permute.xlu0 %19265 }
0x15fb   : > { %v14312_v31 = vpop.f32.mrb[252].mxu0 }
0x15fc   : > { %v18942_v5 = vpop.f32.mrb[253].mxu0 }
0x15fd   : > { %v14315_v37 = vpop.f32.mrb[254].mxu0 }
0x15fe   : > { %v14264_v34 = vpop.f32.mrb[248].mxu1  ;;  %v18943_v10 = vpop.f32.mrb[255].mxu0 }
0x15ff   : > { %v19394_v43 = vpack.i.bf16 %v14264_v34, %v14216_v59  ;;  %v18936_v61 = vpop.f32.mrb[249].mxu1  ;;  %v24915_v10 = vpop.permute.xlu0 %19275 }
0x1600   : > { %v14267_v13 = vpop.f32.mrb[250].mxu1 }
0x1601   : > { %19395 = vrot.lane.b32.xlu0 %v19394_v43, %s20268_s15  ;;  %v18937_v32 = vpop.f32.mrb[251].mxu1 }
0x1603   : > { %v24917_v43 = vpop.permute.xlu0 %19285 }
0x1606   : > { %v14360_v26 = vpop.f32.mrb[252].mxu1 }
0x1607   : > { %v19399_v14 = vpack.i.bf16 %v14360_v26, %v14312_v31  ;;  %v18948_v20 = vpop.f32.mrb[253].mxu1  ;;  %v24919_v61 = vpop.permute.xlu0 %19295 }
0x1608   : > { %v14363_v1 = vpop.f32.mrb[254].mxu1 }
0x1609   : > { %19400 = vrot.lane.b32.xlu0 %v19399_v14, %s20268_s15  ;;  %v18949_v45 = vpop.f32.mrb[255].mxu1 }
0x160a   : > { %v14408_v40 = vpop.f32.mrb[0].mxu0 }
0x160b   : > { %v18954_v27 = vpop.f32.mrb[1].mxu0  ;;  %v24921_v13 = vpop.permute.xlu0 %19305 }
0x160c   : > { %v14411_v6 = vpop.f32.mrb[2].mxu0 }
0x160d   : > { %v18955_v42 = vpop.f32.mrb[3].mxu0 }
0x160f   : > { %v14456_v25 = vpop.f32.mrb[0].mxu1  ;;  %v24923_v32 = vpop.permute.xlu0 %19315 }
0x1610   : > { %v19404_v19 = vpack.i.bf16 %v14456_v25, %v14408_v40  ;;  %v18960_v38 = vpop.f32.mrb[1].mxu1 }
0x1611   : > { %v14459_v48 = vpop.f32.mrb[2].mxu1 }
0x1612   : > { %19405 = vrot.lane.b32.xlu0 %v19404_v19, %s20268_s15  ;;  %v18961_v44 = vpop.f32.mrb[3].mxu1  ;;  %v14504_v11 = vpop.f32.mrb[4].mxu0 }
0x1613   : > { %v18966_v41 = vpop.f32.mrb[5].mxu0  ;;  %v24925_v26 = vpop.permute.xlu0 %19325 }
0x1614   : > { %v14507_v12 = vpop.f32.mrb[6].mxu0 }
0x1615   : > { %v18967_v52 = vpop.f32.mrb[7].mxu0 }
0x1617   : > { %v14552_v0 = vpop.f32.mrb[4].mxu1  ;;  %v24927_v14 = vpop.permute.xlu0 %19335 }
0x1618   : > { %v19409_v39 = vpack.i.bf16 %v14552_v0, %v14504_v11  ;;  %v18972_v22 = vpop.f32.mrb[5].mxu1 }
0x1619   : > { %v14555_v18 = vpop.f32.mrb[6].mxu1 }
0x161a   : > { %19410 = vrot.lane.b32.xlu0 %v19409_v39, %s20268_s15  ;;  %v18973_v29 = vpop.f32.mrb[7].mxu1  ;;  %v14600_v54 = vpop.f32.mrb[8].mxu0 }
0x161b   : > { %v18978_v57 = vpop.f32.mrb[9].mxu0  ;;  %v24929_v27 = vpop.permute.xlu0 %19345 }
0x161c   : > { %v14603_v62 = vpop.f32.mrb[10].mxu0 }
0x161d   : > { %v18979_v50 = vpop.f32.mrb[11].mxu0  ;;  %v19238_v62 = vunpack.i.h.bf16 %v24869_v8 }
0x161e   : > { %v19237_v50 = vunpack.i.l.bf16 %v24869_v8 }
0x161f   : > { %v14648_v21 = vpop.f32.mrb[8].mxu1  ;;  %v24931_v19 = vpop.permute.xlu0 %19355 }
0x1620   : > { %v19414_v33 = vpack.i.bf16 %v14648_v21, %v14600_v54  ;;  %v18984_v16 = vpop.f32.mrb[9].mxu1  ;;  %v19258_v21 = vunpack.i.h.bf16 %v19256_v60 }
0x1621   : > { %v14651_v55 = vpop.f32.mrb[10].mxu1 }
0x1622   : > { %19415 = vrot.lane.b32.xlu1 %v19414_v33, %s20268_s15  ;;  %v18985_v59 = vpop.f32.mrb[11].mxu1  ;;  %v14696_v4 = vpop.f32.mrb[12].mxu0  ;;  %v19257_v33 = vunpack.i.l.bf16 %v19256_v60  ;;  %v15458_v55 = vsel %vm15457_vm7, %v24858_v46, %v19237_v50  ;;  %v19268_v60 = vunpack.i.h.bf16 %v24912_v24 }
0x1623   : > { %v18990_v35 = vpop.f32.mrb[13].mxu0  ;;  %v24934_v44 = vpop.permute.xlu0 %19365  ;;  %v15459_v59 = vsel %vm15457_vm7, %v24861_v23, %v19238_v62  ;;  %v19287_v62 = vunpack.i.l.bf16 %v24917_v43 }
0x1624   : > { %v14699_v63 = vpop.f32.mrb[14].mxu0 }
0x1625   : > { %v18991_v28 = vpop.f32.mrb[15].mxu0  ;;  %v15475_v63 = vsel %vm15474_vm8, %v15458_v55, %v19257_v33 }
0x1626   : > { %v15476_v28 = vsel %vm15474_vm8, %v15459_v59, %v19258_v21 }
0x1627   : > { %v14744_v31 = vpop.f32.mrb[12].mxu1  ;;  %v24936_v0 = vpop.permute.xlu0 %19375 }
0x1628   : > { %v19419_v5 = vpack.i.bf16 %v14744_v31, %v14696_v4  ;;  %v18996_v37 = vpop.f32.mrb[13].mxu1 }
0x1629   : > { %v14747_v3 = vpop.f32.mrb[14].mxu1  ;;  %v19267_v37 = vunpack.i.l.bf16 %v24912_v24 }
0x162a   : > { %19420 = vrot.lane.b32.xlu1 %v19419_v5, %s20268_s15  ;;  %v18997_v34 = vpop.f32.mrb[15].mxu1 }
0x162b   : > { %v24939_v57 = vpop.permute.xlu0 %19385  ;;  %v15477_v23 = vsel %vm15474_vm8, %v24876_v30, %v19267_v37 }
0x1653   : > { %v14792_v20 = vpop.f32.mrb[16].mxu0 }
0x1654   : > { %v19002_v1 = vpop.f32.mrb[17].mxu0 }
0x1655   : > { %v14795_v45 = vpop.f32.mrb[18].mxu0  ;;  %v19278_v1 = vunpack.i.h.bf16 %v24915_v10 }
0x1656   : > { %v19003_v40 = vpop.f32.mrb[19].mxu0  ;;  %v19277_v45 = vunpack.i.l.bf16 %v24915_v10 }
0x1657   : > { %v19298_v40 = vunpack.i.h.bf16 %v24919_v61 }
0x165b   : > { %v14840_v6 = vpop.f32.mrb[16].mxu1 }
0x165c   : > { %v19424_v42 = vpack.i.bf16 %v14840_v6, %v14792_v20  ;;  %v19008_v25 = vpop.f32.mrb[17].mxu1  ;;  %v15478_v20 = vsel %vm15474_vm8, %v24879_v58, %v19268_v60  ;;  %v19297_v6 = vunpack.i.l.bf16 %v24919_v61  ;;  %v19337_v58 = vunpack.i.l.bf16 %v24927_v14 }
0x165d   : > { %v14843_v38 = vpop.f32.mrb[18].mxu1  ;;  %v19318_v25 = vunpack.i.h.bf16 %v24923_v32  ;;  %v19358_v61 = vunpack.i.h.bf16 %v24931_v19  ;;  %v19347_v60 = vunpack.i.l.bf16 %v24929_v27 }
0x165e   : > { %19425 = vrot.lane.b32.xlu1 %v19424_v42, %s20268_s15  ;;  %v19009_v48 = vpop.f32.mrb[19].mxu1  ;;  %v19317_v38 = vunpack.i.l.bf16 %v24923_v32 }
0x165f   : > { %v19338_v48 = vunpack.i.h.bf16 %v24927_v14 }
0x1664   : > { %v14888_v11 = vpop.f32.mrb[20].mxu0 }
0x1665   : > { %v19014_v41 = vpop.f32.mrb[21].mxu0 }
0x1666   : > { %v14891_v12 = vpop.f32.mrb[22].mxu0  ;;  %v26116_v41 = vld [vmem:[#allocation21_spill] sm:$0xff] }
0x1667   : > { %v19015_v52 = vpop.f32.mrb[23].mxu0  ;;  %v15394_v12 = vsel %vm955_vm1, %v26116_v41, %v19277_v45  ;;  %v19388_v45 = vunpack.i.h.bf16 %v24939_v57  ;;  %v19391_v41 = vpop.permute.xlu1 %19390 }
0x1668   : > { %v19357_v52 = vunpack.i.l.bf16 %v24931_v19 }
0x166b   : > { %v14936_v39 = vpop.f32.mrb[20].mxu1 }
0x166c   : > { %v19429_v22 = vpack.i.bf16 %v14936_v39, %v14888_v11  ;;  %v19020_v18 = vpop.f32.mrb[21].mxu1  ;;  %v26115_v11 = vld [vmem:[#allocation23_spill] sm:$0xff]  ;;  %v15411_v39 = vsel %vm15406_vm4, %v15394_v12, %v19297_v6 }
0x166d   : > { %v14939_v29 = vpop.f32.mrb[22].mxu1  ;;  %v15395_v10 = vsel %vm955_vm1, %v26115_v11, %v19278_v1  ;;  %v19377_v18 = vunpack.i.l.bf16 %v24936_v0  ;;  %v15428_v14 = vsel %vm15423_vm5, %v15411_v39, %v19317_v38  ;;  %v19263_v39 = vunpack.i.h.bf16 %v24845_v9 }
0x166e   : > { %19430 = vrot.lane.b32.xlu1 %v19429_v22, %s20268_s15  ;;  %v19021_v54 = vpop.f32.mrb[23].mxu1  ;;  %v15412_v32 = vsel %vm15406_vm4, %v15395_v10, %v19298_v40  ;;  %v19378_v22 = vunpack.i.h.bf16 %v24936_v0  ;;  %v15445_v50 = vsel %vm15440_vm6, %v15428_v14, %v19337_v58  ;;  %v19308_v0 = vunpack.i.h.bf16 %v24921_v13  ;;  %s16397_s15 = scalar_lea.sflag [#allocation5], %s20502_s19 }
0x166f   : > { %v15429_v29 = vsel %vm15423_vm5, %v15412_v32, %v19318_v25  ;;  %v19288_v54 = vunpack.i.h.bf16 %v24917_v43  ;;  %v15462_v33 = vsel %vm15457_vm7, %v15445_v50, %v19357_v52  ;;  %v19328_v43 = vunpack.i.h.bf16 %v24925_v26 }
0x1670   : > { %v15446_v19 = vsel %vm15440_vm6, %v15429_v29, %v19338_v48  ;;  %v19387_v40 = vunpack.i.l.bf16 %v24939_v57  ;;  %v19242_v52 = vunpack.i.l.bf16 %v24829_v51  ;;  %v19262_v32 = vunpack.i.l.bf16 %v24845_v9 }
0x1671   : > { %v19273_v9 = vunpack.i.h.bf16 %v24855_v47 }
0x1673   : > { %v19396_v16 = vpop.permute.xlu0 %19395 }
0x1674   : > { %v19398_v4 = vunpack.i.h.bf16 %v19396_v16  ;;  %v19397_v35 = vunpack.i.l.bf16 %v19396_v16  ;;  %v15463_v16 = vsel %vm15457_vm7, %v15446_v19, %v19358_v61  ;;  %v19243_v61 = vunpack.i.h.bf16 %v24829_v51 }
0x1676   : > { %v15492_v31 = vsel %vm15491_vm9, %v15475_v63, %v19397_v35  ;;  %v15493_v8 = vsel %vm15491_vm9, %v15476_v28, %v19398_v4  ;;  %v19307_v4 = vunpack.i.l.bf16 %v24921_v13  ;;  %v15479_v35 = vsel %vm15474_vm8, %v15462_v33, %v19377_v18 }
0x1677   : > { %v15508_v5 = vpack.c.bf16 %v15493_v8, %v15492_v31  ;;  %v15480_v63 = vsel %vm15474_vm8, %v15463_v16, %v19378_v22  ;;  %v19327_v28 = vunpack.i.l.bf16 %v24925_v26  ;;  %v15466_v18 = vsel %vm15457_vm7, %v24821_v53, %v19242_v52 }
0x1678   : > { %v15467_v14 = vsel %vm15457_vm7, %v24824_v49, %v19243_v61  ;;  %v19272_v33 = vunpack.i.l.bf16 %v24855_v47 }
0x1679   : > { %19038 = vmatprep.mubr.bf16.mxu0 %v15508_v5  ;;  %v19348_v5 = vunpack.i.h.bf16 %v24929_v27  ;;  %v15484_v50 = vsel %vm15474_vm8, %v15467_v14, %v19263_v39  ;;  %v20087_v39 = vld [vmem:[%s20506_s23 + $0x38] sm:$0xff] }
0x167a   : > { %v15485_v49 = vsel %vm15474_vm8, %v24840_v56, %v19272_v33  ;;  %v19393_v56 = vunpack.i.h.bf16 %v19391_v41 }
0x167b   : > { %v19401_v46 = vpop.permute.xlu0 %19400 }
0x167c   : > { %v19403_v3 = vunpack.i.h.bf16 %v19401_v46  ;;  %v19402_v34 = vunpack.i.l.bf16 %v19401_v46  ;;  %v26117_v46 = vld [vmem:[#allocation27_spill] sm:$0xff] }
0x167d   : > { %v15397_v13 = vsel %vm955_vm1, %v26117_v46, %v19288_v54 }
0x167e   : > { %v15495_v24 = vsel %vm15491_vm9, %v15478_v20, %v19403_v3  ;;  %v15494_v42 = vsel %vm15491_vm9, %v15477_v23, %v19402_v34  ;;  %v26118_v3 = vld [vmem:[#allocation26_spill] sm:$0xff]  ;;  %v19368_v23 = vunpack.i.h.bf16 %v24934_v44  ;;  %v19367_v20 = vunpack.i.l.bf16 %v24934_v44 }
0x167f   : > { %v15509_v30 = vpack.c.bf16 %v15495_v24, %v15494_v42  ;;  %v15396_v34 = vsel %vm955_vm1, %v26118_v3, %v19287_v62  ;;  %v15414_v1 = vsel %vm15406_vm4, %v15397_v13, %v19308_v0  ;;  %v15483_v62 = vsel %vm15474_vm8, %v15466_v18, %v19262_v32  ;;  %v20088_v18 = vld [vmem:[%s20506_s23 + $0x20] sm:$0xff] }
0x1680   : > { %v15413_v26 = vsel %vm15406_vm4, %v15396_v34, %v19307_v4  ;;  %v15431_v6 = vsel %vm15423_vm5, %v15414_v1, %v19328_v43  ;;  %v15490_v13 = vsel %vm15474_vm8, %v24899_v36, %v19393_v56  ;;  %v25048_v34 = vld [vmem:[%s25527_s4] ss:$0 sm:$0xff]  ;;  %v20082_v36 = vld [vmem:[%s20506_s23 + $0x10] sm:$0xff] }
0x1681   : > { %19039 = vmatmul.mubr.bf16.vlgmr.msra.gmra.mrb[24].mxu0 %v15509_v30  ;;  %v15430_v27 = vsel %vm15423_vm5, %v15413_v26, %v19327_v28  ;;  %v15448_v42 = vsel %vm15440_vm6, %v15431_v6, %v19348_v5  ;;  %v20083_v6 = vld [vmem:[%s20506_s23 + $0x8] sm:$0xff] }
0x1682   : > { %v15447_v24 = vsel %vm15440_vm6, %v15430_v27, %v19347_v60  ;;  %v15465_v38 = vsel %vm15457_vm7, %v15448_v42, %v19368_v23  ;;  %v20084_v42 = vld [vmem:[%s20506_s23] sm:$0xff] }
0x1683   : > { %v15464_v44 = vsel %vm15457_vm7, %v15447_v24, %v19367_v20  ;;  %v15482_v57 = vsel %vm15474_vm8, %v15465_v38, %v19388_v45  ;;  %v20085_v38 = vld [vmem:[%s20506_s23 + $0x18] sm:$0xff] }
0x1684   : > { %v19406_v21 = vpop.permute.xlu0 %19405  ;;  %v15481_v58 = vsel %vm15474_vm8, %v15464_v44, %v19387_v40 }
0x1685   : > { %v19408_v55 = vunpack.i.h.bf16 %v19406_v21  ;;  %v19407_v59 = vunpack.i.l.bf16 %v19406_v21 }
0x1687   : > { %v15496_v31 = vsel %vm15491_vm9, %v15479_v35, %v19407_v59  ;;  %v15497_v8 = vsel %vm15491_vm9, %v15480_v63, %v19408_v55  ;;  %v15486_v59 = vsel %vm15474_vm8, %v24843_v15, %v19273_v9  ;;  %v19392_v15 = vunpack.i.l.bf16 %v19391_v41 }
0x1688   : > { %v15510_v37 = vpack.c.bf16 %v15497_v8, %v15496_v31 }
0x1689   : > { %v15489_v46 = vsel %vm15474_vm8, %v24896_v2, %v19392_v15  ;;  %v20094_v15 = vld [vmem:[%s20506_s23 + $0x60] sm:$0xff] }
0x168a   : > { %19042 = vmatprep.mubr.bf16.mxu0 %v15510_v37 }
0x168c   : > { %v19411_v25 = vpop.permute.xlu0 %19410 }
0x168d   : > { %v19413_v30 = vunpack.i.h.bf16 %v19411_v25  ;;  %v19412_v48 = vunpack.i.l.bf16 %v19411_v25 }
0x168f   : > { %v15499_v11 = vsel %vm15491_vm9, %v15482_v57, %v19413_v30  ;;  %v15498_v10 = vsel %vm15491_vm9, %v15481_v58, %v19412_v48 }
0x1690   : > { %v15511_v12 = vpack.c.bf16 %v15499_v11, %v15498_v10  ;;  %v20086_v10 = vld [vmem:[%s20506_s23 + $0x30] sm:$0xff] }
0x1692   : > { %19043 = vmatmul.mubr.bf16.gmra.mrb[28].mxu0 %v15511_v12 }
0x1694   : > { %v19416_v22 = vpop.permute.xlu1 %19415 }
0x1695   : > { %v19418_v29 = vunpack.i.h.bf16 %v19416_v22  ;;  %v19417_v54 = vunpack.i.l.bf16 %v19416_v22 }
0x1697   : > { %v15500_v51 = vsel %vm15491_vm9, %v15483_v62, %v19417_v54  ;;  %v15501_v19 = vsel %vm15491_vm9, %v15484_v50, %v19418_v29  ;;  %v20089_v29 = vld [vmem:[%s20506_s23 + $0x28] sm:$0xff] }
0x1698   : > { %v15512_v21 = vpack.c.bf16 %v15501_v19, %v15500_v51 }
0x169a   : > { %19046 = vmatprep.mubr.bf16.mxu1 %v15512_v21  ;;  %v20090_v21 = vld [vmem:[%s20506_s23 + $0x50] sm:$0xff] }
0x169c   : > { %v19421_v53 = vpop.permute.xlu1 %19420 }
0x169d   : > { %v19423_v16 = vunpack.i.h.bf16 %v19421_v53  ;;  %v19422_v55 = vunpack.i.l.bf16 %v19421_v53 }
0x169f   : > { %v15503_v0 = vsel %vm15491_vm9, %v15486_v59, %v19423_v16  ;;  %v15502_v4 = vsel %vm15491_vm9, %v15485_v49, %v19422_v55  ;;  %v20091_v55 = vld [vmem:[%s20506_s23 + $0x58] sm:$0xff] }
0x16a0   : > { %v15513_v35 = vpack.c.bf16 %v15503_v0, %v15502_v4  ;;  %v20092_v0 = vld [vmem:[%s20506_s23 + $0x40] sm:$0xff] }
0x16a2   : > { %19047 = vmatmul.mubr.bf16.vlgmr.msra.gmra.mrb[24].mxu1 %v15513_v35  ;;  %v20093_v35 = vld [vmem:[%s20506_s23 + $0x48] sm:$0xff] }
0x16d0   : > { %v19426_v63 = vpop.permute.xlu1 %19425 }
0x16d1   : > { %v19428_v43 = vunpack.i.h.bf16 %v19426_v63  ;;  %v19427_v28 = vunpack.i.l.bf16 %v19426_v63 }
0x16d3   : > { %v15504_v47 = vsel %vm15491_vm9, %v24902_v17, %v19427_v28  ;;  %v15505_v31 = vsel %vm15491_vm9, %v24905_v7, %v19428_v43 }
0x16d4   : > { %v15514_v8 = vpack.c.bf16 %v15505_v31, %v15504_v47 }
0x16d6   : > { %19050 = vmatprep.mubr.bf16.mxu1 %v15514_v8 }
0x16e0   : > { %v19431_v5 = vpop.permute.xlu1 %19430 }
0x16e1   : > { %v19433_v60 = vunpack.i.h.bf16 %v19431_v5  ;;  %v19432_v37 = vunpack.i.l.bf16 %v19431_v5 }
0x16e3   : > { %v15507_v17 = vsel %vm15491_vm9, %v15490_v13, %v19433_v60  ;;  %v15506_v3 = vsel %vm15491_vm9, %v15489_v46, %v19432_v37  ;;  %v20095_v46 = vld [vmem:[%s20506_s23 + $0x68] sm:$0xff] }
0x16e4   : > { %v15515_v7 = vpack.c.bf16 %v15507_v17, %v15506_v3  ;;  %v20096_v17 = vld [vmem:[%s20506_s23 + $0x70] sm:$0xff] }
0x16e6   : > { %19051 = vmatmul.mubr.bf16.gmra.mrb[28].mxu1 %v15515_v7  ;;  %v20097_v7 = vld [vmem:[%s20506_s23 + $0x78] sm:$0xff] }
0x1754   : > { %v19040_v23 = vpop.f32.mrb[24].mxu0 }
0x1755   : > { %v15630_v20 = vadd.f32 %v19040_v23, %v25048_v34  ;;  %v15621_v2 = vpop.f32.mrb[25].mxu0 }
0x1756   : > { %v19041_v26 = vpop.f32.mrb[26].mxu0  ;;  %v15622_v45 = vadd.f32 %v25048_v34, %v15621_v2 }
0x1757   : > { %v25052_v1 = vadd.f32 %v20082_v36, %v15630_v20  ;;  %v15624_v40 = vpop.f32.mrb[27].mxu0  ;;  %v15633_v44 = vadd.f32 %v19041_v26, %v25048_v34 }
0x1758   : > { %v15625_v27 = vadd.f32 %v25048_v34, %v15624_v40  ;;  %v25061_v25 = vadd.f32 %v20084_v42, %v15622_v45 }
0x1759   : > { %15704 = vadd.xlane.f32.xlu0 %v25052_v1  ;;  %v25067_v30 = vadd.f32 %v20085_v38, %v15633_v44 }
0x175a   : > { %v25058_v24 = vadd.f32 %v20083_v6, %v15625_v27 }
0x175c   : > { %15702 = vadd.xlane.f32.xlu1 %v25058_v24 }
0x175d   : > { %15700 = vadd.xlane.f32.xlu0 %v25061_v25 }
0x1761   : > { %15706 = vadd.xlane.f32.xlu0 %v25067_v30 }
0x1765   : > { %v19044_v48 = vpop.f32.mrb[28].mxu0 }
0x1766   : > { %v15646_v58 = vadd.f32 %v19044_v48, %v25048_v34  ;;  %v15637_v57 = vpop.f32.mrb[29].mxu0 }
0x1767   : > { %v19045_v11 = vpop.f32.mrb[30].mxu0  ;;  %v15638_v12 = vadd.f32 %v25048_v34, %v15637_v57 }
0x1768   : > { %v25072_v41 = vadd.f32 %v20086_v10, %v15646_v58  ;;  %v15649_v61 = vadd.f32 %v19045_v11, %v25048_v34  ;;  %v15640_v52 = vpop.f32.mrb[31].mxu0 }
0x1769   : > { %v15641_v22 = vadd.f32 %v25048_v34, %v15640_v52  ;;  %v25082_v14 = vadd.f32 %v20088_v18, %v15638_v12 }
0x176a   : > { %v25077_v32 = vadd.f32 %v20087_v39, %v15649_v61  ;;  %15712 = vadd.xlane.f32.xlu0 %v25072_v41 }
0x176b   : > { %v25086_v54 = vadd.f32 %v20089_v29, %v15641_v22 }
0x176c   : > { %15714 = vadd.xlane.f32.xlu1 %v25077_v32 }
0x176e   : > { %15708 = vadd.xlane.f32.xlu0 %v25082_v14 }
0x1770   : > { %15710 = vadd.xlane.f32.xlu1 %v25086_v54 }
0x1775   : > { %v19048_v62 = vpop.f32.mrb[24].mxu1 }
0x1776   : > { %v15662_v50 = vadd.f32 %v19048_v62, %v25048_v34  ;;  %v15653_v51 = vpop.f32.mrb[25].mxu1 }
0x1777   : > { %v19049_v19 = vpop.f32.mrb[26].mxu1  ;;  %v15654_v33 = vadd.f32 %v25048_v34, %v15653_v51 }
0x1778   : > { %v25092_v9 = vadd.f32 %v20090_v21, %v15662_v50  ;;  %v15665_v53 = vadd.f32 %v19049_v19, %v25048_v34  ;;  %v15656_v16 = vpop.f32.mrb[27].mxu1 }
0x1779   : > { %v15657_v59 = vadd.f32 %v25048_v34, %v15656_v16  ;;  %v25102_v4 = vadd.f32 %v20092_v0, %v15654_v33 }
0x177a   : > { %v25097_v49 = vadd.f32 %v20091_v55, %v15665_v53  ;;  %15720 = vadd.xlane.f32.xlu0 %v25092_v9 }
0x177b   : > { %v25106_v63 = vadd.f32 %v20093_v35, %v15657_v59 }
0x177c   : > { %15722 = vadd.xlane.f32.xlu1 %v25097_v49 }
0x177e   : > { %15716 = vadd.xlane.f32.xlu0 %v25102_v4 }
0x1780   : > { %15718 = vadd.xlane.f32.xlu1 %v25106_v63 }
0x17b9   : > { %v19052_v43 = vpop.f32.mrb[28].mxu1 }
0x17ba   : > { %v15669_v28 = vpop.f32.mrb[29].mxu1  ;;  %v15678_v56 = vadd.f32 %v19052_v43, %v25048_v34 }
0x17bb   : > { %v15670_v47 = vadd.f32 %v25048_v34, %v15669_v28  ;;  %v19053_v31 = vpop.f32.mrb[30].mxu1 }
0x17bc   : > { %v15672_v8 = vpop.f32.mrb[31].mxu1  ;;  %v15681_v37 = vadd.f32 %v19053_v31, %v25048_v34  ;;  %v25122_v3 = vadd.f32 %v20096_v17, %v15678_v56 }
0x17bd   : > { %v25113_v5 = vadd.f32 %v20094_v15, %v15670_v47  ;;  %v15673_v60 = vadd.f32 %v25048_v34, %v15672_v8 }
0x17be   : > { %v25126_v23 = vadd.f32 %v20097_v7, %v15681_v37 }
0x17bf   : > { %v25118_v13 = vadd.f32 %v20095_v46, %v15673_v60  ;;  %15724 = vadd.xlane.f32.xlu0 %v25113_v5 }
0x17c1   : > { %15726 = vadd.xlane.f32.xlu1 %v25118_v13 }
0x17c3   : > { %15728 = vadd.xlane.f32.xlu0 %v25122_v3 }
0x17c5   : > { %15730 = vadd.xlane.f32.xlu1 %v25126_v23 }
0x17e6   : > { %v15705_v20 = vpop.xlane.xlu0 %15704 }
0x17e7   : > { %v15735_v2 = vmul.f32 0.0078125, %v15705_v20 }
0x17e9   : > { %v25131_v34 = vsub.f32 %v25052_v1, %v15735_v2  ;;  %v15703_v40 = vpop.xlane.xlu1 %15702 }
0x17ea   : > { %v15701_v26 = vpop.xlane.xlu0 %15700  ;;  %v15734_v42 = vmul.f32 0.0078125, %v15703_v40 }
0x17eb   : > { %v15733_v36 = vmul.f32 0.0078125, %v15701_v26  ;;  %v15767_v45 = vmul.f32 %v25131_v34, %v25131_v34 }
0x17ec   : > { %v25144_v1 = vsub.f32 %v25058_v24, %v15734_v42 }
0x17ed   : > { %v25136_v27 = vsub.f32 %v25061_v25, %v15733_v36  ;;  %15785 = vadd.xlane.f32.xlu0 %v15767_v45 }
0x17ee   : > { %v15707_v6 = vpop.xlane.xlu0 %15706  ;;  %v15766_v57 = vmul.f32 %v25144_v1, %v25144_v1 }
0x17ef   : > { %v15736_v44 = vmul.f32 0.0078125, %v15707_v6  ;;  %v15765_v38 = vmul.f32 %v25136_v27, %v25136_v27 }
0x17f1   : > { %v25141_v48 = vsub.f32 %v25067_v30, %v15736_v44  ;;  %15781 = vadd.xlane.f32.xlu0 %v15765_v38 }
0x17f3   : > { %v15768_v58 = vmul.f32 %v25141_v48, %v25141_v48 }
0x17f5   : > { %15787 = vadd.xlane.f32.xlu1 %v15768_v58 }
0x17f7   : > { %v15713_v25 = vpop.xlane.xlu0 %15712 }
0x17f8   : > { %v15739_v11 = vmul.f32 0.0078125, %v15713_v25 }
0x17f9   : > { %v15715_v10 = vpop.xlane.xlu1 %15714  ;;  %15783 = vadd.xlane.f32.xlu1 %v15766_v57 }
0x17fa   : > { %v25151_v12 = vsub.f32 %v25072_v41, %v15739_v11  ;;  %v15740_v30 = vmul.f32 0.0078125, %v15715_v10  ;;  %v25213_v11 = vld [vmem:[%s25528_s5] ss:$0 sm:$0xff] }
0x17fb   : > { %v15709_v61 = vpop.xlane.xlu0 %15708 }
0x17fc   : > { %v25154_v52 = vsub.f32 %v25077_v32, %v15740_v30  ;;  %v15737_v24 = vmul.f32 0.0078125, %v15709_v61  ;;  %v15771_v39 = vmul.f32 %v25151_v12, %v25151_v12  ;;  %v25219_v61 = vld [vmem:[%s25529_s6] ss:$0 sm:$0xff] }
0x17fd   : > { %v15711_v22 = vpop.xlane.xlu1 %15710 }
0x17fe   : > { %v25159_v18 = vsub.f32 %v25082_v14, %v15737_v24  ;;  %v15738_v29 = vmul.f32 0.0078125, %v15711_v22  ;;  %15793 = vadd.xlane.f32.xlu0 %v15771_v39  ;;  %v15772_v62 = vmul.f32 %v25154_v52, %v25154_v52 }
0x1800   : > { %v25164_v41 = vsub.f32 %v25086_v54, %v15738_v29  ;;  %15795 = vadd.xlane.f32.xlu1 %v15772_v62  ;;  %v15769_v32 = vmul.f32 %v25159_v18, %v25159_v18  ;;  %v25225_v62 = vld [vmem:[%s25530_s7] ss:$0 sm:$0xff] }
0x1802   : > { %15789 = vadd.xlane.f32.xlu0 %v15769_v32  ;;  %v15770_v50 = vmul.f32 %v25164_v41, %v25164_v41 }
0x1804   : > { %15791 = vadd.xlane.f32.xlu1 %v15770_v50 }
0x1807   : > { %v15721_v51 = vpop.xlane.xlu0 %15720 }
0x1808   : > { %v15743_v14 = vmul.f32 0.0078125, %v15721_v51 }
0x1809   : > { %v15723_v19 = vpop.xlane.xlu1 %15722 }
0x180a   : > { %v25171_v21 = vsub.f32 %v25092_v9, %v15743_v14  ;;  %v15744_v33 = vmul.f32 0.0078125, %v15723_v19 }
0x180b   : > { %v15717_v53 = vpop.xlane.xlu0 %15716 }
0x180c   : > { %v25174_v54 = vsub.f32 %v25097_v49, %v15744_v33  ;;  %v15741_v16 = vmul.f32 0.0078125, %v15717_v53  ;;  %v15775_v55 = vmul.f32 %v25171_v21, %v25171_v21 }
0x180d   : > { %v15719_v59 = vpop.xlane.xlu1 %15718 }
0x180e   : > { %v25179_v0 = vsub.f32 %v25102_v4, %v15741_v16  ;;  %v15742_v35 = vmul.f32 0.0078125, %v15719_v59  ;;  %15801 = vadd.xlane.f32.xlu0 %v15775_v55  ;;  %v15776_v43 = vmul.f32 %v25174_v54, %v25174_v54 }
0x1810   : > { %v25184_v9 = vsub.f32 %v25106_v63, %v15742_v35  ;;  %15803 = vadd.xlane.f32.xlu1 %v15776_v43  ;;  %v15773_v49 = vmul.f32 %v25179_v0, %v25179_v0 }
0x1812   : > { %15797 = vadd.xlane.f32.xlu0 %v15773_v49  ;;  %v15774_v28 = vmul.f32 %v25184_v9, %v25184_v9 }
0x1814   : > { %15799 = vadd.xlane.f32.xlu1 %v15774_v28 }
0x184c   : > { %v15725_v47 = vpop.xlane.xlu0 %15724 }
0x184d   : > { %v15745_v4 = vmul.f32 0.0078125, %v15725_v47 }
0x184e   : > { %v15727_v31 = vpop.xlane.xlu1 %15726 }
0x184f   : > { %v25191_v8 = vsub.f32 %v25113_v5, %v15745_v4  ;;  %v15746_v56 = vmul.f32 0.0078125, %v15727_v31 }
0x1850   : > { %v15729_v15 = vpop.xlane.xlu0 %15728 }
0x1851   : > { %v25194_v63 = vsub.f32 %v25118_v13, %v15746_v56  ;;  %v15747_v60 = vmul.f32 0.0078125, %v15729_v15  ;;  %v15777_v37 = vmul.f32 %v25191_v8, %v25191_v8 }
0x1852   : > { %v15731_v46 = vpop.xlane.xlu1 %15730 }
0x1853   : > { %v25199_v17 = vsub.f32 %v25122_v3, %v15747_v60  ;;  %v15748_v7 = vmul.f32 0.0078125, %v15731_v46  ;;  %15805 = vadd.xlane.f32.xlu0 %v15777_v37  ;;  %v15778_v20 = vmul.f32 %v25194_v63, %v25194_v63 }
0x1855   : > { %v25204_v5 = vsub.f32 %v25126_v23, %v15748_v7  ;;  %15807 = vadd.xlane.f32.xlu1 %v15778_v20  ;;  %v15779_v13 = vmul.f32 %v25199_v17, %v25199_v17 }
0x1857   : > { %15809 = vadd.xlane.f32.xlu0 %v15779_v13  ;;  %v15780_v2 = vmul.f32 %v25204_v5, %v25204_v5 }
0x1859   : > { %15811 = vadd.xlane.f32.xlu1 %v15780_v2 }
0x187a   : > { %v15786_v26 = vpop.xlane.xlu0 %15785 }
0x187b   : > { %v15815_v3 = vmul.f32 0.0078125, %v15786_v26 }
0x187d   : > { %v15831_v36 = vadd.f32 1e-05, %v15815_v3 }
0x187e   : > { %v15782_v45 = vpop.xlane.xlu0 %15781 }
0x187f   : > { %19986 = vrsqrt.f32 %v15831_v36  ;;  %v15813_v40 = vmul.f32 0.0078125, %v15782_v45 }
0x1881   : > { %v15829_v6 = vadd.f32 1e-05, %v15813_v40 }
0x1882   : > { %v15788_v42 = vpop.xlane.xlu1 %15787 }
0x1883   : > { %19988 = vrsqrt.f32 %v15829_v6  ;;  %v15816_v23 = vmul.f32 0.0078125, %v15788_v42 }
0x1885   : > { %v15832_v44 = vadd.f32 1e-05, %v15816_v23 }
0x1886   : > { %v15784_v38 = vpop.xlane.xlu1 %15783 }
0x1887   : > { %19990 = vrsqrt.f32 %v15832_v44  ;;  %v15814_v58 = vmul.f32 0.0078125, %v15784_v38 }
0x1889   : > { %v19987_v25 = vpop.eup %19986  ;;  %v15830_v57 = vadd.f32 1e-05, %v15814_v58 }
0x188a   : > { %v15863_v10 = vmul.f32 %v19987_v25, %v25131_v34 }
0x188b   : > { %19992 = vrsqrt.f32 %v15830_v57  ;;  %v15794_v30 = vpop.xlane.xlu0 %15793 }
0x188c   : > { %v15819_v24 = vmul.f32 0.0078125, %v15794_v30  ;;  %v15886_v39 = vmul.f32 %v25213_v11, %v15863_v10 }
0x188d   : > { %v19989_v22 = vpop.eup %19988  ;;  %v15796_v29 = vpop.xlane.xlu1 %15795 }
0x188e   : > { %v15835_v32 = vadd.f32 1e-05, %v15819_v24  ;;  %v15820_v50 = vmul.f32 0.0078125, %v15796_v29  ;;  %v25228_v34 = vadd.f32 %v25219_v61, %v15886_v39  ;;  %v15861_v51 = vmul.f32 %v19989_v22, %v25136_v27 }
0x188f   : > { %v15790_v14 = vpop.xlane.xlu0 %15789 }
0x1890   : > { %19994 = vrsqrt.f32 %v15835_v32  ;;  %v15836_v19 = vadd.f32 1e-05, %v15820_v50  ;;  %v15817_v33 = vmul.f32 0.0078125, %v15790_v14  ;;  %v15932_v53 = vmul.f32 %v25225_v62, %v25228_v34 }
0x1891   : > { %v19991_v16 = vpop.eup %19990  ;;  %v15792_v55 = vpop.xlane.xlu1 %15791  ;;  %v15884_v59 = vmul.f32 %v25213_v11, %v15861_v51 }
0x1892   : > { %19996 = vrsqrt.f32 %v15836_v19  ;;  %v15833_v35 = vadd.f32 1e-05, %v15817_v33  ;;  %v15818_v43 = vmul.f32 0.0078125, %v15792_v55  ;;  %15950 = vadd.xlane.f32.xlu0 %v15932_v53  ;;  %v15864_v49 = vmul.f32 %v19991_v16, %v25141_v48 }
0x1893   : > { %v25236_v28 = vadd.f32 %v25219_v61, %v15884_v59 }
0x1894   : > { %19998 = vrsqrt.f32 %v15833_v35  ;;  %v15834_v27 = vadd.f32 1e-05, %v15818_v43  ;;  %v15887_v47 = vmul.f32 %v25213_v11, %v15864_v49 }
0x1895   : > { %v19993_v4 = vpop.eup %19992  ;;  %v15930_v31 = vmul.f32 %v25225_v62, %v25236_v28 }
0x1896   : > { %20000 = vrsqrt.f32 %v15834_v27  ;;  %v25242_v56 = vadd.f32 %v25219_v61, %v15887_v47  ;;  %v15862_v15 = vmul.f32 %v19993_v4, %v25144_v1 }
0x1897   : > { %15946 = vadd.xlane.f32.xlu0 %v15930_v31 }
0x1898   : > { %v15933_v48 = vmul.f32 %v25225_v62, %v25242_v56  ;;  %v15885_v60 = vmul.f32 %v25213_v11, %v15862_v15 }
0x189a   : > { %v19995_v37 = vpop.eup %19994  ;;  %15952 = vadd.xlane.f32.xlu1 %v15933_v48  ;;  %v25249_v46 = vadd.f32 %v25219_v61, %v15885_v60 }
0x189b   : > { %v15802_v7 = vpop.xlane.xlu0 %15801  ;;  %v15867_v20 = vmul.f32 %v19995_v37, %v25151_v12 }
0x189c   : > { %v19997_v13 = vpop.eup %19996  ;;  %v15823_v2 = vmul.f32 0.0078125, %v15802_v7  ;;  %v15931_v26 = vmul.f32 %v25225_v62, %v25249_v46 }
0x189d   : > { %v15804_v1 = vpop.xlane.xlu1 %15803  ;;  %v15890_v3 = vmul.f32 %v25213_v11, %v15867_v20  ;;  %v15868_v36 = vmul.f32 %v19997_v13, %v25154_v52 }
0x189e   : > { %v19999_v45 = vpop.eup %19998  ;;  %v15839_v40 = vadd.f32 1e-05, %v15823_v2  ;;  %v15824_v6 = vmul.f32 0.0078125, %v15804_v1  ;;  %15948 = vadd.xlane.f32.xlu1 %v15931_v26 }
0x189f   : > { %v15798_v42 = vpop.xlane.xlu0 %15797  ;;  %v25257_v23 = vadd.f32 %v25219_v61, %v15890_v3  ;;  %v15891_v12 = vmul.f32 %v25213_v11, %v15868_v36  ;;  %v15865_v44 = vmul.f32 %v19999_v45, %v25159_v18 }
0x18a0   : > { %v20001_v38 = vpop.eup %20000  ;;  %20002 = vrsqrt.f32 %v15839_v40  ;;  %v15840_v58 = vadd.f32 1e-05, %v15824_v6  ;;  %v15821_v25 = vmul.f32 0.0078125, %v15798_v42 }
0x18a1   : > { %v15800_v57 = vpop.xlane.xlu1 %15799  ;;  %v15936_v52 = vmul.f32 %v25225_v62, %v25257_v23  ;;  %v25264_v10 = vadd.f32 %v25219_v61, %v15891_v12  ;;  %v15888_v30 = vmul.f32 %v25213_v11, %v15865_v44  ;;  %v15866_v24 = vmul.f32 %v20001_v38, %v25164_v41 }
0x18a2   : > { %20004 = vrsqrt.f32 %v15840_v58  ;;  %v15837_v39 = vadd.f32 1e-05, %v15821_v25  ;;  %v15822_v22 = vmul.f32 0.0078125, %v15800_v57 }
0x18a3   : > { %15958 = vadd.xlane.f32.xlu0 %v15936_v52  ;;  %v15937_v18 = vmul.f32 %v25225_v62, %v25264_v10  ;;  %v25271_v29 = vadd.f32 %v25219_v61, %v15888_v30  ;;  %v15889_v32 = vmul.f32 %v25213_v11, %v15866_v24 }
0x18a4   : > { %20006 = vrsqrt.f32 %v15837_v39  ;;  %v15838_v50 = vadd.f32 1e-05, %v15822_v22 }
0x18a5   : > { %15960 = vadd.xlane.f32.xlu1 %v15937_v18  ;;  %v15934_v51 = vmul.f32 %v25225_v62, %v25271_v29  ;;  %v25277_v41 = vadd.f32 %v25219_v61, %v15889_v32 }
0x18a6   : > { %20008 = vrsqrt.f32 %v15838_v50 }
0x18a7   : > { %15954 = vadd.xlane.f32.xlu0 %v15934_v51  ;;  %v15935_v14 = vmul.f32 %v25225_v62, %v25277_v41 }
0x18a9   : > { %15956 = vadd.xlane.f32.xlu1 %v15935_v14  ;;  %v25337_v14 = vstv %s15978_s26  ;;  %s20190_s26 = scalar_lea.vmem %s20189_s24, 512 }
0x18aa   : > { %v20003_v19 = vpop.eup %20002  ;;  %p20192_p9 = scmp.lt.s32.totalorder %s20190_s26, %s20184_s22 }
0x18ab   : > { %v15871_v33 = vmul.f32 %v20003_v19, %v25171_v21 }
0x18ac   : > { %v20005_v53 = vpop.eup %20004  ;;  %p20193_p12 = por %p20192_p9, %p20191_p5 }
0x18ad   : > { %v15894_v16 = vmul.f32 %v25213_v11, %v15871_v33  ;;  %v15872_v55 = vmul.f32 %v20005_v53, %v25174_v54 }
0x18ae   : > { %v20007_v59 = vpop.eup %20006  ;;  %p20194_p2 = pnand %p20193_p12, %p20187_p3 }
0x18af   : > { %v25285_v35 = vadd.f32 %v25219_v61, %v15894_v16  ;;  %v15895_v43 = vmul.f32 %v25213_v11, %v15872_v55  ;;  %v15869_v49 = vmul.f32 %v20007_v59, %v25179_v0 }
0x18b0   : > { %v20009_v27 = vpop.eup %20008 }
0x18b1   : > { %v15940_v47 = vmul.f32 %v25225_v62, %v25285_v35  ;;  %v25292_v4 = vadd.f32 %v25219_v61, %v15895_v43  ;;  %v15892_v21 = vmul.f32 %v25213_v11, %v15869_v49  ;;  %v15870_v31 = vmul.f32 %v20009_v27, %v25184_v9 }
0x18b3   : > { %15966 = vadd.xlane.f32.xlu0 %v15940_v47  ;;  %v15941_v54 = vmul.f32 %v25225_v62, %v25292_v4  ;;  %v25299_v15 = vadd.f32 %v25219_v61, %v15892_v21  ;;  %v15893_v0 = vmul.f32 %v25213_v11, %v15870_v31 }
0x18b5   : > { %15968 = vadd.xlane.f32.xlu1 %v15941_v54  ;;  %v15938_v48 = vmul.f32 %v25225_v62, %v25299_v15  ;;  %v25305_v60 = vadd.f32 %v25219_v61, %v15893_v0 }
0x18b7   : > { %15962 = vadd.xlane.f32.xlu0 %v15938_v48  ;;  %v15939_v9 = vmul.f32 %v25225_v62, %v25305_v60 }
0x18b9   : > { %15964 = vadd.xlane.f32.xlu1 %v15939_v9 }
0x18e0   : > { %v15806_v37 = vpop.xlane.xlu0 %15805 }
0x18e1   : > { %v15825_v7 = vmul.f32 0.0078125, %v15806_v37 }
0x18e2   : > { %v15808_v20 = vpop.xlane.xlu1 %15807 }
0x18e3   : > { %v15841_v13 = vadd.f32 1e-05, %v15825_v7  ;;  %v15826_v2 = vmul.f32 0.0078125, %v15808_v20 }
0x18e4   : > { %v15810_v26 = vpop.xlane.xlu0 %15809 }
0x18e5   : > { %20010 = vrsqrt.f32 %v15841_v13  ;;  %v15842_v1 = vadd.f32 1e-05, %v15826_v2  ;;  %v15827_v3 = vmul.f32 0.0078125, %v15810_v26 }
0x18e6   : > { %v15812_v36 = vpop.xlane.xlu1 %15811 }
0x18e7   : > { %20012 = vrsqrt.f32 %v15842_v1  ;;  %v15843_v45 = vadd.f32 1e-05, %v15827_v3  ;;  %v15828_v40 = vmul.f32 0.0078125, %v15812_v36 }
0x18e9   : > { %20014 = vrsqrt.f32 %v15843_v45  ;;  %v15844_v6 = vadd.f32 1e-05, %v15828_v40 }
0x18eb   : > { %20016 = vrsqrt.f32 %v15844_v6 }
0x18ef   : > { %v20011_v42 = vpop.eup %20010 }
0x18f0   : > { %v15873_v12 = vmul.f32 %v20011_v42, %v25191_v8 }
0x18f1   : > { %v20013_v44 = vpop.eup %20012 }
0x18f2   : > { %v15896_v38 = vmul.f32 %v25213_v11, %v15873_v12  ;;  %v15874_v58 = vmul.f32 %v20013_v44, %v25194_v63 }
0x18f3   : > { %v20015_v25 = vpop.eup %20014 }
0x18f4   : > { %v25313_v57 = vadd.f32 %v25219_v61, %v15896_v38  ;;  %v15897_v52 = vmul.f32 %v25213_v11, %v15874_v58  ;;  %v15875_v30 = vmul.f32 %v20015_v25, %v25199_v17 }
0x18f5   : > { %v20017_v24 = vpop.eup %20016 }
0x18f6   : > { %v15942_v39 = vmul.f32 %v25225_v62, %v25313_v57  ;;  %v25320_v22 = vadd.f32 %v25219_v61, %v15897_v52  ;;  %v15898_v8 = vmul.f32 %v25213_v11, %v15875_v30  ;;  %v15876_v18 = vmul.f32 %v20017_v24, %v25204_v5 }
0x18f8   : > { %15970 = vadd.xlane.f32.xlu0 %v15942_v39  ;;  %v15943_v63 = vmul.f32 %v25225_v62, %v25320_v22  ;;  %v25327_v32 = vadd.f32 %v25219_v61, %v15898_v8  ;;  %v15899_v17 = vmul.f32 %v25213_v11, %v15876_v18 }
0x18fa   : > { %15972 = vadd.xlane.f32.xlu1 %v15943_v63  ;;  %v15944_v50 = vmul.f32 %v25225_v62, %v25327_v32  ;;  %v25333_v51 = vadd.f32 %v25219_v61, %v15899_v17 }
0x18fc   : > { %15974 = vadd.xlane.f32.xlu0 %v15944_v50  ;;  %v15945_v5 = vmul.f32 %v25225_v62, %v25333_v51 }
0x18fe   : > { %15976 = vadd.xlane.f32.xlu1 %v15945_v5 }
0x191f   : > { %v15951_v19 = vpop.xlane.xlu0 %15950 }
0x1920   : > { %v15982_v33 = vadd.f32 %v25337_v14, %v15951_v19 }
0x1922   : > { %v16008_v53 = vrot.slane %v15982_v33, 4 }
0x1924   : > { %v16009_v11 = vmax.f32 %v15982_v33, %v16008_v53  ;;  %v15947_v16 = vpop.xlane.xlu0 %15946 }
0x1925   : > { %v15980_v55 = vadd.f32 %v25337_v14, %v15947_v16 }
0x1926   : > { %v16010_v59 = vrot.slane %v16009_v11, 2 }
0x1927   : > { %v15996_v43 = vrot.slane %v15980_v55, 4  ;;  %v15953_v61 = vpop.xlane.xlu1 %15952 }
0x1928   : > { %v16011_v49 = vmax.f32 %v16009_v11, %v16010_v59  ;;  %v15983_v27 = vadd.f32 %v25337_v14, %v15953_v61 }
0x1929   : > { %v15997_v47 = vmax.f32 %v15980_v55, %v15996_v43 }
0x192a   : > { %v16012_v62 = vrot.slane %v16011_v49, 1  ;;  %v16014_v21 = vrot.slane %v15983_v27, 4 }
0x192b   : > { %v15998_v31 = vrot.slane %v15997_v47, 2  ;;  %v15949_v54 = vpop.xlane.xlu1 %15948 }
0x192c   : > { %v16013_v0 = vmax.f32 %v16011_v49, %v16012_v62  ;;  %v16015_v48 = vmax.f32 %v15983_v27, %v16014_v21  ;;  %v15981_v9 = vadd.f32 %v25337_v14, %v15949_v54 }
0x192d   : > { %v15999_v37 = vmax.f32 %v15997_v47, %v15998_v31 }
0x192e   : > { %v16094_v7 = vsub.f32 %v15982_v33, %v16013_v0  ;;  %v16016_v20 = vrot.slane %v16015_v48, 2  ;;  %v16002_v13 = vrot.slane %v15981_v9, 4 }
0x192f   : > { %v16000_v2 = vrot.slane %v15999_v37, 1 }
0x1930   : > { %v16112_v26 = vmul.f32 1.442695, %v16094_v7  ;;  %v16017_v1 = vmax.f32 %v16015_v48, %v16016_v20  ;;  %v16003_v3 = vmax.f32 %v15981_v9, %v16002_v13  ;;  %v15959_v36 = vpop.xlane.xlu0 %15958 }
0x1931   : > { %v16001_v45 = vmax.f32 %v15999_v37, %v16000_v2  ;;  %v15986_v40 = vadd.f32 %v25337_v14, %v15959_v36 }
0x1932   : > { %20018 = vpow2.f32 %v16112_v26  ;;  %v16018_v6 = vrot.slane %v16017_v1, 1  ;;  %v16004_v42 = vrot.slane %v16003_v3, 2  ;;  %v15961_v12 = vpop.xlane.xlu1 %15960 }
0x1933   : > { %v16092_v44 = vsub.f32 %v15980_v55, %v16001_v45  ;;  %v16032_v38 = vrot.slane %v15986_v40, 4  ;;  %v15987_v58 = vadd.f32 %v25337_v14, %v15961_v12 }
0x1934   : > { %v16019_v25 = vmax.f32 %v16017_v1, %v16018_v6  ;;  %v16005_v52 = vmax.f32 %v16003_v3, %v16004_v42  ;;  %v15955_v30 = vpop.xlane.xlu0 %15954 }
0x1935   : > { %v16108_v24 = vmul.f32 1.442695, %v16092_v44  ;;  %v16033_v39 = vmax.f32 %v15986_v40, %v16032_v38  ;;  %v16038_v8 = vrot.slane %v15987_v58, 4  ;;  %v15984_v18 = vadd.f32 %v25337_v14, %v15955_v30 }
0x1936   : > { %v16095_v63 = vsub.f32 %v15983_v27, %v16019_v25  ;;  %v16006_v17 = vrot.slane %v16005_v52, 1  ;;  %v15957_v50 = vpop.xlane.xlu1 %15956 }
0x1937   : > { %20020 = vpow2.f32 %v16108_v24  ;;  %v16034_v5 = vrot.slane %v16033_v39, 2  ;;  %v16039_v19 = vmax.f32 %v15987_v58, %v16038_v8  ;;  %v16020_v33 = vrot.slane %v15984_v18, 4 }
0x1938   : > { %v16114_v53 = vmul.f32 1.442695, %v16095_v63  ;;  %v16007_v11 = vmax.f32 %v16005_v52, %v16006_v17  ;;  %v15985_v16 = vadd.f32 %v25337_v14, %v15957_v50 }
0x1939   : > { %v16035_v55 = vmax.f32 %v16033_v39, %v16034_v5  ;;  %v16040_v59 = vrot.slane %v16039_v19, 2  ;;  %v16021_v43 = vmax.f32 %v15984_v18, %v16020_v33 }
0x193a   : > { %20022 = vpow2.f32 %v16114_v53  ;;  %v16093_v61 = vsub.f32 %v15981_v9, %v16007_v11  ;;  %v16026_v49 = vrot.slane %v15985_v16, 4 }
0x193b   : > { %v16036_v47 = vrot.slane %v16035_v55, 1  ;;  %v16041_v62 = vmax.f32 %v16039_v19, %v16040_v59  ;;  %v16022_v21 = vrot.slane %v16021_v43, 2 }
0x193c   : > { %v25347_v27 = vpop.eup %20018  ;;  %v16110_v31 = vmul.f32 1.442695, %v16093_v61  ;;  %v16027_v54 = vmax.f32 %v15985_v16, %v16026_v49 }
0x193d   : > { %v16152_v0 = vrot.slane %v25347_v27, 4  ;;  %v16037_v48 = vmax.f32 %v16035_v55, %v16036_v47  ;;  %v16042_v37 = vrot.slane %v16041_v62, 1  ;;  %v16023_v7 = vmax.f32 %v16021_v43, %v16022_v21 }
0x193e   : > { %20024 = vpow2.f32 %v16110_v31  ;;  %v16028_v20 = vrot.slane %v16027_v54, 2 }
0x193f   : > { %v16153_v13 = vadd.f32 %v25347_v27, %v16152_v0  ;;  %v16098_v2 = vsub.f32 %v15986_v40, %v16037_v48  ;;  %v16043_v26 = vmax.f32 %v16041_v62, %v16042_v37  ;;  %v16024_v9 = vrot.slane %v16023_v7, 1 }
0x1940   : > { %v16029_v1 = vmax.f32 %v16027_v54, %v16028_v20  ;;  %v15967_v3 = vpop.xlane.xlu0 %15966 }
0x1941   : > { %v25351_v36 = vpop.eup %20020  ;;  %v16154_v45 = vrot.slane %v16153_v13, 2  ;;  %v16120_v6 = vmul.f32 1.442695, %v16098_v2  ;;  %v16099_v42 = vsub.f32 %v15987_v58, %v16043_v26  ;;  %v16025_v12 = vmax.f32 %v16023_v7, %v16024_v9 }
0x1942   : > { %v16140_v44 = vrot.slane %v25351_v36, 4  ;;  %v16030_v38 = vrot.slane %v16029_v1, 1  ;;  %v25355_v25 = vadd.f32 %v25337_v14, %v15967_v3  ;;  %v15969_v52 = vpop.xlane.xlu1 %15968 }
0x1943   : > { %v16155_v30 = vadd.f32 %v16154_v45, %v16153_v13  ;;  %20026 = vpow2.f32 %v16120_v6  ;;  %v16122_v40 = vmul.f32 1.442695, %v16099_v42  ;;  %v16096_v24 = vsub.f32 %v15984_v18, %v16025_v12 }
0x1944   : > { %v25357_v39 = vpop.eup %20022  ;;  %v16141_v8 = vadd.f32 %v25351_v36, %v16140_v44  ;;  %v16031_v63 = vmax.f32 %v16029_v1, %v16030_v38  ;;  %v16056_v17 = vrot.slane %v25355_v25, 4  ;;  %v25362_v58 = vadd.f32 %v25337_v14, %v15969_v52  ;;  %v15963_v50 = vpop.xlane.xlu0 %15962 }
0x1945   : > { %v16156_v5 = vrot.slane %v16155_v30, 1  ;;  %v16158_v19 = vrot.slane %v25357_v39, 4  ;;  %20028 = vpow2.f32 %v16122_v40  ;;  %v16116_v33 = vmul.f32 1.442695, %v16096_v24 }
0x1946   : > { %v16142_v53 = vrot.slane %v16141_v8, 2  ;;  %v16097_v11 = vsub.f32 %v15985_v16, %v16031_v63  ;;  %v16057_v18 = vmax.f32 %v25355_v25, %v16056_v17  ;;  %v16062_v55 = vrot.slane %v25362_v58, 4  ;;  %v15965_v54 = vpop.xlane.xlu1 %15964 }
0x1947   : > { %v16157_v59 = vadd.f32 %v16156_v5, %v16155_v30  ;;  %v16159_v43 = vadd.f32 %v25357_v39, %v16158_v19  ;;  %20030 = vpow2.f32 %v16116_v33  ;;  %v25369_v61 = vadd.f32 %v25337_v14, %v15963_v50 }
0x1948   : > { %v25371_v49 = vpop.eup %20024  ;;  %v16143_v47 = vadd.f32 %v16142_v53, %v16141_v8  ;;  %v16118_v62 = vmul.f32 1.442695, %v16097_v11  ;;  %v16058_v21 = vrot.slane %v16057_v18, 2  ;;  %v16063_v31 = vmax.f32 %v25362_v58, %v16062_v55 }
0x1949   : > { %20032 = vrcp.f32 %v16157_v59  ;;  %v16160_v16 = vrot.slane %v16159_v43, 2  ;;  %v16146_v0 = vrot.slane %v25371_v49, 4  ;;  %v16044_v48 = vrot.slane %v25369_v61, 4 }
0x194a   : > { %v16144_v37 = vrot.slane %v16143_v47, 1  ;;  %20034 = vpow2.f32 %v16118_v62  ;;  %v16059_v7 = vmax.f32 %v16057_v18, %v16058_v21  ;;  %v16064_v20 = vrot.slane %v16063_v31, 2 }
0x194b   : > { %v16161_v13 = vadd.f32 %v16160_v16, %v16159_v43  ;;  %v16147_v2 = vadd.f32 %v25371_v49, %v16146_v0  ;;  %v16045_v26 = vmax.f32 %v25369_v61, %v16044_v48  ;;  %v25379_v9 = vadd.f32 %v25337_v14, %v15965_v54 }
0x194c   : > { %v16145_v1 = vadd.f32 %v16144_v37, %v16143_v47  ;;  %v16060_v3 = vrot.slane %v16059_v7, 1  ;;  %v16065_v45 = vmax.f32 %v16063_v31, %v16064_v20 }
0x194d   : > { %v25381_v6 = vpop.eup %20026  ;;  %v16162_v42 = vrot.slane %v16161_v13, 1  ;;  %v16148_v12 = vrot.slane %v16147_v2, 2  ;;  %v16046_v44 = vrot.slane %v16045_v26, 2  ;;  %v16050_v38 = vrot.slane %v25379_v9, 4 }
0x194e   : > { %20036 = vrcp.f32 %v16145_v1  ;;  %v16176_v52 = vrot.slane %v25381_v6, 4  ;;  %v16061_v30 = vmax.f32 %v16059_v7, %v16060_v3  ;;  %v16066_v40 = vrot.slane %v16065_v45, 1 }
0x194f   : > { %v25385_v24 = vpop.eup %20028  ;;  %v16163_v8 = vadd.f32 %v16162_v42, %v16161_v13  ;;  %v16149_v63 = vadd.f32 %v16148_v12, %v16147_v2  ;;  %v16047_v17 = vmax.f32 %v16045_v26, %v16046_v44  ;;  %v16051_v50 = vmax.f32 %v25379_v9, %v16050_v38 }
0x1950   : > { %v16177_v5 = vadd.f32 %v25381_v6, %v16176_v52  ;;  %v16182_v19 = vrot.slane %v25385_v24, 4  ;;  %v16102_v33 = vsub.f32 %v25355_v25, %v16061_v30  ;;  %v16067_v53 = vmax.f32 %v16065_v45, %v16066_v40 }
0x1951   : > { %v25391_v11 = vpop.eup %20030  ;;  %20038 = vrcp.f32 %v16163_v8  ;;  %v16150_v18 = vrot.slane %v16149_v63, 1  ;;  %v16048_v55 = vrot.slane %v16047_v17, 1  ;;  %v16052_v59 = vrot.slane %v16051_v50, 2 }
0x1952   : > { %v16178_v43 = vrot.slane %v16177_v5, 2  ;;  %v16183_v47 = vadd.f32 %v25385_v24, %v16182_v19  ;;  %v16164_v62 = vrot.slane %v25391_v11, 4  ;;  %v16128_v21 = vmul.f32 1.442695, %v16102_v33 }
0x1953   : > { %v20033_v31 = vpop.eup %20032  ;;  %v16151_v54 = vadd.f32 %v16150_v18, %v16149_v63  ;;  %v16103_v16 = vsub.f32 %v25362_v58, %v16067_v53  ;;  %v16049_v0 = vmax.f32 %v16047_v17, %v16048_v55  ;;  %v16053_v48 = vmax.f32 %v16051_v50, %v16052_v59 }
0x1954   : > { %v25396_v25 = vpop.eup %20034  ;;  %v16254_v37 = vmul.f32 %v20033_v31, %v25347_v27  ;;  %v16179_v7 = vadd.f32 %v16178_v43, %v16177_v5  ;;  %v16184_v20 = vrot.slane %v16183_v47, 2  ;;  %v16165_v13 = vadd.f32 %v25391_v11, %v16164_v62 }
0x1955   : > { %20040 = vrcp.f32 %v16151_v54  ;;  %v16170_v2 = vrot.slane %v25396_v25, 4  ;;  %v16130_v26 = vmul.f32 1.442695, %v16103_v16  ;;  %v16100_v1 = vsub.f32 %v25369_v61, %v16049_v0 }
0x1956   : > { %v16270_v3 = vmul.f32 %v16254_v37, %v25228_v34  ;;  %v16180_v45 = vrot.slane %v16179_v7, 1  ;;  %v16185_v58 = vadd.f32 %v16184_v20, %v16183_v47  ;;  %v16166_v42 = vrot.slane %v16165_v13, 2 }
0x1957   : > { %v16171_v12 = vadd.f32 %v25396_v25, %v16170_v2  ;;  %20042 = vpow2.f32 %v16128_v21  ;;  %v16124_v44 = vmul.f32 1.442695, %v16100_v1  ;;  %v16054_v27 = vrot.slane %v16053_v48, 1 }
0x1958   : > { %v20037_v38 = vpop.eup %20036  ;;  %v16296_v52 = vrot.slane %v16270_v3, 4  ;;  %v16181_v30 = vadd.f32 %v16180_v45, %v16179_v7  ;;  %v16186_v40 = vrot.slane %v16185_v58, 1  ;;  %v16167_v8 = vadd.f32 %v16166_v42, %v16165_v13 }
0x1959   : > { %v16252_v63 = vmul.f32 %v20037_v38, %v25351_v36  ;;  %v16172_v17 = vrot.slane %v16171_v12, 2  ;;  %20044 = vpow2.f32 %v16130_v26  ;;  %v16055_v61 = vmax.f32 %v16053_v48, %v16054_v27 }
0x195a   : > { %v16297_v34 = vadd.f32 %v16296_v52, %v16270_v3  ;;  %20046 = vrcp.f32 %v16181_v30  ;;  %v16187_v50 = vadd.f32 %v16186_v40, %v16185_v58  ;;  %v16168_v5 = vrot.slane %v16167_v8, 1 }
0x195b   : > { %v20039_v19 = vpop.eup %20038  ;;  %v16268_v33 = vmul.f32 %v16252_v63, %v25236_v28  ;;  %v16173_v53 = vadd.f32 %v16172_v17, %v16171_v12  ;;  %20048 = vpow2.f32 %v16124_v44  ;;  %v16101_v18 = vsub.f32 %v25379_v9, %v16055_v61 }
0x195c   : > { %v16298_v55 = vrot.slane %v16297_v34, 2  ;;  %v16255_v59 = vmul.f32 %v20039_v19, %v25357_v39  ;;  %20050 = vrcp.f32 %v16187_v50  ;;  %v16169_v36 = vadd.f32 %v16168_v5, %v16167_v8 }
0x195d   : > { %v16284_v43 = vrot.slane %v16268_v33, 4  ;;  %v16174_v47 = vrot.slane %v16173_v53, 1  ;;  %v16126_v28 = vmul.f32 1.442695, %v16101_v18 }
0x195e   : > { %v16299_v62 = vadd.f32 %v16298_v55, %v16297_v34  ;;  %v16271_v21 = vmul.f32 %v16255_v59, %v25242_v56  ;;  %20052 = vrcp.f32 %v16169_v36 }
0x195f   : > { %v20041_v31 = vpop.eup %20040  ;;  %v16285_v54 = vadd.f32 %v16284_v43, %v16268_v33  ;;  %v16175_v16 = vadd.f32 %v16174_v47, %v16173_v53 }
0x1960   : > { %v16300_v0 = vrot.slane %v16299_v62, 1  ;;  %v16302_v48 = vrot.slane %v16271_v21, 4  ;;  %v16253_v9 = vmul.f32 %v20041_v31, %v25371_v49 }
0x1961   : > { %v25411_v37 = vpop.eup %20042  ;;  %v16286_v39 = vrot.slane %v16285_v54, 2  ;;  %20054 = vrcp.f32 %v16175_v16 }
0x1962   : > { %v16301_v7 = vadd.f32 %v16300_v0, %v16299_v62  ;;  %v16303_v20 = vadd.f32 %v16302_v48, %v16271_v21  ;;  %v16269_v13 = vmul.f32 %v16253_v9, %v25249_v46  ;;  %v16200_v2 = vrot.slane %v25411_v37, 4 }
0x1963   : > { %v25415_v56 = vpop.eup %20044  ;;  %v16287_v26 = vadd.f32 %v16286_v39, %v16285_v54  ;;  %20056 = vpow2.f32 %v16126_v28 }
0x1964   : > { %v20047_v1 = vpop.eup %20046  ;;  %16382 = vst [vmem:[%s25417_s27 + $0x2] sm:$0x1] %v16301_v7  ;;  %v16304_v49 = vrot.slane %v16303_v20, 2  ;;  %v16290_v3 = vrot.slane %v16269_v13, 4  ;;  %v16201_v45 = vadd.f32 %v25411_v37, %v16200_v2  ;;  %v16206_v58 = vrot.slane %v25415_v56, 4 }
0x1965   : > { %v25422_v42 = vpop.eup %20048  ;;  %v16288_v46 = vrot.slane %v16287_v26, 1  ;;  %v16258_v12 = vmul.f32 %v20047_v1, %v25381_v6 }
0x1966   : > { %v20051_v44 = vpop.eup %20050  ;;  %v16305_v27 = vadd.f32 %v16304_v49, %v16303_v20  ;;  %v16291_v38 = vadd.f32 %v16290_v3, %v16269_v13  ;;  %v16202_v52 = vrot.slane %v16201_v45, 2  ;;  %v16207_v30 = vadd.f32 %v25415_v56, %v16206_v58 }
0x1967   : > { %v16289_v40 = vadd.f32 %v16288_v46, %v16287_v26  ;;  %v16274_v8 = vmul.f32 %v16258_v12, %v25257_v23  ;;  %v16259_v63 = vmul.f32 %v20051_v44, %v25385_v24  ;;  %v16188_v17 = vrot.slane %v25422_v42, 4 }
0x1968   : > { %v20053_v61 = vpop.eup %20052  ;;  %v16306_v34 = vrot.slane %v16305_v27, 1  ;;  %v16292_v50 = vrot.slane %v16291_v38, 2  ;;  %v16203_v5 = vadd.f32 %v16202_v52, %v16201_v45  ;;  %v16208_v19 = vrot.slane %v16207_v30, 2 }
0x1969   : > { %16380 = vst [vmem:[%s25417_s27] sm:$0x1] %v16289_v40  ;;  %v16320_v6 = vrot.slane %v16274_v8, 4  ;;  %v16275_v33 = vmul.f32 %v16259_v63, %v25264_v10  ;;  %v16256_v53 = vmul.f32 %v20053_v61, %v25391_v11  ;;  %v16189_v18 = vadd.f32 %v25422_v42, %v16188_v17 }
0x196a   : > { %v16307_v55 = vadd.f32 %v16306_v34, %v16305_v27  ;;  %v16293_v23 = vadd.f32 %v16292_v50, %v16291_v38  ;;  %v16204_v59 = vrot.slane %v16203_v5, 1  ;;  %v16209_v24 = vadd.f32 %v16208_v19, %v16207_v30 }
0x196b   : > { %v20055_v36 = vpop.eup %20054  ;;  %v16321_v43 = vadd.f32 %v16320_v6, %v16274_v8  ;;  %v16326_v47 = vrot.slane %v16275_v33, 4  ;;  %v16272_v62 = vmul.f32 %v16256_v53, %v25271_v29  ;;  %v16190_v21 = vrot.slane %v16189_v18, 2 }
0x196c   : > { %16383 = vst [vmem:[%s25417_s27 + $0x3] sm:$0x1] %v16307_v55  ;;  %v16294_v31 = vrot.slane %v16293_v23, 1  ;;  %v16257_v54 = vmul.f32 %v20055_v36, %v25396_v25  ;;  %v16205_v10 = vadd.f32 %v16204_v59, %v16203_v5  ;;  %v16210_v16 = vrot.slane %v16209_v24, 1 }
0x196d   : > { %v25436_v11 = vpop.eup %20056  ;;  %v16322_v28 = vrot.slane %v16321_v43, 2  ;;  %v16327_v0 = vadd.f32 %v16326_v47, %v16275_v33  ;;  %v16308_v48 = vrot.slane %v16272_v62, 4  ;;  %v16191_v9 = vadd.f32 %v16190_v21, %v16189_v18 }
0x196e   : > { %v16295_v39 = vadd.f32 %v16294_v31, %v16293_v23  ;;  %v16273_v7 = vmul.f32 %v16257_v54, %v25277_v41  ;;  %20058 = vrcp.f32 %v16205_v10  ;;  %v16211_v20 = vadd.f32 %v16210_v16, %v16209_v24 }
0x196f   : > { %v16323_v29 = vadd.f32 %v16322_v28, %v16321_v43  ;;  %v16328_v13 = vrot.slane %v16327_v0, 2  ;;  %v16309_v2 = vadd.f32 %v16308_v48, %v16272_v62  ;;  %v16192_v26 = vrot.slane %v16191_v9, 1 }
0x1970   : > { %16381 = vst [vmem:[%s25417_s27 + $0x1] sm:$0x1] %v16295_v39  ;;  %v16314_v25 = vrot.slane %v16273_v7, 4  ;;  %20060 = vrcp.f32 %v16211_v20  ;;  %v16194_v1 = vrot.slane %v25436_v11, 4 }
0x1971   : > { %v16324_v49 = vrot.slane %v16323_v29, 1  ;;  %v16329_v3 = vadd.f32 %v16328_v13, %v16327_v0  ;;  %v16310_v45 = vrot.slane %v16309_v2, 2  ;;  %v16193_v58 = vadd.f32 %v16192_v26, %v16191_v9 }
0x1972   : > { %v16315_v46 = vadd.f32 %v16314_v25, %v16273_v7  ;;  %v16195_v41 = vadd.f32 %v25436_v11, %v16194_v1 }
0x1973   : > { %v16325_v12 = vadd.f32 %v16324_v49, %v16323_v29  ;;  %v16330_v44 = vrot.slane %v16329_v3, 1  ;;  %v16311_v27 = vadd.f32 %v16310_v45, %v16309_v2  ;;  %20062 = vrcp.f32 %v16193_v58 }
0x1974   : > { %v16316_v38 = vrot.slane %v16315_v46, 2  ;;  %v16196_v52 = vrot.slane %v16195_v41, 2 }
0x1975   : > { %16386 = vst [vmem:[%s25417_s27 + $0x6] sm:$0x1] %v16325_v12  ;;  %v16331_v30 = vadd.f32 %v16330_v44, %v16329_v3  ;;  %v16312_v40 = vrot.slane %v16311_v27, 1 }
0x1976   : > { %v16317_v8 = vadd.f32 %v16316_v38, %v16315_v46  ;;  %v16197_v63 = vadd.f32 %v16196_v52, %v16195_v41 }
0x1977   : > { %16387 = vst [vmem:[%s25417_s27 + $0x7] sm:$0x1] %v16331_v30  ;;  %v16313_v17 = vadd.f32 %v16312_v40, %v16311_v27 }
0x1978   : > { %v20059_v61 = vpop.eup %20058  ;;  %v16318_v34 = vrot.slane %v16317_v8, 1  ;;  %v16198_v50 = vrot.slane %v16197_v63, 1 }
0x1979   : > { %16384 = vst [vmem:[%s25417_s27 + $0x4] sm:$0x1] %v16313_v17  ;;  %v16262_v5 = vmul.f32 %v20059_v61, %v25411_v37 }
0x197a   : > { %v20061_v19 = vpop.eup %20060  ;;  %v16319_v6 = vadd.f32 %v16318_v34, %v16317_v8  ;;  %v16199_v33 = vadd.f32 %v16198_v50, %v16197_v63 }
0x197b   : > { %v16278_v53 = vmul.f32 %v16262_v5, %v25285_v35  ;;  %v16263_v18 = vmul.f32 %v20061_v19, %v25415_v56 }
0x197c   : > { %16385 = vst [vmem:[%s25417_s27 + $0x5] sm:$0x1] %v16319_v6  ;;  %20064 = vrcp.f32 %v16199_v33 }
0x197d   : > { %v20063_v55 = vpop.eup %20062  ;;  %v16344_v23 = vrot.slane %v16278_v53, 4  ;;  %v16279_v59 = vmul.f32 %v16263_v18, %v25292_v4 }
0x197e   : > { %v16260_v24 = vmul.f32 %v20063_v55, %v25422_v42 }
0x197f   : > { %v16345_v36 = vadd.f32 %v16344_v23, %v16278_v53  ;;  %v16350_v43 = vrot.slane %v16279_v59, 4 }
0x1980   : > { %v16276_v47 = vmul.f32 %v16260_v24, %v25299_v15 }
0x1981   : > { %v16346_v37 = vrot.slane %v16345_v36, 2  ;;  %v16351_v62 = vadd.f32 %v16350_v43, %v16279_v59 }
0x1982   : > { %v16332_v21 = vrot.slane %v16276_v47, 4 }
0x1983   : > { %v16347_v31 = vadd.f32 %v16346_v37, %v16345_v36  ;;  %v16352_v35 = vrot.slane %v16351_v62, 2 }
0x1984   : > { %v16333_v54 = vadd.f32 %v16332_v21, %v16276_v47 }
0x1985   : > { %v16348_v56 = vrot.slane %v16347_v31, 1  ;;  %v16353_v10 = vadd.f32 %v16352_v35, %v16351_v62  ;;  %v15971_v16 = vpop.xlane.xlu0 %15970 }
0x1986   : > { %v20065_v28 = vpop.eup %20064  ;;  %v16334_v0 = vrot.slane %v16333_v54, 2  ;;  %v15992_v4 = vadd.f32 %v25337_v14, %v15971_v16 }
0x1987   : > { %v16349_v42 = vadd.f32 %v16348_v56, %v16347_v31  ;;  %v16354_v48 = vrot.slane %v16353_v10, 1  ;;  %v16261_v9 = vmul.f32 %v20065_v28, %v25436_v11  ;;  %v15973_v15 = vpop.xlane.xlu1 %15972 }
0x1988   : > { %v16335_v39 = vadd.f32 %v16334_v0, %v16333_v54  ;;  %v16068_v7 = vrot.slane %v15992_v4, 4  ;;  %v15993_v20 = vadd.f32 %v25337_v14, %v15973_v15 }
0x1989   : > { %16390 = vst [vmem:[%s25417_s27 + $0xa] sm:$0x1] %v16349_v42  ;;  %v16355_v29 = vadd.f32 %v16354_v48, %v16353_v10  ;;  %v16277_v13 = vmul.f32 %v16261_v9, %v25305_v60  ;;  %v15975_v2 = vpop.xlane.xlu0 %15974 }
0x198a   : > { %v16336_v26 = vrot.slane %v16335_v39, 1  ;;  %v16069_v25 = vmax.f32 %v15992_v4, %v16068_v7  ;;  %v16074_v1 = vrot.slane %v15993_v20, 4  ;;  %v15994_v49 = vadd.f32 %v25337_v14, %v15975_v2 }
0x198b   : > { %16391 = vst [vmem:[%s25417_s27 + $0xb] sm:$0x1] %v16355_v29  ;;  %v16338_v3 = vrot.slane %v16277_v13, 4  ;;  %v15977_v45 = vpop.xlane.xlu1 %15976 }
0x198c   : > { %v16337_v11 = vadd.f32 %v16336_v26, %v16335_v39  ;;  %v16070_v58 = vrot.slane %v16069_v25, 2  ;;  %v16075_v46 = vmax.f32 %v15993_v20, %v16074_v1  ;;  %v16080_v41 = vrot.slane %v15994_v49, 4 }
0x198d   : > { %v16339_v12 = vadd.f32 %v16338_v3, %v16277_v13  ;;  %v15995_v44 = vadd.f32 %v25337_v14, %v15977_v45 }
0x198e   : > { %16388 = vst [vmem:[%s25417_s27 + $0x8] sm:$0x1] %v16337_v11  ;;  %v16071_v27 = vmax.f32 %v16069_v25, %v16070_v58  ;;  %v16076_v38 = vrot.slane %v16075_v46, 2  ;;  %v16081_v60 = vmax.f32 %v15994_v49, %v16080_v41 }
0x198f   : > { %v16340_v52 = vrot.slane %v16339_v12, 2  ;;  %v16086_v30 = vrot.slane %v15995_v44, 4 }
0x1990   : > { %v16072_v40 = vrot.slane %v16071_v27, 1  ;;  %v16077_v8 = vmax.f32 %v16075_v46, %v16076_v38  ;;  %v16082_v63 = vrot.slane %v16081_v60, 2 }
0x1991   : > { %v16341_v17 = vadd.f32 %v16340_v52, %v16339_v12  ;;  %v16087_v61 = vmax.f32 %v15995_v44, %v16086_v30 }
0x1992   : > { %v16073_v34 = vmax.f32 %v16071_v27, %v16072_v40  ;;  %v16078_v50 = vrot.slane %v16077_v8, 1  ;;  %v16083_v5 = vmax.f32 %v16081_v60, %v16082_v63 }
0x1993   : > { %v16342_v19 = vrot.slane %v16341_v17, 1  ;;  %v16088_v6 = vrot.slane %v16087_v61, 2 }
0x1994   : > { %v16104_v33 = vsub.f32 %v15992_v4, %v16073_v34  ;;  %v16079_v53 = vmax.f32 %v16077_v8, %v16078_v50  ;;  %v16084_v14 = vrot.slane %v16083_v5, 1 }
0x1995   : > { %v16343_v18 = vadd.f32 %v16342_v19, %v16341_v17  ;;  %v16089_v55 = vmax.f32 %v16087_v61, %v16088_v6 }
0x1996   : > { %v16132_v23 = vmul.f32 1.442695, %v16104_v33  ;;  %v16105_v59 = vsub.f32 %v15993_v20, %v16079_v53  ;;  %v16085_v24 = vmax.f32 %v16083_v5, %v16084_v14 }
0x1997   : > { %16389 = vst [vmem:[%s25417_s27 + $0x9] sm:$0x1] %v16343_v18  ;;  %v16090_v36 = vrot.slane %v16089_v55, 1 }
0x1998   : > { %20066 = vpow2.f32 %v16132_v23  ;;  %v16134_v43 = vmul.f32 1.442695, %v16105_v59  ;;  %v16106_v47 = vsub.f32 %v15994_v49, %v16085_v24 }
0x1999   : > { %v16091_v37 = vmax.f32 %v16089_v55, %v16090_v36 }
0x199a   : > { %20068 = vpow2.f32 %v16134_v43  ;;  %v16136_v62 = vmul.f32 1.442695, %v16106_v47 }
0x199b   : > { %v16107_v21 = vsub.f32 %v15995_v44, %v16091_v37 }
0x199c   : > { %20070 = vpow2.f32 %v16136_v62 }
0x199d   : > { %v16138_v31 = vmul.f32 1.442695, %v16107_v21 }
0x199f   : > { %20072 = vpow2.f32 %v16138_v31 }
0x19a2   : > { %v20067_v35 = vpop.eup %20066 }
0x19a3   : > { %v16212_v54 = vrot.slane %v20067_v35, 4 }
0x19a4   : > { %v20069_v56 = vpop.eup %20068 }
0x19a5   : > { %v16213_v10 = vadd.f32 %v20067_v35, %v16212_v54  ;;  %v16218_v16 = vrot.slane %v20069_v56, 4 }
0x19a6   : > { %v20071_v28 = vpop.eup %20070 }
0x19a7   : > { %v16214_v0 = vrot.slane %v16213_v10, 2  ;;  %v16219_v4 = vadd.f32 %v20069_v56, %v16218_v16  ;;  %v16224_v42 = vrot.slane %v20071_v28, 4 }
0x19a9   : > { %v20073_v48 = vpop.eup %20072  ;;  %v16215_v9 = vadd.f32 %v16214_v0, %v16213_v10  ;;  %v16220_v15 = vrot.slane %v16219_v4, 2  ;;  %v16225_v39 = vadd.f32 %v20071_v28, %v16224_v42 }
0x19aa   : > { %v16230_v7 = vrot.slane %v20073_v48, 4 }
0x19ab   : > { %v16216_v20 = vrot.slane %v16215_v9, 1  ;;  %v16221_v29 = vadd.f32 %v16220_v15, %v16219_v4  ;;  %v16226_v13 = vrot.slane %v16225_v39, 2 }
0x19ac   : > { %v16231_v2 = vadd.f32 %v20073_v48, %v16230_v7 }
0x19ad   : > { %v16217_v26 = vadd.f32 %v16216_v20, %v16215_v9  ;;  %v16222_v25 = vrot.slane %v16221_v29, 1  ;;  %v16227_v1 = vadd.f32 %v16226_v13, %v16225_v39 }
0x19ae   : > { %v16232_v49 = vrot.slane %v16231_v2, 2 }
0x19af   : > { %20074 = vrcp.f32 %v16217_v26  ;;  %v16223_v3 = vadd.f32 %v16222_v25, %v16221_v29  ;;  %v16228_v45 = vrot.slane %v16227_v1, 1 }
0x19b0   : > { %v16233_v11 = vadd.f32 %v16232_v49, %v16231_v2 }
0x19b1   : > { %20076 = vrcp.f32 %v16223_v3  ;;  %v16229_v58 = vadd.f32 %v16228_v45, %v16227_v1 }
0x19b2   : > { %v16234_v46 = vrot.slane %v16233_v11, 1 }
0x19b3   : > { %20078 = vrcp.f32 %v16229_v58 }
0x19b4   : > { %v16235_v41 = vadd.f32 %v16234_v46, %v16233_v11 }
0x19b6   : > { %20080 = vrcp.f32 %v16235_v41 }
0x19b9   : > { %v20075_v12 = vpop.eup %20074 }
0x19ba   : > { %v16264_v44 = vmul.f32 %v20075_v12, %v20067_v35 }
0x19bb   : > { %v20077_v27 = vpop.eup %20076 }
0x19bc   : > { %v16280_v38 = vmul.f32 %v16264_v44, %v25313_v57  ;;  %v16265_v60 = vmul.f32 %v20077_v27, %v20069_v56 }
0x19bd   : > { %v20079_v52 = vpop.eup %20078 }
0x19be   : > { %v16356_v30 = vrot.slane %v16280_v38, 4  ;;  %v16281_v40 = vmul.f32 %v16265_v60, %v25320_v22  ;;  %v16266_v8 = vmul.f32 %v20079_v52, %v20071_v28 }
0x19c0   : > { %v20081_v63 = vpop.eup %20080  ;;  %v16357_v17 = vadd.f32 %v16356_v30, %v16280_v38  ;;  %v16362_v61 = vrot.slane %v16281_v40, 4  ;;  %v16282_v34 = vmul.f32 %v16266_v8, %v25327_v32 }
0x19c1   : > { %v16267_v50 = vmul.f32 %v20081_v63, %v20073_v48 }
0x19c2   : > { %v16358_v5 = vrot.slane %v16357_v17, 2  ;;  %v16363_v19 = vadd.f32 %v16362_v61, %v16281_v40  ;;  %v16368_v6 = vrot.slane %v16282_v34, 4 }
0x19c3   : > { %v16283_v33 = vmul.f32 %v16267_v50, %v25333_v51 }
0x19c4   : > { %v16359_v53 = vadd.f32 %v16358_v5, %v16357_v17  ;;  %v16364_v57 = vrot.slane %v16363_v19, 2  ;;  %v16369_v14 = vadd.f32 %v16368_v6, %v16282_v34 }
0x19c5   : > { %v16374_v18 = vrot.slane %v16283_v33, 4 }
0x19c6   : > { %v16360_v22 = vrot.slane %v16359_v53, 1  ;;  %v16365_v55 = vadd.f32 %v16364_v57, %v16363_v19  ;;  %v16370_v23 = vrot.slane %v16369_v14, 2 }
0x19c7   : > { %v16375_v59 = vadd.f32 %v16374_v18, %v16283_v33 }
0x19c8   : > { %v16361_v32 = vadd.f32 %v16360_v22, %v16359_v53  ;;  %v16366_v24 = vrot.slane %v16365_v55, 1  ;;  %v16371_v36 = vadd.f32 %v16370_v23, %v16369_v14 }
0x19c9   : > { %v16376_v43 = vrot.slane %v16375_v59, 2 }
0x19ca   : > { %16392 = vst [vmem:[%s25417_s27 + $0xc] sm:$0x1] %v16361_v32  ;;  %v16367_v51 = vadd.f32 %v16366_v24, %v16365_v55  ;;  %v16372_v47 = vrot.slane %v16371_v36, 1 }
0x19cb   : > { %v16377_v37 = vadd.f32 %v16376_v43, %v16375_v59 }
0x19cc   : > { %16393 = vst [vmem:[%s25417_s27 + $0xd] sm:$0x1] %v16367_v51  ;;  %v16373_v62 = vadd.f32 %v16372_v47, %v16371_v36 }
0x19cd   : > { %v16378_v21 = vrot.slane %v16377_v37, 1 }
0x19ce   : > { %16394 = vst [vmem:[%s25417_s27 + $0xe] sm:$0x1] %v16373_v62 }
0x19cf   : > { %v16379_v31 = vadd.f32 %v16378_v21, %v16377_v37 }
0x19d1   : > { %16395 = vst [vmem:[%s25417_s27 + $0xf] sm:$0x1] %v16379_v31 }
0x19d2   : > { %20197 = shalt.err (!%p20194_p2)
}
0x19d3   : > { %s20198_s20 = scalar_lea.hbm %s25474_s18, 256  ;;  %s20202_s23 = scalar_lea.hbm %s25532_s9, 512 }
0x19d4   : > { %p20199_p13 = scmp.ne.s32.totalorder %s25474_s18, %s20198_s20  ;;  %p20203_p4 = scmp.lt.u32.totalorder %s25474_s18, %s25532_s9 }
0x19d5   : > { %p20204_p7 = scmp.lt.u32.totalorder %s20202_s23, %s20198_s20  ;;  %p20206_p11 = scmp.lt.u32.totalorder %s20198_s20, %s25474_s18 }
0x19d6   : > { %p20200_p6 = pnand %p20199_p13, %p26119_p0 }
0x19d7   : > { %p20205_p8 = por %p20204_p7, %p20203_p4 }
0x19d8   : > { %p20201_p10 = pneg %p20200_p6 }
0x19d9   : > { %p20207_p1 = por %p20206_p11, %p20205_p8 }
0x19db   : > { %p20208_p3 = pnand %p20207_p1, %p20201_p10 }
0x19dd   : > { %20211 = shalt.err (!%p20208_p3)
}
0x19de   : > { %s20276_s22 = smov 1  }
0x19df   : > { %19080 = dma.vmem_to_hbm [thread:$0]  (%p26119_p0), %s25476_s30, 256, %s25474_s18, %s16397_s15, %s20274_s10, %s20274_s10, %s20276_s22  }
0x19e0 PF: > { %s16425_s24 = sand.u32 1, %s20242_s11   ;;  %p26120_p5 = scmp.ne.s32.totalorder %s25673_s17, 0 }
0x19e1   : > { %p26121_p9 = scmp.ge.s32.totalorder %s20254_s14, 2  ;;  %s16426_s26 = scalar_lea.sflag [#allocation5], %s16425_s24 }
0x19e3   : > { %p19094_p12 = pnand %p26121_p9, %p26120_p5 }
0x19e5   : > { %20237 = dma.done.wait (!%p19094_p12), %s16426_s26, 256  }
0x19e6   : > { %20239 = vsyncadd (!%p19094_p12), %s16426_s26, 4294967040  ;;  %p24_p2 = scmp.ge.s32.totalorder %s20440_s25, 4   ;;  %s26122_s11 = smov %s20246_s12 }
0x19e7   : > { %s26123_s12 = smov %s20250_s13  ;;  %s26124_s13 = smov %s20449_s28 }
0x19e8   : > { %s26125_s14 = smov %s20440_s25  ;;  %26 = sbr.rel (!%p24_p2) target bundleno = 8 (0x8), region = 109 }
0x19ef   :  { %16431 = vsyncpa [#allocation4], 1 }
0x19f0   :  { %16433 = vsyncpa [#allocation4 + $0x1], 1 }
0x19f1   :  { %16434 = vsyncpa [#allocation7], 1 }
0x19f2   :  { %16435 = vsyncpa [#allocation5], 1 }
0x19f3   :  { %16437 = vsyncpa [#allocation5 + $0x1], 1 }

</bundles_post_ra>
